<compile_context>
chip_gen: v7x
topology: tpu7x:2x2x1
jax: 0.10.0
libtpu: 0.0.40
codegen_flags: <defaults>
</compile_context>

<pallas_src>
import functools

import jax
import jax.numpy as jnp
from jax.experimental import pallas as pl
from jax.experimental.pallas import tpu as pltpu


def _round_up(v, m):
    return (v + m - 1) // m * m


# --------------------------------------------------------------------------
# Pallas kernels
# --------------------------------------------------------------------------

def _fused_mm_kernel(*refs, n_k, pre, post):
    """(tm, tk) @ (tk, N), accumulated over the K grid axis, with optional fused
    eval-mode BatchNorm+ReLU on the input columns (pre) and on the result (post)."""
    i = 0
    x_ref, w_ref = refs[i], refs[i + 1]
    i += 2
    if pre:
        s1_ref, t1_ref = refs[i], refs[i + 1]
        i += 2
    if post:
        s2_ref, t2_ref = refs[i], refs[i + 1]
        i += 2
    o_ref, acc_ref = refs[i], refs[i + 1]

    k = pl.program_id(1)

    @pl.when(k == 0)
    def _init():
        acc_ref[...] = jnp.zeros_like(acc_ref)

    x = x_ref[...].astype(jnp.float32)
    if pre:
        x = jnp.maximum(x * s1_ref[...] + t1_ref[...], 0.0)
    acc_ref[...] += jnp.dot(x.astype(jnp.bfloat16), w_ref[...],
                            preferred_element_type=jnp.float32)

    @pl.when(k == n_k - 1)
    def _finalize():
        r = acc_ref[...]
        if post:
            r = jnp.maximum(r * s2_ref[...] + t2_ref[...], 0.0)
        o_ref[...] = r.astype(o_ref.dtype)


def _conv3x3_kernel(x_ref, w_ref, o_ref, *, wp):
    """Direct 3x3 / stride-1 conv on one flattened, spatially padded image.

    x_ref: (1, (H+3)*(W+2), Cin)  zero-padded image, row-major flattened
    w_ref: (9, Cin, Cout)
    o_ref: (1, H*(W+2), Cout)     dense result; the W-pad columns are sliced off in glue
    """
    L = o_ref.shape[1]
    cout = o_ref.shape[2]
    x = x_ref[0].astype(jnp.float32)
    acc = jnp.zeros((L, cout), jnp.float32)
    for di in range(3):
        for dj in range(3):
            s = di * wp + dj
            win = x[s:s + L, :].astype(jnp.bfloat16)
            acc = acc + jnp.dot(win, w_ref[di * 3 + dj],
                                preferred_element_type=jnp.float32)
    o_ref[0] = acc.astype(o_ref.dtype)


def _pool_dense_kernel(x_ref, o_ref, *, win, op):
    """Dense (stride-1) win x win window reduction over one image, reading it once."""
    x = x_ref[0].astype(jnp.float32)            # (Hin, Win, C)
    ho, wo = o_ref.shape[1], o_ref.shape[2]
    acc = None
    for di in range(win):
        for dj in range(win):
            v = x[di:di + ho, dj:dj + wo, :]
            if acc is None:
                acc = v
            elif op == "max":
                acc = jnp.maximum(acc, v)
            else:
                acc = acc + v
    if op == "mean":
        acc = acc * (1.0 / (win * win))
    o_ref[0] = acc.astype(o_ref.dtype)


def _gap_bn_relu_kernel(x_ref, s_ref, t_ref, o_ref):
    """Fused BN(eval)+ReLU + global average pool for one image."""
    x = x_ref[0].astype(jnp.float32)            # (H*W, C)
    y = jnp.maximum(x * s_ref[...] + t_ref[...], 0.0)
    o_ref[0] = jnp.mean(y, axis=0, keepdims=True)


def _linear_kernel(x_ref, w_ref, b_ref, o_ref):
    o_ref[...] = (jnp.dot(x_ref[...], w_ref[...],
                          preferred_element_type=jnp.float32) + b_ref[...])


# --------------------------------------------------------------------------
# Kernel wrappers
# --------------------------------------------------------------------------

def fused_matmul(x2d, w2d, pre=None, post=None, out_dtype=jnp.bfloat16,
                 tm_max=512, tk_max=512):
    """[M, K] @ [K, N] with optional fused BN+ReLU prologue/epilogue.

    Rows are tiled at up to 512 (pl.cdiv-style grid with zero-padded tail, never a
    "whole array in one block" fallback), K gets its own reduction grid axis with an
    f32 VMEM accumulator so the working set stays bounded at any K.
    """
    M, K = x2d.shape
    N = w2d.shape[1]

    tm = tm_max if M >= tm_max else _round_up(M, 16)
    Mp = _round_up(M, tm)
    tk = tk_max if K >= tk_max else K
    Kp = _round_up(K, tk)
    n_k = Kp // tk

    x2d = x2d.astype(jnp.bfloat16)
    w2d = w2d.astype(jnp.bfloat16)
    if Mp != M or Kp != K:
        x2d = jnp.pad(x2d, ((0, Mp - M), (0, Kp - K)))
    if Kp != K:
        w2d = jnp.pad(w2d, ((0, Kp - K), (0, 0)))

    inputs = [x2d, w2d]
    in_specs = [pl.BlockSpec((tm, tk), lambda i, k: (i, k)),
                pl.BlockSpec((tk, N), lambda i, k: (k, 0))]
    if pre is not None:
        s1, t1 = pre
        if Kp != K:
            s1 = jnp.pad(s1, ((0, 0), (0, Kp - K)))
            t1 = jnp.pad(t1, ((0, 0), (0, Kp - K)))
        inputs += [s1, t1]
        in_specs += [pl.BlockSpec((1, tk), lambda i, k: (0, k)),
                     pl.BlockSpec((1, tk), lambda i, k: (0, k))]
    if post is not None:
        s2, t2 = post
        inputs += [s2, t2]
        in_specs += [pl.BlockSpec((1, N), lambda i, k: (0, 0)),
                     pl.BlockSpec((1, N), lambda i, k: (0, 0))]

    out = pl.pallas_call(
        functools.partial(_fused_mm_kernel, n_k=n_k,
                          pre=pre is not None, post=post is not None),
        out_shape=jax.ShapeDtypeStruct((Mp, N), out_dtype),
        grid=(Mp // tm, n_k),
        in_specs=in_specs,
        out_specs=pl.BlockSpec((tm, N), lambda i, k: (i, 0)),
        scratch_shapes=[pltpu.VMEM((tm, N), jnp.float32)],
        compiler_params=pltpu.CompilerParams(
            dimension_semantics=("parallel", "arbitrary")),
    )(*inputs)
    if Mp != M:
        out = out[:M]
    return out


def conv1x1(x, w_hwio, pre=None, post=None):
    """1x1 conv with optional fused BN+ReLU before (pre) and after (post)."""
    N, H, W, C = x.shape
    Cout = w_hwio.shape[3]
    y = fused_matmul(x.reshape(N * H * W, C), w_hwio.reshape(C, Cout),
                     pre=pre, post=post)
    return y.reshape(N, H, W, Cout)


def conv3x3_s1_p1(x, w_hwio):
    """3x3 stride-1 pad-1 conv via 9 shifted matmuls over the flat padded image."""
    N, H, W, Cin = x.shape
    Cout = w_hwio.shape[3]
    Wp = W + 2
    # pad 1 top/left, 1 right, 2 bottom: the extra bottom row keeps every shifted
    # read of the dense formulation inside the flattened buffer.
    xp = jnp.pad(x, ((0, 0), (1, 2), (1, 1), (0, 0)))
    xf = xp.reshape(N, (H + 3) * Wp, Cin)
    L = H * Wp
    wf = w_hwio.reshape(9, Cin, Cout).astype(jnp.bfloat16)
    dense = pl.pallas_call(
        functools.partial(_conv3x3_kernel, wp=Wp),
        out_shape=jax.ShapeDtypeStruct((N, L, Cout), jnp.bfloat16),
        grid=(N,),
        in_specs=[pl.BlockSpec((1, (H + 3) * Wp, Cin), lambda n: (n, 0, 0)),
                  pl.BlockSpec((9, Cin, Cout), lambda n: (0, 0, 0))],
        out_specs=pl.BlockSpec((1, L, Cout), lambda n: (n, 0, 0)),
        compiler_params=pltpu.CompilerParams(dimension_semantics=("parallel",)),
    )(xf, wf)
    return dense.reshape(N, H, Wp, Cout)[:, :, :W, :]


def maxpool_3x3_s2_p1(x):
    N, H, W, C = x.shape
    Ho, Wo = (H - 1) // 2 + 1, (W - 1) // 2 + 1
    xp = jnp.pad(x, ((0, 0), (1, 1), (1, 1), (0, 0)), constant_values=-jnp.inf)
    dh, dw = H, W                                   # dense stride-1 window starts
    dense = pl.pallas_call(
        functools.partial(_pool_dense_kernel, win=3, op="max"),
        out_shape=jax.ShapeDtypeStruct((N, dh, dw, C), x.dtype),
        grid=(N,),
        in_specs=[pl.BlockSpec((1, H + 2, W + 2, C), lambda n: (n, 0, 0, 0))],
        out_specs=pl.BlockSpec((1, dh, dw, C), lambda n: (n, 0, 0, 0)),
        compiler_params=pltpu.CompilerParams(dimension_semantics=("parallel",)),
    )(xp)
    return dense[:, 0:2 * Ho - 1:2, 0:2 * Wo - 1:2, :]


def avgpool_2x2_s2(x):
    N, H, W, C = x.shape
    Ho, Wo = H // 2, W // 2
    dh, dw = H - 1, W - 1
    dense = pl.pallas_call(
        functools.partial(_pool_dense_kernel, win=2, op="mean"),
        out_shape=jax.ShapeDtypeStruct((N, dh, dw, C), x.dtype),
        grid=(N,),
        in_specs=[pl.BlockSpec((1, H, W, C), lambda n: (n, 0, 0, 0))],
        out_specs=pl.BlockSpec((1, dh, dw, C), lambda n: (n, 0, 0, 0)),
        compiler_params=pltpu.CompilerParams(dimension_semantics=("parallel",)),
    )(x)
    return dense[:, 0:2 * Ho - 1:2, 0:2 * Wo - 1:2, :]


def global_pool_bn_relu(x, scale, shift):
    """norm5 + ReLU + adaptive average pool, fused."""
    N, H, W, C = x.shape
    xf = x.reshape(N, H * W, C)
    out = pl.pallas_call(
        _gap_bn_relu_kernel,
        out_shape=jax.ShapeDtypeStruct((N, 1, C), jnp.float32),
        grid=(N,),
        in_specs=[pl.BlockSpec((1, H * W, C), lambda n: (n, 0, 0)),
                  pl.BlockSpec((1, C), lambda n: (0, 0)),
                  pl.BlockSpec((1, C), lambda n: (0, 0))],
        out_specs=pl.BlockSpec((1, 1, C), lambda n: (n, 0, 0)),
        compiler_params=pltpu.CompilerParams(dimension_semantics=("parallel",)),
    )(xf, scale, shift)
    return out.reshape(N, C)


def pallas_linear(x, w, b):
    M, K = x.shape
    N = w.shape[1]
    return pl.pallas_call(
        _linear_kernel,
        out_shape=jax.ShapeDtypeStruct((M, N), jnp.float32),
        grid=(1,),
        in_specs=[pl.BlockSpec((M, K), lambda i: (0, 0)),
                  pl.BlockSpec((K, N), lambda i: (0, 0)),
                  pl.BlockSpec((1, N), lambda i: (0, 0))],
        out_specs=pl.BlockSpec((M, N), lambda i: (0, 0)),
    )(x, w, b)


def stem_conv_bn_relu(x, w_hwio, norm):
    """7x7 stride-2 pad-3 conv + BN + ReLU (fused epilogue) on the 3-channel input."""
    # TODO(synk): im2col duplication is negligible for 3 input channels; a direct
    #             shifted-matmul stem kernel would remove it at full densenet169 scale.
    N, H, W, C = x.shape
    kh, kw, ci, co = w_hwio.shape
    stride, pad = 2, 3
    Ho = (H + 2 * pad - kh) // stride + 1
    Wo = (W + 2 * pad - kw) // stride + 1
    xp = jnp.pad(x, ((0, 0), (pad, pad), (pad, pad), (0, 0)))
    slices = []
    for i in range(kh):
        for j in range(kw):
            slices.append(xp[:, i:i + stride * (Ho - 1) + 1:stride,
                             j:j + stride * (Wo - 1) + 1:stride, :])
    cols = jnp.concatenate(slices, axis=-1).reshape(N * Ho * Wo, kh * kw * ci)
    out = fused_matmul(cols, w_hwio.reshape(kh * kw * ci, co), post=norm)
    return out.reshape(N, Ho, Wo, co)


# --------------------------------------------------------------------------
# DenseNet parameters & forward
# --------------------------------------------------------------------------

GROWTH_RATE = 8
BLOCK_CONFIG = (2, 2, 2, 2)   # scaled-down densenet169-style config (see TODO above)
NUM_INIT_FEATURES = 16
BN_SIZE = 4
NUM_CLASSES = 2
BN_EPS = 1e-5


def init_params(key, in_channels=3):
    keys = iter(jax.random.split(key, 512))

    def nk():
        return next(keys)

    def conv_w(kh, kw, ci, co):
        fan = kh * kw * ci
        return jax.random.normal(nk(), (kh, kw, ci, co), jnp.float32) * (2.0 / fan) ** 0.5

    def bn(c):
        gamma = 1.0 + 0.1 * jax.random.normal(nk(), (c,), jnp.float32)
        beta = 0.1 * jax.random.normal(nk(), (c,), jnp.float32)
        mean = 0.1 * jax.random.normal(nk(), (c,), jnp.float32)
        var = 1.0 + 0.1 * jax.random.uniform(nk(), (c,), jnp.float32)
        scale = gamma * jax.lax.rsqrt(var + BN_EPS)
        shift = beta - mean * scale
        return scale.reshape(1, c), shift.reshape(1, c)

    params = {}
    params["conv0"] = conv_w(7, 7, in_channels, NUM_INIT_FEATURES)
    params["norm0"] = bn(NUM_INIT_FEATURES)

    nf = NUM_INIT_FEATURES
    blocks = []
    transitions = []
    for bi, num_layers in enumerate(BLOCK_CONFIG):
        layers = []
        for li in range(num_layers):
            ci = nf + li * GROWTH_RATE
            layers.append(dict(
                norm1=bn(ci),
                conv1=conv_w(1, 1, ci, BN_SIZE * GROWTH_RATE),
                norm2=bn(BN_SIZE * GROWTH_RATE),
                conv2=conv_w(3, 3, BN_SIZE * GROWTH_RATE, GROWTH_RATE),
            ))
        blocks.append(layers)
        nf = nf + num_layers * GROWTH_RATE
        if bi != len(BLOCK_CONFIG) - 1:
            transitions.append(dict(norm=bn(nf), conv=conv_w(1, 1, nf, nf // 2)))
            nf = nf // 2
    params["blocks"] = blocks
    params["transitions"] = transitions
    params["norm5"] = bn(nf)
    params["classifier_w"] = jax.random.normal(nk(), (nf, NUM_CLASSES), jnp.float32) * 0.05
    params["classifier_b"] = jnp.zeros((1, NUM_CLASSES), jnp.float32)
    return params


@jax.jit
def densenet_forward(params, x_nchw):
    # layout: input is NCHW (PyTorch convention); kernels operate on NHWC / bf16.
    x = jnp.transpose(x_nchw, (0, 2, 3, 1)).astype(jnp.float32)

    # stem: conv7x7/2 (+fused BN+ReLU epilogue) -> maxpool3x3/2
    x = stem_conv_bn_relu(x, params["conv0"], params["norm0"])
    x = maxpool_3x3_s2_p1(x)

    # dense blocks + transitions
    for bi, layers in enumerate(params["blocks"]):
        feats = x
        for layer in layers:
            # norm1 -> relu -> conv1(1x1) -> norm2 -> relu, all in one matmul kernel
            y = conv1x1(feats, layer["conv1"], pre=layer["norm1"], post=layer["norm2"])
            # 3x3 growth conv: direct shifted-matmul kernel, no im2col tensor in HBM
            y = conv3x3_s1_p1(y, layer["conv2"])
            # TODO(synk): the dense-connectivity concat still copies the running feature
            #             map (O(L^2) traffic); a preallocated channel-padded buffer with
            #             aliased slice writes would remove it.
            feats = jnp.concatenate([feats, y], axis=-1)
        x = feats
        if bi < len(params["transitions"]):
            t = params["transitions"][bi]
            x = conv1x1(x, t["conv"], pre=t["norm"])   # norm+relu fused into the 1x1 conv
            x = avgpool_2x2_s2(x)

    # norm5 + ReLU + adaptive avg pool (fused) + classifier
    pooled = global_pool_bn_relu(x, *params["norm5"])          # [N, C] f32
    logits = pallas_linear(pooled, params["classifier_w"], params["classifier_b"])
    return logits


# --------------------------------------------------------------------------

if __name__ == "__main__":
    key = jax.random.PRNGKey(0)
    pkey, xkey = jax.random.split(key)
    params = init_params(pkey)
    x = jax.random.normal(xkey, (2, 3, 32, 32), jnp.float32)    # NCHW, as in PyTorch
    logits = densenet_forward(params, x)
    jax.block_until_ready(logits)
    assert logits.shape == (2, NUM_CLASSES) and logits.dtype == jnp.float32
    print("KERNEL_OK")
</pallas_src>

<mosaic_0001>
module attributes {stable_mosaic.version = 11 : i64} {
  func.func @_pool_dense_kernel(%arg0: i32, %arg1: memref<1x18x18x16xbf16, #tpu.memory_space<vmem>>, %arg2: memref<1x16x16x16xbf16, #tpu.memory_space<vmem>>) attributes {dimension_semantics = [#tpu.dimension_semantics<parallel>], iteration_bounds = array<i64: 2>, scalar_prefetch = 0 : i64, scratch_operands = 0 : i64, tpu.core_type = #tpu.core_type<tc>, window_params = [{transform_indices = @transform_0, window_bounds = array<i64: 1, 18, 18, 16>}, {transform_indices = @transform_1, window_bounds = array<i64: 1, 16, 16, 16>}]} {
    %c0 = arith.constant 0 : index
    %c0_0 = arith.constant 0 : index
    %c0_1 = arith.constant 0 : index
    %c0_2 = arith.constant 0 : index
    %0 = vector.load %arg1[%c0, %c0_0, %c0_1, %c0_2] : memref<1x18x18x16xbf16, #tpu.memory_space<vmem>>, vector<1x18x18x16xbf16>
    %1 = vector.shape_cast %0 : vector<1x18x18x16xbf16> to vector<18x18x16xbf16>
    %2 = arith.extf %1 : vector<18x18x16xbf16> to vector<18x18x16xf32>
    %3 = vector.extract_strided_slice %2 {offsets = [0, 0, 0], sizes = [16, 16, 16], strides = [1, 1, 1]} : vector<18x18x16xf32> to vector<16x16x16xf32>
    %4 = vector.extract_strided_slice %2 {offsets = [0, 1, 0], sizes = [16, 16, 16], strides = [1, 1, 1]} : vector<18x18x16xf32> to vector<16x16x16xf32>
    %5 = arith.maximumf %3, %4 : vector<16x16x16xf32>
    %6 = vector.extract_strided_slice %2 {offsets = [0, 2, 0], sizes = [16, 16, 16], strides = [1, 1, 1]} : vector<18x18x16xf32> to vector<16x16x16xf32>
    %7 = arith.maximumf %5, %6 : vector<16x16x16xf32>
    %8 = vector.extract_strided_slice %2 {offsets = [1, 0, 0], sizes = [16, 16, 16], strides = [1, 1, 1]} : vector<18x18x16xf32> to vector<16x16x16xf32>
    %9 = arith.maximumf %7, %8 : vector<16x16x16xf32>
    %10 = vector.extract_strided_slice %2 {offsets = [1, 1, 0], sizes = [16, 16, 16], strides = [1, 1, 1]} : vector<18x18x16xf32> to vector<16x16x16xf32>
    %11 = arith.maximumf %9, %10 : vector<16x16x16xf32>
    %12 = vector.extract_strided_slice %2 {offsets = [1, 2, 0], sizes = [16, 16, 16], strides = [1, 1, 1]} : vector<18x18x16xf32> to vector<16x16x16xf32>
    %13 = arith.maximumf %11, %12 : vector<16x16x16xf32>
    %14 = vector.extract_strided_slice %2 {offsets = [2, 0, 0], sizes = [16, 16, 16], strides = [1, 1, 1]} : vector<18x18x16xf32> to vector<16x16x16xf32>
    %15 = arith.maximumf %13, %14 : vector<16x16x16xf32>
    %16 = vector.extract_strided_slice %2 {offsets = [2, 1, 0], sizes = [16, 16, 16], strides = [1, 1, 1]} : vector<18x18x16xf32> to vector<16x16x16xf32>
    %17 = arith.maximumf %15, %16 : vector<16x16x16xf32>
    %18 = vector.extract_strided_slice %2 {offsets = [2, 2, 0], sizes = [16, 16, 16], strides = [1, 1, 1]} : vector<18x18x16xf32> to vector<16x16x16xf32>
    %19 = arith.maximumf %17, %18 : vector<16x16x16xf32>
    %20 = arith.truncf %19 : vector<16x16x16xf32> to vector<16x16x16xbf16>
    %c0_3 = arith.constant 0 : index
    %c0_4 = arith.constant 0 : index
    %c0_5 = arith.constant 0 : index
    %c0_6 = arith.constant 0 : index
    %21 = vector.load %arg2[%c0_3, %c0_4, %c0_5, %c0_6] : memref<1x16x16x16xbf16, #tpu.memory_space<vmem>>, vector<1x16x16x16xbf16>
    %22 = vector.shape_cast %21 : vector<1x16x16x16xbf16> to vector<16x16x16xbf16>
    %23 = vector.shape_cast %20 : vector<16x16x16xbf16> to vector<1x16x16x16xbf16>
    tpu.vector_store %arg2[%c0_3, %c0_4, %c0_5, %c0_6], %23 {strides = array<i32>} : memref<1x16x16x16xbf16, #tpu.memory_space<vmem>>, vector<1x16x16x16xbf16>,
    return
  }
  func.func @transform_0(%arg0: i32) -> (i32, i32, i32, i32) {
    %c0_i32 = arith.constant 0 : i32
    %c0_i32_0 = arith.constant 0 : i32
    %c0_i32_1 = arith.constant 0 : i32
    %c0_i32_2 = arith.constant 0 : i32
    return %arg0, %c0_i32, %c0_i32_0, %c0_i32_1 : i32, i32, i32, i32
  }
  func.func @transform_1(%arg0: i32) -> (i32, i32, i32, i32) {
    %c0_i32 = arith.constant 0 : i32
    %c0_i32_0 = arith.constant 0 : i32
    %c0_i32_1 = arith.constant 0 : i32
    %c0_i32_2 = arith.constant 0 : i32
    return %arg0, %c0_i32, %c0_i32_0, %c0_i32_1 : i32, i32, i32, i32
  }
}

module attributes {stable_mosaic.version = 11 : i64} {
  func.func @_fused_mm_kernel(%arg0: i32, %arg1: i32, %arg2: memref<512x147xbf16, #tpu.memory_space<vmem>>, %arg3: memref<147x16xbf16, #tpu.memory_space<vmem>>, %arg4: memref<1x16xf32, #tpu.memory_space<vmem>>, %arg5: memref<1x16xf32, #tpu.memory_space<vmem>>, %arg6: memref<512x16xbf16, #tpu.memory_space<vmem>>, %arg7: memref<512x16xf32, #tpu.memory_space<vmem>>) attributes {dimension_semantics = [#tpu.dimension_semantics<parallel>, #tpu.dimension_semantics<arbitrary>], iteration_bounds = array<i64: 1, 1>, scalar_prefetch = 0 : i64, scratch_operands = 1 : i64, tpu.core_type = #tpu.core_type<tc>, window_params = [{transform_indices = @transform_0, window_bounds = array<i64: 512, 147>}, {transform_indices = @transform_1, window_bounds = array<i64: 147, 16>}, {pipeline_mode = #tpu.pipeline_mode<synchronous>, transform_indices = @transform_2, window_bounds = array<i64: 1, 16>}, {pipeline_mode = #tpu.pipeline_mode<synchronous>, transform_indices = @transform_3, window_bounds = array<i64: 1, 16>}, {transform_indices = @transform_4, window_bounds = array<i64: 512, 16>}]} {
    %c0_i32 = arith.constant 0 : i32
    %0 = arith.cmpi eq, %arg1, %c0_i32 : i32
    %1 = arith.extui %0 : i1 to i32
    %c0_i32_0 = arith.constant 0 : i32
    %2 = arith.cmpi ne, %1, %c0_i32_0 : i32
    scf.if %2 {
      %cst_10 = arith.constant 0.000000e+00 : f32
      %14 = vector.broadcast %cst_10 : f32 to vector<512x16xf32>
      %c0_11 = arith.constant 0 : index
      %c0_12 = arith.constant 0 : index
      %15 = vector.load %arg7[%c0_11, %c0_12] : memref<512x16xf32, #tpu.memory_space<vmem>>, vector<512x16xf32>
      tpu.vector_store %arg7[%c0_11, %c0_12], %14 {strides = array<i32>} : memref<512x16xf32, #tpu.memory_space<vmem>>, vector<512x16xf32>,
    } else {
    }
    %c0 = arith.constant 0 : index
    %c0_1 = arith.constant 0 : index
    %3 = vector.load %arg2[%c0, %c0_1] : memref<512x147xbf16, #tpu.memory_space<vmem>>, vector<512x147xbf16>
    %4 = arith.extf %3 : vector<512x147xbf16> to vector<512x147xf32>
    %c0_2 = arith.constant 0 : index
    %c0_3 = arith.constant 0 : index
    %5 = vector.load %arg7[%c0_2, %c0_3] : memref<512x16xf32, #tpu.memory_space<vmem>>, vector<512x16xf32>
    %6 = arith.truncf %4 : vector<512x147xf32> to vector<512x147xbf16>
    %c0_4 = arith.constant 0 : index
    %c0_5 = arith.constant 0 : index
    %7 = vector.load %arg3[%c0_4, %c0_5] : memref<147x16xbf16, #tpu.memory_space<vmem>>, vector<147x16xbf16>
    %cst = arith.constant dense<0.000000e+00> : vector<512x16xf32>
    %8 = tpu.matmul %6, %7, %cst {dimension_numbers = #tpu.dot_dimension_numbers<[1], [0], [0], [1], [0, 0, 1, 1], [], []>} : vector<512x147xbf16>, vector<147x16xbf16>, vector<512x16xf32> -> vector<512x16xf32>
    %9 = arith.addf %5, %8 : vector<512x16xf32>
    %c0_6 = arith.constant 0 : index
    %c0_7 = arith.constant 0 : index
    %10 = vector.load %arg7[%c0_6, %c0_7] : memref<512x16xf32, #tpu.memory_space<vmem>>, vector<512x16xf32>
    tpu.vector_store %arg7[%c0_6, %c0_7], %9 {strides = array<i32>} : memref<512x16xf32, #tpu.memory_space<vmem>>, vector<512x16xf32>,
    %c0_i32_8 = arith.constant 0 : i32
    %11 = arith.cmpi eq, %arg1, %c0_i32_8 : i32
    %12 = arith.extui %11 : i1 to i32
    %c0_i32_9 = arith.constant 0 : i32
    %13 = arith.cmpi ne, %12, %c0_i32_9 : i32
    scf.if %13 {
      %c0_10 = arith.constant 0 : index
      %c0_11 = arith.constant 0 : index
      %14 = vector.load %arg7[%c0_10, %c0_11] : memref<512x16xf32, #tpu.memory_space<vmem>>, vector<512x16xf32>
      %c0_12 = arith.constant 0 : index
      %c0_13 = arith.constant 0 : index
      %15 = vector.load %arg4[%c0_12, %c0_13] : memref<1x16xf32, #tpu.memory_space<vmem>>, vector<1x16xf32>
      %16 = vector.broadcast %15 : vector<1x16xf32> to vector<512x16xf32>
      %17 = arith.mulf %14, %16 : vector<512x16xf32>
      %c0_14 = arith.constant 0 : index
      %c0_15 = arith.constant 0 : index
      %18 = vector.load %arg5[%c0_14, %c0_15] : memref<1x16xf32, #tpu.memory_space<vmem>>, vector<1x16xf32>
      %19 = vector.broadcast %18 : vector<1x16xf32> to vector<512x16xf32>
      %20 = arith.addf %17, %19 : vector<512x16xf32>
      %cst_16 = arith.constant 0.000000e+00 : f32
      %21 = vector.broadcast %cst_16 : f32 to vector<512x16xf32>
      %22 = arith.maximumf %20, %21 : vector<512x16xf32>
      %23 = arith.truncf %22 : vector<512x16xf32> to vector<512x16xbf16>
      %c0_17 = arith.constant 0 : index
      %c0_18 = arith.constant 0 : index
      %24 = vector.load %arg6[%c0_17, %c0_18] : memref<512x16xbf16, #tpu.memory_space<vmem>>, vector<512x16xbf16>
      tpu.vector_store %arg6[%c0_17, %c0_18], %23 {strides = array<i32>} : memref<512x16xbf16, #tpu.memory_space<vmem>>, vector<512x16xbf16>,
    } else {
    }
    return
  }
  func.func @transform_0(%arg0: i32, %arg1: i32) -> (i32, i32) {
    %c0_i32 = arith.constant 0 : i32
    return %arg0, %arg1 : i32, i32
  }
  func.func @transform_1(%arg0: i32, %arg1: i32) -> (i32, i32) {
    %c0_i32 = arith.constant 0 : i32
    %c0_i32_0 = arith.constant 0 : i32
    return %arg1, %c0_i32 : i32, i32
  }
  func.func @transform_2(%arg0: i32, %arg1: i32) -> (i32, i32) {
    %c0_i32 = arith.constant 0 : i32
    %c0_i32_0 = arith.constant 0 : i32
    %c0_i32_1 = arith.constant 0 : i32
    return %c0_i32, %c0_i32_0 : i32, i32
  }
  func.func @transform_3(%arg0: i32, %arg1: i32) -> (i32, i32) {
    %c0_i32 = arith.constant 0 : i32
    %c0_i32_0 = arith.constant 0 : i32
    %c0_i32_1 = arith.constant 0 : i32
    return %c0_i32, %c0_i32_0 : i32, i32
  }
  func.func @transform_4(%arg0: i32, %arg1: i32) -> (i32, i32) {
    %c0_i32 = arith.constant 0 : i32
    %c0_i32_0 = arith.constant 0 : i32
    return %arg0, %c0_i32 : i32, i32
  }
}

module attributes {stable_mosaic.version = 11 : i64} {
  func.func @_fused_mm_kernel(%arg0: i32, %arg1: i32, %arg2: memref<128x16xbf16, #tpu.memory_space<vmem>>, %arg3: memref<16x32xbf16, #tpu.memory_space<vmem>>, %arg4: memref<1x16xf32, #tpu.memory_space<vmem>>, %arg5: memref<1x16xf32, #tpu.memory_space<vmem>>, %arg6: memref<1x32xf32, #tpu.memory_space<vmem>>, %arg7: memref<1x32xf32, #tpu.memory_space<vmem>>, %arg8: memref<128x32xbf16, #tpu.memory_space<vmem>>, %arg9: memref<128x32xf32, #tpu.memory_space<vmem>>) attributes {dimension_semantics = [#tpu.dimension_semantics<parallel>, #tpu.dimension_semantics<arbitrary>], iteration_bounds = array<i64: 1, 1>, scalar_prefetch = 0 : i64, scratch_operands = 1 : i64, tpu.core_type = #tpu.core_type<tc>, window_params = [{transform_indices = @transform_0, window_bounds = array<i64: 128, 16>}, {transform_indices = @transform_1, window_bounds = array<i64: 16, 32>}, {transform_indices = @transform_2, window_bounds = array<i64: 1, 16>}, {transform_indices = @transform_3, window_bounds = array<i64: 1, 16>}, {pipeline_mode = #tpu.pipeline_mode<synchronous>, transform_indices = @transform_4, window_bounds = array<i64: 1, 32>}, {pipeline_mode = #tpu.pipeline_mode<synchronous>, transform_indices = @transform_5, window_bounds = array<i64: 1, 32>}, {transform_indices = @transform_6, window_bounds = array<i64: 128, 32>}]} {
    %c0_i32 = arith.constant 0 : i32
    %0 = arith.cmpi eq, %arg1, %c0_i32 : i32
    %1 = arith.extui %0 : i1 to i32
    %c0_i32_0 = arith.constant 0 : i32
    %2 = arith.cmpi ne, %1, %c0_i32_0 : i32
    scf.if %2 {
      %cst_15 = arith.constant 0.000000e+00 : f32
      %22 = vector.broadcast %cst_15 : f32 to vector<128x32xf32>
      %c0_16 = arith.constant 0 : index
      %c0_17 = arith.constant 0 : index
      %23 = vector.load %arg9[%c0_16, %c0_17] : memref<128x32xf32, #tpu.memory_space<vmem>>, vector<128x32xf32>
      tpu.vector_store %arg9[%c0_16, %c0_17], %22 {strides = array<i32>} : memref<128x32xf32, #tpu.memory_space<vmem>>, vector<128x32xf32>,
    } else {
    }
    %c0 = arith.constant 0 : index
    %c0_1 = arith.constant 0 : index
    %3 = vector.load %arg2[%c0, %c0_1] : memref<128x16xbf16, #tpu.memory_space<vmem>>, vector<128x16xbf16>
    %4 = arith.extf %3 : vector<128x16xbf16> to vector<128x16xf32>
    %c0_2 = arith.constant 0 : index
    %c0_3 = arith.constant 0 : index
    %5 = vector.load %arg4[%c0_2, %c0_3] : memref<1x16xf32, #tpu.memory_space<vmem>>, vector<1x16xf32>
    %6 = vector.broadcast %5 : vector<1x16xf32> to vector<128x16xf32>
    %7 = arith.mulf %4, %6 : vector<128x16xf32>
    %c0_4 = arith.constant 0 : index
    %c0_5 = arith.constant 0 : index
    %8 = vector.load %arg5[%c0_4, %c0_5] : memref<1x16xf32, #tpu.memory_space<vmem>>, vector<1x16xf32>
    %9 = vector.broadcast %8 : vector<1x16xf32> to vector<128x16xf32>
    %10 = arith.addf %7, %9 : vector<128x16xf32>
    %cst = arith.constant 0.000000e+00 : f32
    %11 = vector.broadcast %cst : f32 to vector<128x16xf32>
    %12 = arith.maximumf %10, %11 : vector<128x16xf32>
    %c0_6 = arith.constant 0 : index
    %c0_7 = arith.constant 0 : index
    %13 = vector.load %arg9[%c0_6, %c0_7] : memref<128x32xf32, #tpu.memory_space<vmem>>, vector<128x32xf32>
    %14 = arith.truncf %12 : vector<128x16xf32> to vector<128x16xbf16>
    %c0_8 = arith.constant 0 : index
    %c0_9 = arith.constant 0 : index
    %15 = vector.load %arg3[%c0_8, %c0_9] : memref<16x32xbf16, #tpu.memory_space<vmem>>, vector<16x32xbf16>
    %cst_10 = arith.constant dense<0.000000e+00> : vector<128x32xf32>
    %16 = tpu.matmul %14, %15, %cst_10 {dimension_numbers = #tpu.dot_dimension_numbers<[1], [0], [0], [1], [0, 0, 1, 1], [], []>} : vector<128x16xbf16>, vector<16x32xbf16>, vector<128x32xf32> -> vector<128x32xf32>
    %17 = arith.addf %13, %16 : vector<128x32xf32>
    %c0_11 = arith.constant 0 : index
    %c0_12 = arith.constant 0 : index
    %18 = vector.load %arg9[%c0_11, %c0_12] : memref<128x32xf32, #tpu.memory_space<vmem>>, vector<128x32xf32>
    tpu.vector_store %arg9[%c0_11, %c0_12], %17 {strides = array<i32>} : memref<128x32xf32, #tpu.memory_space<vmem>>, vector<128x32xf32>,
    %c0_i32_13 = arith.constant 0 : i32
    %19 = arith.cmpi eq, %arg1, %c0_i32_13 : i32
    %20 = arith.extui %19 : i1 to i32
    %c0_i32_14 = arith.constant 0 : i32
    %21 = arith.cmpi ne, %20, %c0_i32_14 : i32
    scf.if %21 {
      %c0_15 = arith.constant 0 : index
      %c0_16 = arith.constant 0 : index
      %22 = vector.load %arg9[%c0_15, %c0_16] : memref<128x32xf32, #tpu.memory_space<vmem>>, vector<128x32xf32>
      %c0_17 = arith.constant 0 : index
      %c0_18 = arith.constant 0 : index
      %23 = vector.load %arg6[%c0_17, %c0_18] : memref<1x32xf32, #tpu.memory_space<vmem>>, vector<1x32xf32>
      %24 = vector.broadcast %23 : vector<1x32xf32> to vector<128x32xf32>
      %25 = arith.mulf %22, %24 : vector<128x32xf32>
      %c0_19 = arith.constant 0 : index
      %c0_20 = arith.constant 0 : index
      %26 = vector.load %arg7[%c0_19, %c0_20] : memref<1x32xf32, #tpu.memory_space<vmem>>, vector<1x32xf32>
      %27 = vector.broadcast %26 : vector<1x32xf32> to vector<128x32xf32>
      %28 = arith.addf %25, %27 : vector<128x32xf32>
      %cst_21 = arith.constant 0.000000e+00 : f32
      %29 = vector.broadcast %cst_21 : f32 to vector<128x32xf32>
      %30 = arith.maximumf %28, %29 : vector<128x32xf32>
      %31 = arith.truncf %30 : vector<128x32xf32> to vector<128x32xbf16>
      %c0_22 = arith.constant 0 : index
      %c0_23 = arith.constant 0 : index
      %32 = vector.load %arg8[%c0_22, %c0_23] : memref<128x32xbf16, #tpu.memory_space<vmem>>, vector<128x32xbf16>
      tpu.vector_store %arg8[%c0_22, %c0_23], %31 {strides = array<i32>} : memref<128x32xbf16, #tpu.memory_space<vmem>>, vector<128x32xbf16>,
    } else {
    }
    return
  }
  func.func @transform_0(%arg0: i32, %arg1: i32) -> (i32, i32) {
    %c0_i32 = arith.constant 0 : i32
    return %arg0, %arg1 : i32, i32
  }
  func.func @transform_1(%arg0: i32, %arg1: i32) -> (i32, i32) {
    %c0_i32 = arith.constant 0 : i32
    %c0_i32_0 = arith.constant 0 : i32
    return %arg1, %c0_i32 : i32, i32
  }
  func.func @transform_2(%arg0: i32, %arg1: i32) -> (i32, i32) {
    %c0_i32 = arith.constant 0 : i32
    %c0_i32_0 = arith.constant 0 : i32
    return %c0_i32, %arg1 : i32, i32
  }
  func.func @transform_3(%arg0: i32, %arg1: i32) -> (i32, i32) {
    %c0_i32 = arith.constant 0 : i32
    %c0_i32_0 = arith.constant 0 : i32
    return %c0_i32, %arg1 : i32, i32
  }
  func.func @transform_4(%arg0: i32, %arg1: i32) -> (i32, i32) {
    %c0_i32 = arith.constant 0 : i32
    %c0_i32_0 = arith.constant 0 : i32
    %c0_i32_1 = arith.constant 0 : i32
    return %c0_i32, %c0_i32_0 : i32, i32
  }
  func.func @transform_5(%arg0: i32, %arg1: i32) -> (i32, i32) {
    %c0_i32 = arith.constant 0 : i32
    %c0_i32_0 = arith.constant 0 : i32
    %c0_i32_1 = arith.constant 0 : i32
    return %c0_i32, %c0_i32_0 : i32, i32
  }
  func.func @transform_6(%arg0: i32, %arg1: i32) -> (i32, i32) {
    %c0_i32 = arith.constant 0 : i32
    %c0_i32_0 = arith.constant 0 : i32
    return %arg0, %c0_i32 : i32, i32
  }
}

module attributes {stable_mosaic.version = 11 : i64} {
  func.func @_conv3x3_kernel(%arg0: i32, %arg1: memref<1x110x32xbf16, #tpu.memory_space<vmem>>, %arg2: memref<9x32x8xbf16, #tpu.memory_space<vmem>>, %arg3: memref<1x80x8xbf16, #tpu.memory_space<vmem>>) attributes {dimension_semantics = [#tpu.dimension_semantics<parallel>], iteration_bounds = array<i64: 2>, scalar_prefetch = 0 : i64, scratch_operands = 0 : i64, tpu.core_type = #tpu.core_type<tc>, window_params = [{transform_indices = @transform_0, window_bounds = array<i64: 1, 110, 32>}, {pipeline_mode = #tpu.pipeline_mode<synchronous>, transform_indices = @transform_1, window_bounds = array<i64: 9, 32, 8>}, {transform_indices = @transform_2, window_bounds = array<i64: 1, 80, 8>}]} {
    %c0 = arith.constant 0 : index
    %c0_0 = arith.constant 0 : index
    %c0_1 = arith.constant 0 : index
    %0 = vector.load %arg1[%c0, %c0_0, %c0_1] : memref<1x110x32xbf16, #tpu.memory_space<vmem>>, vector<1x110x32xbf16>
    %1 = vector.shape_cast %0 : vector<1x110x32xbf16> to vector<110x32xbf16>
    %2 = arith.extf %1 : vector<110x32xbf16> to vector<110x32xf32>
    %cst = arith.constant 0.000000e+00 : f32
    %3 = vector.broadcast %cst : f32 to vector<80x8xf32>
    %4 = vector.extract_strided_slice %2 {offsets = [0, 0], sizes = [80, 32], strides = [1, 1]} : vector<110x32xf32> to vector<80x32xf32>
    %5 = arith.truncf %4 : vector<80x32xf32> to vector<80x32xbf16>
    %c0_2 = arith.constant 0 : index
    %c0_3 = arith.constant 0 : index
    %c0_4 = arith.constant 0 : index
    %6 = vector.load %arg2[%c0_2, %c0_3, %c0_4] : memref<9x32x8xbf16, #tpu.memory_space<vmem>>, vector<1x32x8xbf16>
    %7 = vector.shape_cast %6 : vector<1x32x8xbf16> to vector<32x8xbf16>
    %cst_5 = arith.constant dense<0.000000e+00> : vector<80x8xf32>
    %8 = tpu.matmul %5, %7, %cst_5 {dimension_numbers = #tpu.dot_dimension_numbers<[1], [0], [0], [1], [0, 0, 1, 1], [], []>} : vector<80x32xbf16>, vector<32x8xbf16>, vector<80x8xf32> -> vector<80x8xf32>
    %9 = arith.addf %3, %8 : vector<80x8xf32>
    %10 = vector.extract_strided_slice %2 {offsets = [1, 0], sizes = [80, 32], strides = [1, 1]} : vector<110x32xf32> to vector<80x32xf32>
    %11 = arith.truncf %10 : vector<80x32xf32> to vector<80x32xbf16>
    %c1 = arith.constant 1 : index
    %c0_6 = arith.constant 0 : index
    %c0_7 = arith.constant 0 : index
    %12 = vector.load %arg2[%c1, %c0_6, %c0_7] : memref<9x32x8xbf16, #tpu.memory_space<vmem>>, vector<1x32x8xbf16>
    %13 = vector.shape_cast %12 : vector<1x32x8xbf16> to vector<32x8xbf16>
    %cst_8 = arith.constant dense<0.000000e+00> : vector<80x8xf32>
    %14 = tpu.matmul %11, %13, %cst_8 {dimension_numbers = #tpu.dot_dimension_numbers<[1], [0], [0], [1], [0, 0, 1, 1], [], []>} : vector<80x32xbf16>, vector<32x8xbf16>, vector<80x8xf32> -> vector<80x8xf32>
    %15 = arith.addf %9, %14 : vector<80x8xf32>
    %16 = vector.extract_strided_slice %2 {offsets = [2, 0], sizes = [80, 32], strides = [1, 1]} : vector<110x32xf32> to vector<80x32xf32>
    %17 = arith.truncf %16 : vector<80x32xf32> to vector<80x32xbf16>
    %c2 = arith.constant 2 : index
    %c0_9 = arith.constant 0 : index
    %c0_10 = arith.constant 0 : index
    %18 = vector.load %arg2[%c2, %c0_9, %c0_10] : memref<9x32x8xbf16, #tpu.memory_space<vmem>>, vector<1x32x8xbf16>
    %19 = vector.shape_cast %18 : vector<1x32x8xbf16> to vector<32x8xbf16>
    %cst_11 = arith.constant dense<0.000000e+00> : vector<80x8xf32>
    %20 = tpu.matmul %17, %19, %cst_11 {dimension_numbers = #tpu.dot_dimension_numbers<[1], [0], [0], [1], [0, 0, 1, 1], [], []>} : vector<80x32xbf16>, vector<32x8xbf16>, vector<80x8xf32> -> vector<80x8xf32>
    %21 = arith.addf %15, %20 : vector<80x8xf32>
    %22 = vector.extract_strided_slice %2 {offsets = [10, 0], sizes = [80, 32], strides = [1, 1]} : vector<110x32xf32> to vector<80x32xf32>
    %23 = arith.truncf %22 : vector<80x32xf32> to vector<80x32xbf16>
    %c3 = arith.constant 3 : index
    %c0_12 = arith.constant 0 : index
    %c0_13 = arith.constant 0 : index
    %24 = vector.load %arg2[%c3, %c0_12, %c0_13] : memref<9x32x8xbf16, #tpu.memory_space<vmem>>, vector<1x32x8xbf16>
    %25 = vector.shape_cast %24 : vector<1x32x8xbf16> to vector<32x8xbf16>
    %cst_14 = arith.constant dense<0.000000e+00> : vector<80x8xf32>
    %26 = tpu.matmul %23, %25, %cst_14 {dimension_numbers = #tpu.dot_dimension_numbers<[1], [0], [0], [1], [0, 0, 1, 1], [], []>} : vector<80x32xbf16>, vector<32x8xbf16>, vector<80x8xf32> -> vector<80x8xf32>
    %27 = arith.addf %21, %26 : vector<80x8xf32>
    %28 = vector.extract_strided_slice %2 {offsets = [11, 0], sizes = [80, 32], strides = [1, 1]} : vector<110x32xf32> to vector<80x32xf32>
    %29 = arith.truncf %28 : vector<80x32xf32> to vector<80x32xbf16>
    %c4 = arith.constant 4 : index
    %c0_15 = arith.constant 0 : index
    %c0_16 = arith.constant 0 : index
    %30 = vector.load %arg2[%c4, %c0_15, %c0_16] : memref<9x32x8xbf16, #tpu.memory_space<vmem>>, vector<1x32x8xbf16>
    %31 = vector.shape_cast %30 : vector<1x32x8xbf16> to vector<32x8xbf16>
    %cst_17 = arith.constant dense<0.000000e+00> : vector<80x8xf32>
    %32 = tpu.matmul %29, %31, %cst_17 {dimension_numbers = #tpu.dot_dimension_numbers<[1], [0], [0], [1], [0, 0, 1, 1], [], []>} : vector<80x32xbf16>, vector<32x8xbf16>, vector<80x8xf32> -> vector<80x8xf32>
    %33 = arith.addf %27, %32 : vector<80x8xf32>
    %34 = vector.extract_strided_slice %2 {offsets = [12, 0], sizes = [80, 32], strides = [1, 1]} : vector<110x32xf32> to vector<80x32xf32>
    %35 = arith.truncf %34 : vector<80x32xf32> to vector<80x32xbf16>
    %c5 = arith.constant 5 : index
    %c0_18 = arith.constant 0 : index
    %c0_19 = arith.constant 0 : index
    %36 = vector.load %arg2[%c5, %c0_18, %c0_19] : memref<9x32x8xbf16, #tpu.memory_space<vmem>>, vector<1x32x8xbf16>
    %37 = vector.shape_cast %36 : vector<1x32x8xbf16> to vector<32x8xbf16>
    %cst_20 = arith.constant dense<0.000000e+00> : vector<80x8xf32>
    %38 = tpu.matmul %35, %37, %cst_20 {dimension_numbers = #tpu.dot_dimension_numbers<[1], [0], [0], [1], [0, 0, 1, 1], [], []>} : vector<80x32xbf16>, vector<32x8xbf16>, vector<80x8xf32> -> vector<80x8xf32>
    %39 = arith.addf %33, %38 : vector<80x8xf32>
    %40 = vector.extract_strided_slice %2 {offsets = [20, 0], sizes = [80, 32], strides = [1, 1]} : vector<110x32xf32> to vector<80x32xf32>
    %41 = arith.truncf %40 : vector<80x32xf32> to vector<80x32xbf16>
    %c6 = arith.constant 6 : index
    %c0_21 = arith.constant 0 : index
    %c0_22 = arith.constant 0 : index
    %42 = vector.load %arg2[%c6, %c0_21, %c0_22] : memref<9x32x8xbf16, #tpu.memory_space<vmem>>, vector<1x32x8xbf16>
    %43 = vector.shape_cast %42 : vector<1x32x8xbf16> to vector<32x8xbf16>
    %cst_23 = arith.constant dense<0.000000e+00> : vector<80x8xf32>
    %44 = tpu.matmul %41, %43, %cst_23 {dimension_numbers = #tpu.dot_dimension_numbers<[1], [0], [0], [1], [0, 0, 1, 1], [], []>} : vector<80x32xbf16>, vector<32x8xbf16>, vector<80x8xf32> -> vector<80x8xf32>
    %45 = arith.addf %39, %44 : vector<80x8xf32>
    %46 = vector.extract_strided_slice %2 {offsets = [21, 0], sizes = [80, 32], strides = [1, 1]} : vector<110x32xf32> to vector<80x32xf32>
    %47 = arith.truncf %46 : vector<80x32xf32> to vector<80x32xbf16>
    %c7 = arith.constant 7 : index
    %c0_24 = arith.constant 0 : index
    %c0_25 = arith.constant 0 : index
    %48 = vector.load %arg2[%c7, %c0_24, %c0_25] : memref<9x32x8xbf16, #tpu.memory_space<vmem>>, vector<1x32x8xbf16>
    %49 = vector.shape_cast %48 : vector<1x32x8xbf16> to vector<32x8xbf16>
    %cst_26 = arith.constant dense<0.000000e+00> : vector<80x8xf32>
    %50 = tpu.matmul %47, %49, %cst_26 {dimension_numbers = #tpu.dot_dimension_numbers<[1], [0], [0], [1], [0, 0, 1, 1], [], []>} : vector<80x32xbf16>, vector<32x8xbf16>, vector<80x8xf32> -> vector<80x8xf32>
    %51 = arith.addf %45, %50 : vector<80x8xf32>
    %52 = vector.extract_strided_slice %2 {offsets = [22, 0], sizes = [80, 32], strides = [1, 1]} : vector<110x32xf32> to vector<80x32xf32>
    %53 = arith.truncf %52 : vector<80x32xf32> to vector<80x32xbf16>
    %c8 = arith.constant 8 : index
    %c0_27 = arith.constant 0 : index
    %c0_28 = arith.constant 0 : index
    %54 = vector.load %arg2[%c8, %c0_27, %c0_28] : memref<9x32x8xbf16, #tpu.memory_space<vmem>>, vector<1x32x8xbf16>
    %55 = vector.shape_cast %54 : vector<1x32x8xbf16> to vector<32x8xbf16>
    %cst_29 = arith.constant dense<0.000000e+00> : vector<80x8xf32>
    %56 = tpu.matmul %53, %55, %cst_29 {dimension_numbers = #tpu.dot_dimension_numbers<[1], [0], [0], [1], [0, 0, 1, 1], [], []>} : vector<80x32xbf16>, vector<32x8xbf16>, vector<80x8xf32> -> vector<80x8xf32>
    %57 = arith.addf %51, %56 : vector<80x8xf32>
    %58 = arith.truncf %57 : vector<80x8xf32> to vector<80x8xbf16>
    %c0_30 = arith.constant 0 : index
    %c0_31 = arith.constant 0 : index
    %c0_32 = arith.constant 0 : index
    %59 = vector.load %arg3[%c0_30, %c0_31, %c0_32] : memref<1x80x8xbf16, #tpu.memory_space<vmem>>, vector<1x80x8xbf16>
    %60 = vector.shape_cast %59 : vector<1x80x8xbf16> to vector<80x8xbf16>
    %61 = vector.shape_cast %58 : vector<80x8xbf16> to vector<1x80x8xbf16>
    tpu.vector_store %arg3[%c0_30, %c0_31, %c0_32], %61 {strides = array<i32>} : memref<1x80x8xbf16, #tpu.memory_space<vmem>>, vector<1x80x8xbf16>,
    return
  }
  func.func @transform_0(%arg0: i32) -> (i32, i32, i32) {
    %c0_i32 = arith.constant 0 : i32
    %c0_i32_0 = arith.constant 0 : i32
    %c0_i32_1 = arith.constant 0 : i32
    return %arg0, %c0_i32, %c0_i32_0 : i32, i32, i32
  }
  func.func @transform_1(%arg0: i32) -> (i32, i32, i32) {
    %c0_i32 = arith.constant 0 : i32
    %c0_i32_0 = arith.constant 0 : i32
    %c0_i32_1 = arith.constant 0 : i32
    %c0_i32_2 = arith.constant 0 : i32
    return %c0_i32, %c0_i32_0, %c0_i32_1 : i32, i32, i32
  }
  func.func @transform_2(%arg0: i32) -> (i32, i32, i32) {
    %c0_i32 = arith.constant 0 : i32
    %c0_i32_0 = arith.constant 0 : i32
    %c0_i32_1 = arith.constant 0 : i32
    return %arg0, %c0_i32, %c0_i32_0 : i32, i32, i32
  }
}

module attributes {stable_mosaic.version = 11 : i64} {
  func.func @_fused_mm_kernel(%arg0: i32, %arg1: i32, %arg2: memref<128x24xbf16, #tpu.memory_space<vmem>>, %arg3: memref<24x32xbf16, #tpu.memory_space<vmem>>, %arg4: memref<1x24xf32, #tpu.memory_space<vmem>>, %arg5: memref<1x24xf32, #tpu.memory_space<vmem>>, %arg6: memref<1x32xf32, #tpu.memory_space<vmem>>, %arg7: memref<1x32xf32, #tpu.memory_space<vmem>>, %arg8: memref<128x32xbf16, #tpu.memory_space<vmem>>, %arg9: memref<128x32xf32, #tpu.memory_space<vmem>>) attributes {dimension_semantics = [#tpu.dimension_semantics<parallel>, #tpu.dimension_semantics<arbitrary>], iteration_bounds = array<i64: 1, 1>, scalar_prefetch = 0 : i64, scratch_operands = 1 : i64, tpu.core_type = #tpu.core_type<tc>, window_params = [{transform_indices = @transform_0, window_bounds = array<i64: 128, 24>}, {transform_indices = @transform_1, window_bounds = array<i64: 24, 32>}, {transform_indices = @transform_2, window_bounds = array<i64: 1, 24>}, {transform_indices = @transform_3, window_bounds = array<i64: 1, 24>}, {pipeline_mode = #tpu.pipeline_mode<synchronous>, transform_indices = @transform_4, window_bounds = array<i64: 1, 32>}, {pipeline_mode = #tpu.pipeline_mode<synchronous>, transform_indices = @transform_5, window_bounds = array<i64: 1, 32>}, {transform_indices = @transform_6, window_bounds = array<i64: 128, 32>}]} {
    %c0_i32 = arith.constant 0 : i32
    %0 = arith.cmpi eq, %arg1, %c0_i32 : i32
    %1 = arith.extui %0 : i1 to i32
    %c0_i32_0 = arith.constant 0 : i32
    %2 = arith.cmpi ne, %1, %c0_i32_0 : i32
    scf.if %2 {
      %cst_15 = arith.constant 0.000000e+00 : f32
      %22 = vector.broadcast %cst_15 : f32 to vector<128x32xf32>
      %c0_16 = arith.constant 0 : index
      %c0_17 = arith.constant 0 : index
      %23 = vector.load %arg9[%c0_16, %c0_17] : memref<128x32xf32, #tpu.memory_space<vmem>>, vector<128x32xf32>
      tpu.vector_store %arg9[%c0_16, %c0_17], %22 {strides = array<i32>} : memref<128x32xf32, #tpu.memory_space<vmem>>, vector<128x32xf32>,
    } else {
    }
    %c0 = arith.constant 0 : index
    %c0_1 = arith.constant 0 : index
    %3 = vector.load %arg2[%c0, %c0_1] : memref<128x24xbf16, #tpu.memory_space<vmem>>, vector<128x24xbf16>
    %4 = arith.extf %3 : vector<128x24xbf16> to vector<128x24xf32>
    %c0_2 = arith.constant 0 : index
    %c0_3 = arith.constant 0 : index
    %5 = vector.load %arg4[%c0_2, %c0_3] : memref<1x24xf32, #tpu.memory_space<vmem>>, vector<1x24xf32>
    %6 = vector.broadcast %5 : vector<1x24xf32> to vector<128x24xf32>
    %7 = arith.mulf %4, %6 : vector<128x24xf32>
    %c0_4 = arith.constant 0 : index
    %c0_5 = arith.constant 0 : index
    %8 = vector.load %arg5[%c0_4, %c0_5] : memref<1x24xf32, #tpu.memory_space<vmem>>, vector<1x24xf32>
    %9 = vector.broadcast %8 : vector<1x24xf32> to vector<128x24xf32>
    %10 = arith.addf %7, %9 : vector<128x24xf32>
    %cst = arith.constant 0.000000e+00 : f32
    %11 = vector.broadcast %cst : f32 to vector<128x24xf32>
    %12 = arith.maximumf %10, %11 : vector<128x24xf32>
    %c0_6 = arith.constant 0 : index
    %c0_7 = arith.constant 0 : index
    %13 = vector.load %arg9[%c0_6, %c0_7] : memref<128x32xf32, #tpu.memory_space<vmem>>, vector<128x32xf32>
    %14 = arith.truncf %12 : vector<128x24xf32> to vector<128x24xbf16>
    %c0_8 = arith.constant 0 : index
    %c0_9 = arith.constant 0 : index
    %15 = vector.load %arg3[%c0_8, %c0_9] : memref<24x32xbf16, #tpu.memory_space<vmem>>, vector<24x32xbf16>
    %cst_10 = arith.constant dense<0.000000e+00> : vector<128x32xf32>
    %16 = tpu.matmul %14, %15, %cst_10 {dimension_numbers = #tpu.dot_dimension_numbers<[1], [0], [0], [1], [0, 0, 1, 1], [], []>} : vector<128x24xbf16>, vector<24x32xbf16>, vector<128x32xf32> -> vector<128x32xf32>
    %17 = arith.addf %13, %16 : vector<128x32xf32>
    %c0_11 = arith.constant 0 : index
    %c0_12 = arith.constant 0 : index
    %18 = vector.load %arg9[%c0_11, %c0_12] : memref<128x32xf32, #tpu.memory_space<vmem>>, vector<128x32xf32>
    tpu.vector_store %arg9[%c0_11, %c0_12], %17 {strides = array<i32>} : memref<128x32xf32, #tpu.memory_space<vmem>>, vector<128x32xf32>,
    %c0_i32_13 = arith.constant 0 : i32
    %19 = arith.cmpi eq, %arg1, %c0_i32_13 : i32
    %20 = arith.extui %19 : i1 to i32
    %c0_i32_14 = arith.constant 0 : i32
    %21 = arith.cmpi ne, %20, %c0_i32_14 : i32
    scf.if %21 {
      %c0_15 = arith.constant 0 : index
      %c0_16 = arith.constant 0 : index
      %22 = vector.load %arg9[%c0_15, %c0_16] : memref<128x32xf32, #tpu.memory_space<vmem>>, vector<128x32xf32>
      %c0_17 = arith.constant 0 : index
      %c0_18 = arith.constant 0 : index
      %23 = vector.load %arg6[%c0_17, %c0_18] : memref<1x32xf32, #tpu.memory_space<vmem>>, vector<1x32xf32>
      %24 = vector.broadcast %23 : vector<1x32xf32> to vector<128x32xf32>
      %25 = arith.mulf %22, %24 : vector<128x32xf32>
      %c0_19 = arith.constant 0 : index
      %c0_20 = arith.constant 0 : index
      %26 = vector.load %arg7[%c0_19, %c0_20] : memref<1x32xf32, #tpu.memory_space<vmem>>, vector<1x32xf32>
      %27 = vector.broadcast %26 : vector<1x32xf32> to vector<128x32xf32>
      %28 = arith.addf %25, %27 : vector<128x32xf32>
      %cst_21 = arith.constant 0.000000e+00 : f32
      %29 = vector.broadcast %cst_21 : f32 to vector<128x32xf32>
      %30 = arith.maximumf %28, %29 : vector<128x32xf32>
      %31 = arith.truncf %30 : vector<128x32xf32> to vector<128x32xbf16>
      %c0_22 = arith.constant 0 : index
      %c0_23 = arith.constant 0 : index
      %32 = vector.load %arg8[%c0_22, %c0_23] : memref<128x32xbf16, #tpu.memory_space<vmem>>, vector<128x32xbf16>
      tpu.vector_store %arg8[%c0_22, %c0_23], %31 {strides = array<i32>} : memref<128x32xbf16, #tpu.memory_space<vmem>>, vector<128x32xbf16>,
    } else {
    }
    return
  }
  func.func @transform_0(%arg0: i32, %arg1: i32) -> (i32, i32) {
    %c0_i32 = arith.constant 0 : i32
    return %arg0, %arg1 : i32, i32
  }
  func.func @transform_1(%arg0: i32, %arg1: i32) -> (i32, i32) {
    %c0_i32 = arith.constant 0 : i32
    %c0_i32_0 = arith.constant 0 : i32
    return %arg1, %c0_i32 : i32, i32
  }
  func.func @transform_2(%arg0: i32, %arg1: i32) -> (i32, i32) {
    %c0_i32 = arith.constant 0 : i32
    %c0_i32_0 = arith.constant 0 : i32
    return %c0_i32, %arg1 : i32, i32
  }
  func.func @transform_3(%arg0: i32, %arg1: i32) -> (i32, i32) {
    %c0_i32 = arith.constant 0 : i32
    %c0_i32_0 = arith.constant 0 : i32
    return %c0_i32, %arg1 : i32, i32
  }
  func.func @transform_4(%arg0: i32, %arg1: i32) -> (i32, i32) {
    %c0_i32 = arith.constant 0 : i32
    %c0_i32_0 = arith.constant 0 : i32
    %c0_i32_1 = arith.constant 0 : i32
    return %c0_i32, %c0_i32_0 : i32, i32
  }
  func.func @transform_5(%arg0: i32, %arg1: i32) -> (i32, i32) {
    %c0_i32 = arith.constant 0 : i32
    %c0_i32_0 = arith.constant 0 : i32
    %c0_i32_1 = arith.constant 0 : i32
    return %c0_i32, %c0_i32_0 : i32, i32
  }
  func.func @transform_6(%arg0: i32, %arg1: i32) -> (i32, i32) {
    %c0_i32 = arith.constant 0 : i32
    %c0_i32_0 = arith.constant 0 : i32
    return %arg0, %c0_i32 : i32, i32
  }
}

module attributes {stable_mosaic.version = 11 : i64} {
  func.func @_fused_mm_kernel(%arg0: i32, %arg1: i32, %arg2: memref<128x32xbf16, #tpu.memory_space<vmem>>, %arg3: memref<32x16xbf16, #tpu.memory_space<vmem>>, %arg4: memref<1x32xf32, #tpu.memory_space<vmem>>, %arg5: memref<1x32xf32, #tpu.memory_space<vmem>>, %arg6: memref<128x16xbf16, #tpu.memory_space<vmem>>, %arg7: memref<128x16xf32, #tpu.memory_space<vmem>>) attributes {dimension_semantics = [#tpu.dimension_semantics<parallel>, #tpu.dimension_semantics<arbitrary>], iteration_bounds = array<i64: 1, 1>, scalar_prefetch = 0 : i64, scratch_operands = 1 : i64, tpu.core_type = #tpu.core_type<tc>, window_params = [{transform_indices = @transform_0, window_bounds = array<i64: 128, 32>}, {transform_indices = @transform_1, window_bounds = array<i64: 32, 16>}, {transform_indices = @transform_2, window_bounds = array<i64: 1, 32>}, {transform_indices = @transform_3, window_bounds = array<i64: 1, 32>}, {transform_indices = @transform_4, window_bounds = array<i64: 128, 16>}]} {
    %c0_i32 = arith.constant 0 : i32
    %0 = arith.cmpi eq, %arg1, %c0_i32 : i32
    %1 = arith.extui %0 : i1 to i32
    %c0_i32_0 = arith.constant 0 : i32
    %2 = arith.cmpi ne, %1, %c0_i32_0 : i32
    scf.if %2 {
      %cst_15 = arith.constant 0.000000e+00 : f32
      %22 = vector.broadcast %cst_15 : f32 to vector<128x16xf32>
      %c0_16 = arith.constant 0 : index
      %c0_17 = arith.constant 0 : index
      %23 = vector.load %arg7[%c0_16, %c0_17] : memref<128x16xf32, #tpu.memory_space<vmem>>, vector<128x16xf32>
      tpu.vector_store %arg7[%c0_16, %c0_17], %22 {strides = array<i32>} : memref<128x16xf32, #tpu.memory_space<vmem>>, vector<128x16xf32>,
    } else {
    }
    %c0 = arith.constant 0 : index
    %c0_1 = arith.constant 0 : index
    %3 = vector.load %arg2[%c0, %c0_1] : memref<128x32xbf16, #tpu.memory_space<vmem>>, vector<128x32xbf16>
    %4 = arith.extf %3 : vector<128x32xbf16> to vector<128x32xf32>
    %c0_2 = arith.constant 0 : index
    %c0_3 = arith.constant 0 : index
    %5 = vector.load %arg4[%c0_2, %c0_3] : memref<1x32xf32, #tpu.memory_space<vmem>>, vector<1x32xf32>
    %6 = vector.broadcast %5 : vector<1x32xf32> to vector<128x32xf32>
    %7 = arith.mulf %4, %6 : vector<128x32xf32>
    %c0_4 = arith.constant 0 : index
    %c0_5 = arith.constant 0 : index
    %8 = vector.load %arg5[%c0_4, %c0_5] : memref<1x32xf32, #tpu.memory_space<vmem>>, vector<1x32xf32>
    %9 = vector.broadcast %8 : vector<1x32xf32> to vector<128x32xf32>
    %10 = arith.addf %7, %9 : vector<128x32xf32>
    %cst = arith.constant 0.000000e+00 : f32
    %11 = vector.broadcast %cst : f32 to vector<128x32xf32>
    %12 = arith.maximumf %10, %11 : vector<128x32xf32>
    %c0_6 = arith.constant 0 : index
    %c0_7 = arith.constant 0 : index
    %13 = vector.load %arg7[%c0_6, %c0_7] : memref<128x16xf32, #tpu.memory_space<vmem>>, vector<128x16xf32>
    %14 = arith.truncf %12 : vector<128x32xf32> to vector<128x32xbf16>
    %c0_8 = arith.constant 0 : index
    %c0_9 = arith.constant 0 : index
    %15 = vector.load %arg3[%c0_8, %c0_9] : memref<32x16xbf16, #tpu.memory_space<vmem>>, vector<32x16xbf16>
    %cst_10 = arith.constant dense<0.000000e+00> : vector<128x16xf32>
    %16 = tpu.matmul %14, %15, %cst_10 {dimension_numbers = #tpu.dot_dimension_numbers<[1], [0], [0], [1], [0, 0, 1, 1], [], []>} : vector<128x32xbf16>, vector<32x16xbf16>, vector<128x16xf32> -> vector<128x16xf32>
    %17 = arith.addf %13, %16 : vector<128x16xf32>
    %c0_11 = arith.constant 0 : index
    %c0_12 = arith.constant 0 : index
    %18 = vector.load %arg7[%c0_11, %c0_12] : memref<128x16xf32, #tpu.memory_space<vmem>>, vector<128x16xf32>
    tpu.vector_store %arg7[%c0_11, %c0_12], %17 {strides = array<i32>} : memref<128x16xf32, #tpu.memory_space<vmem>>, vector<128x16xf32>,
    %c0_i32_13 = arith.constant 0 : i32
    %19 = arith.cmpi eq, %arg1, %c0_i32_13 : i32
    %20 = arith.extui %19 : i1 to i32
    %c0_i32_14 = arith.constant 0 : i32
    %21 = arith.cmpi ne, %20, %c0_i32_14 : i32
    scf.if %21 {
      %c0_15 = arith.constant 0 : index
      %c0_16 = arith.constant 0 : index
      %22 = vector.load %arg7[%c0_15, %c0_16] : memref<128x16xf32, #tpu.memory_space<vmem>>, vector<128x16xf32>
      %23 = arith.truncf %22 : vector<128x16xf32> to vector<128x16xbf16>
      %c0_17 = arith.constant 0 : index
      %c0_18 = arith.constant 0 : index
      %24 = vector.load %arg6[%c0_17, %c0_18] : memref<128x16xbf16, #tpu.memory_space<vmem>>, vector<128x16xbf16>
      tpu.vector_store %arg6[%c0_17, %c0_18], %23 {strides = array<i32>} : memref<128x16xbf16, #tpu.memory_space<vmem>>, vector<128x16xbf16>,
    } else {
    }
    return
  }
  func.func @transform_0(%arg0: i32, %arg1: i32) -> (i32, i32) {
    %c0_i32 = arith.constant 0 : i32
    return %arg0, %arg1 : i32, i32
  }
  func.func @transform_1(%arg0: i32, %arg1: i32) -> (i32, i32) {
    %c0_i32 = arith.constant 0 : i32
    %c0_i32_0 = arith.constant 0 : i32
    return %arg1, %c0_i32 : i32, i32
  }
  func.func @transform_2(%arg0: i32, %arg1: i32) -> (i32, i32) {
    %c0_i32 = arith.constant 0 : i32
    %c0_i32_0 = arith.constant 0 : i32
    return %c0_i32, %arg1 : i32, i32
  }
  func.func @transform_3(%arg0: i32, %arg1: i32) -> (i32, i32) {
    %c0_i32 = arith.constant 0 : i32
    %c0_i32_0 = arith.constant 0 : i32
    return %c0_i32, %arg1 : i32, i32
  }
  func.func @transform_4(%arg0: i32, %arg1: i32) -> (i32, i32) {
    %c0_i32 = arith.constant 0 : i32
    %c0_i32_0 = arith.constant 0 : i32
    return %arg0, %c0_i32 : i32, i32
  }
}

module attributes {stable_mosaic.version = 11 : i64} {
  func.func @_pool_dense_kernel(%arg0: i32, %arg1: memref<1x8x8x16xbf16, #tpu.memory_space<vmem>>, %arg2: memref<1x7x7x16xbf16, #tpu.memory_space<vmem>>) attributes {dimension_semantics = [#tpu.dimension_semantics<parallel>], iteration_bounds = array<i64: 2>, scalar_prefetch = 0 : i64, scratch_operands = 0 : i64, tpu.core_type = #tpu.core_type<tc>, window_params = [{transform_indices = @transform_0, window_bounds = array<i64: 1, 8, 8, 16>}, {transform_indices = @transform_1, window_bounds = array<i64: 1, 7, 7, 16>}]} {
    %c0 = arith.constant 0 : index
    %c0_0 = arith.constant 0 : index
    %c0_1 = arith.constant 0 : index
    %c0_2 = arith.constant 0 : index
    %0 = vector.load %arg1[%c0, %c0_0, %c0_1, %c0_2] : memref<1x8x8x16xbf16, #tpu.memory_space<vmem>>, vector<1x8x8x16xbf16>
    %1 = vector.shape_cast %0 : vector<1x8x8x16xbf16> to vector<8x8x16xbf16>
    %2 = arith.extf %1 : vector<8x8x16xbf16> to vector<8x8x16xf32>
    %3 = vector.extract_strided_slice %2 {offsets = [0, 0, 0], sizes = [7, 7, 16], strides = [1, 1, 1]} : vector<8x8x16xf32> to vector<7x7x16xf32>
    %4 = vector.extract_strided_slice %2 {offsets = [0, 1, 0], sizes = [7, 7, 16], strides = [1, 1, 1]} : vector<8x8x16xf32> to vector<7x7x16xf32>
    %5 = arith.addf %3, %4 : vector<7x7x16xf32>
    %6 = vector.extract_strided_slice %2 {offsets = [1, 0, 0], sizes = [7, 7, 16], strides = [1, 1, 1]} : vector<8x8x16xf32> to vector<7x7x16xf32>
    %7 = arith.addf %5, %6 : vector<7x7x16xf32>
    %8 = vector.extract_strided_slice %2 {offsets = [1, 1, 0], sizes = [7, 7, 16], strides = [1, 1, 1]} : vector<8x8x16xf32> to vector<7x7x16xf32>
    %9 = arith.addf %7, %8 : vector<7x7x16xf32>
    %cst = arith.constant 2.500000e-01 : f32
    %10 = vector.broadcast %cst : f32 to vector<7x7x16xf32>
    %11 = arith.mulf %9, %10 : vector<7x7x16xf32>
    %12 = arith.truncf %11 : vector<7x7x16xf32> to vector<7x7x16xbf16>
    %c0_3 = arith.constant 0 : index
    %c0_4 = arith.constant 0 : index
    %c0_5 = arith.constant 0 : index
    %c0_6 = arith.constant 0 : index
    %13 = vector.load %arg2[%c0_3, %c0_4, %c0_5, %c0_6] : memref<1x7x7x16xbf16, #tpu.memory_space<vmem>>, vector<1x7x7x16xbf16>
    %14 = vector.shape_cast %13 : vector<1x7x7x16xbf16> to vector<7x7x16xbf16>
    %15 = vector.shape_cast %12 : vector<7x7x16xbf16> to vector<1x7x7x16xbf16>
    tpu.vector_store %arg2[%c0_3, %c0_4, %c0_5, %c0_6], %15 {strides = array<i32>} : memref<1x7x7x16xbf16, #tpu.memory_space<vmem>>, vector<1x7x7x16xbf16>,
    return
  }
  func.func @transform_0(%arg0: i32) -> (i32, i32, i32, i32) {
    %c0_i32 = arith.constant 0 : i32
    %c0_i32_0 = arith.constant 0 : i32
    %c0_i32_1 = arith.constant 0 : i32
    %c0_i32_2 = arith.constant 0 : i32
    return %arg0, %c0_i32, %c0_i32_0, %c0_i32_1 : i32, i32, i32, i32
  }
  func.func @transform_1(%arg0: i32) -> (i32, i32, i32, i32) {
    %c0_i32 = arith.constant 0 : i32
    %c0_i32_0 = arith.constant 0 : i32
    %c0_i32_1 = arith.constant 0 : i32
    %c0_i32_2 = arith.constant 0 : i32
    return %arg0, %c0_i32, %c0_i32_0, %c0_i32_1 : i32, i32, i32, i32
  }
}

module attributes {stable_mosaic.version = 11 : i64} {
  func.func @_fused_mm_kernel(%arg0: i32, %arg1: i32, %arg2: memref<32x16xbf16, #tpu.memory_space<vmem>>, %arg3: memref<16x32xbf16, #tpu.memory_space<vmem>>, %arg4: memref<1x16xf32, #tpu.memory_space<vmem>>, %arg5: memref<1x16xf32, #tpu.memory_space<vmem>>, %arg6: memref<1x32xf32, #tpu.memory_space<vmem>>, %arg7: memref<1x32xf32, #tpu.memory_space<vmem>>, %arg8: memref<32x32xbf16, #tpu.memory_space<vmem>>, %arg9: memref<32x32xf32, #tpu.memory_space<vmem>>) attributes {dimension_semantics = [#tpu.dimension_semantics<parallel>, #tpu.dimension_semantics<arbitrary>], iteration_bounds = array<i64: 1, 1>, scalar_prefetch = 0 : i64, scratch_operands = 1 : i64, tpu.core_type = #tpu.core_type<tc>, window_params = [{transform_indices = @transform_0, window_bounds = array<i64: 32, 16>}, {transform_indices = @transform_1, window_bounds = array<i64: 16, 32>}, {transform_indices = @transform_2, window_bounds = array<i64: 1, 16>}, {transform_indices = @transform_3, window_bounds = array<i64: 1, 16>}, {pipeline_mode = #tpu.pipeline_mode<synchronous>, transform_indices = @transform_4, window_bounds = array<i64: 1, 32>}, {pipeline_mode = #tpu.pipeline_mode<synchronous>, transform_indices = @transform_5, window_bounds = array<i64: 1, 32>}, {transform_indices = @transform_6, window_bounds = array<i64: 32, 32>}]} {
    %c0_i32 = arith.constant 0 : i32
    %0 = arith.cmpi eq, %arg1, %c0_i32 : i32
    %1 = arith.extui %0 : i1 to i32
    %c0_i32_0 = arith.constant 0 : i32
    %2 = arith.cmpi ne, %1, %c0_i32_0 : i32
    scf.if %2 {
      %cst_15 = arith.constant 0.000000e+00 : f32
      %22 = vector.broadcast %cst_15 : f32 to vector<32x32xf32>
      %c0_16 = arith.constant 0 : index
      %c0_17 = arith.constant 0 : index
      %23 = vector.load %arg9[%c0_16, %c0_17] : memref<32x32xf32, #tpu.memory_space<vmem>>, vector<32x32xf32>
      tpu.vector_store %arg9[%c0_16, %c0_17], %22 {strides = array<i32>} : memref<32x32xf32, #tpu.memory_space<vmem>>, vector<32x32xf32>,
    } else {
    }
    %c0 = arith.constant 0 : index
    %c0_1 = arith.constant 0 : index
    %3 = vector.load %arg2[%c0, %c0_1] : memref<32x16xbf16, #tpu.memory_space<vmem>>, vector<32x16xbf16>
    %4 = arith.extf %3 : vector<32x16xbf16> to vector<32x16xf32>
    %c0_2 = arith.constant 0 : index
    %c0_3 = arith.constant 0 : index
    %5 = vector.load %arg4[%c0_2, %c0_3] : memref<1x16xf32, #tpu.memory_space<vmem>>, vector<1x16xf32>
    %6 = vector.broadcast %5 : vector<1x16xf32> to vector<32x16xf32>
    %7 = arith.mulf %4, %6 : vector<32x16xf32>
    %c0_4 = arith.constant 0 : index
    %c0_5 = arith.constant 0 : index
    %8 = vector.load %arg5[%c0_4, %c0_5] : memref<1x16xf32, #tpu.memory_space<vmem>>, vector<1x16xf32>
    %9 = vector.broadcast %8 : vector<1x16xf32> to vector<32x16xf32>
    %10 = arith.addf %7, %9 : vector<32x16xf32>
    %cst = arith.constant 0.000000e+00 : f32
    %11 = vector.broadcast %cst : f32 to vector<32x16xf32>
    %12 = arith.maximumf %10, %11 : vector<32x16xf32>
    %c0_6 = arith.constant 0 : index
    %c0_7 = arith.constant 0 : index
    %13 = vector.load %arg9[%c0_6, %c0_7] : memref<32x32xf32, #tpu.memory_space<vmem>>, vector<32x32xf32>
    %14 = arith.truncf %12 : vector<32x16xf32> to vector<32x16xbf16>
    %c0_8 = arith.constant 0 : index
    %c0_9 = arith.constant 0 : index
    %15 = vector.load %arg3[%c0_8, %c0_9] : memref<16x32xbf16, #tpu.memory_space<vmem>>, vector<16x32xbf16>
    %cst_10 = arith.constant dense<0.000000e+00> : vector<32x32xf32>
    %16 = tpu.matmul %14, %15, %cst_10 {dimension_numbers = #tpu.dot_dimension_numbers<[1], [0], [0], [1], [0, 0, 1, 1], [], []>} : vector<32x16xbf16>, vector<16x32xbf16>, vector<32x32xf32> -> vector<32x32xf32>
    %17 = arith.addf %13, %16 : vector<32x32xf32>
    %c0_11 = arith.constant 0 : index
    %c0_12 = arith.constant 0 : index
    %18 = vector.load %arg9[%c0_11, %c0_12] : memref<32x32xf32, #tpu.memory_space<vmem>>, vector<32x32xf32>
    tpu.vector_store %arg9[%c0_11, %c0_12], %17 {strides = array<i32>} : memref<32x32xf32, #tpu.memory_space<vmem>>, vector<32x32xf32>,
    %c0_i32_13 = arith.constant 0 : i32
    %19 = arith.cmpi eq, %arg1, %c0_i32_13 : i32
    %20 = arith.extui %19 : i1 to i32
    %c0_i32_14 = arith.constant 0 : i32
    %21 = arith.cmpi ne, %20, %c0_i32_14 : i32
    scf.if %21 {
      %c0_15 = arith.constant 0 : index
      %c0_16 = arith.constant 0 : index
      %22 = vector.load %arg9[%c0_15, %c0_16] : memref<32x32xf32, #tpu.memory_space<vmem>>, vector<32x32xf32>
      %c0_17 = arith.constant 0 : index
      %c0_18 = arith.constant 0 : index
      %23 = vector.load %arg6[%c0_17, %c0_18] : memref<1x32xf32, #tpu.memory_space<vmem>>, vector<1x32xf32>
      %24 = vector.broadcast %23 : vector<1x32xf32> to vector<32x32xf32>
      %25 = arith.mulf %22, %24 : vector<32x32xf32>
      %c0_19 = arith.constant 0 : index
      %c0_20 = arith.constant 0 : index
      %26 = vector.load %arg7[%c0_19, %c0_20] : memref<1x32xf32, #tpu.memory_space<vmem>>, vector<1x32xf32>
      %27 = vector.broadcast %26 : vector<1x32xf32> to vector<32x32xf32>
      %28 = arith.addf %25, %27 : vector<32x32xf32>
      %cst_21 = arith.constant 0.000000e+00 : f32
      %29 = vector.broadcast %cst_21 : f32 to vector<32x32xf32>
      %30 = arith.maximumf %28, %29 : vector<32x32xf32>
      %31 = arith.truncf %30 : vector<32x32xf32> to vector<32x32xbf16>
      %c0_22 = arith.constant 0 : index
      %c0_23 = arith.constant 0 : index
      %32 = vector.load %arg8[%c0_22, %c0_23] : memref<32x32xbf16, #tpu.memory_space<vmem>>, vector<32x32xbf16>
      tpu.vector_store %arg8[%c0_22, %c0_23], %31 {strides = array<i32>} : memref<32x32xbf16, #tpu.memory_space<vmem>>, vector<32x32xbf16>,
    } else {
    }
    return
  }
  func.func @transform_0(%arg0: i32, %arg1: i32) -> (i32, i32) {
    %c0_i32 = arith.constant 0 : i32
    return %arg0, %arg1 : i32, i32
  }
  func.func @transform_1(%arg0: i32, %arg1: i32) -> (i32, i32) {
    %c0_i32 = arith.constant 0 : i32
    %c0_i32_0 = arith.constant 0 : i32
    return %arg1, %c0_i32 : i32, i32
  }
  func.func @transform_2(%arg0: i32, %arg1: i32) -> (i32, i32) {
    %c0_i32 = arith.constant 0 : i32
    %c0_i32_0 = arith.constant 0 : i32
    return %c0_i32, %arg1 : i32, i32
  }
  func.func @transform_3(%arg0: i32, %arg1: i32) -> (i32, i32) {
    %c0_i32 = arith.constant 0 : i32
    %c0_i32_0 = arith.constant 0 : i32
    return %c0_i32, %arg1 : i32, i32
  }
  func.func @transform_4(%arg0: i32, %arg1: i32) -> (i32, i32) {
    %c0_i32 = arith.constant 0 : i32
    %c0_i32_0 = arith.constant 0 : i32
    %c0_i32_1 = arith.constant 0 : i32
    return %c0_i32, %c0_i32_0 : i32, i32
  }
  func.func @transform_5(%arg0: i32, %arg1: i32) -> (i32, i32) {
    %c0_i32 = arith.constant 0 : i32
    %c0_i32_0 = arith.constant 0 : i32
    %c0_i32_1 = arith.constant 0 : i32
    return %c0_i32, %c0_i32_0 : i32, i32
  }
  func.func @transform_6(%arg0: i32, %arg1: i32) -> (i32, i32) {
    %c0_i32 = arith.constant 0 : i32
    %c0_i32_0 = arith.constant 0 : i32
    return %arg0, %c0_i32 : i32, i32
  }
}

module attributes {stable_mosaic.version = 11 : i64} {
  func.func @_conv3x3_kernel(%arg0: i32, %arg1: memref<1x42x32xbf16, #tpu.memory_space<vmem>>, %arg2: memref<9x32x8xbf16, #tpu.memory_space<vmem>>, %arg3: memref<1x24x8xbf16, #tpu.memory_space<vmem>>) attributes {dimension_semantics = [#tpu.dimension_semantics<parallel>], iteration_bounds = array<i64: 2>, scalar_prefetch = 0 : i64, scratch_operands = 0 : i64, tpu.core_type = #tpu.core_type<tc>, window_params = [{transform_indices = @transform_0, window_bounds = array<i64: 1, 42, 32>}, {pipeline_mode = #tpu.pipeline_mode<synchronous>, transform_indices = @transform_1, window_bounds = array<i64: 9, 32, 8>}, {transform_indices = @transform_2, window_bounds = array<i64: 1, 24, 8>}]} {
    %c0 = arith.constant 0 : index
    %c0_0 = arith.constant 0 : index
    %c0_1 = arith.constant 0 : index
    %0 = vector.load %arg1[%c0, %c0_0, %c0_1] : memref<1x42x32xbf16, #tpu.memory_space<vmem>>, vector<1x42x32xbf16>
    %1 = vector.shape_cast %0 : vector<1x42x32xbf16> to vector<42x32xbf16>
    %2 = arith.extf %1 : vector<42x32xbf16> to vector<42x32xf32>
    %cst = arith.constant 0.000000e+00 : f32
    %3 = vector.broadcast %cst : f32 to vector<24x8xf32>
    %4 = vector.extract_strided_slice %2 {offsets = [0, 0], sizes = [24, 32], strides = [1, 1]} : vector<42x32xf32> to vector<24x32xf32>
    %5 = arith.truncf %4 : vector<24x32xf32> to vector<24x32xbf16>
    %c0_2 = arith.constant 0 : index
    %c0_3 = arith.constant 0 : index
    %c0_4 = arith.constant 0 : index
    %6 = vector.load %arg2[%c0_2, %c0_3, %c0_4] : memref<9x32x8xbf16, #tpu.memory_space<vmem>>, vector<1x32x8xbf16>
    %7 = vector.shape_cast %6 : vector<1x32x8xbf16> to vector<32x8xbf16>
    %cst_5 = arith.constant dense<0.000000e+00> : vector<24x8xf32>
    %8 = tpu.matmul %5, %7, %cst_5 {dimension_numbers = #tpu.dot_dimension_numbers<[1], [0], [0], [1], [0, 0, 1, 1], [], []>} : vector<24x32xbf16>, vector<32x8xbf16>, vector<24x8xf32> -> vector<24x8xf32>
    %9 = arith.addf %3, %8 : vector<24x8xf32>
    %10 = vector.extract_strided_slice %2 {offsets = [1, 0], sizes = [24, 32], strides = [1, 1]} : vector<42x32xf32> to vector<24x32xf32>
    %11 = arith.truncf %10 : vector<24x32xf32> to vector<24x32xbf16>
    %c1 = arith.constant 1 : index
    %c0_6 = arith.constant 0 : index
    %c0_7 = arith.constant 0 : index
    %12 = vector.load %arg2[%c1, %c0_6, %c0_7] : memref<9x32x8xbf16, #tpu.memory_space<vmem>>, vector<1x32x8xbf16>
    %13 = vector.shape_cast %12 : vector<1x32x8xbf16> to vector<32x8xbf16>
    %cst_8 = arith.constant dense<0.000000e+00> : vector<24x8xf32>
    %14 = tpu.matmul %11, %13, %cst_8 {dimension_numbers = #tpu.dot_dimension_numbers<[1], [0], [0], [1], [0, 0, 1, 1], [], []>} : vector<24x32xbf16>, vector<32x8xbf16>, vector<24x8xf32> -> vector<24x8xf32>
    %15 = arith.addf %9, %14 : vector<24x8xf32>
    %16 = vector.extract_strided_slice %2 {offsets = [2, 0], sizes = [24, 32], strides = [1, 1]} : vector<42x32xf32> to vector<24x32xf32>
    %17 = arith.truncf %16 : vector<24x32xf32> to vector<24x32xbf16>
    %c2 = arith.constant 2 : index
    %c0_9 = arith.constant 0 : index
    %c0_10 = arith.constant 0 : index
    %18 = vector.load %arg2[%c2, %c0_9, %c0_10] : memref<9x32x8xbf16, #tpu.memory_space<vmem>>, vector<1x32x8xbf16>
    %19 = vector.shape_cast %18 : vector<1x32x8xbf16> to vector<32x8xbf16>
    %cst_11 = arith.constant dense<0.000000e+00> : vector<24x8xf32>
    %20 = tpu.matmul %17, %19, %cst_11 {dimension_numbers = #tpu.dot_dimension_numbers<[1], [0], [0], [1], [0, 0, 1, 1], [], []>} : vector<24x32xbf16>, vector<32x8xbf16>, vector<24x8xf32> -> vector<24x8xf32>
    %21 = arith.addf %15, %20 : vector<24x8xf32>
    %22 = vector.extract_strided_slice %2 {offsets = [6, 0], sizes = [24, 32], strides = [1, 1]} : vector<42x32xf32> to vector<24x32xf32>
    %23 = arith.truncf %22 : vector<24x32xf32> to vector<24x32xbf16>
    %c3 = arith.constant 3 : index
    %c0_12 = arith.constant 0 : index
    %c0_13 = arith.constant 0 : index
    %24 = vector.load %arg2[%c3, %c0_12, %c0_13] : memref<9x32x8xbf16, #tpu.memory_space<vmem>>, vector<1x32x8xbf16>
    %25 = vector.shape_cast %24 : vector<1x32x8xbf16> to vector<32x8xbf16>
    %cst_14 = arith.constant dense<0.000000e+00> : vector<24x8xf32>
    %26 = tpu.matmul %23, %25, %cst_14 {dimension_numbers = #tpu.dot_dimension_numbers<[1], [0], [0], [1], [0, 0, 1, 1], [], []>} : vector<24x32xbf16>, vector<32x8xbf16>, vector<24x8xf32> -> vector<24x8xf32>
    %27 = arith.addf %21, %26 : vector<24x8xf32>
    %28 = vector.extract_strided_slice %2 {offsets = [7, 0], sizes = [24, 32], strides = [1, 1]} : vector<42x32xf32> to vector<24x32xf32>
    %29 = arith.truncf %28 : vector<24x32xf32> to vector<24x32xbf16>
    %c4 = arith.constant 4 : index
    %c0_15 = arith.constant 0 : index
    %c0_16 = arith.constant 0 : index
    %30 = vector.load %arg2[%c4, %c0_15, %c0_16] : memref<9x32x8xbf16, #tpu.memory_space<vmem>>, vector<1x32x8xbf16>
    %31 = vector.shape_cast %30 : vector<1x32x8xbf16> to vector<32x8xbf16>
    %cst_17 = arith.constant dense<0.000000e+00> : vector<24x8xf32>
    %32 = tpu.matmul %29, %31, %cst_17 {dimension_numbers = #tpu.dot_dimension_numbers<[1], [0], [0], [1], [0, 0, 1, 1], [], []>} : vector<24x32xbf16>, vector<32x8xbf16>, vector<24x8xf32> -> vector<24x8xf32>
    %33 = arith.addf %27, %32 : vector<24x8xf32>
    %34 = vector.extract_strided_slice %2 {offsets = [8, 0], sizes = [24, 32], strides = [1, 1]} : vector<42x32xf32> to vector<24x32xf32>
    %35 = arith.truncf %34 : vector<24x32xf32> to vector<24x32xbf16>
    %c5 = arith.constant 5 : index
    %c0_18 = arith.constant 0 : index
    %c0_19 = arith.constant 0 : index
    %36 = vector.load %arg2[%c5, %c0_18, %c0_19] : memref<9x32x8xbf16, #tpu.memory_space<vmem>>, vector<1x32x8xbf16>
    %37 = vector.shape_cast %36 : vector<1x32x8xbf16> to vector<32x8xbf16>
    %cst_20 = arith.constant dense<0.000000e+00> : vector<24x8xf32>
    %38 = tpu.matmul %35, %37, %cst_20 {dimension_numbers = #tpu.dot_dimension_numbers<[1], [0], [0], [1], [0, 0, 1, 1], [], []>} : vector<24x32xbf16>, vector<32x8xbf16>, vector<24x8xf32> -> vector<24x8xf32>
    %39 = arith.addf %33, %38 : vector<24x8xf32>
    %40 = vector.extract_strided_slice %2 {offsets = [12, 0], sizes = [24, 32], strides = [1, 1]} : vector<42x32xf32> to vector<24x32xf32>
    %41 = arith.truncf %40 : vector<24x32xf32> to vector<24x32xbf16>
    %c6 = arith.constant 6 : index
    %c0_21 = arith.constant 0 : index
    %c0_22 = arith.constant 0 : index
    %42 = vector.load %arg2[%c6, %c0_21, %c0_22] : memref<9x32x8xbf16, #tpu.memory_space<vmem>>, vector<1x32x8xbf16>
    %43 = vector.shape_cast %42 : vector<1x32x8xbf16> to vector<32x8xbf16>
    %cst_23 = arith.constant dense<0.000000e+00> : vector<24x8xf32>
    %44 = tpu.matmul %41, %43, %cst_23 {dimension_numbers = #tpu.dot_dimension_numbers<[1], [0], [0], [1], [0, 0, 1, 1], [], []>} : vector<24x32xbf16>, vector<32x8xbf16>, vector<24x8xf32> -> vector<24x8xf32>
    %45 = arith.addf %39, %44 : vector<24x8xf32>
    %46 = vector.extract_strided_slice %2 {offsets = [13, 0], sizes = [24, 32], strides = [1, 1]} : vector<42x32xf32> to vector<24x32xf32>
    %47 = arith.truncf %46 : vector<24x32xf32> to vector<24x32xbf16>
    %c7 = arith.constant 7 : index
    %c0_24 = arith.constant 0 : index
    %c0_25 = arith.constant 0 : index
    %48 = vector.load %arg2[%c7, %c0_24, %c0_25] : memref<9x32x8xbf16, #tpu.memory_space<vmem>>, vector<1x32x8xbf16>
    %49 = vector.shape_cast %48 : vector<1x32x8xbf16> to vector<32x8xbf16>
    %cst_26 = arith.constant dense<0.000000e+00> : vector<24x8xf32>
    %50 = tpu.matmul %47, %49, %cst_26 {dimension_numbers = #tpu.dot_dimension_numbers<[1], [0], [0], [1], [0, 0, 1, 1], [], []>} : vector<24x32xbf16>, vector<32x8xbf16>, vector<24x8xf32> -> vector<24x8xf32>
    %51 = arith.addf %45, %50 : vector<24x8xf32>
    %52 = vector.extract_strided_slice %2 {offsets = [14, 0], sizes = [24, 32], strides = [1, 1]} : vector<42x32xf32> to vector<24x32xf32>
    %53 = arith.truncf %52 : vector<24x32xf32> to vector<24x32xbf16>
    %c8 = arith.constant 8 : index
    %c0_27 = arith.constant 0 : index
    %c0_28 = arith.constant 0 : index
    %54 = vector.load %arg2[%c8, %c0_27, %c0_28] : memref<9x32x8xbf16, #tpu.memory_space<vmem>>, vector<1x32x8xbf16>
    %55 = vector.shape_cast %54 : vector<1x32x8xbf16> to vector<32x8xbf16>
    %cst_29 = arith.constant dense<0.000000e+00> : vector<24x8xf32>
    %56 = tpu.matmul %53, %55, %cst_29 {dimension_numbers = #tpu.dot_dimension_numbers<[1], [0], [0], [1], [0, 0, 1, 1], [], []>} : vector<24x32xbf16>, vector<32x8xbf16>, vector<24x8xf32> -> vector<24x8xf32>
    %57 = arith.addf %51, %56 : vector<24x8xf32>
    %58 = arith.truncf %57 : vector<24x8xf32> to vector<24x8xbf16>
    %c0_30 = arith.constant 0 : index
    %c0_31 = arith.constant 0 : index
    %c0_32 = arith.constant 0 : index
    %59 = vector.load %arg3[%c0_30, %c0_31, %c0_32] : memref<1x24x8xbf16, #tpu.memory_space<vmem>>, vector<1x24x8xbf16>
    %60 = vector.shape_cast %59 : vector<1x24x8xbf16> to vector<24x8xbf16>
    %61 = vector.shape_cast %58 : vector<24x8xbf16> to vector<1x24x8xbf16>
    tpu.vector_store %arg3[%c0_30, %c0_31, %c0_32], %61 {strides = array<i32>} : memref<1x24x8xbf16, #tpu.memory_space<vmem>>, vector<1x24x8xbf16>,
    return
  }
  func.func @transform_0(%arg0: i32) -> (i32, i32, i32) {
    %c0_i32 = arith.constant 0 : i32
    %c0_i32_0 = arith.constant 0 : i32
    %c0_i32_1 = arith.constant 0 : i32
    return %arg0, %c0_i32, %c0_i32_0 : i32, i32, i32
  }
  func.func @transform_1(%arg0: i32) -> (i32, i32, i32) {
    %c0_i32 = arith.constant 0 : i32
    %c0_i32_0 = arith.constant 0 : i32
    %c0_i32_1 = arith.constant 0 : i32
    %c0_i32_2 = arith.constant 0 : i32
    return %c0_i32, %c0_i32_0, %c0_i32_1 : i32, i32, i32
  }
  func.func @transform_2(%arg0: i32) -> (i32, i32, i32) {
    %c0_i32 = arith.constant 0 : i32
    %c0_i32_0 = arith.constant 0 : i32
    %c0_i32_1 = arith.constant 0 : i32
    return %arg0, %c0_i32, %c0_i32_0 : i32, i32, i32
  }
}

module attributes {stable_mosaic.version = 11 : i64} {
  func.func @_fused_mm_kernel(%arg0: i32, %arg1: i32, %arg2: memref<32x24xbf16, #tpu.memory_space<vmem>>, %arg3: memref<24x32xbf16, #tpu.memory_space<vmem>>, %arg4: memref<1x24xf32, #tpu.memory_space<vmem>>, %arg5: memref<1x24xf32, #tpu.memory_space<vmem>>, %arg6: memref<1x32xf32, #tpu.memory_space<vmem>>, %arg7: memref<1x32xf32, #tpu.memory_space<vmem>>, %arg8: memref<32x32xbf16, #tpu.memory_space<vmem>>, %arg9: memref<32x32xf32, #tpu.memory_space<vmem>>) attributes {dimension_semantics = [#tpu.dimension_semantics<parallel>, #tpu.dimension_semantics<arbitrary>], iteration_bounds = array<i64: 1, 1>, scalar_prefetch = 0 : i64, scratch_operands = 1 : i64, tpu.core_type = #tpu.core_type<tc>, window_params = [{transform_indices = @transform_0, window_bounds = array<i64: 32, 24>}, {transform_indices = @transform_1, window_bounds = array<i64: 24, 32>}, {transform_indices = @transform_2, window_bounds = array<i64: 1, 24>}, {transform_indices = @transform_3, window_bounds = array<i64: 1, 24>}, {pipeline_mode = #tpu.pipeline_mode<synchronous>, transform_indices = @transform_4, window_bounds = array<i64: 1, 32>}, {pipeline_mode = #tpu.pipeline_mode<synchronous>, transform_indices = @transform_5, window_bounds = array<i64: 1, 32>}, {transform_indices = @transform_6, window_bounds = array<i64: 32, 32>}]} {
    %c0_i32 = arith.constant 0 : i32
    %0 = arith.cmpi eq, %arg1, %c0_i32 : i32
    %1 = arith.extui %0 : i1 to i32
    %c0_i32_0 = arith.constant 0 : i32
    %2 = arith.cmpi ne, %1, %c0_i32_0 : i32
    scf.if %2 {
      %cst_15 = arith.constant 0.000000e+00 : f32
      %22 = vector.broadcast %cst_15 : f32 to vector<32x32xf32>
      %c0_16 = arith.constant 0 : index
      %c0_17 = arith.constant 0 : index
      %23 = vector.load %arg9[%c0_16, %c0_17] : memref<32x32xf32, #tpu.memory_space<vmem>>, vector<32x32xf32>
      tpu.vector_store %arg9[%c0_16, %c0_17], %22 {strides = array<i32>} : memref<32x32xf32, #tpu.memory_space<vmem>>, vector<32x32xf32>,
    } else {
    }
    %c0 = arith.constant 0 : index
    %c0_1 = arith.constant 0 : index
    %3 = vector.load %arg2[%c0, %c0_1] : memref<32x24xbf16, #tpu.memory_space<vmem>>, vector<32x24xbf16>
    %4 = arith.extf %3 : vector<32x24xbf16> to vector<32x24xf32>
    %c0_2 = arith.constant 0 : index
    %c0_3 = arith.constant 0 : index
    %5 = vector.load %arg4[%c0_2, %c0_3] : memref<1x24xf32, #tpu.memory_space<vmem>>, vector<1x24xf32>
    %6 = vector.broadcast %5 : vector<1x24xf32> to vector<32x24xf32>
    %7 = arith.mulf %4, %6 : vector<32x24xf32>
    %c0_4 = arith.constant 0 : index
    %c0_5 = arith.constant 0 : index
    %8 = vector.load %arg5[%c0_4, %c0_5] : memref<1x24xf32, #tpu.memory_space<vmem>>, vector<1x24xf32>
    %9 = vector.broadcast %8 : vector<1x24xf32> to vector<32x24xf32>
    %10 = arith.addf %7, %9 : vector<32x24xf32>
    %cst = arith.constant 0.000000e+00 : f32
    %11 = vector.broadcast %cst : f32 to vector<32x24xf32>
    %12 = arith.maximumf %10, %11 : vector<32x24xf32>
    %c0_6 = arith.constant 0 : index
    %c0_7 = arith.constant 0 : index
    %13 = vector.load %arg9[%c0_6, %c0_7] : memref<32x32xf32, #tpu.memory_space<vmem>>, vector<32x32xf32>
    %14 = arith.truncf %12 : vector<32x24xf32> to vector<32x24xbf16>
    %c0_8 = arith.constant 0 : index
    %c0_9 = arith.constant 0 : index
    %15 = vector.load %arg3[%c0_8, %c0_9] : memref<24x32xbf16, #tpu.memory_space<vmem>>, vector<24x32xbf16>
    %cst_10 = arith.constant dense<0.000000e+00> : vector<32x32xf32>
    %16 = tpu.matmul %14, %15, %cst_10 {dimension_numbers = #tpu.dot_dimension_numbers<[1], [0], [0], [1], [0, 0, 1, 1], [], []>} : vector<32x24xbf16>, vector<24x32xbf16>, vector<32x32xf32> -> vector<32x32xf32>
    %17 = arith.addf %13, %16 : vector<32x32xf32>
    %c0_11 = arith.constant 0 : index
    %c0_12 = arith.constant 0 : index
    %18 = vector.load %arg9[%c0_11, %c0_12] : memref<32x32xf32, #tpu.memory_space<vmem>>, vector<32x32xf32>
    tpu.vector_store %arg9[%c0_11, %c0_12], %17 {strides = array<i32>} : memref<32x32xf32, #tpu.memory_space<vmem>>, vector<32x32xf32>,
    %c0_i32_13 = arith.constant 0 : i32
    %19 = arith.cmpi eq, %arg1, %c0_i32_13 : i32
    %20 = arith.extui %19 : i1 to i32
    %c0_i32_14 = arith.constant 0 : i32
    %21 = arith.cmpi ne, %20, %c0_i32_14 : i32
    scf.if %21 {
      %c0_15 = arith.constant 0 : index
      %c0_16 = arith.constant 0 : index
      %22 = vector.load %arg9[%c0_15, %c0_16] : memref<32x32xf32, #tpu.memory_space<vmem>>, vector<32x32xf32>
      %c0_17 = arith.constant 0 : index
      %c0_18 = arith.constant 0 : index
      %23 = vector.load %arg6[%c0_17, %c0_18] : memref<1x32xf32, #tpu.memory_space<vmem>>, vector<1x32xf32>
      %24 = vector.broadcast %23 : vector<1x32xf32> to vector<32x32xf32>
      %25 = arith.mulf %22, %24 : vector<32x32xf32>
      %c0_19 = arith.constant 0 : index
      %c0_20 = arith.constant 0 : index
      %26 = vector.load %arg7[%c0_19, %c0_20] : memref<1x32xf32, #tpu.memory_space<vmem>>, vector<1x32xf32>
      %27 = vector.broadcast %26 : vector<1x32xf32> to vector<32x32xf32>
      %28 = arith.addf %25, %27 : vector<32x32xf32>
      %cst_21 = arith.constant 0.000000e+00 : f32
      %29 = vector.broadcast %cst_21 : f32 to vector<32x32xf32>
      %30 = arith.maximumf %28, %29 : vector<32x32xf32>
      %31 = arith.truncf %30 : vector<32x32xf32> to vector<32x32xbf16>
      %c0_22 = arith.constant 0 : index
      %c0_23 = arith.constant 0 : index
      %32 = vector.load %arg8[%c0_22, %c0_23] : memref<32x32xbf16, #tpu.memory_space<vmem>>, vector<32x32xbf16>
      tpu.vector_store %arg8[%c0_22, %c0_23], %31 {strides = array<i32>} : memref<32x32xbf16, #tpu.memory_space<vmem>>, vector<32x32xbf16>,
    } else {
    }
    return
  }
  func.func @transform_0(%arg0: i32, %arg1: i32) -> (i32, i32) {
    %c0_i32 = arith.constant 0 : i32
    return %arg0, %arg1 : i32, i32
  }
  func.func @transform_1(%arg0: i32, %arg1: i32) -> (i32, i32) {
    %c0_i32 = arith.constant 0 : i32
    %c0_i32_0 = arith.constant 0 : i32
    return %arg1, %c0_i32 : i32, i32
  }
  func.func @transform_2(%arg0: i32, %arg1: i32) -> (i32, i32) {
    %c0_i32 = arith.constant 0 : i32
    %c0_i32_0 = arith.constant 0 : i32
    return %c0_i32, %arg1 : i32, i32
  }
  func.func @transform_3(%arg0: i32, %arg1: i32) -> (i32, i32) {
    %c0_i32 = arith.constant 0 : i32
    %c0_i32_0 = arith.constant 0 : i32
    return %c0_i32, %arg1 : i32, i32
  }
  func.func @transform_4(%arg0: i32, %arg1: i32) -> (i32, i32) {
    %c0_i32 = arith.constant 0 : i32
    %c0_i32_0 = arith.constant 0 : i32
    %c0_i32_1 = arith.constant 0 : i32
    return %c0_i32, %c0_i32_0 : i32, i32
  }
  func.func @transform_5(%arg0: i32, %arg1: i32) -> (i32, i32) {
    %c0_i32 = arith.constant 0 : i32
    %c0_i32_0 = arith.constant 0 : i32
    %c0_i32_1 = arith.constant 0 : i32
    return %c0_i32, %c0_i32_0 : i32, i32
  }
  func.func @transform_6(%arg0: i32, %arg1: i32) -> (i32, i32) {
    %c0_i32 = arith.constant 0 : i32
    %c0_i32_0 = arith.constant 0 : i32
    return %arg0, %c0_i32 : i32, i32
  }
}

module attributes {stable_mosaic.version = 11 : i64} {
  func.func @_fused_mm_kernel(%arg0: i32, %arg1: i32, %arg2: memref<32x32xbf16, #tpu.memory_space<vmem>>, %arg3: memref<32x16xbf16, #tpu.memory_space<vmem>>, %arg4: memref<1x32xf32, #tpu.memory_space<vmem>>, %arg5: memref<1x32xf32, #tpu.memory_space<vmem>>, %arg6: memref<32x16xbf16, #tpu.memory_space<vmem>>, %arg7: memref<32x16xf32, #tpu.memory_space<vmem>>) attributes {dimension_semantics = [#tpu.dimension_semantics<parallel>, #tpu.dimension_semantics<arbitrary>], iteration_bounds = array<i64: 1, 1>, scalar_prefetch = 0 : i64, scratch_operands = 1 : i64, tpu.core_type = #tpu.core_type<tc>, window_params = [{transform_indices = @transform_0, window_bounds = array<i64: 32, 32>}, {transform_indices = @transform_1, window_bounds = array<i64: 32, 16>}, {transform_indices = @transform_2, window_bounds = array<i64: 1, 32>}, {transform_indices = @transform_3, window_bounds = array<i64: 1, 32>}, {transform_indices = @transform_4, window_bounds = array<i64: 32, 16>}]} {
    %c0_i32 = arith.constant 0 : i32
    %0 = arith.cmpi eq, %arg1, %c0_i32 : i32
    %1 = arith.extui %0 : i1 to i32
    %c0_i32_0 = arith.constant 0 : i32
    %2 = arith.cmpi ne, %1, %c0_i32_0 : i32
    scf.if %2 {
      %cst_15 = arith.constant 0.000000e+00 : f32
      %22 = vector.broadcast %cst_15 : f32 to vector<32x16xf32>
      %c0_16 = arith.constant 0 : index
      %c0_17 = arith.constant 0 : index
      %23 = vector.load %arg7[%c0_16, %c0_17] : memref<32x16xf32, #tpu.memory_space<vmem>>, vector<32x16xf32>
      tpu.vector_store %arg7[%c0_16, %c0_17], %22 {strides = array<i32>} : memref<32x16xf32, #tpu.memory_space<vmem>>, vector<32x16xf32>,
    } else {
    }
    %c0 = arith.constant 0 : index
    %c0_1 = arith.constant 0 : index
    %3 = vector.load %arg2[%c0, %c0_1] : memref<32x32xbf16, #tpu.memory_space<vmem>>, vector<32x32xbf16>
    %4 = arith.extf %3 : vector<32x32xbf16> to vector<32x32xf32>
    %c0_2 = arith.constant 0 : index
    %c0_3 = arith.constant 0 : index
    %5 = vector.load %arg4[%c0_2, %c0_3] : memref<1x32xf32, #tpu.memory_space<vmem>>, vector<1x32xf32>
    %6 = vector.broadcast %5 : vector<1x32xf32> to vector<32x32xf32>
    %7 = arith.mulf %4, %6 : vector<32x32xf32>
    %c0_4 = arith.constant 0 : index
    %c0_5 = arith.constant 0 : index
    %8 = vector.load %arg5[%c0_4, %c0_5] : memref<1x32xf32, #tpu.memory_space<vmem>>, vector<1x32xf32>
    %9 = vector.broadcast %8 : vector<1x32xf32> to vector<32x32xf32>
    %10 = arith.addf %7, %9 : vector<32x32xf32>
    %cst = arith.constant 0.000000e+00 : f32
    %11 = vector.broadcast %cst : f32 to vector<32x32xf32>
    %12 = arith.maximumf %10, %11 : vector<32x32xf32>
    %c0_6 = arith.constant 0 : index
    %c0_7 = arith.constant 0 : index
    %13 = vector.load %arg7[%c0_6, %c0_7] : memref<32x16xf32, #tpu.memory_space<vmem>>, vector<32x16xf32>
    %14 = arith.truncf %12 : vector<32x32xf32> to vector<32x32xbf16>
    %c0_8 = arith.constant 0 : index
    %c0_9 = arith.constant 0 : index
    %15 = vector.load %arg3[%c0_8, %c0_9] : memref<32x16xbf16, #tpu.memory_space<vmem>>, vector<32x16xbf16>
    %cst_10 = arith.constant dense<0.000000e+00> : vector<32x16xf32>
    %16 = tpu.matmul %14, %15, %cst_10 {dimension_numbers = #tpu.dot_dimension_numbers<[1], [0], [0], [1], [0, 0, 1, 1], [], []>} : vector<32x32xbf16>, vector<32x16xbf16>, vector<32x16xf32> -> vector<32x16xf32>
    %17 = arith.addf %13, %16 : vector<32x16xf32>
    %c0_11 = arith.constant 0 : index
    %c0_12 = arith.constant 0 : index
    %18 = vector.load %arg7[%c0_11, %c0_12] : memref<32x16xf32, #tpu.memory_space<vmem>>, vector<32x16xf32>
    tpu.vector_store %arg7[%c0_11, %c0_12], %17 {strides = array<i32>} : memref<32x16xf32, #tpu.memory_space<vmem>>, vector<32x16xf32>,
    %c0_i32_13 = arith.constant 0 : i32
    %19 = arith.cmpi eq, %arg1, %c0_i32_13 : i32
    %20 = arith.extui %19 : i1 to i32
    %c0_i32_14 = arith.constant 0 : i32
    %21 = arith.cmpi ne, %20, %c0_i32_14 : i32
    scf.if %21 {
      %c0_15 = arith.constant 0 : index
      %c0_16 = arith.constant 0 : index
      %22 = vector.load %arg7[%c0_15, %c0_16] : memref<32x16xf32, #tpu.memory_space<vmem>>, vector<32x16xf32>
      %23 = arith.truncf %22 : vector<32x16xf32> to vector<32x16xbf16>
      %c0_17 = arith.constant 0 : index
      %c0_18 = arith.constant 0 : index
      %24 = vector.load %arg6[%c0_17, %c0_18] : memref<32x16xbf16, #tpu.memory_space<vmem>>, vector<32x16xbf16>
      tpu.vector_store %arg6[%c0_17, %c0_18], %23 {strides = array<i32>} : memref<32x16xbf16, #tpu.memory_space<vmem>>, vector<32x16xbf16>,
    } else {
    }
    return
  }
  func.func @transform_0(%arg0: i32, %arg1: i32) -> (i32, i32) {
    %c0_i32 = arith.constant 0 : i32
    return %arg0, %arg1 : i32, i32
  }
  func.func @transform_1(%arg0: i32, %arg1: i32) -> (i32, i32) {
    %c0_i32 = arith.constant 0 : i32
    %c0_i32_0 = arith.constant 0 : i32
    return %arg1, %c0_i32 : i32, i32
  }
  func.func @transform_2(%arg0: i32, %arg1: i32) -> (i32, i32) {
    %c0_i32 = arith.constant 0 : i32
    %c0_i32_0 = arith.constant 0 : i32
    return %c0_i32, %arg1 : i32, i32
  }
  func.func @transform_3(%arg0: i32, %arg1: i32) -> (i32, i32) {
    %c0_i32 = arith.constant 0 : i32
    %c0_i32_0 = arith.constant 0 : i32
    return %c0_i32, %arg1 : i32, i32
  }
  func.func @transform_4(%arg0: i32, %arg1: i32) -> (i32, i32) {
    %c0_i32 = arith.constant 0 : i32
    %c0_i32_0 = arith.constant 0 : i32
    return %arg0, %c0_i32 : i32, i32
  }
}

module attributes {stable_mosaic.version = 11 : i64} {
  func.func @_pool_dense_kernel(%arg0: i32, %arg1: memref<1x4x4x16xbf16, #tpu.memory_space<vmem>>, %arg2: memref<1x3x3x16xbf16, #tpu.memory_space<vmem>>) attributes {dimension_semantics = [#tpu.dimension_semantics<parallel>], iteration_bounds = array<i64: 2>, scalar_prefetch = 0 : i64, scratch_operands = 0 : i64, tpu.core_type = #tpu.core_type<tc>, window_params = [{transform_indices = @transform_0, window_bounds = array<i64: 1, 4, 4, 16>}, {transform_indices = @transform_1, window_bounds = array<i64: 1, 3, 3, 16>}]} {
    %c0 = arith.constant 0 : index
    %c0_0 = arith.constant 0 : index
    %c0_1 = arith.constant 0 : index
    %c0_2 = arith.constant 0 : index
    %0 = vector.load %arg1[%c0, %c0_0, %c0_1, %c0_2] : memref<1x4x4x16xbf16, #tpu.memory_space<vmem>>, vector<1x4x4x16xbf16>
    %1 = vector.shape_cast %0 : vector<1x4x4x16xbf16> to vector<4x4x16xbf16>
    %2 = arith.extf %1 : vector<4x4x16xbf16> to vector<4x4x16xf32>
    %3 = vector.extract_strided_slice %2 {offsets = [0, 0, 0], sizes = [3, 3, 16], strides = [1, 1, 1]} : vector<4x4x16xf32> to vector<3x3x16xf32>
    %4 = vector.extract_strided_slice %2 {offsets = [0, 1, 0], sizes = [3, 3, 16], strides = [1, 1, 1]} : vector<4x4x16xf32> to vector<3x3x16xf32>
    %5 = arith.addf %3, %4 : vector<3x3x16xf32>
    %6 = vector.extract_strided_slice %2 {offsets = [1, 0, 0], sizes = [3, 3, 16], strides = [1, 1, 1]} : vector<4x4x16xf32> to vector<3x3x16xf32>
    %7 = arith.addf %5, %6 : vector<3x3x16xf32>
    %8 = vector.extract_strided_slice %2 {offsets = [1, 1, 0], sizes = [3, 3, 16], strides = [1, 1, 1]} : vector<4x4x16xf32> to vector<3x3x16xf32>
    %9 = arith.addf %7, %8 : vector<3x3x16xf32>
    %cst = arith.constant 2.500000e-01 : f32
    %10 = vector.broadcast %cst : f32 to vector<3x3x16xf32>
    %11 = arith.mulf %9, %10 : vector<3x3x16xf32>
    %12 = arith.truncf %11 : vector<3x3x16xf32> to vector<3x3x16xbf16>
    %c0_3 = arith.constant 0 : index
    %c0_4 = arith.constant 0 : index
    %c0_5 = arith.constant 0 : index
    %c0_6 = arith.constant 0 : index
    %13 = vector.load %arg2[%c0_3, %c0_4, %c0_5, %c0_6] : memref<1x3x3x16xbf16, #tpu.memory_space<vmem>>, vector<1x3x3x16xbf16>
    %14 = vector.shape_cast %13 : vector<1x3x3x16xbf16> to vector<3x3x16xbf16>
    %15 = vector.shape_cast %12 : vector<3x3x16xbf16> to vector<1x3x3x16xbf16>
    tpu.vector_store %arg2[%c0_3, %c0_4, %c0_5, %c0_6], %15 {strides = array<i32>} : memref<1x3x3x16xbf16, #tpu.memory_space<vmem>>, vector<1x3x3x16xbf16>,
    return
  }
  func.func @transform_0(%arg0: i32) -> (i32, i32, i32, i32) {
    %c0_i32 = arith.constant 0 : i32
    %c0_i32_0 = arith.constant 0 : i32
    %c0_i32_1 = arith.constant 0 : i32
    %c0_i32_2 = arith.constant 0 : i32
    return %arg0, %c0_i32, %c0_i32_0, %c0_i32_1 : i32, i32, i32, i32
  }
  func.func @transform_1(%arg0: i32) -> (i32, i32, i32, i32) {
    %c0_i32 = arith.constant 0 : i32
    %c0_i32_0 = arith.constant 0 : i32
    %c0_i32_1 = arith.constant 0 : i32
    %c0_i32_2 = arith.constant 0 : i32
    return %arg0, %c0_i32, %c0_i32_0, %c0_i32_1 : i32, i32, i32, i32
  }
}

module attributes {stable_mosaic.version = 11 : i64} {
  func.func @_fused_mm_kernel(%arg0: i32, %arg1: i32, %arg2: memref<16x16xbf16, #tpu.memory_space<vmem>>, %arg3: memref<16x32xbf16, #tpu.memory_space<vmem>>, %arg4: memref<1x16xf32, #tpu.memory_space<vmem>>, %arg5: memref<1x16xf32, #tpu.memory_space<vmem>>, %arg6: memref<1x32xf32, #tpu.memory_space<vmem>>, %arg7: memref<1x32xf32, #tpu.memory_space<vmem>>, %arg8: memref<16x32xbf16, #tpu.memory_space<vmem>>, %arg9: memref<16x32xf32, #tpu.memory_space<vmem>>) attributes {dimension_semantics = [#tpu.dimension_semantics<parallel>, #tpu.dimension_semantics<arbitrary>], iteration_bounds = array<i64: 1, 1>, scalar_prefetch = 0 : i64, scratch_operands = 1 : i64, tpu.core_type = #tpu.core_type<tc>, window_params = [{transform_indices = @transform_0, window_bounds = array<i64: 16, 16>}, {transform_indices = @transform_1, window_bounds = array<i64: 16, 32>}, {transform_indices = @transform_2, window_bounds = array<i64: 1, 16>}, {transform_indices = @transform_3, window_bounds = array<i64: 1, 16>}, {pipeline_mode = #tpu.pipeline_mode<synchronous>, transform_indices = @transform_4, window_bounds = array<i64: 1, 32>}, {pipeline_mode = #tpu.pipeline_mode<synchronous>, transform_indices = @transform_5, window_bounds = array<i64: 1, 32>}, {transform_indices = @transform_6, window_bounds = array<i64: 16, 32>}]} {
    %c0_i32 = arith.constant 0 : i32
    %0 = arith.cmpi eq, %arg1, %c0_i32 : i32
    %1 = arith.extui %0 : i1 to i32
    %c0_i32_0 = arith.constant 0 : i32
    %2 = arith.cmpi ne, %1, %c0_i32_0 : i32
    scf.if %2 {
      %cst_15 = arith.constant 0.000000e+00 : f32
      %22 = vector.broadcast %cst_15 : f32 to vector<16x32xf32>
      %c0_16 = arith.constant 0 : index
      %c0_17 = arith.constant 0 : index
      %23 = vector.load %arg9[%c0_16, %c0_17] : memref<16x32xf32, #tpu.memory_space<vmem>>, vector<16x32xf32>
      tpu.vector_store %arg9[%c0_16, %c0_17], %22 {strides = array<i32>} : memref<16x32xf32, #tpu.memory_space<vmem>>, vector<16x32xf32>,
    } else {
    }
    %c0 = arith.constant 0 : index
    %c0_1 = arith.constant 0 : index
    %3 = vector.load %arg2[%c0, %c0_1] : memref<16x16xbf16, #tpu.memory_space<vmem>>, vector<16x16xbf16>
    %4 = arith.extf %3 : vector<16x16xbf16> to vector<16x16xf32>
    %c0_2 = arith.constant 0 : index
    %c0_3 = arith.constant 0 : index
    %5 = vector.load %arg4[%c0_2, %c0_3] : memref<1x16xf32, #tpu.memory_space<vmem>>, vector<1x16xf32>
    %6 = vector.broadcast %5 : vector<1x16xf32> to vector<16x16xf32>
    %7 = arith.mulf %4, %6 : vector<16x16xf32>
    %c0_4 = arith.constant 0 : index
    %c0_5 = arith.constant 0 : index
    %8 = vector.load %arg5[%c0_4, %c0_5] : memref<1x16xf32, #tpu.memory_space<vmem>>, vector<1x16xf32>
    %9 = vector.broadcast %8 : vector<1x16xf32> to vector<16x16xf32>
    %10 = arith.addf %7, %9 : vector<16x16xf32>
    %cst = arith.constant 0.000000e+00 : f32
    %11 = vector.broadcast %cst : f32 to vector<16x16xf32>
    %12 = arith.maximumf %10, %11 : vector<16x16xf32>
    %c0_6 = arith.constant 0 : index
    %c0_7 = arith.constant 0 : index
    %13 = vector.load %arg9[%c0_6, %c0_7] : memref<16x32xf32, #tpu.memory_space<vmem>>, vector<16x32xf32>
    %14 = arith.truncf %12 : vector<16x16xf32> to vector<16x16xbf16>
    %c0_8 = arith.constant 0 : index
    %c0_9 = arith.constant 0 : index
    %15 = vector.load %arg3[%c0_8, %c0_9] : memref<16x32xbf16, #tpu.memory_space<vmem>>, vector<16x32xbf16>
    %cst_10 = arith.constant dense<0.000000e+00> : vector<16x32xf32>
    %16 = tpu.matmul %14, %15, %cst_10 {dimension_numbers = #tpu.dot_dimension_numbers<[1], [0], [0], [1], [0, 0, 1, 1], [], []>} : vector<16x16xbf16>, vector<16x32xbf16>, vector<16x32xf32> -> vector<16x32xf32>
    %17 = arith.addf %13, %16 : vector<16x32xf32>
    %c0_11 = arith.constant 0 : index
    %c0_12 = arith.constant 0 : index
    %18 = vector.load %arg9[%c0_11, %c0_12] : memref<16x32xf32, #tpu.memory_space<vmem>>, vector<16x32xf32>
    tpu.vector_store %arg9[%c0_11, %c0_12], %17 {strides = array<i32>} : memref<16x32xf32, #tpu.memory_space<vmem>>, vector<16x32xf32>,
    %c0_i32_13 = arith.constant 0 : i32
    %19 = arith.cmpi eq, %arg1, %c0_i32_13 : i32
    %20 = arith.extui %19 : i1 to i32
    %c0_i32_14 = arith.constant 0 : i32
    %21 = arith.cmpi ne, %20, %c0_i32_14 : i32
    scf.if %21 {
      %c0_15 = arith.constant 0 : index
      %c0_16 = arith.constant 0 : index
      %22 = vector.load %arg9[%c0_15, %c0_16] : memref<16x32xf32, #tpu.memory_space<vmem>>, vector<16x32xf32>
      %c0_17 = arith.constant 0 : index
      %c0_18 = arith.constant 0 : index
      %23 = vector.load %arg6[%c0_17, %c0_18] : memref<1x32xf32, #tpu.memory_space<vmem>>, vector<1x32xf32>
      %24 = vector.broadcast %23 : vector<1x32xf32> to vector<16x32xf32>
      %25 = arith.mulf %22, %24 : vector<16x32xf32>
      %c0_19 = arith.constant 0 : index
      %c0_20 = arith.constant 0 : index
      %26 = vector.load %arg7[%c0_19, %c0_20] : memref<1x32xf32, #tpu.memory_space<vmem>>, vector<1x32xf32>
      %27 = vector.broadcast %26 : vector<1x32xf32> to vector<16x32xf32>
      %28 = arith.addf %25, %27 : vector<16x32xf32>
      %cst_21 = arith.constant 0.000000e+00 : f32
      %29 = vector.broadcast %cst_21 : f32 to vector<16x32xf32>
      %30 = arith.maximumf %28, %29 : vector<16x32xf32>
      %31 = arith.truncf %30 : vector<16x32xf32> to vector<16x32xbf16>
      %c0_22 = arith.constant 0 : index
      %c0_23 = arith.constant 0 : index
      %32 = vector.load %arg8[%c0_22, %c0_23] : memref<16x32xbf16, #tpu.memory_space<vmem>>, vector<16x32xbf16>
      tpu.vector_store %arg8[%c0_22, %c0_23], %31 {strides = array<i32>} : memref<16x32xbf16, #tpu.memory_space<vmem>>, vector<16x32xbf16>,
    } else {
    }
    return
  }
  func.func @transform_0(%arg0: i32, %arg1: i32) -> (i32, i32) {
    %c0_i32 = arith.constant 0 : i32
    return %arg0, %arg1 : i32, i32
  }
  func.func @transform_1(%arg0: i32, %arg1: i32) -> (i32, i32) {
    %c0_i32 = arith.constant 0 : i32
    %c0_i32_0 = arith.constant 0 : i32
    return %arg1, %c0_i32 : i32, i32
  }
  func.func @transform_2(%arg0: i32, %arg1: i32) -> (i32, i32) {
    %c0_i32 = arith.constant 0 : i32
    %c0_i32_0 = arith.constant 0 : i32
    return %c0_i32, %arg1 : i32, i32
  }
  func.func @transform_3(%arg0: i32, %arg1: i32) -> (i32, i32) {
    %c0_i32 = arith.constant 0 : i32
    %c0_i32_0 = arith.constant 0 : i32
    return %c0_i32, %arg1 : i32, i32
  }
  func.func @transform_4(%arg0: i32, %arg1: i32) -> (i32, i32) {
    %c0_i32 = arith.constant 0 : i32
    %c0_i32_0 = arith.constant 0 : i32
    %c0_i32_1 = arith.constant 0 : i32
    return %c0_i32, %c0_i32_0 : i32, i32
  }
  func.func @transform_5(%arg0: i32, %arg1: i32) -> (i32, i32) {
    %c0_i32 = arith.constant 0 : i32
    %c0_i32_0 = arith.constant 0 : i32
    %c0_i32_1 = arith.constant 0 : i32
    return %c0_i32, %c0_i32_0 : i32, i32
  }
  func.func @transform_6(%arg0: i32, %arg1: i32) -> (i32, i32) {
    %c0_i32 = arith.constant 0 : i32
    %c0_i32_0 = arith.constant 0 : i32
    return %arg0, %c0_i32 : i32, i32
  }
}

module attributes {stable_mosaic.version = 11 : i64} {
  func.func @_conv3x3_kernel(%arg0: i32, %arg1: memref<1x20x32xbf16, #tpu.memory_space<vmem>>, %arg2: memref<9x32x8xbf16, #tpu.memory_space<vmem>>, %arg3: memref<1x8x8xbf16, #tpu.memory_space<vmem>>) attributes {dimension_semantics = [#tpu.dimension_semantics<parallel>], iteration_bounds = array<i64: 2>, scalar_prefetch = 0 : i64, scratch_operands = 0 : i64, tpu.core_type = #tpu.core_type<tc>, window_params = [{transform_indices = @transform_0, window_bounds = array<i64: 1, 20, 32>}, {pipeline_mode = #tpu.pipeline_mode<synchronous>, transform_indices = @transform_1, window_bounds = array<i64: 9, 32, 8>}, {transform_indices = @transform_2, window_bounds = array<i64: 1, 8, 8>}]} {
    %c0 = arith.constant 0 : index
    %c0_0 = arith.constant 0 : index
    %c0_1 = arith.constant 0 : index
    %0 = vector.load %arg1[%c0, %c0_0, %c0_1] : memref<1x20x32xbf16, #tpu.memory_space<vmem>>, vector<1x20x32xbf16>
    %1 = vector.shape_cast %0 : vector<1x20x32xbf16> to vector<20x32xbf16>
    %2 = arith.extf %1 : vector<20x32xbf16> to vector<20x32xf32>
    %cst = arith.constant 0.000000e+00 : f32
    %3 = vector.broadcast %cst : f32 to vector<8x8xf32>
    %4 = vector.extract_strided_slice %2 {offsets = [0, 0], sizes = [8, 32], strides = [1, 1]} : vector<20x32xf32> to vector<8x32xf32>
    %5 = arith.truncf %4 : vector<8x32xf32> to vector<8x32xbf16>
    %c0_2 = arith.constant 0 : index
    %c0_3 = arith.constant 0 : index
    %c0_4 = arith.constant 0 : index
    %6 = vector.load %arg2[%c0_2, %c0_3, %c0_4] : memref<9x32x8xbf16, #tpu.memory_space<vmem>>, vector<1x32x8xbf16>
    %7 = vector.shape_cast %6 : vector<1x32x8xbf16> to vector<32x8xbf16>
    %cst_5 = arith.constant dense<0.000000e+00> : vector<8x8xf32>
    %8 = tpu.matmul %5, %7, %cst_5 {dimension_numbers = #tpu.dot_dimension_numbers<[1], [0], [0], [1], [0, 0, 1, 1], [], []>} : vector<8x32xbf16>, vector<32x8xbf16>, vector<8x8xf32> -> vector<8x8xf32>
    %9 = arith.addf %3, %8 : vector<8x8xf32>
    %10 = vector.extract_strided_slice %2 {offsets = [1, 0], sizes = [8, 32], strides = [1, 1]} : vector<20x32xf32> to vector<8x32xf32>
    %11 = arith.truncf %10 : vector<8x32xf32> to vector<8x32xbf16>
    %c1 = arith.constant 1 : index
    %c0_6 = arith.constant 0 : index
    %c0_7 = arith.constant 0 : index
    %12 = vector.load %arg2[%c1, %c0_6, %c0_7] : memref<9x32x8xbf16, #tpu.memory_space<vmem>>, vector<1x32x8xbf16>
    %13 = vector.shape_cast %12 : vector<1x32x8xbf16> to vector<32x8xbf16>
    %cst_8 = arith.constant dense<0.000000e+00> : vector<8x8xf32>
    %14 = tpu.matmul %11, %13, %cst_8 {dimension_numbers = #tpu.dot_dimension_numbers<[1], [0], [0], [1], [0, 0, 1, 1], [], []>} : vector<8x32xbf16>, vector<32x8xbf16>, vector<8x8xf32> -> vector<8x8xf32>
    %15 = arith.addf %9, %14 : vector<8x8xf32>
    %16 = vector.extract_strided_slice %2 {offsets = [2, 0], sizes = [8, 32], strides = [1, 1]} : vector<20x32xf32> to vector<8x32xf32>
    %17 = arith.truncf %16 : vector<8x32xf32> to vector<8x32xbf16>
    %c2 = arith.constant 2 : index
    %c0_9 = arith.constant 0 : index
    %c0_10 = arith.constant 0 : index
    %18 = vector.load %arg2[%c2, %c0_9, %c0_10] : memref<9x32x8xbf16, #tpu.memory_space<vmem>>, vector<1x32x8xbf16>
    %19 = vector.shape_cast %18 : vector<1x32x8xbf16> to vector<32x8xbf16>
    %cst_11 = arith.constant dense<0.000000e+00> : vector<8x8xf32>
    %20 = tpu.matmul %17, %19, %cst_11 {dimension_numbers = #tpu.dot_dimension_numbers<[1], [0], [0], [1], [0, 0, 1, 1], [], []>} : vector<8x32xbf16>, vector<32x8xbf16>, vector<8x8xf32> -> vector<8x8xf32>
    %21 = arith.addf %15, %20 : vector<8x8xf32>
    %22 = vector.extract_strided_slice %2 {offsets = [4, 0], sizes = [8, 32], strides = [1, 1]} : vector<20x32xf32> to vector<8x32xf32>
    %23 = arith.truncf %22 : vector<8x32xf32> to vector<8x32xbf16>
    %c3 = arith.constant 3 : index
    %c0_12 = arith.constant 0 : index
    %c0_13 = arith.constant 0 : index
    %24 = vector.load %arg2[%c3, %c0_12, %c0_13] : memref<9x32x8xbf16, #tpu.memory_space<vmem>>, vector<1x32x8xbf16>
    %25 = vector.shape_cast %24 : vector<1x32x8xbf16> to vector<32x8xbf16>
    %cst_14 = arith.constant dense<0.000000e+00> : vector<8x8xf32>
    %26 = tpu.matmul %23, %25, %cst_14 {dimension_numbers = #tpu.dot_dimension_numbers<[1], [0], [0], [1], [0, 0, 1, 1], [], []>} : vector<8x32xbf16>, vector<32x8xbf16>, vector<8x8xf32> -> vector<8x8xf32>
    %27 = arith.addf %21, %26 : vector<8x8xf32>
    %28 = vector.extract_strided_slice %2 {offsets = [5, 0], sizes = [8, 32], strides = [1, 1]} : vector<20x32xf32> to vector<8x32xf32>
    %29 = arith.truncf %28 : vector<8x32xf32> to vector<8x32xbf16>
    %c4 = arith.constant 4 : index
    %c0_15 = arith.constant 0 : index
    %c0_16 = arith.constant 0 : index
    %30 = vector.load %arg2[%c4, %c0_15, %c0_16] : memref<9x32x8xbf16, #tpu.memory_space<vmem>>, vector<1x32x8xbf16>
    %31 = vector.shape_cast %30 : vector<1x32x8xbf16> to vector<32x8xbf16>
    %cst_17 = arith.constant dense<0.000000e+00> : vector<8x8xf32>
    %32 = tpu.matmul %29, %31, %cst_17 {dimension_numbers = #tpu.dot_dimension_numbers<[1], [0], [0], [1], [0, 0, 1, 1], [], []>} : vector<8x32xbf16>, vector<32x8xbf16>, vector<8x8xf32> -> vector<8x8xf32>
    %33 = arith.addf %27, %32 : vector<8x8xf32>
    %34 = vector.extract_strided_slice %2 {offsets = [6, 0], sizes = [8, 32], strides = [1, 1]} : vector<20x32xf32> to vector<8x32xf32>
    %35 = arith.truncf %34 : vector<8x32xf32> to vector<8x32xbf16>
    %c5 = arith.constant 5 : index
    %c0_18 = arith.constant 0 : index
    %c0_19 = arith.constant 0 : index
    %36 = vector.load %arg2[%c5, %c0_18, %c0_19] : memref<9x32x8xbf16, #tpu.memory_space<vmem>>, vector<1x32x8xbf16>
    %37 = vector.shape_cast %36 : vector<1x32x8xbf16> to vector<32x8xbf16>
    %cst_20 = arith.constant dense<0.000000e+00> : vector<8x8xf32>
    %38 = tpu.matmul %35, %37, %cst_20 {dimension_numbers = #tpu.dot_dimension_numbers<[1], [0], [0], [1], [0, 0, 1, 1], [], []>} : vector<8x32xbf16>, vector<32x8xbf16>, vector<8x8xf32> -> vector<8x8xf32>
    %39 = arith.addf %33, %38 : vector<8x8xf32>
    %40 = vector.extract_strided_slice %2 {offsets = [8, 0], sizes = [8, 32], strides = [1, 1]} : vector<20x32xf32> to vector<8x32xf32>
    %41 = arith.truncf %40 : vector<8x32xf32> to vector<8x32xbf16>
    %c6 = arith.constant 6 : index
    %c0_21 = arith.constant 0 : index
    %c0_22 = arith.constant 0 : index
    %42 = vector.load %arg2[%c6, %c0_21, %c0_22] : memref<9x32x8xbf16, #tpu.memory_space<vmem>>, vector<1x32x8xbf16>
    %43 = vector.shape_cast %42 : vector<1x32x8xbf16> to vector<32x8xbf16>
    %cst_23 = arith.constant dense<0.000000e+00> : vector<8x8xf32>
    %44 = tpu.matmul %41, %43, %cst_23 {dimension_numbers = #tpu.dot_dimension_numbers<[1], [0], [0], [1], [0, 0, 1, 1], [], []>} : vector<8x32xbf16>, vector<32x8xbf16>, vector<8x8xf32> -> vector<8x8xf32>
    %45 = arith.addf %39, %44 : vector<8x8xf32>
    %46 = vector.extract_strided_slice %2 {offsets = [9, 0], sizes = [8, 32], strides = [1, 1]} : vector<20x32xf32> to vector<8x32xf32>
    %47 = arith.truncf %46 : vector<8x32xf32> to vector<8x32xbf16>
    %c7 = arith.constant 7 : index
    %c0_24 = arith.constant 0 : index
    %c0_25 = arith.constant 0 : index
    %48 = vector.load %arg2[%c7, %c0_24, %c0_25] : memref<9x32x8xbf16, #tpu.memory_space<vmem>>, vector<1x32x8xbf16>
    %49 = vector.shape_cast %48 : vector<1x32x8xbf16> to vector<32x8xbf16>
    %cst_26 = arith.constant dense<0.000000e+00> : vector<8x8xf32>
    %50 = tpu.matmul %47, %49, %cst_26 {dimension_numbers = #tpu.dot_dimension_numbers<[1], [0], [0], [1], [0, 0, 1, 1], [], []>} : vector<8x32xbf16>, vector<32x8xbf16>, vector<8x8xf32> -> vector<8x8xf32>
    %51 = arith.addf %45, %50 : vector<8x8xf32>
    %52 = vector.extract_strided_slice %2 {offsets = [10, 0], sizes = [8, 32], strides = [1, 1]} : vector<20x32xf32> to vector<8x32xf32>
    %53 = arith.truncf %52 : vector<8x32xf32> to vector<8x32xbf16>
    %c8 = arith.constant 8 : index
    %c0_27 = arith.constant 0 : index
    %c0_28 = arith.constant 0 : index
    %54 = vector.load %arg2[%c8, %c0_27, %c0_28] : memref<9x32x8xbf16, #tpu.memory_space<vmem>>, vector<1x32x8xbf16>
    %55 = vector.shape_cast %54 : vector<1x32x8xbf16> to vector<32x8xbf16>
    %cst_29 = arith.constant dense<0.000000e+00> : vector<8x8xf32>
    %56 = tpu.matmul %53, %55, %cst_29 {dimension_numbers = #tpu.dot_dimension_numbers<[1], [0], [0], [1], [0, 0, 1, 1], [], []>} : vector<8x32xbf16>, vector<32x8xbf16>, vector<8x8xf32> -> vector<8x8xf32>
    %57 = arith.addf %51, %56 : vector<8x8xf32>
    %58 = arith.truncf %57 : vector<8x8xf32> to vector<8x8xbf16>
    %c0_30 = arith.constant 0 : index
    %c0_31 = arith.constant 0 : index
    %c0_32 = arith.constant 0 : index
    %59 = vector.load %arg3[%c0_30, %c0_31, %c0_32] : memref<1x8x8xbf16, #tpu.memory_space<vmem>>, vector<1x8x8xbf16>
    %60 = vector.shape_cast %59 : vector<1x8x8xbf16> to vector<8x8xbf16>
    %61 = vector.shape_cast %58 : vector<8x8xbf16> to vector<1x8x8xbf16>
    tpu.vector_store %arg3[%c0_30, %c0_31, %c0_32], %61 {strides = array<i32>} : memref<1x8x8xbf16, #tpu.memory_space<vmem>>, vector<1x8x8xbf16>,
    return
  }
  func.func @transform_0(%arg0: i32) -> (i32, i32, i32) {
    %c0_i32 = arith.constant 0 : i32
    %c0_i32_0 = arith.constant 0 : i32
    %c0_i32_1 = arith.constant 0 : i32
    return %arg0, %c0_i32, %c0_i32_0 : i32, i32, i32
  }
  func.func @transform_1(%arg0: i32) -> (i32, i32, i32) {
    %c0_i32 = arith.constant 0 : i32
    %c0_i32_0 = arith.constant 0 : i32
    %c0_i32_1 = arith.constant 0 : i32
    %c0_i32_2 = arith.constant 0 : i32
    return %c0_i32, %c0_i32_0, %c0_i32_1 : i32, i32, i32
  }
  func.func @transform_2(%arg0: i32) -> (i32, i32, i32) {
    %c0_i32 = arith.constant 0 : i32
    %c0_i32_0 = arith.constant 0 : i32
    %c0_i32_1 = arith.constant 0 : i32
    return %arg0, %c0_i32, %c0_i32_0 : i32, i32, i32
  }
}

module attributes {stable_mosaic.version = 11 : i64} {
  func.func @_fused_mm_kernel(%arg0: i32, %arg1: i32, %arg2: memref<16x24xbf16, #tpu.memory_space<vmem>>, %arg3: memref<24x32xbf16, #tpu.memory_space<vmem>>, %arg4: memref<1x24xf32, #tpu.memory_space<vmem>>, %arg5: memref<1x24xf32, #tpu.memory_space<vmem>>, %arg6: memref<1x32xf32, #tpu.memory_space<vmem>>, %arg7: memref<1x32xf32, #tpu.memory_space<vmem>>, %arg8: memref<16x32xbf16, #tpu.memory_space<vmem>>, %arg9: memref<16x32xf32, #tpu.memory_space<vmem>>) attributes {dimension_semantics = [#tpu.dimension_semantics<parallel>, #tpu.dimension_semantics<arbitrary>], iteration_bounds = array<i64: 1, 1>, scalar_prefetch = 0 : i64, scratch_operands = 1 : i64, tpu.core_type = #tpu.core_type<tc>, window_params = [{transform_indices = @transform_0, window_bounds = array<i64: 16, 24>}, {transform_indices = @transform_1, window_bounds = array<i64: 24, 32>}, {transform_indices = @transform_2, window_bounds = array<i64: 1, 24>}, {transform_indices = @transform_3, window_bounds = array<i64: 1, 24>}, {pipeline_mode = #tpu.pipeline_mode<synchronous>, transform_indices = @transform_4, window_bounds = array<i64: 1, 32>}, {pipeline_mode = #tpu.pipeline_mode<synchronous>, transform_indices = @transform_5, window_bounds = array<i64: 1, 32>}, {transform_indices = @transform_6, window_bounds = array<i64: 16, 32>}]} {
    %c0_i32 = arith.constant 0 : i32
    %0 = arith.cmpi eq, %arg1, %c0_i32 : i32
    %1 = arith.extui %0 : i1 to i32
    %c0_i32_0 = arith.constant 0 : i32
    %2 = arith.cmpi ne, %1, %c0_i32_0 : i32
    scf.if %2 {
      %cst_15 = arith.constant 0.000000e+00 : f32
      %22 = vector.broadcast %cst_15 : f32 to vector<16x32xf32>
      %c0_16 = arith.constant 0 : index
      %c0_17 = arith.constant 0 : index
      %23 = vector.load %arg9[%c0_16, %c0_17] : memref<16x32xf32, #tpu.memory_space<vmem>>, vector<16x32xf32>
      tpu.vector_store %arg9[%c0_16, %c0_17], %22 {strides = array<i32>} : memref<16x32xf32, #tpu.memory_space<vmem>>, vector<16x32xf32>,
    } else {
    }
    %c0 = arith.constant 0 : index
    %c0_1 = arith.constant 0 : index
    %3 = vector.load %arg2[%c0, %c0_1] : memref<16x24xbf16, #tpu.memory_space<vmem>>, vector<16x24xbf16>
    %4 = arith.extf %3 : vector<16x24xbf16> to vector<16x24xf32>
    %c0_2 = arith.constant 0 : index
    %c0_3 = arith.constant 0 : index
    %5 = vector.load %arg4[%c0_2, %c0_3] : memref<1x24xf32, #tpu.memory_space<vmem>>, vector<1x24xf32>
    %6 = vector.broadcast %5 : vector<1x24xf32> to vector<16x24xf32>
    %7 = arith.mulf %4, %6 : vector<16x24xf32>
    %c0_4 = arith.constant 0 : index
    %c0_5 = arith.constant 0 : index
    %8 = vector.load %arg5[%c0_4, %c0_5] : memref<1x24xf32, #tpu.memory_space<vmem>>, vector<1x24xf32>
    %9 = vector.broadcast %8 : vector<1x24xf32> to vector<16x24xf32>
    %10 = arith.addf %7, %9 : vector<16x24xf32>
    %cst = arith.constant 0.000000e+00 : f32
    %11 = vector.broadcast %cst : f32 to vector<16x24xf32>
    %12 = arith.maximumf %10, %11 : vector<16x24xf32>
    %c0_6 = arith.constant 0 : index
    %c0_7 = arith.constant 0 : index
    %13 = vector.load %arg9[%c0_6, %c0_7] : memref<16x32xf32, #tpu.memory_space<vmem>>, vector<16x32xf32>
    %14 = arith.truncf %12 : vector<16x24xf32> to vector<16x24xbf16>
    %c0_8 = arith.constant 0 : index
    %c0_9 = arith.constant 0 : index
    %15 = vector.load %arg3[%c0_8, %c0_9] : memref<24x32xbf16, #tpu.memory_space<vmem>>, vector<24x32xbf16>
    %cst_10 = arith.constant dense<0.000000e+00> : vector<16x32xf32>
    %16 = tpu.matmul %14, %15, %cst_10 {dimension_numbers = #tpu.dot_dimension_numbers<[1], [0], [0], [1], [0, 0, 1, 1], [], []>} : vector<16x24xbf16>, vector<24x32xbf16>, vector<16x32xf32> -> vector<16x32xf32>
    %17 = arith.addf %13, %16 : vector<16x32xf32>
    %c0_11 = arith.constant 0 : index
    %c0_12 = arith.constant 0 : index
    %18 = vector.load %arg9[%c0_11, %c0_12] : memref<16x32xf32, #tpu.memory_space<vmem>>, vector<16x32xf32>
    tpu.vector_store %arg9[%c0_11, %c0_12], %17 {strides = array<i32>} : memref<16x32xf32, #tpu.memory_space<vmem>>, vector<16x32xf32>,
    %c0_i32_13 = arith.constant 0 : i32
    %19 = arith.cmpi eq, %arg1, %c0_i32_13 : i32
    %20 = arith.extui %19 : i1 to i32
    %c0_i32_14 = arith.constant 0 : i32
    %21 = arith.cmpi ne, %20, %c0_i32_14 : i32
    scf.if %21 {
      %c0_15 = arith.constant 0 : index
      %c0_16 = arith.constant 0 : index
      %22 = vector.load %arg9[%c0_15, %c0_16] : memref<16x32xf32, #tpu.memory_space<vmem>>, vector<16x32xf32>
      %c0_17 = arith.constant 0 : index
      %c0_18 = arith.constant 0 : index
      %23 = vector.load %arg6[%c0_17, %c0_18] : memref<1x32xf32, #tpu.memory_space<vmem>>, vector<1x32xf32>
      %24 = vector.broadcast %23 : vector<1x32xf32> to vector<16x32xf32>
      %25 = arith.mulf %22, %24 : vector<16x32xf32>
      %c0_19 = arith.constant 0 : index
      %c0_20 = arith.constant 0 : index
      %26 = vector.load %arg7[%c0_19, %c0_20] : memref<1x32xf32, #tpu.memory_space<vmem>>, vector<1x32xf32>
      %27 = vector.broadcast %26 : vector<1x32xf32> to vector<16x32xf32>
      %28 = arith.addf %25, %27 : vector<16x32xf32>
      %cst_21 = arith.constant 0.000000e+00 : f32
      %29 = vector.broadcast %cst_21 : f32 to vector<16x32xf32>
      %30 = arith.maximumf %28, %29 : vector<16x32xf32>
      %31 = arith.truncf %30 : vector<16x32xf32> to vector<16x32xbf16>
      %c0_22 = arith.constant 0 : index
      %c0_23 = arith.constant 0 : index
      %32 = vector.load %arg8[%c0_22, %c0_23] : memref<16x32xbf16, #tpu.memory_space<vmem>>, vector<16x32xbf16>
      tpu.vector_store %arg8[%c0_22, %c0_23], %31 {strides = array<i32>} : memref<16x32xbf16, #tpu.memory_space<vmem>>, vector<16x32xbf16>,
    } else {
    }
    return
  }
  func.func @transform_0(%arg0: i32, %arg1: i32) -> (i32, i32) {
    %c0_i32 = arith.constant 0 : i32
    return %arg0, %arg1 : i32, i32
  }
  func.func @transform_1(%arg0: i32, %arg1: i32) -> (i32, i32) {
    %c0_i32 = arith.constant 0 : i32
    %c0_i32_0 = arith.constant 0 : i32
    return %arg1, %c0_i32 : i32, i32
  }
  func.func @transform_2(%arg0: i32, %arg1: i32) -> (i32, i32) {
    %c0_i32 = arith.constant 0 : i32
    %c0_i32_0 = arith.constant 0 : i32
    return %c0_i32, %arg1 : i32, i32
  }
  func.func @transform_3(%arg0: i32, %arg1: i32) -> (i32, i32) {
    %c0_i32 = arith.constant 0 : i32
    %c0_i32_0 = arith.constant 0 : i32
    return %c0_i32, %arg1 : i32, i32
  }
  func.func @transform_4(%arg0: i32, %arg1: i32) -> (i32, i32) {
    %c0_i32 = arith.constant 0 : i32
    %c0_i32_0 = arith.constant 0 : i32
    %c0_i32_1 = arith.constant 0 : i32
    return %c0_i32, %c0_i32_0 : i32, i32
  }
  func.func @transform_5(%arg0: i32, %arg1: i32) -> (i32, i32) {
    %c0_i32 = arith.constant 0 : i32
    %c0_i32_0 = arith.constant 0 : i32
    %c0_i32_1 = arith.constant 0 : i32
    return %c0_i32, %c0_i32_0 : i32, i32
  }
  func.func @transform_6(%arg0: i32, %arg1: i32) -> (i32, i32) {
    %c0_i32 = arith.constant 0 : i32
    %c0_i32_0 = arith.constant 0 : i32
    return %arg0, %c0_i32 : i32, i32
  }
}

module attributes {stable_mosaic.version = 11 : i64} {
  func.func @_fused_mm_kernel(%arg0: i32, %arg1: i32, %arg2: memref<16x32xbf16, #tpu.memory_space<vmem>>, %arg3: memref<32x16xbf16, #tpu.memory_space<vmem>>, %arg4: memref<1x32xf32, #tpu.memory_space<vmem>>, %arg5: memref<1x32xf32, #tpu.memory_space<vmem>>, %arg6: memref<16x16xbf16, #tpu.memory_space<vmem>>, %arg7: memref<16x16xf32, #tpu.memory_space<vmem>>) attributes {dimension_semantics = [#tpu.dimension_semantics<parallel>, #tpu.dimension_semantics<arbitrary>], iteration_bounds = array<i64: 1, 1>, scalar_prefetch = 0 : i64, scratch_operands = 1 : i64, tpu.core_type = #tpu.core_type<tc>, window_params = [{transform_indices = @transform_0, window_bounds = array<i64: 16, 32>}, {transform_indices = @transform_1, window_bounds = array<i64: 32, 16>}, {transform_indices = @transform_2, window_bounds = array<i64: 1, 32>}, {transform_indices = @transform_3, window_bounds = array<i64: 1, 32>}, {transform_indices = @transform_4, window_bounds = array<i64: 16, 16>}]} {
    %c0_i32 = arith.constant 0 : i32
    %0 = arith.cmpi eq, %arg1, %c0_i32 : i32
    %1 = arith.extui %0 : i1 to i32
    %c0_i32_0 = arith.constant 0 : i32
    %2 = arith.cmpi ne, %1, %c0_i32_0 : i32
    scf.if %2 {
      %cst_15 = arith.constant 0.000000e+00 : f32
      %22 = vector.broadcast %cst_15 : f32 to vector<16x16xf32>
      %c0_16 = arith.constant 0 : index
      %c0_17 = arith.constant 0 : index
      %23 = vector.load %arg7[%c0_16, %c0_17] : memref<16x16xf32, #tpu.memory_space<vmem>>, vector<16x16xf32>
      tpu.vector_store %arg7[%c0_16, %c0_17], %22 {strides = array<i32>} : memref<16x16xf32, #tpu.memory_space<vmem>>, vector<16x16xf32>,
    } else {
    }
    %c0 = arith.constant 0 : index
    %c0_1 = arith.constant 0 : index
    %3 = vector.load %arg2[%c0, %c0_1] : memref<16x32xbf16, #tpu.memory_space<vmem>>, vector<16x32xbf16>
    %4 = arith.extf %3 : vector<16x32xbf16> to vector<16x32xf32>
    %c0_2 = arith.constant 0 : index
    %c0_3 = arith.constant 0 : index
    %5 = vector.load %arg4[%c0_2, %c0_3] : memref<1x32xf32, #tpu.memory_space<vmem>>, vector<1x32xf32>
    %6 = vector.broadcast %5 : vector<1x32xf32> to vector<16x32xf32>
    %7 = arith.mulf %4, %6 : vector<16x32xf32>
    %c0_4 = arith.constant 0 : index
    %c0_5 = arith.constant 0 : index
    %8 = vector.load %arg5[%c0_4, %c0_5] : memref<1x32xf32, #tpu.memory_space<vmem>>, vector<1x32xf32>
    %9 = vector.broadcast %8 : vector<1x32xf32> to vector<16x32xf32>
    %10 = arith.addf %7, %9 : vector<16x32xf32>
    %cst = arith.constant 0.000000e+00 : f32
    %11 = vector.broadcast %cst : f32 to vector<16x32xf32>
    %12 = arith.maximumf %10, %11 : vector<16x32xf32>
    %c0_6 = arith.constant 0 : index
    %c0_7 = arith.constant 0 : index
    %13 = vector.load %arg7[%c0_6, %c0_7] : memref<16x16xf32, #tpu.memory_space<vmem>>, vector<16x16xf32>
    %14 = arith.truncf %12 : vector<16x32xf32> to vector<16x32xbf16>
    %c0_8 = arith.constant 0 : index
    %c0_9 = arith.constant 0 : index
    %15 = vector.load %arg3[%c0_8, %c0_9] : memref<32x16xbf16, #tpu.memory_space<vmem>>, vector<32x16xbf16>
    %cst_10 = arith.constant dense<0.000000e+00> : vector<16x16xf32>
    %16 = tpu.matmul %14, %15, %cst_10 {dimension_numbers = #tpu.dot_dimension_numbers<[1], [0], [0], [1], [0, 0, 1, 1], [], []>} : vector<16x32xbf16>, vector<32x16xbf16>, vector<16x16xf32> -> vector<16x16xf32>
    %17 = arith.addf %13, %16 : vector<16x16xf32>
    %c0_11 = arith.constant 0 : index
    %c0_12 = arith.constant 0 : index
    %18 = vector.load %arg7[%c0_11, %c0_12] : memref<16x16xf32, #tpu.memory_space<vmem>>, vector<16x16xf32>
    tpu.vector_store %arg7[%c0_11, %c0_12], %17 {strides = array<i32>} : memref<16x16xf32, #tpu.memory_space<vmem>>, vector<16x16xf32>,
    %c0_i32_13 = arith.constant 0 : i32
    %19 = arith.cmpi eq, %arg1, %c0_i32_13 : i32
    %20 = arith.extui %19 : i1 to i32
    %c0_i32_14 = arith.constant 0 : i32
    %21 = arith.cmpi ne, %20, %c0_i32_14 : i32
    scf.if %21 {
      %c0_15 = arith.constant 0 : index
      %c0_16 = arith.constant 0 : index
      %22 = vector.load %arg7[%c0_15, %c0_16] : memref<16x16xf32, #tpu.memory_space<vmem>>, vector<16x16xf32>
      %23 = arith.truncf %22 : vector<16x16xf32> to vector<16x16xbf16>
      %c0_17 = arith.constant 0 : index
      %c0_18 = arith.constant 0 : index
      %24 = vector.load %arg6[%c0_17, %c0_18] : memref<16x16xbf16, #tpu.memory_space<vmem>>, vector<16x16xbf16>
      tpu.vector_store %arg6[%c0_17, %c0_18], %23 {strides = array<i32>} : memref<16x16xbf16, #tpu.memory_space<vmem>>, vector<16x16xbf16>,
    } else {
    }
    return
  }
  func.func @transform_0(%arg0: i32, %arg1: i32) -> (i32, i32) {
    %c0_i32 = arith.constant 0 : i32
    return %arg0, %arg1 : i32, i32
  }
  func.func @transform_1(%arg0: i32, %arg1: i32) -> (i32, i32) {
    %c0_i32 = arith.constant 0 : i32
    %c0_i32_0 = arith.constant 0 : i32
    return %arg1, %c0_i32 : i32, i32
  }
  func.func @transform_2(%arg0: i32, %arg1: i32) -> (i32, i32) {
    %c0_i32 = arith.constant 0 : i32
    %c0_i32_0 = arith.constant 0 : i32
    return %c0_i32, %arg1 : i32, i32
  }
  func.func @transform_3(%arg0: i32, %arg1: i32) -> (i32, i32) {
    %c0_i32 = arith.constant 0 : i32
    %c0_i32_0 = arith.constant 0 : i32
    return %c0_i32, %arg1 : i32, i32
  }
  func.func @transform_4(%arg0: i32, %arg1: i32) -> (i32, i32) {
    %c0_i32 = arith.constant 0 : i32
    %c0_i32_0 = arith.constant 0 : i32
    return %arg0, %c0_i32 : i32, i32
  }
}

module attributes {stable_mosaic.version = 11 : i64} {
  func.func @_pool_dense_kernel(%arg0: i32, %arg1: memref<1x2x2x16xbf16, #tpu.memory_space<vmem>>, %arg2: memref<1x1x1x16xbf16, #tpu.memory_space<vmem>>) attributes {dimension_semantics = [#tpu.dimension_semantics<parallel>], iteration_bounds = array<i64: 2>, scalar_prefetch = 0 : i64, scratch_operands = 0 : i64, tpu.core_type = #tpu.core_type<tc>, window_params = [{transform_indices = @transform_0, window_bounds = array<i64: 1, 2, 2, 16>}, {transform_indices = @transform_1, window_bounds = array<i64: 1, 1, 1, 16>}]} {
    %c0 = arith.constant 0 : index
    %c0_0 = arith.constant 0 : index
    %c0_1 = arith.constant 0 : index
    %c0_2 = arith.constant 0 : index
    %0 = vector.load %arg1[%c0, %c0_0, %c0_1, %c0_2] : memref<1x2x2x16xbf16, #tpu.memory_space<vmem>>, vector<1x2x2x16xbf16>
    %1 = vector.shape_cast %0 : vector<1x2x2x16xbf16> to vector<2x2x16xbf16>
    %2 = arith.extf %1 : vector<2x2x16xbf16> to vector<2x2x16xf32>
    %3 = vector.extract_strided_slice %2 {offsets = [0, 0, 0], sizes = [1, 1, 16], strides = [1, 1, 1]} : vector<2x2x16xf32> to vector<1x1x16xf32>
    %4 = vector.extract_strided_slice %2 {offsets = [0, 1, 0], sizes = [1, 1, 16], strides = [1, 1, 1]} : vector<2x2x16xf32> to vector<1x1x16xf32>
    %5 = arith.addf %3, %4 : vector<1x1x16xf32>
    %6 = vector.extract_strided_slice %2 {offsets = [1, 0, 0], sizes = [1, 1, 16], strides = [1, 1, 1]} : vector<2x2x16xf32> to vector<1x1x16xf32>
    %7 = arith.addf %5, %6 : vector<1x1x16xf32>
    %8 = vector.extract_strided_slice %2 {offsets = [1, 1, 0], sizes = [1, 1, 16], strides = [1, 1, 1]} : vector<2x2x16xf32> to vector<1x1x16xf32>
    %9 = arith.addf %7, %8 : vector<1x1x16xf32>
    %cst = arith.constant 2.500000e-01 : f32
    %10 = vector.broadcast %cst : f32 to vector<1x1x16xf32>
    %11 = arith.mulf %9, %10 : vector<1x1x16xf32>
    %12 = arith.truncf %11 : vector<1x1x16xf32> to vector<1x1x16xbf16>
    %c0_3 = arith.constant 0 : index
    %c0_4 = arith.constant 0 : index
    %c0_5 = arith.constant 0 : index
    %c0_6 = arith.constant 0 : index
    %13 = vector.load %arg2[%c0_3, %c0_4, %c0_5, %c0_6] : memref<1x1x1x16xbf16, #tpu.memory_space<vmem>>, vector<1x1x1x16xbf16>
    %14 = vector.shape_cast %13 : vector<1x1x1x16xbf16> to vector<1x1x16xbf16>
    %15 = vector.shape_cast %12 : vector<1x1x16xbf16> to vector<1x1x1x16xbf16>
    tpu.vector_store %arg2[%c0_3, %c0_4, %c0_5, %c0_6], %15 {strides = array<i32>} : memref<1x1x1x16xbf16, #tpu.memory_space<vmem>>, vector<1x1x1x16xbf16>,
    return
  }
  func.func @transform_0(%arg0: i32) -> (i32, i32, i32, i32) {
    %c0_i32 = arith.constant 0 : i32
    %c0_i32_0 = arith.constant 0 : i32
    %c0_i32_1 = arith.constant 0 : i32
    %c0_i32_2 = arith.constant 0 : i32
    return %arg0, %c0_i32, %c0_i32_0, %c0_i32_1 : i32, i32, i32, i32
  }
  func.func @transform_1(%arg0: i32) -> (i32, i32, i32, i32) {
    %c0_i32 = arith.constant 0 : i32
    %c0_i32_0 = arith.constant 0 : i32
    %c0_i32_1 = arith.constant 0 : i32
    %c0_i32_2 = arith.constant 0 : i32
    return %arg0, %c0_i32, %c0_i32_0, %c0_i32_1 : i32, i32, i32, i32
  }
}

module attributes {stable_mosaic.version = 11 : i64} {
  func.func @_conv3x3_kernel(%arg0: i32, %arg1: memref<1x12x32xbf16, #tpu.memory_space<vmem>>, %arg2: memref<9x32x8xbf16, #tpu.memory_space<vmem>>, %arg3: memref<1x3x8xbf16, #tpu.memory_space<vmem>>) attributes {dimension_semantics = [#tpu.dimension_semantics<parallel>], iteration_bounds = array<i64: 2>, scalar_prefetch = 0 : i64, scratch_operands = 0 : i64, tpu.core_type = #tpu.core_type<tc>, window_params = [{transform_indices = @transform_0, window_bounds = array<i64: 1, 12, 32>}, {pipeline_mode = #tpu.pipeline_mode<synchronous>, transform_indices = @transform_1, window_bounds = array<i64: 9, 32, 8>}, {transform_indices = @transform_2, window_bounds = array<i64: 1, 3, 8>}]} {
    %c0 = arith.constant 0 : index
    %c0_0 = arith.constant 0 : index
    %c0_1 = arith.constant 0 : index
    %0 = vector.load %arg1[%c0, %c0_0, %c0_1] : memref<1x12x32xbf16, #tpu.memory_space<vmem>>, vector<1x12x32xbf16>
    %1 = vector.shape_cast %0 : vector<1x12x32xbf16> to vector<12x32xbf16>
    %2 = arith.extf %1 : vector<12x32xbf16> to vector<12x32xf32>
    %cst = arith.constant 0.000000e+00 : f32
    %3 = vector.broadcast %cst : f32 to vector<3x8xf32>
    %4 = vector.extract_strided_slice %2 {offsets = [0, 0], sizes = [3, 32], strides = [1, 1]} : vector<12x32xf32> to vector<3x32xf32>
    %5 = arith.truncf %4 : vector<3x32xf32> to vector<3x32xbf16>
    %c0_2 = arith.constant 0 : index
    %c0_3 = arith.constant 0 : index
    %c0_4 = arith.constant 0 : index
    %6 = vector.load %arg2[%c0_2, %c0_3, %c0_4] : memref<9x32x8xbf16, #tpu.memory_space<vmem>>, vector<1x32x8xbf16>
    %7 = vector.shape_cast %6 : vector<1x32x8xbf16> to vector<32x8xbf16>
    %cst_5 = arith.constant dense<0.000000e+00> : vector<3x8xf32>
    %8 = tpu.matmul %5, %7, %cst_5 {dimension_numbers = #tpu.dot_dimension_numbers<[1], [0], [0], [1], [0, 0, 1, 1], [], []>} : vector<3x32xbf16>, vector<32x8xbf16>, vector<3x8xf32> -> vector<3x8xf32>
    %9 = arith.addf %3, %8 : vector<3x8xf32>
    %10 = vector.extract_strided_slice %2 {offsets = [1, 0], sizes = [3, 32], strides = [1, 1]} : vector<12x32xf32> to vector<3x32xf32>
    %11 = arith.truncf %10 : vector<3x32xf32> to vector<3x32xbf16>
    %c1 = arith.constant 1 : index
    %c0_6 = arith.constant 0 : index
    %c0_7 = arith.constant 0 : index
    %12 = vector.load %arg2[%c1, %c0_6, %c0_7] : memref<9x32x8xbf16, #tpu.memory_space<vmem>>, vector<1x32x8xbf16>
    %13 = vector.shape_cast %12 : vector<1x32x8xbf16> to vector<32x8xbf16>
    %cst_8 = arith.constant dense<0.000000e+00> : vector<3x8xf32>
    %14 = tpu.matmul %11, %13, %cst_8 {dimension_numbers = #tpu.dot_dimension_numbers<[1], [0], [0], [1], [0, 0, 1, 1], [], []>} : vector<3x32xbf16>, vector<32x8xbf16>, vector<3x8xf32> -> vector<3x8xf32>
    %15 = arith.addf %9, %14 : vector<3x8xf32>
    %16 = vector.extract_strided_slice %2 {offsets = [2, 0], sizes = [3, 32], strides = [1, 1]} : vector<12x32xf32> to vector<3x32xf32>
    %17 = arith.truncf %16 : vector<3x32xf32> to vector<3x32xbf16>
    %c2 = arith.constant 2 : index
    %c0_9 = arith.constant 0 : index
    %c0_10 = arith.constant 0 : index
    %18 = vector.load %arg2[%c2, %c0_9, %c0_10] : memref<9x32x8xbf16, #tpu.memory_space<vmem>>, vector<1x32x8xbf16>
    %19 = vector.shape_cast %18 : vector<1x32x8xbf16> to vector<32x8xbf16>
    %cst_11 = arith.constant dense<0.000000e+00> : vector<3x8xf32>
    %20 = tpu.matmul %17, %19, %cst_11 {dimension_numbers = #tpu.dot_dimension_numbers<[1], [0], [0], [1], [0, 0, 1, 1], [], []>} : vector<3x32xbf16>, vector<32x8xbf16>, vector<3x8xf32> -> vector<3x8xf32>
    %21 = arith.addf %15, %20 : vector<3x8xf32>
    %22 = vector.extract_strided_slice %2 {offsets = [3, 0], sizes = [3, 32], strides = [1, 1]} : vector<12x32xf32> to vector<3x32xf32>
    %23 = arith.truncf %22 : vector<3x32xf32> to vector<3x32xbf16>
    %c3 = arith.constant 3 : index
    %c0_12 = arith.constant 0 : index
    %c0_13 = arith.constant 0 : index
    %24 = vector.load %arg2[%c3, %c0_12, %c0_13] : memref<9x32x8xbf16, #tpu.memory_space<vmem>>, vector<1x32x8xbf16>
    %25 = vector.shape_cast %24 : vector<1x32x8xbf16> to vector<32x8xbf16>
    %cst_14 = arith.constant dense<0.000000e+00> : vector<3x8xf32>
    %26 = tpu.matmul %23, %25, %cst_14 {dimension_numbers = #tpu.dot_dimension_numbers<[1], [0], [0], [1], [0, 0, 1, 1], [], []>} : vector<3x32xbf16>, vector<32x8xbf16>, vector<3x8xf32> -> vector<3x8xf32>
    %27 = arith.addf %21, %26 : vector<3x8xf32>
    %28 = vector.extract_strided_slice %2 {offsets = [4, 0], sizes = [3, 32], strides = [1, 1]} : vector<12x32xf32> to vector<3x32xf32>
    %29 = arith.truncf %28 : vector<3x32xf32> to vector<3x32xbf16>
    %c4 = arith.constant 4 : index
    %c0_15 = arith.constant 0 : index
    %c0_16 = arith.constant 0 : index
    %30 = vector.load %arg2[%c4, %c0_15, %c0_16] : memref<9x32x8xbf16, #tpu.memory_space<vmem>>, vector<1x32x8xbf16>
    %31 = vector.shape_cast %30 : vector<1x32x8xbf16> to vector<32x8xbf16>
    %cst_17 = arith.constant dense<0.000000e+00> : vector<3x8xf32>
    %32 = tpu.matmul %29, %31, %cst_17 {dimension_numbers = #tpu.dot_dimension_numbers<[1], [0], [0], [1], [0, 0, 1, 1], [], []>} : vector<3x32xbf16>, vector<32x8xbf16>, vector<3x8xf32> -> vector<3x8xf32>
    %33 = arith.addf %27, %32 : vector<3x8xf32>
    %34 = vector.extract_strided_slice %2 {offsets = [5, 0], sizes = [3, 32], strides = [1, 1]} : vector<12x32xf32> to vector<3x32xf32>
    %35 = arith.truncf %34 : vector<3x32xf32> to vector<3x32xbf16>
    %c5 = arith.constant 5 : index
    %c0_18 = arith.constant 0 : index
    %c0_19 = arith.constant 0 : index
    %36 = vector.load %arg2[%c5, %c0_18, %c0_19] : memref<9x32x8xbf16, #tpu.memory_space<vmem>>, vector<1x32x8xbf16>
    %37 = vector.shape_cast %36 : vector<1x32x8xbf16> to vector<32x8xbf16>
    %cst_20 = arith.constant dense<0.000000e+00> : vector<3x8xf32>
    %38 = tpu.matmul %35, %37, %cst_20 {dimension_numbers = #tpu.dot_dimension_numbers<[1], [0], [0], [1], [0, 0, 1, 1], [], []>} : vector<3x32xbf16>, vector<32x8xbf16>, vector<3x8xf32> -> vector<3x8xf32>
    %39 = arith.addf %33, %38 : vector<3x8xf32>
    %40 = vector.extract_strided_slice %2 {offsets = [6, 0], sizes = [3, 32], strides = [1, 1]} : vector<12x32xf32> to vector<3x32xf32>
    %41 = arith.truncf %40 : vector<3x32xf32> to vector<3x32xbf16>
    %c6 = arith.constant 6 : index
    %c0_21 = arith.constant 0 : index
    %c0_22 = arith.constant 0 : index
    %42 = vector.load %arg2[%c6, %c0_21, %c0_22] : memref<9x32x8xbf16, #tpu.memory_space<vmem>>, vector<1x32x8xbf16>
    %43 = vector.shape_cast %42 : vector<1x32x8xbf16> to vector<32x8xbf16>
    %cst_23 = arith.constant dense<0.000000e+00> : vector<3x8xf32>
    %44 = tpu.matmul %41, %43, %cst_23 {dimension_numbers = #tpu.dot_dimension_numbers<[1], [0], [0], [1], [0, 0, 1, 1], [], []>} : vector<3x32xbf16>, vector<32x8xbf16>, vector<3x8xf32> -> vector<3x8xf32>
    %45 = arith.addf %39, %44 : vector<3x8xf32>
    %46 = vector.extract_strided_slice %2 {offsets = [7, 0], sizes = [3, 32], strides = [1, 1]} : vector<12x32xf32> to vector<3x32xf32>
    %47 = arith.truncf %46 : vector<3x32xf32> to vector<3x32xbf16>
    %c7 = arith.constant 7 : index
    %c0_24 = arith.constant 0 : index
    %c0_25 = arith.constant 0 : index
    %48 = vector.load %arg2[%c7, %c0_24, %c0_25] : memref<9x32x8xbf16, #tpu.memory_space<vmem>>, vector<1x32x8xbf16>
    %49 = vector.shape_cast %48 : vector<1x32x8xbf16> to vector<32x8xbf16>
    %cst_26 = arith.constant dense<0.000000e+00> : vector<3x8xf32>
    %50 = tpu.matmul %47, %49, %cst_26 {dimension_numbers = #tpu.dot_dimension_numbers<[1], [0], [0], [1], [0, 0, 1, 1], [], []>} : vector<3x32xbf16>, vector<32x8xbf16>, vector<3x8xf32> -> vector<3x8xf32>
    %51 = arith.addf %45, %50 : vector<3x8xf32>
    %52 = vector.extract_strided_slice %2 {offsets = [8, 0], sizes = [3, 32], strides = [1, 1]} : vector<12x32xf32> to vector<3x32xf32>
    %53 = arith.truncf %52 : vector<3x32xf32> to vector<3x32xbf16>
    %c8 = arith.constant 8 : index
    %c0_27 = arith.constant 0 : index
    %c0_28 = arith.constant 0 : index
    %54 = vector.load %arg2[%c8, %c0_27, %c0_28] : memref<9x32x8xbf16, #tpu.memory_space<vmem>>, vector<1x32x8xbf16>
    %55 = vector.shape_cast %54 : vector<1x32x8xbf16> to vector<32x8xbf16>
    %cst_29 = arith.constant dense<0.000000e+00> : vector<3x8xf32>
    %56 = tpu.matmul %53, %55, %cst_29 {dimension_numbers = #tpu.dot_dimension_numbers<[1], [0], [0], [1], [0, 0, 1, 1], [], []>} : vector<3x32xbf16>, vector<32x8xbf16>, vector<3x8xf32> -> vector<3x8xf32>
    %57 = arith.addf %51, %56 : vector<3x8xf32>
    %58 = arith.truncf %57 : vector<3x8xf32> to vector<3x8xbf16>
    %c0_30 = arith.constant 0 : index
    %c0_31 = arith.constant 0 : index
    %c0_32 = arith.constant 0 : index
    %59 = vector.load %arg3[%c0_30, %c0_31, %c0_32] : memref<1x3x8xbf16, #tpu.memory_space<vmem>>, vector<1x3x8xbf16>
    %60 = vector.shape_cast %59 : vector<1x3x8xbf16> to vector<3x8xbf16>
    %61 = vector.shape_cast %58 : vector<3x8xbf16> to vector<1x3x8xbf16>
    tpu.vector_store %arg3[%c0_30, %c0_31, %c0_32], %61 {strides = array<i32>} : memref<1x3x8xbf16, #tpu.memory_space<vmem>>, vector<1x3x8xbf16>,
    return
  }
  func.func @transform_0(%arg0: i32) -> (i32, i32, i32) {
    %c0_i32 = arith.constant 0 : i32
    %c0_i32_0 = arith.constant 0 : i32
    %c0_i32_1 = arith.constant 0 : i32
    return %arg0, %c0_i32, %c0_i32_0 : i32, i32, i32
  }
  func.func @transform_1(%arg0: i32) -> (i32, i32, i32) {
    %c0_i32 = arith.constant 0 : i32
    %c0_i32_0 = arith.constant 0 : i32
    %c0_i32_1 = arith.constant 0 : i32
    %c0_i32_2 = arith.constant 0 : i32
    return %c0_i32, %c0_i32_0, %c0_i32_1 : i32, i32, i32
  }
  func.func @transform_2(%arg0: i32) -> (i32, i32, i32) {
    %c0_i32 = arith.constant 0 : i32
    %c0_i32_0 = arith.constant 0 : i32
    %c0_i32_1 = arith.constant 0 : i32
    return %arg0, %c0_i32, %c0_i32_0 : i32, i32, i32
  }
}

module attributes {stable_mosaic.version = 11 : i64} {
  func.func @_gap_bn_relu_kernel(%arg0: i32, %arg1: memref<1x1x32xbf16, #tpu.memory_space<vmem>>, %arg2: memref<1x32xf32, #tpu.memory_space<vmem>>, %arg3: memref<1x32xf32, #tpu.memory_space<vmem>>, %arg4: memref<1x1x32xf32, #tpu.memory_space<vmem>>) attributes {dimension_semantics = [#tpu.dimension_semantics<parallel>], iteration_bounds = array<i64: 2>, scalar_prefetch = 0 : i64, scratch_operands = 0 : i64, tpu.core_type = #tpu.core_type<tc>, window_params = [{transform_indices = @transform_0, window_bounds = array<i64: 1, 1, 32>}, {pipeline_mode = #tpu.pipeline_mode<synchronous>, transform_indices = @transform_1, window_bounds = array<i64: 1, 32>}, {pipeline_mode = #tpu.pipeline_mode<synchronous>, transform_indices = @transform_2, window_bounds = array<i64: 1, 32>}, {transform_indices = @transform_3, window_bounds = array<i64: 1, 1, 32>}]} {
    %c0 = arith.constant 0 : index
    %c0_0 = arith.constant 0 : index
    %c0_1 = arith.constant 0 : index
    %0 = vector.load %arg1[%c0, %c0_0, %c0_1] : memref<1x1x32xbf16, #tpu.memory_space<vmem>>, vector<1x1x32xbf16>
    %1 = vector.shape_cast %0 : vector<1x1x32xbf16> to vector<1x32xbf16>
    %2 = arith.extf %1 : vector<1x32xbf16> to vector<1x32xf32>
    %c0_2 = arith.constant 0 : index
    %c0_3 = arith.constant 0 : index
    %3 = vector.load %arg2[%c0_2, %c0_3] : memref<1x32xf32, #tpu.memory_space<vmem>>, vector<1x32xf32>
    %4 = arith.mulf %2, %3 : vector<1x32xf32>
    %c0_4 = arith.constant 0 : index
    %c0_5 = arith.constant 0 : index
    %5 = vector.load %arg3[%c0_4, %c0_5] : memref<1x32xf32, #tpu.memory_space<vmem>>, vector<1x32xf32>
    %6 = arith.addf %4, %5 : vector<1x32xf32>
    %cst = arith.constant 0.000000e+00 : f32
    %7 = vector.broadcast %cst : f32 to vector<1x32xf32>
    %8 = arith.maximumf %6, %7 : vector<1x32xf32>
    %cst_6 = arith.constant dense<0.000000e+00> : vector<32xf32>
    %9 = vector.multi_reduction <add>, %8, %cst_6 [0] : vector<1x32xf32> to vector<32xf32>
    %10 = vector.shape_cast %9 : vector<32xf32> to vector<1x32xf32>
    %cst_7 = arith.constant 1.000000e+00 : f32
    %11 = vector.broadcast %cst_7 : f32 to vector<1x32xf32>
    %12 = arith.divf %10, %11 : vector<1x32xf32>
    %c0_8 = arith.constant 0 : index
    %c0_9 = arith.constant 0 : index
    %c0_10 = arith.constant 0 : index
    %13 = vector.load %arg4[%c0_8, %c0_9, %c0_10] : memref<1x1x32xf32, #tpu.memory_space<vmem>>, vector<1x1x32xf32>
    %14 = vector.shape_cast %13 : vector<1x1x32xf32> to vector<1x32xf32>
    %15 = vector.shape_cast %12 : vector<1x32xf32> to vector<1x1x32xf32>
    tpu.vector_store %arg4[%c0_8, %c0_9, %c0_10], %15 {strides = array<i32>} : memref<1x1x32xf32, #tpu.memory_space<vmem>>, vector<1x1x32xf32>,
    return
  }
  func.func @transform_0(%arg0: i32) -> (i32, i32, i32) {
    %c0_i32 = arith.constant 0 : i32
    %c0_i32_0 = arith.constant 0 : i32
    %c0_i32_1 = arith.constant 0 : i32
    return %arg0, %c0_i32, %c0_i32_0 : i32, i32, i32
  }
  func.func @transform_1(%arg0: i32) -> (i32, i32) {
    %c0_i32 = arith.constant 0 : i32
    %c0_i32_0 = arith.constant 0 : i32
    %c0_i32_1 = arith.constant 0 : i32
    return %c0_i32, %c0_i32_0 : i32, i32
  }
  func.func @transform_2(%arg0: i32) -> (i32, i32) {
    %c0_i32 = arith.constant 0 : i32
    %c0_i32_0 = arith.constant 0 : i32
    %c0_i32_1 = arith.constant 0 : i32
    return %c0_i32, %c0_i32_0 : i32, i32
  }
  func.func @transform_3(%arg0: i32) -> (i32, i32, i32) {
    %c0_i32 = arith.constant 0 : i32
    %c0_i32_0 = arith.constant 0 : i32
    %c0_i32_1 = arith.constant 0 : i32
    return %arg0, %c0_i32, %c0_i32_0 : i32, i32, i32
  }
}

module attributes {stable_mosaic.version = 11 : i64} {
  func.func @_linear_kernel(%arg0: i32, %arg1: memref<2x32xf32, #tpu.memory_space<vmem>>, %arg2: memref<32x2xf32, #tpu.memory_space<vmem>>, %arg3: memref<1x2xf32, #tpu.memory_space<vmem>>, %arg4: memref<2x2xf32, #tpu.memory_space<vmem>>) attributes {dimension_semantics = [#tpu.dimension_semantics<arbitrary>], iteration_bounds = array<i64: 1>, scalar_prefetch = 0 : i64, scratch_operands = 0 : i64, tpu.core_type = #tpu.core_type<tc>, window_params = [{pipeline_mode = #tpu.pipeline_mode<synchronous>, transform_indices = @transform_0, window_bounds = array<i64: 2, 32>}, {pipeline_mode = #tpu.pipeline_mode<synchronous>, transform_indices = @transform_1, window_bounds = array<i64: 32, 2>}, {pipeline_mode = #tpu.pipeline_mode<synchronous>, transform_indices = @transform_2, window_bounds = array<i64: 1, 2>}, {pipeline_mode = #tpu.pipeline_mode<synchronous>, transform_indices = @transform_3, window_bounds = array<i64: 2, 2>}]} {
    %c0 = arith.constant 0 : index
    %c0_0 = arith.constant 0 : index
    %0 = vector.load %arg1[%c0, %c0_0] : memref<2x32xf32, #tpu.memory_space<vmem>>, vector<2x32xf32>
    %c0_1 = arith.constant 0 : index
    %c0_2 = arith.constant 0 : index
    %1 = vector.load %arg2[%c0_1, %c0_2] : memref<32x2xf32, #tpu.memory_space<vmem>>, vector<32x2xf32>
    %cst = arith.constant dense<0.000000e+00> : vector<2x2xf32>
    %2 = tpu.matmul %0, %1, %cst {dimension_numbers = #tpu.dot_dimension_numbers<[1], [0], [0], [1], [0, 0, 1, 1], [], []>} : vector<2x32xf32>, vector<32x2xf32>, vector<2x2xf32> -> vector<2x2xf32>
    %c0_3 = arith.constant 0 : index
    %c0_4 = arith.constant 0 : index
    %3 = vector.load %arg3[%c0_3, %c0_4] : memref<1x2xf32, #tpu.memory_space<vmem>>, vector<1x2xf32>
    %4 = vector.broadcast %3 : vector<1x2xf32> to vector<2x2xf32>
    %5 = arith.addf %2, %4 : vector<2x2xf32>
    %c0_5 = arith.constant 0 : index
    %c0_6 = arith.constant 0 : index
    %6 = vector.load %arg4[%c0_5, %c0_6] : memref<2x2xf32, #tpu.memory_space<vmem>>, vector<2x2xf32>
    tpu.vector_store %arg4[%c0_5, %c0_6], %5 {strides = array<i32>} : memref<2x2xf32, #tpu.memory_space<vmem>>, vector<2x2xf32>,
    return
  }
  func.func @transform_0(%arg0: i32) -> (i32, i32) {
    %c0_i32 = arith.constant 0 : i32
    %c0_i32_0 = arith.constant 0 : i32
    %c0_i32_1 = arith.constant 0 : i32
    return %c0_i32, %c0_i32_0 : i32, i32
  }
  func.func @transform_1(%arg0: i32) -> (i32, i32) {
    %c0_i32 = arith.constant 0 : i32
    %c0_i32_0 = arith.constant 0 : i32
    %c0_i32_1 = arith.constant 0 : i32
    return %c0_i32, %c0_i32_0 : i32, i32
  }
  func.func @transform_2(%arg0: i32) -> (i32, i32) {
    %c0_i32 = arith.constant 0 : i32
    %c0_i32_0 = arith.constant 0 : i32
    %c0_i32_1 = arith.constant 0 : i32
    return %c0_i32, %c0_i32_0 : i32, i32
  }
  func.func @transform_3(%arg0: i32) -> (i32, i32) {
    %c0_i32 = arith.constant 0 : i32
    %c0_i32_0 = arith.constant 0 : i32
    %c0_i32_1 = arith.constant 0 : i32
    return %c0_i32, %c0_i32_0 : i32, i32
  }
}

</mosaic_0001>

<bundles_post_ra>
// kernel: densenet_forward.27
= control target key start
LH: loop header
LB: loop body
LE: loop exit
PB: predicated region body
PF: predicated region fallthrough
CT: control target
= control target key end

     0   :  { %s1151_s6 = smov 0   ;;  %s1509_s0 = inlined_call_operand.vmem [shape: bf16[2,18,18,16], index: 0, kind: input, shape index: {}]   ;;  %s1510_s1 = inlined_call_operand.vmem [shape: bf16[2,16,16,16], index: 1, kind: output, shape index: {}]  }
   0x1 LB: > { %s1005_s7 = sadd.s32 4294967295, %s1139_s6   ;;  %p1009_p0 = scmp.ge.s32.totalorder %s1139_s6, 1  ;;  %s1139_s6 = sphi %s1151_s6, %s11_s6  }
   0x2   : > { %p87_p1 = scmp.lt.s32.totalorder %s1139_s6, 3 }
   0x4   : > { %p88_p2 = pnand %p1009_p0, %p87_p1 }
   0x5   : > { %p107_p3 = scmp.lt.s32.totalorder (!%p88_p2), %s1005_s7, 1  ;;  %vm273_vm0 = vcmask (!%p88_p2), 1046528   ;;  %vm418_vm1 = vcmask (!%p88_p2), 1045504   ;;  %vm917_vm2 = vcmask (!%p88_p2), 125952  }
   0x6   : > { %91 = sbr.rel (%p88_p2) target bundleno = 156 (0x9c), region = 24 }
   0xd   : > { %s1512_s7 = smov (!%p107_p3, %s1005_s7), 1 }
   0xe   : > { %s1124_s8 = smul.u32 216, %s1512_s7  ;;  %s1047_s12 = sshll.u32 %s1512_s7, 7 }
   0xf   : > { %s1244_s15 = scalar_lea.vmem %s1510_s1, %s1047_s12 }
  0x10   : > { %s1165_s11 = scalar_lea.vmem %s1509_s0, %s1124_s8 }
  0x11   : > { %v1081_v0 = vld [vmem:[%s1165_s11] sm:$0xff]   ;;  %v120_v1 = vld [vmem:[%s1165_s11 + $0xc] sm:$0xff]   ;;  %v1116_v2 = vld [vmem:[%s1165_s11 + $0x18] sm:$0xff]  }
  0x12   : > { %v1082_v3 = vunpack.c.l.bf16 %v1081_v0  ;;  %v1170_v4 = vunpack.c.h.bf16 %v1081_v0  ;;  %v1172_v5 = vunpack.c.l.bf16 %v1116_v2  ;;  %v1174_v6 = vunpack.c.h.bf16 %v1116_v2  ;;  %v126_v7 = vld [vmem:[%s1165_s11 + $0x24] sm:$0xff]   ;;  %v122_v25 = vld [vmem:[%s1165_s11 + $0x14] sm:$0x1]  ;;  %v125_v26 = vld [vmem:[%s1165_s11 + $0x20] sm:$0x1] }
  0x13   : > { %v119_v8 = vld [vmem:[%s1165_s11 + $0x8] sm:$0x1]  ;;  %v174_v9 = vunpack.c.l.bf16 %v120_v1  ;;  %v1178_v10 = vunpack.c.h.bf16 %v120_v1  ;;  %v1180_v11 = vunpack.c.l.bf16 %v126_v7  ;;  %v176_v36 = vunpack.c.l.bf16 %v122_v25  ;;  %v1117_v51 = vld [vmem:[%s1165_s11 + $0x30] sm:$0xff]  }
  0x14   : > { %v173_v12 = vunpack.c.l.bf16 %v119_v8  ;;  %v274_v13 = vrot.slane %v1082_v3, 1  ;;  %v275_v14 = vrot.slane %v1170_v4, 1  ;;  %v284_v15 = vrot.slane %v1172_v5, 1 }
  0x15   : > { %v285_v16 = vrot.slane %v1174_v6, 1  ;;  %v279_v17 = vrot.slane %v174_v9, 1  ;;  %v280_v18 = vrot.slane %v1178_v10, 1  ;;  %v419_v19 = vrot.slane %v1082_v3, 2 }
  0x16   : > { %v420_v20 = vrot.slane %v1170_v4, 2  ;;  %v276_v21 = vsel %vm273_vm0, %v274_v13, %v275_v14  ;;  %v424_v23 = vrot.slane %v174_v9, 2  ;;  %v425_v24 = vrot.slane %v1178_v10, 2 }
  0x17   : > { %v1189_v22 = vsel %vm273_vm0, %v284_v15, %v285_v16  ;;  %v281_v27 = vsel %vm273_vm0, %v279_v17, %v280_v18  ;;  %v386_v28 = vmax.f32 %v1082_v3, %v276_v21  ;;  %v429_v33 = vrot.slane %v1172_v5, 2 }
  0x18   : > { %v390_v29 = vmax.f32 %v1172_v5, %v1189_v22  ;;  %v421_v30 = vsel %vm418_vm1, %v419_v19, %v420_v20  ;;  %v388_v31 = vmax.f32 %v174_v9, %v281_v27  ;;  %v426_v32 = vsel %vm418_vm1, %v424_v23, %v425_v24 }
  0x19   : > { %v430_v34 = vrot.slane %v1174_v6, 2  ;;  %v531_v35 = vmax.f32 %v386_v28, %v421_v30  ;;  %v179_v37 = vunpack.c.l.bf16 %v125_v26  ;;  %v1201_v38 = vunpack.c.h.bf16 %v126_v7 }
  0x1a   : > { %v533_v40 = vmax.f32 %v388_v31, %v426_v32  ;;  %v277_v41 = vrot.slane %v173_v12, 1  ;;  %v422_v42 = vrot.slane %v173_v12, 2  ;;  %v282_v45 = vrot.slane %v176_v36, 1 }
  0x1b   : > { %v431_v39 = vsel %vm418_vm1, %v429_v33, %v430_v34  ;;  %v563_v44 = vmax.f32 %v531_v35, %v174_v9  ;;  %v287_v46 = vrot.slane %v179_v37, 1  ;;  %v427_v50 = vrot.slane %v176_v36, 2 }
  0x1c   : > { %v535_v43 = vmax.f32 %v390_v29, %v431_v39  ;;  %v565_v47 = vmax.f32 %v533_v40, %v1172_v5  ;;  %v278_v48 = vsel %vm273_vm0, %v275_v14, %v277_v41  ;;  %v423_v49 = vsel %vm418_vm1, %v420_v20, %v422_v42 }
  0x1d   : > { %v605_v53 = vmax.f32 %v563_v44, %v281_v27  ;;  %v283_v54 = vsel %vm273_vm0, %v280_v18, %v282_v45  ;;  %v1211_v55 = vsel %vm273_vm0, %v285_v16, %v287_v46  ;;  %v387_v57 = vmax.f32 %v1170_v4, %v278_v48  ;;  %v128_v18 = vld [vmem:[%s1165_s11 + $0x2c] sm:$0x1] }
  0x1e   : > { %v567_v52 = vmax.f32 %v535_v43, %v1180_v11  ;;  %v607_v56 = vmax.f32 %v565_v47, %v1189_v22  ;;  %v389_v58 = vmax.f32 %v1178_v10, %v283_v54  ;;  %v391_v59 = vmax.f32 %v1174_v6, %v1211_v55 }
  0x1f   : > { %v644_v60 = vmax.f32 %v605_v53, %v426_v32  ;;  %v428_v61 = vsel %vm418_vm1, %v425_v24, %v427_v50  ;;  %v432_v62 = vrot.slane %v179_v37, 2  ;;  %v1219_v63 = vunpack.c.l.bf16 %v1117_v51  ;;  %v132_v24 = vld [vmem:[%s1165_s11 + $0x3c] sm:$0xff]  }
  0x20   : > { %v646_v0 = vmax.f32 %v607_v56, %v431_v39  ;;  %v532_v1 = vmax.f32 %v387_v57, %v423_v49  ;;  %v534_v2 = vmax.f32 %v389_v58, %v428_v61  ;;  %v289_v3 = vrot.slane %v1180_v11, 1 }
  0x21   : > { %v676_v4 = vmax.f32 %v644_v60, %v1172_v5  ;;  %v433_v7 = vsel %vm418_vm1, %v430_v34, %v432_v62  ;;  %v290_v8 = vrot.slane %v1201_v38, 1  ;;  %v434_v9 = vrot.slane %v1180_v11, 2 }
  0x22   : > { %v536_v12 = vmax.f32 %v391_v59, %v433_v7  ;;  %v564_v13 = vmax.f32 %v532_v1, %v1178_v10  ;;  %v566_v14 = vmax.f32 %v534_v2, %v1174_v6  ;;  %v435_v15 = vrot.slane %v1201_v38, 2 }
  0x23   : > { %v718_v16 = vmax.f32 %v676_v4, %v1189_v22  ;;  %v291_v17 = vsel %vm273_vm0, %v289_v3, %v290_v8  ;;  %v678_v5 = vmax.f32 %v646_v0, %v1180_v11  ;;  %v1234_v19 = vunpack.c.h.bf16 %v1117_v51  ;;  %v131_v51 = vld [vmem:[%s1165_s11 + $0x38] sm:$0x1]  ;;  %v1118_v0 = vld [vmem:[%s1165_s11 + $0x48] sm:$0xff]  }
  0x24   : > { %v568_v20 = vmax.f32 %v536_v12, %v1201_v38  ;;  %v606_v21 = vmax.f32 %v564_v13, %v283_v54  ;;  %v608_v23 = vmax.f32 %v566_v14, %v1211_v55  ;;  %v392_v10 = vmax.f32 %v1180_v11, %v291_v17 }
  0x25   : > { %v757_v25 = vmax.f32 %v718_v16, %v431_v39  ;;  %v436_v26 = vsel %vm418_vm1, %v434_v9, %v435_v15  ;;  %v609_v27 = vmax.f32 %v567_v52, %v291_v17  ;;  %v720_v22 = vmax.f32 %v678_v5, %v291_v17 }
  0x26   : > { %v645_v28 = vmax.f32 %v606_v21, %v428_v61  ;;  %v647_v29 = vmax.f32 %v608_v23, %v433_v7  ;;  %v537_v30 = vmax.f32 %v392_v10, %v436_v26  ;;  %v182_v31 = vunpack.c.l.bf16 %v128_v18 }
  0x27   : > { %v1048_v32 = vpack.c.bf16 %v757_v25, %v757_v25  ;;  %v648_v33 = vmax.f32 %v609_v27, %v436_v26  ;;  %v759_v11 = vmax.f32 %v720_v22, %v436_v26  ;;  %v1246_v34 = vunpack.c.l.bf16 %v132_v24  ;;  %v138_v25 = vld [vmem:[%s1165_s11 + $0x54] sm:$0xff]  }
  0x28   : > { %v677_v35 = vmax.f32 %v645_v28, %v1174_v6  ;;  %v569_v36 = vmax.f32 %v537_v30, %v1219_v63  ;;  %v292_v37 = vrot.slane %v182_v31, 1  ;;  %v437_v39 = vrot.slane %v182_v31, 2 }
  0x29   : > { %918 = vst.msk [vmem:[%s1244_s15] sm:$0xf] %vm917_vm2, %v1048_v32  ;;  %v1050_v40 = vpack.c.bf16 %v759_v11, %v759_v11  ;;  %v679_v41 = vmax.f32 %v647_v29, %v1201_v38  ;;  %v294_v42 = vrot.slane %v1219_v63, 1  ;;  %v295_v43 = vrot.slane %v1234_v19, 1 }
  0x2a   : > { %v719_v44 = vmax.f32 %v677_v35, %v1211_v55  ;;  %v293_v45 = vsel %vm273_vm0, %v290_v8, %v292_v37  ;;  %v438_v6 = vsel %vm418_vm1, %v435_v15, %v437_v39  ;;  %v439_v46 = vrot.slane %v1219_v63, 2 }
  0x2b   : > { %920 = vst.msk [vmem:[%s1244_s15 + $0x8] sm:$0xf] %vm917_vm2, %v1050_v40  ;;  %v393_v47 = vmax.f32 %v1201_v38, %v293_v45  ;;  %v610_v48 = vmax.f32 %v568_v20, %v293_v45  ;;  %v721_v49 = vmax.f32 %v679_v41, %v293_v45  ;;  %v296_v50 = vsel %vm273_vm0, %v294_v42, %v295_v43 }
  0x2c   : > { %v758_v52 = vmax.f32 %v719_v44, %v433_v7  ;;  %v394_v53 = vmax.f32 %v1219_v63, %v296_v50  ;;  %v440_v54 = vrot.slane %v1234_v19, 2  ;;  %v611_v55 = vmax.f32 %v569_v36, %v296_v50 }
  0x2d   : > { %v538_v56 = vmax.f32 %v393_v47, %v438_v6  ;;  %v649_v57 = vmax.f32 %v610_v48, %v438_v6  ;;  %v760_v58 = vmax.f32 %v721_v49, %v438_v6  ;;  %v680_v59 = vmax.f32 %v648_v33, %v1219_v63 }
  0x2e   : > { %v1049_v38 = vpack.c.bf16 %v758_v52, %v758_v52  ;;  %v441_v60 = vsel %vm418_vm1, %v439_v46, %v440_v54  ;;  %v185_v61 = vunpack.c.l.bf16 %v131_v51  ;;  %v1268_v62 = vunpack.c.h.bf16 %v132_v24  ;;  %v134_v24 = vld [vmem:[%s1165_s11 + $0x44] sm:$0x1] }
  0x2f   : > { %v570_v1 = vmax.f32 %v538_v56, %v1234_v19  ;;  %v1051_v2 = vpack.c.bf16 %v760_v58, %v760_v58  ;;  %v539_v3 = vmax.f32 %v394_v53, %v441_v60  ;;  %v650_v4 = vmax.f32 %v611_v55, %v441_v60  ;;  %v137_v55 = vld [vmem:[%s1165_s11 + $0x50] sm:$0x1] }
  0x30   : > { %919 = vst.msk [vmem:[%s1244_s15 + $0x4] sm:$0xf] %vm917_vm2, %v1049_v38  ;;  %v722_v7 = vmax.f32 %v680_v59, %v296_v50  ;;  %v297_v8 = vrot.slane %v185_v61, 1  ;;  %v442_v9 = vrot.slane %v185_v61, 2  ;;  %v681_v63 = vmax.f32 %v649_v57, %v1234_v19 }
  0x31   : > { %921 = vst.msk [vmem:[%s1244_s15 + $0xc] sm:$0xf] %vm917_vm2, %v1051_v2  ;;  %v571_v12 = vmax.f32 %v539_v3, %v1246_v34  ;;  %v1094_v13 = vunpack.c.l.bf16 %v1118_v0  ;;  %v299_v14 = vrot.slane %v1246_v34, 1  ;;  %v300_v15 = vrot.slane %v1268_v62, 1 }
  0x32   : > { %v761_v16 = vmax.f32 %v722_v7, %v441_v60  ;;  %v298_v17 = vsel %vm273_vm0, %v295_v43, %v297_v8  ;;  %v443_v5 = vsel %vm418_vm1, %v440_v54, %v442_v9  ;;  %v444_v18 = vrot.slane %v1246_v34, 2 }
  0x33   : > { %v395_v20 = vmax.f32 %v1234_v19, %v298_v17  ;;  %v612_v21 = vmax.f32 %v570_v1, %v298_v17  ;;  %v723_v23 = vmax.f32 %v681_v63, %v298_v17  ;;  %v301_v10 = vsel %vm273_vm0, %v299_v14, %v300_v15  ;;  %v1119_v1 = vld [vmem:[%s1165_s11 + $0x60] sm:$0xff]  }
  0x34   : > { %v1052_v26 = vpack.c.bf16 %v761_v16, %v761_v16  ;;  %v396_v27 = vmax.f32 %v1246_v34, %v301_v10  ;;  %v445_v22 = vrot.slane %v1268_v62, 2  ;;  %v613_v28 = vmax.f32 %v571_v12, %v301_v10 }
  0x35   : > { %v540_v29 = vmax.f32 %v395_v20, %v443_v5  ;;  %v651_v30 = vmax.f32 %v612_v21, %v443_v5  ;;  %v762_v31 = vmax.f32 %v723_v23, %v443_v5  ;;  %v682_v32 = vmax.f32 %v650_v4, %v1246_v34  ;;  %v140_v20 = vld [vmem:[%s1165_s11 + $0x5c] sm:$0x1] }
  0x36   : > { %922 = vst.msk [vmem:[%s1244_s15 + $0x10] sm:$0xf] %vm917_vm2, %v1052_v26  ;;  %v446_v19 = vsel %vm418_vm1, %v444_v18, %v445_v22  ;;  %v1293_v33 = vunpack.c.h.bf16 %v1118_v0  ;;  %v188_v11 = vunpack.c.l.bf16 %v134_v24  ;;  %v1295_v35 = vunpack.c.l.bf16 %v138_v25 }
  0x37   : > { %v572_v36 = vmax.f32 %v540_v29, %v1268_v62  ;;  %v1053_v37 = vpack.c.bf16 %v762_v31, %v762_v31  ;;  %v541_v39 = vmax.f32 %v396_v27, %v446_v19  ;;  %v652_v40 = vmax.f32 %v613_v28, %v446_v19 }
  0x38   : > { %v724_v41 = vmax.f32 %v682_v32, %v301_v10  ;;  %v302_v42 = vrot.slane %v188_v11, 1  ;;  %v447_v43 = vrot.slane %v188_v11, 2  ;;  %v683_v34 = vmax.f32 %v651_v30, %v1268_v62 }
  0x39   : > { %923 = vst.msk [vmem:[%s1244_s15 + $0x14] sm:$0xf] %vm917_vm2, %v1053_v37  ;;  %v573_v44 = vmax.f32 %v541_v39, %v1094_v13  ;;  %v304_v45 = vrot.slane %v1094_v13, 1  ;;  %v305_v6 = vrot.slane %v1293_v33, 1  ;;  %v449_v46 = vrot.slane %v1094_v13, 2 }
  0x3a   : > { %v763_v47 = vmax.f32 %v724_v41, %v446_v19  ;;  %v303_v48 = vsel %vm273_vm0, %v300_v15, %v302_v42  ;;  %v448_v49 = vsel %vm418_vm1, %v445_v22, %v447_v43  ;;  %v450_v50 = vrot.slane %v1293_v33, 2 }
  0x3b   : > { %v397_v51 = vmax.f32 %v1268_v62, %v303_v48  ;;  %v614_v52 = vmax.f32 %v572_v36, %v303_v48  ;;  %v725_v53 = vmax.f32 %v683_v34, %v303_v48  ;;  %v306_v54 = vsel %vm273_vm0, %v304_v45, %v305_v6 }
  0x3c   : > { %v1054_v56 = vpack.c.bf16 %v763_v47, %v763_v47  ;;  %v398_v57 = vmax.f32 %v1094_v13, %v306_v54  ;;  %v451_v58 = vsel %vm418_vm1, %v449_v46, %v450_v50  ;;  %v615_v59 = vmax.f32 %v573_v44, %v306_v54  ;;  %v144_v44 = vld [vmem:[%s1165_s11 + $0x6c] sm:$0xff]  }
  0x3d   : > { %v542_v38 = vmax.f32 %v397_v51, %v448_v49  ;;  %v653_v60 = vmax.f32 %v614_v52, %v448_v49  ;;  %v764_v61 = vmax.f32 %v725_v53, %v448_v49  ;;  %v684_v0 = vmax.f32 %v652_v40, %v1094_v13  ;;  %v143_v51 = vld [vmem:[%s1165_s11 + $0x68] sm:$0x1] }
  0x3e   : > { %924 = vst.msk [vmem:[%s1244_s15 + $0x18] sm:$0xf] %vm917_vm2, %v1054_v56  ;;  %v543_v2 = vmax.f32 %v398_v57, %v451_v58  ;;  %v654_v62 = vmax.f32 %v615_v59, %v451_v58  ;;  %v191_v3 = vunpack.c.l.bf16 %v137_v55  ;;  %v193_v4 = vunpack.c.h.bf16 %v138_v25 }
  0x3f   : > { %v574_v7 = vmax.f32 %v542_v38, %v1293_v33  ;;  %v1055_v8 = vpack.c.bf16 %v764_v61, %v764_v61  ;;  %v726_v9 = vmax.f32 %v684_v0, %v306_v54  ;;  %v685_v63 = vmax.f32 %v653_v60, %v1293_v33 }
  0x40   : > { %v575_v12 = vmax.f32 %v543_v2, %v1295_v35  ;;  %v307_v14 = vrot.slane %v191_v3, 1  ;;  %v452_v15 = vrot.slane %v191_v3, 2  ;;  %v1315_v16 = vunpack.c.l.bf16 %v1119_v1 }
  0x41   : > { %925 = vst.msk [vmem:[%s1244_s15 + $0x1c] sm:$0xf] %vm917_vm2, %v1055_v8  ;;  %v765_v13 = vmax.f32 %v726_v9, %v451_v58  ;;  %v309_v17 = vrot.slane %v1295_v35, 1  ;;  %v310_v5 = vrot.slane %v193_v4, 1  ;;  %v454_v18 = vrot.slane %v1295_v35, 2 }
  0x42   : > { %v308_v21 = vsel %vm273_vm0, %v305_v6, %v307_v14  ;;  %v453_v23 = vsel %vm418_vm1, %v450_v50, %v452_v15  ;;  %v455_v10 = vrot.slane %v193_v4, 2  ;;  %v686_v24 = vmax.f32 %v654_v62, %v1295_v35 }
  0x43   : > { %v1056_v25 = vpack.c.bf16 %v765_v13, %v765_v13  ;;  %v399_v26 = vmax.f32 %v1293_v33, %v308_v21  ;;  %v616_v27 = vmax.f32 %v574_v7, %v308_v21  ;;  %v727_v22 = vmax.f32 %v685_v63, %v308_v21 }
  0x44   : > { %v311_v28 = vsel %vm273_vm0, %v309_v17, %v310_v5  ;;  %v456_v29 = vsel %vm418_vm1, %v454_v18, %v455_v10  ;;  %v1328_v30 = vunpack.c.h.bf16 %v1119_v1  ;;  %v194_v31 = vunpack.c.l.bf16 %v140_v20 }
  0x45   : > { %926 = vst.msk [vmem:[%s1244_s15 + $0x20] sm:$0xf] %vm917_vm2, %v1056_v25  ;;  %v544_v32 = vmax.f32 %v399_v26, %v453_v23  ;;  %v655_v19 = vmax.f32 %v616_v27, %v453_v23  ;;  %v766_v11 = vmax.f32 %v727_v22, %v453_v23  ;;  %v400_v36 = vmax.f32 %v1295_v35, %v311_v28 }
  0x46   : > { %v617_v37 = vmax.f32 %v575_v12, %v311_v28  ;;  %v728_v33 = vmax.f32 %v686_v24, %v311_v28  ;;  %v312_v39 = vrot.slane %v194_v31, 1  ;;  %v457_v40 = vrot.slane %v194_v31, 2  ;;  %v146_v24 = vld [vmem:[%s1165_s11 + $0x74] sm:$0x1] }
  0x47   : > { %v576_v41 = vmax.f32 %v544_v32, %v193_v4  ;;  %v1057_v42 = vpack.c.bf16 %v766_v11, %v766_v11  ;;  %v545_v43 = vmax.f32 %v400_v36, %v456_v29  ;;  %v687_v34 = vmax.f32 %v655_v19, %v193_v4 }
  0x48   : > { %v656_v45 = vmax.f32 %v617_v37, %v456_v29  ;;  %v767_v6 = vmax.f32 %v728_v33, %v456_v29  ;;  %v313_v46 = vsel %vm273_vm0, %v310_v5, %v312_v39  ;;  %v458_v47 = vsel %vm418_vm1, %v455_v10, %v457_v40  ;;  %v150_v37 = vld [vmem:[%s1165_s11 + $0x84] sm:$0xff]  }
  0x49   : > { %927 = vst.msk [vmem:[%s1244_s15 + $0x24] sm:$0xf] %vm917_vm2, %v1057_v42  ;;  %v577_v35 = vmax.f32 %v545_v43, %v1315_v16  ;;  %v401_v48 = vmax.f32 %v193_v4, %v313_v46  ;;  %v618_v49 = vmax.f32 %v576_v41, %v313_v46  ;;  %v729_v50 = vmax.f32 %v687_v34, %v313_v46  ;;  %v1120_v4 = vld [vmem:[%s1165_s11 + $0x78] sm:$0xff]  }
  0x4a   : > { %v1058_v52 = vpack.c.bf16 %v767_v6, %v767_v6  ;;  %v198_v53 = vunpack.c.l.bf16 %v144_v44  ;;  %v314_v54 = vrot.slane %v1315_v16, 1  ;;  %v315_v55 = vrot.slane %v1328_v30, 1 }
  0x4b   : > { %v546_v56 = vmax.f32 %v401_v48, %v458_v47  ;;  %v657_v57 = vmax.f32 %v618_v49, %v458_v47  ;;  %v768_v58 = vmax.f32 %v729_v50, %v458_v47  ;;  %v459_v59 = vrot.slane %v1315_v16, 2 }
  0x4c   : > { %928 = vst.msk [vmem:[%s1244_s15 + $0x28] sm:$0xf] %vm917_vm2, %v1058_v52  ;;  %v316_v38 = vsel %vm273_vm0, %v314_v54, %v315_v55  ;;  %v460_v60 = vrot.slane %v1328_v30, 2  ;;  %v688_v61 = vmax.f32 %v656_v45, %v1315_v16  ;;  %v197_v0 = vunpack.c.l.bf16 %v143_v51 }
  0x4d   : > { %v578_v1 = vmax.f32 %v546_v56, %v1328_v30  ;;  %v1059_v2 = vpack.c.bf16 %v768_v58, %v768_v58  ;;  %v402_v62 = vmax.f32 %v1315_v16, %v316_v38  ;;  %v619_v3 = vmax.f32 %v577_v35, %v316_v38 }
  0x4e   : > { %v461_v7 = vsel %vm418_vm1, %v459_v59, %v460_v60  ;;  %v730_v8 = vmax.f32 %v688_v61, %v316_v38  ;;  %v199_v9 = vunpack.c.h.bf16 %v144_v44  ;;  %v317_v63 = vrot.slane %v197_v0, 1 }
  0x4f   : > { %929 = vst.msk [vmem:[%s1244_s15 + $0x2c] sm:$0xf] %vm917_vm2, %v1059_v2  ;;  %v547_v12 = vmax.f32 %v402_v62, %v461_v7  ;;  %v658_v14 = vmax.f32 %v619_v3, %v461_v7  ;;  %v462_v15 = vrot.slane %v197_v0, 2  ;;  %v689_v13 = vmax.f32 %v657_v57, %v1328_v30 }
  0x50   : > { %v769_v17 = vmax.f32 %v730_v8, %v461_v7  ;;  %v318_v5 = vsel %vm273_vm0, %v315_v55, %v317_v63  ;;  %v1356_v16 = vunpack.c.l.bf16 %v1120_v4  ;;  %v319_v18 = vrot.slane %v198_v53, 1  ;;  %v149_v55 = vld [vmem:[%s1165_s11 + $0x80] sm:$0x1] }
  0x51   : > { %v579_v20 = vmax.f32 %v547_v12, %v198_v53  ;;  %v403_v21 = vmax.f32 %v1328_v30, %v318_v5  ;;  %v463_v23 = vsel %vm418_vm1, %v460_v60, %v462_v15  ;;  %v620_v10 = vmax.f32 %v578_v1, %v318_v5 }
  0x52   : > { %v1060_v25 = vpack.c.bf16 %v769_v17, %v769_v17  ;;  %v731_v26 = vmax.f32 %v689_v13, %v318_v5  ;;  %v320_v27 = vrot.slane %v199_v9, 1  ;;  %v464_v22 = vrot.slane %v198_v53, 2 }
  0x53   : > { %v548_v28 = vmax.f32 %v403_v21, %v463_v23  ;;  %v659_v29 = vmax.f32 %v620_v10, %v463_v23  ;;  %v465_v31 = vrot.slane %v199_v9, 2  ;;  %v690_v32 = vmax.f32 %v658_v14, %v198_v53 }
  0x54   : > { %930 = vst.msk [vmem:[%s1244_s15 + $0x30] sm:$0xf] %vm917_vm2, %v1060_v25  ;;  %v770_v19 = vmax.f32 %v731_v26, %v463_v23  ;;  %v321_v11 = vsel %vm273_vm0, %v319_v18, %v320_v27  ;;  %v1364_v30 = vunpack.c.h.bf16 %v1120_v4  ;;  %v200_v36 = vunpack.c.l.bf16 %v146_v24  ;;  %v1121_v4 = vld [vmem:[%s1165_s11 + $0x90] sm:$0xff]  }
  0x55   : > { %v580_v33 = vmax.f32 %v548_v28, %v199_v9  ;;  %v404_v39 = vmax.f32 %v198_v53, %v321_v11  ;;  %v466_v40 = vsel %vm418_vm1, %v464_v22, %v465_v31  ;;  %v621_v41 = vmax.f32 %v579_v20, %v321_v11 }
  0x56   : > { %v1061_v42 = vpack.c.bf16 %v770_v19, %v770_v19  ;;  %v732_v43 = vmax.f32 %v690_v32, %v321_v11  ;;  %v322_v34 = vrot.slane %v200_v36, 1  ;;  %v467_v44 = vrot.slane %v200_v36, 2  ;;  %v152_v32 = vld [vmem:[%s1165_s11 + $0x8c] sm:$0x1] }
  0x57   : > { %v549_v45 = vmax.f32 %v404_v39, %v466_v40  ;;  %v660_v6 = vmax.f32 %v621_v41, %v466_v40  ;;  %v691_v46 = vmax.f32 %v659_v29, %v199_v9  ;;  %v1368_v47 = vunpack.c.l.bf16 %v150_v37 }
  0x58   : > { %931 = vst.msk [vmem:[%s1244_s15 + $0x34] sm:$0xf] %vm917_vm2, %v1061_v42  ;;  %v771_v35 = vmax.f32 %v732_v43, %v466_v40  ;;  %v323_v48 = vsel %vm273_vm0, %v320_v27, %v322_v34  ;;  %v468_v49 = vsel %vm418_vm1, %v465_v31, %v467_v44  ;;  %v324_v50 = vrot.slane %v1356_v16, 1 }
  0x59   : > { %v581_v51 = vmax.f32 %v549_v45, %v1356_v16  ;;  %v405_v52 = vmax.f32 %v199_v9, %v323_v48  ;;  %v622_v53 = vmax.f32 %v580_v33, %v323_v48  ;;  %v733_v54 = vmax.f32 %v691_v46, %v323_v48  ;;  %v156_v33 = vld [vmem:[%s1165_s11 + $0x9c] sm:$0xff]   ;;  %v155_v48 = vld [vmem:[%s1165_s11 + $0x98] sm:$0x1] }
  0x5a   : > { %v1062_v56 = vpack.c.bf16 %v771_v35, %v771_v35  ;;  %v325_v57 = vrot.slane %v1364_v30, 1  ;;  %v469_v58 = vrot.slane %v1356_v16, 2  ;;  %v470_v59 = vrot.slane %v1364_v30, 2 }
  0x5b   : > { %v550_v38 = vmax.f32 %v405_v52, %v468_v49  ;;  %v661_v60 = vmax.f32 %v622_v53, %v468_v49  ;;  %v772_v61 = vmax.f32 %v733_v54, %v468_v49  ;;  %v692_v0 = vmax.f32 %v660_v6, %v1356_v16 }
  0x5c   : > { %932 = vst.msk [vmem:[%s1244_s15 + $0x38] sm:$0xf] %vm917_vm2, %v1062_v56  ;;  %v326_v1 = vsel %vm273_vm0, %v324_v50, %v325_v57  ;;  %v471_v2 = vsel %vm418_vm1, %v469_v58, %v470_v59  ;;  %v203_v62 = vunpack.c.l.bf16 %v149_v55  ;;  %v1385_v3 = vunpack.c.h.bf16 %v150_v37 }
  0x5d   : > { %v582_v7 = vmax.f32 %v550_v38, %v1364_v30  ;;  %v1063_v8 = vpack.c.bf16 %v772_v61, %v772_v61  ;;  %v406_v9 = vmax.f32 %v1356_v16, %v326_v1  ;;  %v623_v63 = vmax.f32 %v581_v51, %v326_v1 }
  0x5e   : > { %v734_v12 = vmax.f32 %v692_v0, %v326_v1  ;;  %v327_v14 = vrot.slane %v203_v62, 1  ;;  %v472_v15 = vrot.slane %v203_v62, 2  ;;  %v693_v13 = vmax.f32 %v661_v60, %v1364_v30 }
  0x5f   : > { %933 = vst.msk [vmem:[%s1244_s15 + $0x3c] sm:$0xf] %vm917_vm2, %v1063_v8  ;;  %v551_v17 = vmax.f32 %v406_v9, %v471_v2  ;;  %v662_v5 = vmax.f32 %v623_v63, %v471_v2  ;;  %v1393_v18 = vunpack.c.l.bf16 %v1121_v4  ;;  %v329_v20 = vrot.slane %v1368_v47, 1 }
  0x60   : > { %v773_v21 = vmax.f32 %v734_v12, %v471_v2  ;;  %v328_v23 = vsel %vm273_vm0, %v325_v57, %v327_v14  ;;  %v473_v16 = vsel %vm418_vm1, %v470_v59, %v472_v15  ;;  %v330_v10 = vrot.slane %v1385_v3, 1 }
  0x61   : > { %v583_v24 = vmax.f32 %v551_v17, %v1368_v47  ;;  %v407_v25 = vmax.f32 %v1364_v30, %v328_v23  ;;  %v624_v26 = vmax.f32 %v582_v7, %v328_v23  ;;  %v735_v27 = vmax.f32 %v693_v13, %v328_v23  ;;  %v1122_v13 = vld [vmem:[%s1165_s11 + $0xa8] sm:$0xff]  }
  0x62   : > { %v1064_v22 = vpack.c.bf16 %v773_v21, %v773_v21  ;;  %v331_v28 = vsel %vm273_vm0, %v329_v20, %v330_v10  ;;  %v474_v29 = vrot.slane %v1368_v47, 2  ;;  %v475_v31 = vrot.slane %v1385_v3, 2 }
  0x63   : > { %v552_v19 = vmax.f32 %v407_v25, %v473_v16  ;;  %v663_v11 = vmax.f32 %v624_v26, %v473_v16  ;;  %v774_v36 = vmax.f32 %v735_v27, %v473_v16  ;;  %v408_v37 = vmax.f32 %v1368_v47, %v331_v28 }
  0x64   : > { %934 = vst.msk [vmem:[%s1244_s15 + $0x40] sm:$0xf] %vm917_vm2, %v1064_v22  ;;  %v476_v30 = vsel %vm418_vm1, %v474_v29, %v475_v31  ;;  %v625_v39 = vmax.f32 %v583_v24, %v331_v28  ;;  %v694_v40 = vmax.f32 %v662_v5, %v1368_v47  ;;  %v1107_v41 = vunpack.c.h.bf16 %v1121_v4 }
  0x65   : > { %v584_v42 = vmax.f32 %v552_v19, %v1385_v3  ;;  %v1065_v43 = vpack.c.bf16 %v774_v36, %v774_v36  ;;  %v553_v34 = vmax.f32 %v408_v37, %v476_v30  ;;  %v206_v44 = vunpack.c.l.bf16 %v152_v32  ;;  %v158_v32 = vld [vmem:[%s1165_s11 + $0xa4] sm:$0x1] }
  0x66   : > { %v664_v45 = vmax.f32 %v625_v39, %v476_v30  ;;  %v736_v6 = vmax.f32 %v694_v40, %v331_v28  ;;  %v695_v46 = vmax.f32 %v663_v11, %v1385_v3  ;;  %v1413_v35 = vunpack.c.l.bf16 %v156_v33 }
  0x67   : > { %935 = vst.msk [vmem:[%s1244_s15 + $0x44] sm:$0xf] %vm917_vm2, %v1065_v43  ;;  %v585_v49 = vmax.f32 %v553_v34, %v1393_v18  ;;  %v332_v50 = vrot.slane %v206_v44, 1  ;;  %v477_v51 = vrot.slane %v206_v44, 2  ;;  %v334_v47 = vrot.slane %v1393_v18, 1 }
  0x68   : > { %v775_v52 = vmax.f32 %v736_v6, %v476_v30  ;;  %v335_v53 = vrot.slane %v1107_v41, 1  ;;  %v479_v54 = vrot.slane %v1393_v18, 2  ;;  %v480_v55 = vrot.slane %v1107_v41, 2 }
  0x69   : > { %v333_v56 = vsel %vm273_vm0, %v330_v10, %v332_v50  ;;  %v478_v57 = vsel %vm418_vm1, %v475_v31, %v477_v51  ;;  %v696_v58 = vmax.f32 %v664_v45, %v1393_v18  ;;  %v209_v59 = vunpack.c.l.bf16 %v155_v48 }
  0x6a   : > { %v1066_v38 = vpack.c.bf16 %v775_v52, %v775_v52  ;;  %v409_v60 = vmax.f32 %v1385_v3, %v333_v56  ;;  %v626_v61 = vmax.f32 %v584_v42, %v333_v56  ;;  %v737_v0 = vmax.f32 %v695_v46, %v333_v56 }
  0x6b   : > { %v336_v1 = vsel %vm273_vm0, %v334_v47, %v335_v53  ;;  %v481_v2 = vsel %vm418_vm1, %v479_v54, %v480_v55  ;;  %v1427_v62 = vunpack.c.h.bf16 %v156_v33  ;;  %v337_v4 = vrot.slane %v209_v59, 1  ;;  %v162_v33 = vld [vmem:[%s1165_s11 + $0xb4] sm:$0xff]  }
  0x6c   : > { %936 = vst.msk [vmem:[%s1244_s15 + $0x48] sm:$0xf] %vm917_vm2, %v1066_v38  ;;  %v554_v7 = vmax.f32 %v409_v60, %v478_v57  ;;  %v665_v8 = vmax.f32 %v626_v61, %v478_v57  ;;  %v776_v9 = vmax.f32 %v737_v0, %v478_v57  ;;  %v410_v63 = vmax.f32 %v1393_v18, %v336_v1 }
  0x6d   : > { %v627_v12 = vmax.f32 %v585_v49, %v336_v1  ;;  %v738_v3 = vmax.f32 %v696_v58, %v336_v1  ;;  %v338_v14 = vsel %vm273_vm0, %v335_v53, %v337_v4  ;;  %v482_v15 = vrot.slane %v209_v59, 2 }
  0x6e   : > { %v586_v17 = vmax.f32 %v554_v7, %v1107_v41  ;;  %v1067_v5 = vpack.c.bf16 %v776_v9, %v776_v9  ;;  %v555_v20 = vmax.f32 %v410_v63, %v481_v2  ;;  %v411_v21 = vmax.f32 %v1107_v41, %v338_v14 }
  0x6f   : > { %v666_v23 = vmax.f32 %v627_v12, %v481_v2  ;;  %v777_v16 = vmax.f32 %v738_v3, %v481_v2  ;;  %v483_v10 = vsel %vm418_vm1, %v480_v55, %v482_v15  ;;  %v697_v24 = vmax.f32 %v665_v8, %v1107_v41  ;;  %v161_v55 = vld [vmem:[%s1165_s11 + $0xb0] sm:$0x1] }
  0x70   : > { %937 = vst.msk [vmem:[%s1244_s15 + $0x4c] sm:$0xf] %vm917_vm2, %v1067_v5  ;;  %v587_v18 = vmax.f32 %v555_v20, %v1413_v35  ;;  %v556_v25 = vmax.f32 %v411_v21, %v483_v10  ;;  %v628_v26 = vmax.f32 %v586_v17, %v338_v14  ;;  %v1110_v27 = vunpack.c.l.bf16 %v1122_v13 }
  0x71   : > { %v1068_v22 = vpack.c.bf16 %v777_v16, %v777_v16  ;;  %v739_v28 = vmax.f32 %v697_v24, %v338_v14  ;;  %v339_v29 = vrot.slane %v1413_v35, 1  ;;  %v340_v31 = vrot.slane %v1427_v62, 1 }
  0x72   : > { %v588_v19 = vmax.f32 %v556_v25, %v1427_v62  ;;  %v667_v11 = vmax.f32 %v628_v26, %v483_v10  ;;  %v484_v36 = vrot.slane %v1413_v35, 2  ;;  %v485_v37 = vrot.slane %v1427_v62, 2 }
  0x73   : > { %938 = vst.msk [vmem:[%s1244_s15 + $0x50] sm:$0xf] %vm917_vm2, %v1068_v22  ;;  %v778_v30 = vmax.f32 %v739_v28, %v483_v10  ;;  %v341_v39 = vsel %vm273_vm0, %v339_v29, %v340_v31  ;;  %v698_v40 = vmax.f32 %v666_v23, %v1413_v35  ;;  %v1111_v41 = vunpack.c.h.bf16 %v1122_v13 }
  0x74   : > { %v412_v42 = vmax.f32 %v1413_v35, %v341_v39  ;;  %v486_v43 = vsel %vm418_vm1, %v484_v36, %v485_v37  ;;  %v629_v34 = vmax.f32 %v587_v18, %v341_v39  ;;  %v212_v44 = vunpack.c.l.bf16 %v158_v32 }
  0x75   : > { %v1069_v45 = vpack.c.bf16 %v778_v30, %v778_v30  ;;  %v740_v6 = vmax.f32 %v698_v40, %v341_v39  ;;  %v699_v46 = vmax.f32 %v667_v11, %v1427_v62  ;;  %v1452_v48 = vunpack.c.l.bf16 %v162_v33  ;;  %v1123_v40 = vld [vmem:[%s1165_s11 + $0xc0] sm:$0xff]  }
  0x76   : > { %v557_v49 = vmax.f32 %v412_v42, %v486_v43  ;;  %v668_v50 = vmax.f32 %v629_v34, %v486_v43  ;;  %v342_v51 = vrot.slane %v212_v44, 1  ;;  %v487_v47 = vrot.slane %v212_v44, 2 }
  0x77   : > { %939 = vst.msk [vmem:[%s1244_s15 + $0x54] sm:$0xf] %vm917_vm2, %v1069_v45  ;;  %v779_v52 = vmax.f32 %v740_v6, %v486_v43  ;;  %v344_v53 = vrot.slane %v1110_v27, 1  ;;  %v345_v35 = vrot.slane %v1111_v41, 1  ;;  %v489_v54 = vrot.slane %v1110_v27, 2 }
  0x78   : > { %v589_v56 = vmax.f32 %v557_v49, %v1110_v27  ;;  %v343_v57 = vsel %vm273_vm0, %v340_v31, %v342_v51  ;;  %v488_v58 = vsel %vm418_vm1, %v485_v37, %v487_v47  ;;  %v490_v59 = vrot.slane %v1111_v41, 2 }
  0x79   : > { %v1070_v38 = vpack.c.bf16 %v779_v52, %v779_v52  ;;  %v413_v60 = vmax.f32 %v1427_v62, %v343_v57  ;;  %v630_v61 = vmax.f32 %v588_v19, %v343_v57  ;;  %v741_v0 = vmax.f32 %v699_v46, %v343_v57 }
  0x7a   : > { %v346_v1 = vsel %vm273_vm0, %v344_v53, %v345_v35  ;;  %v491_v2 = vsel %vm418_vm1, %v489_v54, %v490_v59  ;;  %v700_v4 = vmax.f32 %v668_v50, %v1110_v27  ;;  %v215_v7 = vunpack.c.l.bf16 %v161_v55 }
  0x7b   : > { %940 = vst.msk [vmem:[%s1244_s15 + $0x58] sm:$0xf] %vm917_vm2, %v1070_v38  ;;  %v558_v8 = vmax.f32 %v413_v60, %v488_v58  ;;  %v669_v9 = vmax.f32 %v630_v61, %v488_v58  ;;  %v780_v63 = vmax.f32 %v741_v0, %v488_v58  ;;  %v414_v12 = vmax.f32 %v1110_v27, %v346_v1  ;;  %v164_v27 = vld [vmem:[%s1165_s11 + $0xbc] sm:$0x1]  ;;  %v167_v58 = vld [vmem:[%s1165_s11 + $0xc8] sm:$0x1] }
  0x7c   : > { %v631_v3 = vmax.f32 %v589_v56, %v346_v1  ;;  %v742_v14 = vmax.f32 %v700_v4, %v346_v1  ;;  %v217_v15 = vunpack.c.h.bf16 %v162_v33  ;;  %v347_v62 = vrot.slane %v215_v7, 1 }
  0x7d   : > { %v590_v13 = vmax.f32 %v558_v8, %v1111_v41  ;;  %v1071_v17 = vpack.c.bf16 %v780_v63, %v780_v63  ;;  %v559_v5 = vmax.f32 %v414_v12, %v491_v2  ;;  %v492_v20 = vrot.slane %v215_v7, 2 }
  0x7e   : > { %v670_v21 = vmax.f32 %v631_v3, %v491_v2  ;;  %v781_v23 = vmax.f32 %v742_v14, %v491_v2  ;;  %v348_v16 = vsel %vm273_vm0, %v345_v35, %v347_v62  ;;  %v701_v10 = vmax.f32 %v669_v9, %v1111_v41 }
  0x7f   : > { %941 = vst.msk [vmem:[%s1244_s15 + $0x5c] sm:$0xf] %vm917_vm2, %v1071_v17  ;;  %v591_v24 = vmax.f32 %v559_v5, %v1452_v48  ;;  %v415_v18 = vmax.f32 %v1111_v41, %v348_v16  ;;  %v493_v25 = vsel %vm418_vm1, %v490_v59, %v492_v20  ;;  %v632_v26 = vmax.f32 %v590_v13, %v348_v16  ;;  %v168_v59 = vld [vmem:[%s1165_s11 + $0xcc] sm:$0xff]   ;;  %v170_v13 = vld [vmem:[%s1165_s11 + $0xd4] sm:$0x1] }
  0x80   : > { %v1072_v22 = vpack.c.bf16 %v781_v23, %v781_v23  ;;  %v743_v28 = vmax.f32 %v701_v10, %v348_v16  ;;  %v349_v29 = vrot.slane %v1452_v48, 1  ;;  %v350_v31 = vrot.slane %v217_v15, 1 }
  0x81   : > { %v560_v32 = vmax.f32 %v415_v18, %v493_v25  ;;  %v671_v19 = vmax.f32 %v632_v26, %v493_v25  ;;  %v494_v11 = vrot.slane %v1452_v48, 2  ;;  %v495_v36 = vrot.slane %v217_v15, 2 }
  0x82   : > { %942 = vst.msk [vmem:[%s1244_s15 + $0x60] sm:$0xf] %vm917_vm2, %v1072_v22  ;;  %v782_v37 = vmax.f32 %v743_v28, %v493_v25  ;;  %v351_v33 = vsel %vm273_vm0, %v349_v29, %v350_v31  ;;  %v702_v30 = vmax.f32 %v670_v21, %v1452_v48  ;;  %v218_v39 = vunpack.c.l.bf16 %v164_v27 }
  0x83   : > { %v592_v41 = vmax.f32 %v560_v32, %v217_v15  ;;  %v416_v42 = vmax.f32 %v1452_v48, %v351_v33  ;;  %v496_v43 = vsel %vm418_vm1, %v494_v11, %v495_v36  ;;  %v633_v34 = vmax.f32 %v591_v24, %v351_v33 }
  0x84   : > { %v1073_v44 = vpack.c.bf16 %v782_v37, %v782_v37  ;;  %v744_v45 = vmax.f32 %v702_v30, %v351_v33  ;;  %v352_v6 = vrot.slane %v218_v39, 1  ;;  %v497_v46 = vrot.slane %v218_v39, 2 }
  0x85   : > { %v561_v49 = vmax.f32 %v416_v42, %v496_v43  ;;  %v672_v50 = vmax.f32 %v633_v34, %v496_v43  ;;  %v703_v51 = vmax.f32 %v671_v19, %v217_v15  ;;  %v1114_v47 = vunpack.c.l.bf16 %v1123_v40 }
  0x86   : > { %943 = vst.msk [vmem:[%s1244_s15 + $0x64] sm:$0xf] %vm917_vm2, %v1073_v44  ;;  %v783_v52 = vmax.f32 %v744_v45, %v496_v43  ;;  %v353_v53 = vsel %vm273_vm0, %v350_v31, %v352_v6  ;;  %v498_v48 = vsel %vm418_vm1, %v495_v36, %v497_v46  ;;  %v1115_v35 = vunpack.c.h.bf16 %v1123_v40 }
  0x87   : > { %v417_v54 = vmax.f32 %v217_v15, %v353_v53  ;;  %v634_v55 = vmax.f32 %v592_v41, %v353_v53  ;;  %v745_v56 = vmax.f32 %v703_v51, %v353_v53  ;;  %v593_v57 = vmax.f32 %v561_v49, %v1114_v47 }
  0x88   : > { %v1074_v38 = vpack.c.bf16 %v783_v52, %v783_v52  ;;  %v598_v60 = vrot.slane %v1114_v47, 1  ;;  %v599_v61 = vrot.slane %v1115_v35, 1  ;;  %v637_v0 = vrot.slane %v1114_v47, 2 }
  0x89   : > { %v562_v1 = vmax.f32 %v417_v54, %v498_v48  ;;  %v673_v2 = vmax.f32 %v634_v55, %v498_v48  ;;  %v784_v4 = vmax.f32 %v745_v56, %v498_v48  ;;  %v638_v7 = vrot.slane %v1115_v35, 2 }
  0x8a   : > { %944 = vst.msk [vmem:[%s1244_s15 + $0x68] sm:$0xf] %vm917_vm2, %v1074_v38  ;;  %v600_v8 = vsel %vm273_vm0, %v598_v60, %v599_v61  ;;  %v704_v9 = vmax.f32 %v672_v50, %v1114_v47  ;;  %v221_v63 = vunpack.c.l.bf16 %v167_v58  ;;  %v222_v12 = vunpack.c.l.bf16 %v168_v59 }
  0x8b   : > { %v1075_v3 = vpack.c.bf16 %v784_v4, %v784_v4  ;;  %v635_v14 = vmax.f32 %v593_v57, %v600_v8  ;;  %v639_v15 = vsel %vm418_vm1, %v637_v0, %v638_v7  ;;  %v594_v62 = vmax.f32 %v562_v1, %v1115_v35 }
  0x8c   : > { %v746_v17 = vmax.f32 %v704_v9, %v600_v8  ;;  %v601_v5 = vrot.slane %v221_v63, 1  ;;  %v640_v20 = vrot.slane %v221_v63, 2  ;;  %v705_v21 = vmax.f32 %v673_v2, %v1115_v35 }
  0x8d   : > { %945 = vst.msk [vmem:[%s1244_s15 + $0x6c] sm:$0xf] %vm917_vm2, %v1075_v3  ;;  %v674_v23 = vmax.f32 %v635_v14, %v639_v15  ;;  %v223_v16 = vunpack.c.h.bf16 %v168_v59  ;;  %v711_v10 = vrot.slane %v222_v12, 1  ;;  %v750_v24 = vrot.slane %v222_v12, 2 }
  0x8e   : > { %v785_v18 = vmax.f32 %v746_v17, %v639_v15  ;;  %v602_v25 = vsel %vm273_vm0, %v599_v61, %v601_v5  ;;  %v641_v26 = vsel %vm418_vm1, %v638_v7, %v640_v20  ;;  %v224_v27 = vunpack.c.l.bf16 %v170_v13 }
  0x8f   : > { %v636_v22 = vmax.f32 %v594_v62, %v602_v25  ;;  %v747_v28 = vmax.f32 %v705_v21, %v602_v25  ;;  %v706_v29 = vmax.f32 %v674_v23, %v222_v12  ;;  %v712_v31 = vrot.slane %v223_v16, 1 }
  0x90   : > { %v1076_v32 = vpack.c.bf16 %v785_v18, %v785_v18  ;;  %v751_v19 = vrot.slane %v223_v16, 2  ;;  %v714_v11 = vrot.slane %v224_v27, 1  ;;  %v753_v36 = vrot.slane %v224_v27, 2 }
  0x91   : > { %v675_v37 = vmax.f32 %v636_v22, %v641_v26  ;;  %v786_v33 = vmax.f32 %v747_v28, %v641_v26  ;;  %v713_v30 = vsel %vm273_vm0, %v711_v10, %v712_v31 }
  0x92   : > { %946 = vst.msk [vmem:[%s1244_s15 + $0x70] sm:$0xf] %vm917_vm2, %v1076_v32  ;;  %v748_v39 = vmax.f32 %v706_v29, %v713_v30  ;;  %v752_v40 = vsel %vm418_vm1, %v750_v24, %v751_v19  ;;  %v715_v41 = vsel %vm273_vm0, %v712_v31, %v714_v11  ;;  %v754_v44 = vsel %vm418_vm1, %v751_v19, %v753_v36 }
  0x93   : > { %v1077_v42 = vpack.c.bf16 %v786_v33, %v786_v33  ;;  %v707_v43 = vmax.f32 %v675_v37, %v223_v16 }
  0x94   : > { %v787_v34 = vmax.f32 %v748_v39, %v752_v40 }
  0x95   : > { %947 = vst.msk [vmem:[%s1244_s15 + $0x74] sm:$0xf] %vm917_vm2, %v1077_v42  ;;  %v749_v45 = vmax.f32 %v707_v43, %v715_v41 }
  0x96   : > { %v1078_v6 = vpack.c.bf16 %v787_v34, %v787_v34 }
  0x97   : > { %v788_v46 = vmax.f32 %v749_v45, %v754_v44 }
  0x98   : > { %948 = vst.msk [vmem:[%s1244_s15 + $0x78] sm:$0xf] %vm917_vm2, %v1078_v6 }
  0x99   : > { %v1079_v49 = vpack.c.bf16 %v788_v46, %v788_v46 }
  0x9b   : > { %949 = vst.msk [vmem:[%s1244_s15 + $0x7c] sm:$0xf] %vm917_vm2, %v1079_v49 }
  0x9c PF: > { %s11_s6 = sadd.s32 1, %s1139_s6  }
  0x9d   : > { %p8_p4 = scmp.ge.s32.totalorder %s11_s6, 4  }
  0x9f   :  { %10 = sbr.rel (!%p8_p4) target bundleno = 1 (0x1), region = 54 }

// kernel: densenet_forward.28
= control target key start
LH: loop header
LB: loop body
LE: loop exit
PB: predicated region body
PF: predicated region fallthrough
CT: control target
= control target key end

     0   :  { %vm28_vm0 = vcmask 261120   ;;  %v607_v1 = vmov 0.0   ;;  %vm171_vm1 = vcmask 130048   ;;  %vm471_vm2 = vcmask 257024   ;;  %s858_s1 = inlined_call_operand.vmem [shape: bf16[16,32], index: 1, kind: input, shape index: {}]   ;;  %s859_s0 = inlined_call_operand.vmem [shape: bf16[128,16], index: 0, kind: input, shape index: {}]   ;;  %s860_s2 = inlined_call_operand.vmem [shape: f32[1,16], index: 2, kind: input, shape index: {}]   ;;  %s861_s3 = inlined_call_operand.vmem [shape: f32[1,16], index: 3, kind: input, shape index: {}]   ;;  %s862_s4 = inlined_call_operand.vmem [shape: f32[1,32], index: 4, kind: input, shape index: {}]   ;;  %s863_s5 = inlined_call_operand.vmem [shape: f32[1,32], index: 5, kind: input, shape index: {}]   ;;  %s864_s6 = inlined_call_operand.vmem [shape: bf16[128,32], index: 6, kind: output, shape index: {}]  }
   0x1   :  { %v606_v0 = vld [vmem:[%s858_s1] sm:$0xff]   ;;  %31 = vst.msk [vmem:[#allocation2 + $0x10] sm:$0xff] %vm28_vm0, %v607_v1  ;;  %29 = vst.msk [vmem:[#allocation2] sm:$0xff] %vm28_vm0, %v607_v1  ;;  %v569_v7 = vld [vmem:[%s859_s0 + $0x8] sm:$0xff]  }
   0x2   :  { %30 = vst.msk [vmem:[#allocation2 + $0x8] sm:$0xff] %vm28_vm0, %v607_v1  ;;  %32 = vst.msk [vmem:[#allocation2 + $0x18] sm:$0xff] %vm28_vm0, %v607_v1  ;;  %v538_v2 = vld [vmem:[%s859_s0] sm:$0xff]   ;;  %585 = vmatprep.subr.bf16.mxu0 %v606_v0  ;;  %603 = vmatprep.subr.bf16.mxu1 %v606_v0  ;;  %v573_v8 = vld [vmem:[%s859_s0 + $0x28] sm:$0xff]   ;;  %v543_v12 = vunpack.c.l.bf16 %v569_v7  ;;  %v544_v13 = vunpack.c.h.bf16 %v569_v7 }
   0x3   :  { %33 = vst.msk [vmem:[#allocation2 + $0x20] sm:$0xff] %vm28_vm0, %v607_v1  ;;  %34 = vst.msk [vmem:[#allocation2 + $0x28] sm:$0xff] %vm28_vm0, %v607_v1  ;;  %v668_v3 = vld [vmem:[%s860_s2] ss:$0 sm:$0xff]  ;;  %v539_v4 = vunpack.c.l.bf16 %v538_v2  ;;  %v540_v5 = vunpack.c.h.bf16 %v538_v2  ;;  %586 = vmatpush3.bf16.msra.mxu0 %v606_v0  ;;  %604 = vmatpush3.bf16.msra.mxu1 %v606_v0  ;;  %v559_v16 = vunpack.c.l.bf16 %v573_v8  ;;  %v560_v17 = vunpack.c.h.bf16 %v573_v8  ;;  %v570_v30 = vld [vmem:[%s859_s0 + $0x10] sm:$0xff]  }
   0x4   :  { %35 = vst.msk [vmem:[#allocation2 + $0x30] sm:$0xff] %vm28_vm0, %v607_v1  ;;  %36 = vst.msk [vmem:[#allocation2 + $0x38] sm:$0xff] %vm28_vm0, %v607_v1  ;;  %v572_v6 = vld [vmem:[%s859_s0 + $0x20] sm:$0xff]   ;;  %v86_v20 = vmul.f32 %v543_v12, %v668_v3  ;;  %v87_v21 = vmul.f32 %v544_v13, %v668_v3  ;;  %v574_v35 = vld [vmem:[%s859_s0 + $0x30] sm:$0xff]   ;;  %v547_v44 = vunpack.c.l.bf16 %v570_v30  ;;  %v548_v48 = vunpack.c.h.bf16 %v570_v30 }
   0x5   :  { %37 = vst.msk [vmem:[#allocation2 + $0x40] sm:$0xff] %vm28_vm0, %v607_v1  ;;  %38 = vst.msk [vmem:[#allocation2 + $0x48] sm:$0xff] %vm28_vm0, %v607_v1  ;;  %v682_v9 = vld [vmem:[%s861_s3] ss:$0 sm:$0xff]  ;;  %v555_v10 = vunpack.c.l.bf16 %v572_v6  ;;  %v556_v11 = vunpack.c.h.bf16 %v572_v6  ;;  %v84_v14 = vmul.f32 %v539_v4, %v668_v3  ;;  %v85_v15 = vmul.f32 %v540_v5, %v668_v3  ;;  %v571_v40 = vld [vmem:[%s859_s0 + $0x18] sm:$0xff]  }
   0x6   :  { %39 = vst.msk [vmem:[#allocation2 + $0x50] sm:$0xff] %vm28_vm0, %v607_v1  ;;  %40 = vst.msk [vmem:[#allocation2 + $0x58] sm:$0xff] %vm28_vm0, %v607_v1  ;;  %v94_v24 = vmul.f32 %v559_v16, %v668_v3  ;;  %v95_v25 = vmul.f32 %v560_v17, %v668_v3  ;;  %v109_v28 = vadd.f32 %v682_v9, %v86_v20  ;;  %v575_v45 = vld [vmem:[%s859_s0 + $0x38] sm:$0xff]   ;;  %v563_v49 = vunpack.c.l.bf16 %v574_v35 }
   0x7   :  { %41 = vst.msk [vmem:[#allocation2 + $0x60] sm:$0xff] %vm28_vm0, %v607_v1  ;;  %42 = vst.msk [vmem:[#allocation2 + $0x68] sm:$0xff] %vm28_vm0, %v607_v1  ;;  %v92_v18 = vmul.f32 %v555_v10, %v668_v3  ;;  %v93_v19 = vmul.f32 %v556_v11, %v668_v3  ;;  %v107_v22 = vadd.f32 %v682_v9, %v84_v14  ;;  %v564_v52 = vunpack.c.h.bf16 %v574_v35 }
   0x8   :  { %43 = vst.msk [vmem:[#allocation2 + $0x70] sm:$0xff] %vm28_vm0, %v607_v1  ;;  %44 = vst.msk [vmem:[#allocation2 + $0x78] sm:$0xff] %vm28_vm0, %v607_v1  ;;  %v108_v23 = vadd.f32 %v682_v9, %v85_v15  ;;  %v110_v29 = vadd.f32 %v682_v9, %v87_v21  ;;  %v117_v33 = vadd.f32 %v682_v9, %v94_v24  ;;  %v125_v38 = vmax.f32 %v109_v28, 0.0  ;;  %v141_v21 = vld [vmem:[#allocation2 + $0x10] sm:$0xff] }
   0x9   :  { %v115_v26 = vadd.f32 %v682_v9, %v92_v18  ;;  %v116_v27 = vadd.f32 %v682_v9, %v93_v19  ;;  %v123_v31 = vmax.f32 %v107_v22, 0.0  ;;  %v118_v34 = vadd.f32 %v682_v9, %v95_v25  ;;  %v142_v25 = vld [vmem:[#allocation2 + $0x18] sm:$0xff]  ;;  %v140_v30 = vld [vmem:[#allocation2 + $0x8] sm:$0xff] }
   0xa   :  { %v124_v32 = vmax.f32 %v108_v23, 0.0  ;;  %v126_v39 = vmax.f32 %v110_v29, 0.0  ;;  %v133_v42 = vmax.f32 %v117_v33, 0.0  ;;  %v88_v51 = vmul.f32 %v547_v44, %v668_v3  ;;  %v139_v23 = vld [vmem:[#allocation2] sm:$0xff] }
   0xb   :  { %v131_v36 = vmax.f32 %v115_v26, 0.0  ;;  %v132_v37 = vmax.f32 %v116_v27, 0.0  ;;  %v134_v43 = vmax.f32 %v118_v34, 0.0  ;;  %v551_v53 = vunpack.c.l.bf16 %v571_v40  ;;  %v747_v44 = vld [vmem:[%s862_s4] ss:$0 sm:$0xff] }
   0xc   :  { %v155_v41 = vpack.c.bf16 %v124_v32, %v123_v31  ;;  %v156_v47 = vpack.c.bf16 %v126_v39, %v125_v38  ;;  %v89_v54 = vmul.f32 %v548_v48, %v668_v3  ;;  %v96_v55 = vmul.f32 %v563_v49, %v668_v3  ;;  %v148_v35 = vld [vmem:[#allocation2 + $0x48] sm:$0xff]  ;;  %v752_v49 = vld [vmem:[%s863_s5] ss:$0 sm:$0xff] }
   0xd   :  { %v159_v46 = vpack.c.bf16 %v132_v37, %v131_v36  ;;  %v160_v50 = vpack.c.bf16 %v134_v43, %v133_v42  ;;  %v552_v56 = vunpack.c.h.bf16 %v571_v40  ;;  %v567_v57 = vunpack.c.l.bf16 %v575_v45  ;;  %v149_v22 = vld [vmem:[#allocation2 + $0x50] sm:$0xff]  ;;  %v150_v29 = vld [vmem:[#allocation2 + $0x58] sm:$0xff] }
   0xe   :  { %587 = vmatprep.mubr.msk.bf16.mxu0 %vm171_vm1, %v155_v41  ;;  %v111_v58 = vadd.f32 %v682_v9, %v88_v51  ;;  %v97_v59 = vmul.f32 %v564_v52, %v668_v3  ;;  %v90_v60 = vmul.f32 %v551_v53, %v668_v3  ;;  %v568_v61 = vunpack.c.h.bf16 %v575_v45  ;;  %v145_v45 = vld [vmem:[#allocation2 + $0x30] sm:$0xff]  ;;  %v151_v51 = vld [vmem:[#allocation2 + $0x60] sm:$0xff] }
   0xf   :  { %595 = vmatprep.mubr.msk.bf16.mxu1 %vm171_vm1, %v159_v46  ;;  %588 = vmatmul.mubr.msk.bf16.vlgmr.msra.gmra.mrb[0].mxu0 %vm171_vm1, %v156_v47  ;;  %v112_v62 = vadd.f32 %v682_v9, %v89_v54  ;;  %v119_v63 = vadd.f32 %v682_v9, %v96_v55  ;;  %v91_v0 = vmul.f32 %v552_v56, %v668_v3  ;;  %v153_v46 = vld [vmem:[#allocation2 + $0x70] sm:$0xff]  ;;  %v143_v47 = vld [vmem:[#allocation2 + $0x20] sm:$0xff] }
  0x10   :  { %596 = vmatmul.mubr.msk.bf16.vlgmr.msra.gmra.mrb[0].mxu1 %vm171_vm1, %v160_v50  ;;  %v98_v1 = vmul.f32 %v567_v57, %v668_v3  ;;  %v127_v2 = vmax.f32 %v111_v58, 0.0  ;;  %v120_v4 = vadd.f32 %v682_v9, %v97_v59  ;;  %v113_v5 = vadd.f32 %v682_v9, %v90_v60 }
  0x11   :  { %v99_v6 = vmul.f32 %v568_v61, %v668_v3  ;;  %v128_v7 = vmax.f32 %v112_v62, 0.0  ;;  %v135_v8 = vmax.f32 %v119_v63, 0.0  ;;  %v114_v10 = vadd.f32 %v682_v9, %v91_v0 }
  0x12   :  { %v121_v11 = vadd.f32 %v682_v9, %v98_v1  ;;  %v136_v12 = vmax.f32 %v120_v4, 0.0  ;;  %v129_v13 = vmax.f32 %v113_v5, 0.0 }
  0x13   :  { %v122_v14 = vadd.f32 %v682_v9, %v99_v6  ;;  %v157_v15 = vpack.c.bf16 %v128_v7, %v127_v2  ;;  %v130_v16 = vmax.f32 %v114_v10, 0.0  ;;  %v147_v9 = vld [vmem:[#allocation2 + $0x40] sm:$0xff] }
  0x14   :  { %v137_v17 = vmax.f32 %v121_v11, 0.0  ;;  %v161_v18 = vpack.c.bf16 %v136_v12, %v135_v8 }
  0x15   :  { %v138_v19 = vmax.f32 %v122_v14, 0.0  ;;  %591 = vmatprep.mubr.msk.bf16.mxu0 %vm171_vm1, %v157_v15  ;;  %v158_v20 = vpack.c.bf16 %v130_v16, %v129_v13 }
  0x16   :  { %599 = vmatprep.mubr.msk.bf16.mxu1 %vm171_vm1, %v161_v18 }
  0x17   :  { %v162_v3 = vpack.c.bf16 %v138_v19, %v137_v17  ;;  %592 = vmatmul.mubr.msk.bf16.gmra.mrb[4].mxu0 %vm171_vm1, %v158_v20 }
  0x19   :  { %600 = vmatmul.mubr.msk.bf16.gmra.mrb[4].mxu1 %vm171_vm1, %v162_v3 }
  0xe2   :  { %v589_v24 = vpop.f32.mrb[0].mxu0 }
  0xe3   :  { %v295_v26 = vadd.f32 %v589_v24, %v141_v21  ;;  %v597_v27 = vpop.f32.mrb[0].mxu1  ;;  %v230_v28 = vpop.f32.mrb[1].mxu0 }
  0xe4   :  { %v303_v31 = vadd.f32 %v597_v27, %v149_v22  ;;  %v293_v32 = vadd.f32 %v230_v28, %v139_v23  ;;  %v262_v33 = vpop.f32.mrb[1].mxu1  ;;  %v590_v34 = vpop.f32.mrb[2].mxu0 }
  0xe5   :  { %312 = vst.msk [vmem:[#allocation2 + $0x10] sm:$0xff] %vm28_vm0, %v295_v26  ;;  %v301_v36 = vadd.f32 %v262_v33, %v147_v9  ;;  %v296_v37 = vadd.f32 %v590_v34, %v142_v25  ;;  %v598_v38 = vpop.f32.mrb[2].mxu1  ;;  %v233_v39 = vpop.f32.mrb[3].mxu0  ;;  %v146_v9 = vld [vmem:[#allocation2 + $0x38] sm:$0xff] }
  0xe6   :  { %320 = vst.msk [vmem:[#allocation2 + $0x50] sm:$0xff] %vm28_vm0, %v303_v31  ;;  %310 = vst.msk [vmem:[#allocation2] sm:$0xff] %vm28_vm0, %v293_v32  ;;  %v304_v40 = vadd.f32 %v598_v38, %v150_v29  ;;  %v294_v41 = vadd.f32 %v233_v39, %v140_v30  ;;  %v265_v42 = vpop.f32.mrb[3].mxu1  ;;  %v154_v29 = vld [vmem:[#allocation2 + $0x78] sm:$0xff]  ;;  %v144_v30 = vld [vmem:[#allocation2 + $0x28] sm:$0xff] }
  0xe7   :  { %318 = vst.msk [vmem:[#allocation2 + $0x40] sm:$0xff] %vm28_vm0, %v301_v36  ;;  %313 = vst.msk [vmem:[#allocation2 + $0x18] sm:$0xff] %vm28_vm0, %v296_v37  ;;  %v302_v43 = vadd.f32 %v265_v42, %v148_v35  ;;  %v152_v35 = vld [vmem:[#allocation2 + $0x68] sm:$0xff] }
  0xe8   :  { %321 = vst.msk [vmem:[#allocation2 + $0x58] sm:$0xff] %vm28_vm0, %v304_v40  ;;  %311 = vst.msk [vmem:[#allocation2 + $0x8] sm:$0xff] %vm28_vm0, %v294_v41 }
  0xe9   :  { %319 = vst.msk [vmem:[#allocation2 + $0x48] sm:$0xff] %vm28_vm0, %v302_v43 }
  0xea   :  { %v593_v50 = vpop.f32.mrb[4].mxu0 }
  0xeb   :  { %v299_v55 = vadd.f32 %v593_v50, %v145_v45  ;;  %v246_v57 = vpop.f32.mrb[5].mxu0 }
  0xec   :  { %v331_v48 = vld [vmem:[#allocation2 + $0x10] sm:$0xff]  ;;  %v601_v56 = vpop.f32.mrb[4].mxu1  ;;  %v297_v63 = vadd.f32 %v246_v57, %v143_v47  ;;  %v594_v1 = vpop.f32.mrb[6].mxu0 }
  0xed   :  { %v354_v52 = vmul.f32 %v747_v44, %v331_v48  ;;  %v339_v53 = vld [vmem:[#allocation2 + $0x50] sm:$0xff]  ;;  %v329_v54 = vld [vmem:[#allocation2] sm:$0xff]  ;;  %v307_v62 = vadd.f32 %v601_v56, %v153_v46  ;;  %v278_v0 = vpop.f32.mrb[5].mxu1  ;;  %316 = vst.msk [vmem:[#allocation2 + $0x30] sm:$0xff] %vm28_vm0, %v299_v55  ;;  %v249_v11 = vpop.f32.mrb[7].mxu0  ;;  %v300_v39 = vadd.f32 %v594_v1, %v146_v9 }
  0xee   :  { %v362_v58 = vmul.f32 %v747_v44, %v339_v53  ;;  %v352_v59 = vmul.f32 %v747_v44, %v329_v54  ;;  %v337_v60 = vld [vmem:[#allocation2 + $0x40] sm:$0xff]  ;;  %v332_v61 = vld [vmem:[#allocation2 + $0x18] sm:$0xff]  ;;  %v305_v8 = vadd.f32 %v278_v0, %v151_v51  ;;  %v602_v10 = vpop.f32.mrb[6].mxu1  ;;  %314 = vst.msk [vmem:[#allocation2 + $0x20] sm:$0xff] %vm28_vm0, %v297_v63  ;;  %v298_v45 = vadd.f32 %v249_v11, %v144_v30 }
  0xef   :  { %v377_v2 = vadd.f32 %v752_v49, %v354_v52  ;;  %v360_v4 = vmul.f32 %v747_v44, %v337_v60  ;;  %v355_v5 = vmul.f32 %v747_v44, %v332_v61  ;;  %v340_v6 = vld [vmem:[#allocation2 + $0x58] sm:$0xff]  ;;  %v330_v7 = vld [vmem:[#allocation2 + $0x8] sm:$0xff]  ;;  %324 = vst.msk [vmem:[#allocation2 + $0x70] sm:$0xff] %vm28_vm0, %v307_v62  ;;  %v281_v17 = vpop.f32.mrb[7].mxu1  ;;  %v308_v43 = vadd.f32 %v602_v10, %v154_v29 }
  0xf0   :  { %v385_v12 = vadd.f32 %v752_v49, %v362_v58  ;;  %v375_v13 = vadd.f32 %v752_v49, %v352_v59  ;;  %v363_v14 = vmul.f32 %v747_v44, %v340_v6  ;;  %v353_v15 = vmul.f32 %v747_v44, %v330_v7  ;;  %v338_v16 = vld [vmem:[#allocation2 + $0x48] sm:$0xff]  ;;  %322 = vst.msk [vmem:[#allocation2 + $0x60] sm:$0xff] %vm28_vm0, %v305_v8 }
  0xf1   :  { %v393_v18 = vmax.f32 %v377_v2, 0.0  ;;  %v383_v19 = vadd.f32 %v752_v49, %v360_v4  ;;  %v378_v20 = vadd.f32 %v752_v49, %v355_v5  ;;  %v361_v3 = vmul.f32 %v747_v44, %v338_v16  ;;  %317 = vst.msk [vmem:[#allocation2 + $0x38] sm:$0xff] %vm28_vm0, %v300_v39  ;;  %325 = vst.msk [vmem:[#allocation2 + $0x78] sm:$0xff] %vm28_vm0, %v308_v43 }
  0xf2   :  { %v401_v21 = vmax.f32 %v385_v12, 0.0  ;;  %v391_v22 = vmax.f32 %v375_v13, 0.0  ;;  %v386_v23 = vadd.f32 %v752_v49, %v363_v14  ;;  %v376_v24 = vadd.f32 %v752_v49, %v353_v15  ;;  %315 = vst.msk [vmem:[#allocation2 + $0x28] sm:$0xff] %vm28_vm0, %v298_v45 }
  0xf3   :  { %v523_v25 = vpack.c.bf16 %v393_v18, %v393_v18  ;;  %v399_v26 = vmax.f32 %v383_v19, 0.0  ;;  %v394_v27 = vmax.f32 %v378_v20, 0.0  ;;  %v384_v28 = vadd.f32 %v752_v49, %v361_v3 }
  0xf4   :  { %v531_v31 = vpack.c.bf16 %v401_v21, %v401_v21  ;;  %v521_v32 = vpack.c.bf16 %v391_v22, %v391_v22  ;;  %v402_v33 = vmax.f32 %v386_v23, 0.0  ;;  %v392_v34 = vmax.f32 %v376_v24, 0.0  ;;  %v335_v42 = vld [vmem:[#allocation2 + $0x30] sm:$0xff] }
  0xf5   :  { %474 = vst.msk [vmem:[%s864_s6 + $0x8] sm:$0xf] %vm471_vm2, %v523_v25  ;;  %v529_v36 = vpack.c.bf16 %v399_v26, %v399_v26  ;;  %v524_v37 = vpack.c.bf16 %v394_v27, %v394_v27  ;;  %v400_v38 = vmax.f32 %v384_v28, 0.0  ;;  %v358_v47 = vmul.f32 %v747_v44, %v335_v42  ;;  %v333_v50 = vld [vmem:[#allocation2 + $0x20] sm:$0xff] }
  0xf6   :  { %482 = vst.msk [vmem:[%s864_s6 + $0x28] sm:$0xf] %vm471_vm2, %v531_v31  ;;  %472 = vst.msk [vmem:[%s864_s6] sm:$0xf] %vm471_vm2, %v521_v32  ;;  %v532_v40 = vpack.c.bf16 %v402_v33, %v402_v33  ;;  %v522_v41 = vpack.c.bf16 %v392_v34, %v392_v34  ;;  %v343_v48 = vld [vmem:[#allocation2 + $0x70] sm:$0xff]  ;;  %v306_v51 = vadd.f32 %v281_v17, %v152_v35 }
  0xf7   :  { %480 = vst.msk [vmem:[%s864_s6 + $0x20] sm:$0xf] %vm471_vm2, %v529_v36  ;;  %475 = vst.msk [vmem:[%s864_s6 + $0xc] sm:$0xf] %vm471_vm2, %v524_v37  ;;  %v530_v46 = vpack.c.bf16 %v400_v38, %v400_v38  ;;  %v366_v52 = vmul.f32 %v747_v44, %v343_v48  ;;  %v356_v53 = vmul.f32 %v747_v44, %v333_v50  ;;  %v341_v54 = vld [vmem:[#allocation2 + $0x60] sm:$0xff] }
  0xf8   :  { %483 = vst.msk [vmem:[%s864_s6 + $0x2c] sm:$0xf] %vm471_vm2, %v532_v40  ;;  %473 = vst.msk [vmem:[%s864_s6 + $0x4] sm:$0xf] %vm471_vm2, %v522_v41  ;;  %v381_v55 = vadd.f32 %v752_v49, %v358_v47  ;;  %v364_v56 = vmul.f32 %v747_v44, %v341_v54  ;;  %v336_v4 = vld [vmem:[#allocation2 + $0x38] sm:$0xff] }
  0xf9   :  { %481 = vst.msk [vmem:[%s864_s6 + $0x24] sm:$0xf] %vm471_vm2, %v530_v46  ;;  %v389_v57 = vadd.f32 %v752_v49, %v366_v52  ;;  %v379_v58 = vadd.f32 %v752_v49, %v356_v53  ;;  %v359_v6 = vmul.f32 %v747_v44, %v336_v4  ;;  %v344_v7 = vld [vmem:[#allocation2 + $0x78] sm:$0xff]  ;;  %v334_v8 = vld [vmem:[#allocation2 + $0x28] sm:$0xff] }
  0xfa   :  { %323 = vst.msk [vmem:[#allocation2 + $0x68] sm:$0xff] %vm28_vm0, %v306_v51  ;;  %v397_v59 = vmax.f32 %v381_v55, 0.0  ;;  %v387_v60 = vadd.f32 %v752_v49, %v364_v56  ;;  %v367_v10 = vmul.f32 %v747_v44, %v344_v7  ;;  %v357_v11 = vmul.f32 %v747_v44, %v334_v8 }
  0xfb   :  { %v405_v61 = vmax.f32 %v389_v57, 0.0  ;;  %v395_v62 = vmax.f32 %v379_v58, 0.0  ;;  %v382_v13 = vadd.f32 %v752_v49, %v359_v6 }
  0xfc   :  { %v527_v63 = vpack.c.bf16 %v397_v59, %v397_v59  ;;  %v403_v0 = vmax.f32 %v387_v60, 0.0  ;;  %v390_v15 = vadd.f32 %v752_v49, %v367_v10  ;;  %v380_v16 = vadd.f32 %v752_v49, %v357_v11 }
  0xfd   :  { %v535_v1 = vpack.c.bf16 %v405_v61, %v405_v61  ;;  %v525_v2 = vpack.c.bf16 %v395_v62, %v395_v62  ;;  %v398_v17 = vmax.f32 %v382_v13, 0.0 }
  0xfe   :  { %478 = vst.msk [vmem:[%s864_s6 + $0x18] sm:$0xf] %vm471_vm2, %v527_v63  ;;  %v533_v5 = vpack.c.bf16 %v403_v0, %v403_v0  ;;  %v406_v19 = vmax.f32 %v390_v15, 0.0  ;;  %v396_v20 = vmax.f32 %v380_v16, 0.0 }
  0xff   :  { %486 = vst.msk [vmem:[%s864_s6 + $0x38] sm:$0xf] %vm471_vm2, %v535_v1  ;;  %476 = vst.msk [vmem:[%s864_s6 + $0x10] sm:$0xf] %vm471_vm2, %v525_v2  ;;  %v528_v3 = vpack.c.bf16 %v398_v17, %v398_v17 }
 0x100   :  { %484 = vst.msk [vmem:[%s864_s6 + $0x30] sm:$0xf] %vm471_vm2, %v533_v5  ;;  %v536_v22 = vpack.c.bf16 %v406_v19, %v406_v19  ;;  %v526_v23 = vpack.c.bf16 %v396_v20, %v396_v20 }
 0x101   :  { %v342_v12 = vld [vmem:[#allocation2 + $0x68] sm:$0xff]  ;;  %479 = vst.msk [vmem:[%s864_s6 + $0x1c] sm:$0xf] %vm471_vm2, %v528_v3 }
 0x102   :  { %v365_v14 = vmul.f32 %v747_v44, %v342_v12  ;;  %487 = vst.msk [vmem:[%s864_s6 + $0x3c] sm:$0xf] %vm471_vm2, %v536_v22  ;;  %477 = vst.msk [vmem:[%s864_s6 + $0x14] sm:$0xf] %vm471_vm2, %v526_v23 }
 0x104   :  { %v388_v18 = vadd.f32 %v752_v49, %v365_v14 }
 0x106   :  { %v404_v21 = vmax.f32 %v388_v18, 0.0 }
 0x108   :  { %v534_v24 = vpack.c.bf16 %v404_v21, %v404_v21 }
 0x10a   :  { %485 = vst.msk [vmem:[%s864_s6 + $0x34] sm:$0xf] %vm471_vm2, %v534_v24 }

// kernel: densenet_forward.26
= control target key start
LH: loop header
LB: loop body
LE: loop exit
PB: predicated region body
PF: predicated region fallthrough
CT: control target
= control target key end

     0   :  { %v2066_v0 = vmov 0   ;;  %vm579_vm0 = vcmask 154624   ;;  %vm676_vm1 = vcmask 1040384   ;;  %vm677_vm2 = vcmask 1041408   ;;  %s2948_s1 = inlined_call_operand.vmem [shape: bf16[147,16], index: 1, kind: input, shape index: {}]   ;;  %s2949_s0 = inlined_call_operand.vmem [shape: bf16[512,147], index: 0, kind: input, shape index: {}]   ;;  %s2950_s2 = inlined_call_operand.vmem [shape: f32[1,16], index: 2, kind: input, shape index: {}]   ;;  %s2951_s3 = inlined_call_operand.vmem [shape: f32[1,16], index: 3, kind: input, shape index: {}]   ;;  %s2952_s4 = inlined_call_operand.vmem [shape: bf16[512,16], index: 4, kind: output, shape index: {}]  }
   0x1   :  { %683 = vmatprep.subr.bf16.mxu0 %v2066_v0  ;;  %1935 = vmatprep.subr.bf16.mxu1 %v2066_v0  ;;  %v1958_v1 = vld [vmem:[%s2948_s1] sm:$0xff]   ;;  %v1959_v2 = vld [vmem:[%s2948_s1 + $0x8] sm:$0xff]   ;;  %v1960_v3 = vld [vmem:[%s2948_s1 + $0x10] sm:$0xff]   ;;  %v2067_v11 = vmov 65535   ;;  %vm22_vm3 = vcmask 130048   ;;  %v2068_v17 = vmov 0.0  }
   0x2   :  { %684 = vmatpush1.bf16.msra.mxu0 %v1958_v1  ;;  %1945 = vmatpush1.bf16.msra.mxu1 %v1958_v1  ;;  %v1961_v4 = vld [vmem:[%s2948_s1 + $0x18] sm:$0xff]   ;;  %v1970_v5 = vld [vmem:[%s2949_s0 + $0x4] ss:$8 sps:$4 sm:$0xff]   ;;  %v1964_v9 = vld [vmem:[%s2948_s1 + $0x30] sm:$0xff]   ;;  %v678_v12 = vsel %vm676_vm1, 4294967295, %v2067_v11  ;;  %23 = vst.msk [vmem:[#allocation2] sm:$0xff] %vm22_vm3, %v2068_v17 }
   0x3   :  { %685 = vmatprep.subr.bf16.mxu0 %v2066_v0  ;;  %1936 = vmatprep.subr.bf16.mxu1 %v2066_v0  ;;  %v1973_v6 = vld [vmem:[%s2949_s0 + $0x104] ss:$8 sps:$4 sm:$0xff]   ;;  %v1965_v10 = vld [vmem:[%s2948_s1 + $0x38] sm:$0xff]   ;;  %v1967_v14 = vld [vmem:[%s2948_s1 + $0x48] ss:$0 sps:$4 sm:$0x33]  }
   0x4   :  { %1773 = vmatprep.mubr.msk.bf16.mxu0 %vm579_vm0, %v1970_v5  ;;  %v1962_v7 = vld [vmem:[%s2948_s1 + $0x20] sm:$0xff]   ;;  %1789 = vmatprep.mubr.msk.bf16.mxu1 %vm579_vm0, %v1973_v6  ;;  %v1963_v8 = vld [vmem:[%s2948_s1 + $0x28] sm:$0xff]   ;;  %v679_v15 = vsel %vm677_vm2, %v678_v12, 0  ;;  %24 = vst.msk [vmem:[#allocation2 + $0x8] sm:$0xff] %vm22_vm3, %v2068_v17  ;;  %25 = vst.msk [vmem:[#allocation2 + $0x10] sm:$0xff] %vm22_vm3, %v2068_v17  ;;  %vm1630_vm4 = vcmask 125952  }
   0x5   :  { %v1966_v13 = vld [vmem:[%s2948_s1 + $0x40] sm:$0xff]   ;;  %v2132_v16 = vand.u32 %v1967_v14, %v679_v15  ;;  %26 = vst.msk [vmem:[#allocation2 + $0x18] sm:$0xff] %vm22_vm3, %v2068_v17  ;;  %27 = vst.msk [vmem:[#allocation2 + $0x20] sm:$0xff] %vm22_vm3, %v2068_v17  ;;  %v1974_v20 = vld [vmem:[%s2949_s0 + $0x14] ss:$8 sps:$4 sm:$0xff]  }
   0x6   :  { %686 = vmatpush1.bf16.msra.mxu0 %v1959_v2  ;;  %1946 = vmatpush1.bf16.msra.mxu1 %v1959_v2  ;;  %28 = vst.msk [vmem:[#allocation2 + $0x28] sm:$0xff] %vm22_vm3, %v2068_v17  ;;  %29 = vst.msk [vmem:[#allocation2 + $0x30] sm:$0xff] %vm22_vm3, %v2068_v17  ;;  %v1968_v18 = vld [vmem:[%s2949_s0] ss:$8 sps:$4 sm:$0xff]   ;;  %v1976_v21 = vld [vmem:[%s2949_s0 + $0x114] ss:$8 sps:$4 sm:$0xff]  }
   0x7   :  { %687 = vmatprep.subr.bf16.mxu0 %v2066_v0  ;;  %1937 = vmatprep.subr.bf16.mxu1 %v2066_v0  ;;  %30 = vst.msk [vmem:[#allocation2 + $0x38] sm:$0xff] %vm22_vm3, %v2068_v17  ;;  %31 = vst.msk [vmem:[#allocation2 + $0x40] sm:$0xff] %vm22_vm3, %v2068_v17  ;;  %v1971_v19 = vld [vmem:[%s2949_s0 + $0x100] ss:$8 sps:$4 sm:$0xff]   ;;  %v1978_v22 = vld [vmem:[%s2949_s0 + $0x10] ss:$8 sps:$4 sm:$0xff]  }
   0x8   :  { %32 = vst.msk [vmem:[#allocation2 + $0x48] sm:$0xff] %vm22_vm3, %v2068_v17  ;;  %33 = vst.msk [vmem:[#allocation2 + $0x50] sm:$0xff] %vm22_vm3, %v2068_v17  ;;  %v1979_v23 = vld [vmem:[%s2949_s0 + $0x110] ss:$8 sps:$4 sm:$0xff]   ;;  %v1980_v24 = vld [vmem:[%s2949_s0 + $0x24] ss:$8 sps:$4 sm:$0xff]  }
   0x9   :  { %34 = vst.msk [vmem:[#allocation2 + $0x58] sm:$0xff] %vm22_vm3, %v2068_v17  ;;  %35 = vst.msk [vmem:[#allocation2 + $0x60] sm:$0xff] %vm22_vm3, %v2068_v17  ;;  %v1982_v25 = vld [vmem:[%s2949_s0 + $0x124] ss:$8 sps:$4 sm:$0xff]   ;;  %v1984_v26 = vld [vmem:[%s2949_s0 + $0x20] ss:$8 sps:$4 sm:$0xff]  }
   0xa   :  { %688 = vmatpush1.bf16.msra.mxu0 %v1960_v3  ;;  %1947 = vmatpush1.bf16.msra.mxu1 %v1960_v3  ;;  %36 = vst.msk [vmem:[#allocation2 + $0x68] sm:$0xff] %vm22_vm3, %v2068_v17  ;;  %37 = vst.msk [vmem:[#allocation2 + $0x70] sm:$0xff] %vm22_vm3, %v2068_v17  ;;  %v1985_v27 = vld [vmem:[%s2949_s0 + $0x120] ss:$8 sps:$4 sm:$0xff]   ;;  %v1986_v28 = vld [vmem:[%s2949_s0 + $0x34] ss:$8 sps:$4 sm:$0xff]  }
   0xb   :  { %689 = vmatprep.subr.bf16.mxu0 %v2066_v0  ;;  %1938 = vmatprep.subr.bf16.mxu1 %v2066_v0  ;;  %38 = vst.msk [vmem:[#allocation2 + $0x78] sm:$0xff] %vm22_vm3, %v2068_v17  ;;  %39 = vst.msk [vmem:[#allocation2 + $0x80] sm:$0xff] %vm22_vm3, %v2068_v17  ;;  %v1988_v29 = vld [vmem:[%s2949_s0 + $0x134] ss:$8 sps:$4 sm:$0xff]   ;;  %v1990_v30 = vld [vmem:[%s2949_s0 + $0x30] ss:$8 sps:$4 sm:$0xff]  }
   0xc   :  { %40 = vst.msk [vmem:[#allocation2 + $0x88] sm:$0xff] %vm22_vm3, %v2068_v17  ;;  %41 = vst.msk [vmem:[#allocation2 + $0x90] sm:$0xff] %vm22_vm3, %v2068_v17  ;;  %v1991_v31 = vld [vmem:[%s2949_s0 + $0x130] ss:$8 sps:$4 sm:$0xff]   ;;  %v1992_v32 = vld [vmem:[%s2949_s0 + $0x44] ss:$8 sps:$4 sm:$0xff]  }
   0xd   :  { %42 = vst.msk [vmem:[#allocation2 + $0x98] sm:$0xff] %vm22_vm3, %v2068_v17  ;;  %43 = vst.msk [vmem:[#allocation2 + $0xa0] sm:$0xff] %vm22_vm3, %v2068_v17  ;;  %v1994_v33 = vld [vmem:[%s2949_s0 + $0x144] ss:$8 sps:$4 sm:$0xff]   ;;  %v1996_v34 = vld [vmem:[%s2949_s0 + $0x40] ss:$8 sps:$4 sm:$0xff]  }
   0xe   :  { %690 = vmatpush1.bf16.msra.mxu0 %v1961_v4  ;;  %1948 = vmatpush1.bf16.msra.mxu1 %v1961_v4  ;;  %44 = vst.msk [vmem:[#allocation2 + $0xa8] sm:$0xff] %vm22_vm3, %v2068_v17  ;;  %45 = vst.msk [vmem:[#allocation2 + $0xb0] sm:$0xff] %vm22_vm3, %v2068_v17  ;;  %v1997_v35 = vld [vmem:[%s2949_s0 + $0x140] ss:$8 sps:$4 sm:$0xff]   ;;  %v1998_v36 = vld [vmem:[%s2949_s0 + $0x54] ss:$8 sps:$4 sm:$0xff]  }
   0xf   :  { %691 = vmatprep.subr.bf16.mxu0 %v2066_v0  ;;  %1939 = vmatprep.subr.bf16.mxu1 %v2066_v0  ;;  %46 = vst.msk [vmem:[#allocation2 + $0xb8] sm:$0xff] %vm22_vm3, %v2068_v17  ;;  %47 = vst.msk [vmem:[#allocation2 + $0xc0] sm:$0xff] %vm22_vm3, %v2068_v17  ;;  %v2000_v37 = vld [vmem:[%s2949_s0 + $0x154] ss:$8 sps:$4 sm:$0xff]   ;;  %v2002_v38 = vld [vmem:[%s2949_s0 + $0x50] ss:$8 sps:$4 sm:$0xff]  }
  0x10   :  { %48 = vst.msk [vmem:[#allocation2 + $0xc8] sm:$0xff] %vm22_vm3, %v2068_v17  ;;  %49 = vst.msk [vmem:[#allocation2 + $0xd0] sm:$0xff] %vm22_vm3, %v2068_v17  ;;  %v2003_v39 = vld [vmem:[%s2949_s0 + $0x150] ss:$8 sps:$4 sm:$0xff]   ;;  %v2004_v40 = vld [vmem:[%s2949_s0 + $0x64] ss:$8 sps:$4 sm:$0xff]  }
  0x11   :  { %50 = vst.msk [vmem:[#allocation2 + $0xd8] sm:$0xff] %vm22_vm3, %v2068_v17  ;;  %51 = vst.msk [vmem:[#allocation2 + $0xe0] sm:$0xff] %vm22_vm3, %v2068_v17  ;;  %v2006_v41 = vld [vmem:[%s2949_s0 + $0x164] ss:$8 sps:$4 sm:$0xff]   ;;  %v2008_v42 = vld [vmem:[%s2949_s0 + $0x60] ss:$8 sps:$4 sm:$0xff]  }
  0x12   :  { %692 = vmatpush1.bf16.msra.mxu0 %v1962_v7  ;;  %1949 = vmatpush1.bf16.msra.mxu1 %v1962_v7  ;;  %52 = vst.msk [vmem:[#allocation2 + $0xe8] sm:$0xff] %vm22_vm3, %v2068_v17  ;;  %53 = vst.msk [vmem:[#allocation2 + $0xf0] sm:$0xff] %vm22_vm3, %v2068_v17  ;;  %v2009_v43 = vld [vmem:[%s2949_s0 + $0x160] ss:$8 sps:$4 sm:$0xff]   ;;  %v2010_v44 = vld [vmem:[%s2949_s0 + $0x74] ss:$8 sps:$4 sm:$0xff]  }
  0x13   :  { %693 = vmatprep.subr.bf16.mxu0 %v2066_v0  ;;  %1940 = vmatprep.subr.bf16.mxu1 %v2066_v0  ;;  %54 = vst.msk [vmem:[#allocation2 + $0xf8] sm:$0xff] %vm22_vm3, %v2068_v17  ;;  %55 = vst.msk [vmem:[#allocation2 + $0x100] sm:$0xff] %vm22_vm3, %v2068_v17  ;;  %v2012_v45 = vld [vmem:[%s2949_s0 + $0x174] ss:$8 sps:$4 sm:$0xff]   ;;  %v2014_v46 = vld [vmem:[%s2949_s0 + $0x70] ss:$8 sps:$4 sm:$0xff]  }
  0x14   :  { %56 = vst.msk [vmem:[#allocation2 + $0x108] sm:$0xff] %vm22_vm3, %v2068_v17  ;;  %57 = vst.msk [vmem:[#allocation2 + $0x110] sm:$0xff] %vm22_vm3, %v2068_v17  ;;  %v2015_v47 = vld [vmem:[%s2949_s0 + $0x170] ss:$8 sps:$4 sm:$0xff]   ;;  %v2016_v48 = vld [vmem:[%s2949_s0 + $0x84] ss:$8 sps:$4 sm:$0xff]  }
  0x15   :  { %58 = vst.msk [vmem:[#allocation2 + $0x118] sm:$0xff] %vm22_vm3, %v2068_v17  ;;  %59 = vst.msk [vmem:[#allocation2 + $0x120] sm:$0xff] %vm22_vm3, %v2068_v17  ;;  %v2018_v49 = vld [vmem:[%s2949_s0 + $0x184] ss:$8 sps:$4 sm:$0xff]   ;;  %v2020_v50 = vld [vmem:[%s2949_s0 + $0x80] ss:$8 sps:$4 sm:$0xff]  }
  0x16   :  { %694 = vmatpush1.bf16.msra.mxu0 %v1963_v8  ;;  %1950 = vmatpush1.bf16.msra.mxu1 %v1963_v8  ;;  %60 = vst.msk [vmem:[#allocation2 + $0x128] sm:$0xff] %vm22_vm3, %v2068_v17  ;;  %61 = vst.msk [vmem:[#allocation2 + $0x130] sm:$0xff] %vm22_vm3, %v2068_v17  ;;  %v2021_v51 = vld [vmem:[%s2949_s0 + $0x180] ss:$8 sps:$4 sm:$0xff]   ;;  %v2022_v52 = vld [vmem:[%s2949_s0 + $0x94] ss:$8 sps:$4 sm:$0xff]  }
  0x17   :  { %695 = vmatprep.subr.bf16.mxu0 %v2066_v0  ;;  %1941 = vmatprep.subr.bf16.mxu1 %v2066_v0  ;;  %62 = vst.msk [vmem:[#allocation2 + $0x138] sm:$0xff] %vm22_vm3, %v2068_v17  ;;  %63 = vst.msk [vmem:[#allocation2 + $0x140] sm:$0xff] %vm22_vm3, %v2068_v17  ;;  %v2024_v53 = vld [vmem:[%s2949_s0 + $0x194] ss:$8 sps:$4 sm:$0xff]   ;;  %v2026_v54 = vld [vmem:[%s2949_s0 + $0x90] ss:$8 sps:$4 sm:$0xff]  }
  0x18   :  { %64 = vst.msk [vmem:[#allocation2 + $0x148] sm:$0xff] %vm22_vm3, %v2068_v17  ;;  %65 = vst.msk [vmem:[#allocation2 + $0x150] sm:$0xff] %vm22_vm3, %v2068_v17  ;;  %v2027_v55 = vld [vmem:[%s2949_s0 + $0x190] ss:$8 sps:$4 sm:$0xff]   ;;  %v2028_v56 = vld [vmem:[%s2949_s0 + $0xa4] ss:$8 sps:$4 sm:$0xff]  }
  0x19   :  { %66 = vst.msk [vmem:[#allocation2 + $0x158] sm:$0xff] %vm22_vm3, %v2068_v17  ;;  %67 = vst.msk [vmem:[#allocation2 + $0x160] sm:$0xff] %vm22_vm3, %v2068_v17  ;;  %v2030_v57 = vld [vmem:[%s2949_s0 + $0x1a4] ss:$8 sps:$4 sm:$0xff]   ;;  %v2032_v58 = vld [vmem:[%s2949_s0 + $0xa0] ss:$8 sps:$4 sm:$0xff]  }
  0x1a   :  { %696 = vmatpush1.bf16.msra.mxu0 %v1964_v9  ;;  %1951 = vmatpush1.bf16.msra.mxu1 %v1964_v9  ;;  %68 = vst.msk [vmem:[#allocation2 + $0x168] sm:$0xff] %vm22_vm3, %v2068_v17  ;;  %69 = vst.msk [vmem:[#allocation2 + $0x170] sm:$0xff] %vm22_vm3, %v2068_v17  ;;  %v2033_v59 = vld [vmem:[%s2949_s0 + $0x1a0] ss:$8 sps:$4 sm:$0xff]   ;;  %v2034_v60 = vld [vmem:[%s2949_s0 + $0xb4] ss:$8 sps:$4 sm:$0xff]  }
  0x1b   :  { %697 = vmatprep.subr.bf16.mxu0 %v2066_v0  ;;  %1942 = vmatprep.subr.bf16.mxu1 %v2066_v0  ;;  %70 = vst.msk [vmem:[#allocation2 + $0x178] sm:$0xff] %vm22_vm3, %v2068_v17  ;;  %71 = vst.msk [vmem:[#allocation2 + $0x180] sm:$0xff] %vm22_vm3, %v2068_v17  ;;  %v2036_v61 = vld [vmem:[%s2949_s0 + $0x1b4] ss:$8 sps:$4 sm:$0xff]   ;;  %v2038_v62 = vld [vmem:[%s2949_s0 + $0xb0] ss:$8 sps:$4 sm:$0xff]  }
  0x1c   :  { %72 = vst.msk [vmem:[#allocation2 + $0x188] sm:$0xff] %vm22_vm3, %v2068_v17  ;;  %73 = vst.msk [vmem:[#allocation2 + $0x190] sm:$0xff] %vm22_vm3, %v2068_v17  ;;  %v2039_v63 = vld [vmem:[%s2949_s0 + $0x1b0] ss:$8 sps:$4 sm:$0xff]   ;;  %v2042_v1 = vld [vmem:[%s2949_s0 + $0x1c4] ss:$8 sps:$4 sm:$0xff]  }
  0x1d   :  { %74 = vst.msk [vmem:[#allocation2 + $0x198] sm:$0xff] %vm22_vm3, %v2068_v17  ;;  %75 = vst.msk [vmem:[#allocation2 + $0x1a0] sm:$0xff] %vm22_vm3, %v2068_v17  ;;  %v2044_v2 = vld [vmem:[%s2949_s0 + $0xc0] ss:$8 sps:$4 sm:$0xff]   ;;  %v2046_v4 = vld [vmem:[%s2949_s0 + $0xd4] ss:$8 sps:$4 sm:$0xff]  }
  0x1e   :  { %698 = vmatpush1.bf16.msra.mxu0 %v1965_v10  ;;  %1952 = vmatpush1.bf16.msra.mxu1 %v1965_v10  ;;  %76 = vst.msk [vmem:[#allocation2 + $0x1a8] sm:$0xff] %vm22_vm3, %v2068_v17  ;;  %77 = vst.msk [vmem:[#allocation2 + $0x1b0] sm:$0xff] %vm22_vm3, %v2068_v17  ;;  %v2045_v3 = vld [vmem:[%s2949_s0 + $0x1c0] ss:$8 sps:$4 sm:$0xff]   ;;  %v2048_v5 = vld [vmem:[%s2949_s0 + $0x1d4] ss:$8 sps:$4 sm:$0xff]  }
  0x1f   :  { %699 = vmatprep.subr.bf16.mxu0 %v2066_v0  ;;  %1943 = vmatprep.subr.bf16.mxu1 %v2066_v0  ;;  %78 = vst.msk [vmem:[#allocation2 + $0x1b8] sm:$0xff] %vm22_vm3, %v2068_v17  ;;  %79 = vst.msk [vmem:[#allocation2 + $0x1c0] sm:$0xff] %vm22_vm3, %v2068_v17  ;;  %v2050_v6 = vld [vmem:[%s2949_s0 + $0xd0] ss:$8 sps:$4 sm:$0xff]   ;;  %v2052_v8 = vld [vmem:[%s2949_s0 + $0xe4] ss:$8 sps:$4 sm:$0xff]  }
  0x20   :  { %80 = vst.msk [vmem:[#allocation2 + $0x1c8] sm:$0xff] %vm22_vm3, %v2068_v17  ;;  %81 = vst.msk [vmem:[#allocation2 + $0x1d0] sm:$0xff] %vm22_vm3, %v2068_v17  ;;  %v2051_v7 = vld [vmem:[%s2949_s0 + $0x1d0] ss:$8 sps:$4 sm:$0xff]   ;;  %v2054_v9 = vld [vmem:[%s2949_s0 + $0x1e4] ss:$8 sps:$4 sm:$0xff]  }
  0x21   :  { %82 = vst.msk [vmem:[#allocation2 + $0x1d8] sm:$0xff] %vm22_vm3, %v2068_v17  ;;  %83 = vst.msk [vmem:[#allocation2 + $0x1e0] sm:$0xff] %vm22_vm3, %v2068_v17  ;;  %v2056_v10 = vld [vmem:[%s2949_s0 + $0xe0] ss:$8 sps:$4 sm:$0xff]   ;;  %v2058_v12 = vld [vmem:[%s2949_s0 + $0xf4] ss:$8 sps:$4 sm:$0xff]  }
  0x22   :  { %700 = vmatpush1.bf16.msra.mxu0 %v1966_v13  ;;  %1953 = vmatpush1.bf16.msra.mxu1 %v1966_v13  ;;  %84 = vst.msk [vmem:[#allocation2 + $0x1e8] sm:$0xff] %vm22_vm3, %v2068_v17  ;;  %85 = vst.msk [vmem:[#allocation2 + $0x1f0] sm:$0xff] %vm22_vm3, %v2068_v17  ;;  %v2057_v11 = vld [vmem:[%s2949_s0 + $0x1e0] ss:$8 sps:$4 sm:$0xff]   ;;  %v2060_v13 = vld [vmem:[%s2949_s0 + $0x1f4] ss:$8 sps:$4 sm:$0xff]  }
  0x23   :  { %701 = vmatprep.subr.bf16.mxu0 %v2066_v0  ;;  %1944 = vmatprep.subr.bf16.mxu1 %v2066_v0  ;;  %86 = vst.msk [vmem:[#allocation2 + $0x1f8] sm:$0xff] %vm22_vm3, %v2068_v17  ;;  %v2040_v0 = vld [vmem:[%s2949_s0 + $0xc4] ss:$8 sps:$4 sm:$0xff]   ;;  %v2062_v14 = vld [vmem:[%s2949_s0 + $0xf0] ss:$8 sps:$4 sm:$0xff]  }
  0x24   :  { %v2063_v15 = vld [vmem:[%s2949_s0 + $0x1f0] ss:$8 sps:$4 sm:$0xff]   ;;  %v183_v17 = vld [vmem:[#allocation2 + $0x100] sm:$0xff] }
  0x26   :  { %702 = vmatpush1.bf16.msra.mxu0 %v2132_v16  ;;  %1954 = vmatpush1.bf16.msra.mxu1 %v2132_v16  ;;  %v151_v16 = vld [vmem:[#allocation2] sm:$0xff] }
  0x29   :  { %716 = vmatmul.mubr.bf16.vlgmr.msra.gmra.mrb[0].mxu0 %v1968_v18  ;;  %844 = vmatmul.mubr.bf16.vlgmr.msra.gmra.mrb[0].mxu1 %v1971_v19 }
  0x2a   :  { %1774 = vmatprep.mubr.msk.bf16.mxu0 %vm579_vm0, %v1974_v20  ;;  %1790 = vmatprep.mubr.msk.bf16.mxu1 %vm579_vm0, %v1976_v21  ;;  %v152_v20 = vld [vmem:[#allocation2 + $0x8] sm:$0xff] }
  0x2b   :  { %v184_v21 = vld [vmem:[#allocation2 + $0x108] sm:$0xff] }
  0x31   :  { %724 = vmatmul.mubr.bf16.gmra.mrb[4].mxu0 %v1978_v22  ;;  %852 = vmatmul.mubr.bf16.gmra.mrb[4].mxu1 %v1979_v23 }
  0x32   :  { %1775 = vmatprep.mubr.msk.bf16.mxu0 %vm579_vm0, %v1980_v24  ;;  %1791 = vmatprep.mubr.msk.bf16.mxu1 %vm579_vm0, %v1982_v25 }
  0x39   :  { %732 = vmatmul.mubr.bf16.gmra.mrb[8].mxu0 %v1984_v26  ;;  %860 = vmatmul.mubr.bf16.gmra.mrb[8].mxu1 %v1985_v27 }
  0x3a   :  { %1776 = vmatprep.mubr.msk.bf16.mxu0 %vm579_vm0, %v1986_v28  ;;  %1792 = vmatprep.mubr.msk.bf16.mxu1 %vm579_vm0, %v1988_v29 }
  0x41   :  { %740 = vmatmul.mubr.bf16.gmra.mrb[12].mxu0 %v1990_v30  ;;  %868 = vmatmul.mubr.bf16.gmra.mrb[12].mxu1 %v1991_v31 }
  0x42   :  { %1777 = vmatprep.mubr.msk.bf16.mxu0 %vm579_vm0, %v1992_v32  ;;  %1793 = vmatprep.mubr.msk.bf16.mxu1 %vm579_vm0, %v1994_v33  ;;  %v153_v32 = vld [vmem:[#allocation2 + $0x10] sm:$0xff] }
  0x43   :  { %v185_v33 = vld [vmem:[#allocation2 + $0x110] sm:$0xff] }
  0x49   :  { %748 = vmatmul.mubr.bf16.gmra.mrb[16].mxu0 %v1996_v34  ;;  %876 = vmatmul.mubr.bf16.gmra.mrb[16].mxu1 %v1997_v35  ;;  %v2487_v34 = vld [vmem:[%s2950_s2] ss:$0 sm:$0xff] }
  0x4a   :  { %1778 = vmatprep.mubr.msk.bf16.mxu0 %vm579_vm0, %v1998_v36  ;;  %1794 = vmatprep.mubr.msk.bf16.mxu1 %vm579_vm0, %v2000_v37  ;;  %v154_v37 = vld [vmem:[#allocation2 + $0x18] sm:$0xff] }
  0x51   :  { %756 = vmatmul.mubr.bf16.gmra.mrb[20].mxu0 %v2002_v38  ;;  %884 = vmatmul.mubr.bf16.gmra.mrb[20].mxu1 %v2003_v39  ;;  %v186_v38 = vld [vmem:[#allocation2 + $0x118] sm:$0xff] }
  0x52   :  { %1779 = vmatprep.mubr.msk.bf16.mxu0 %vm579_vm0, %v2004_v40  ;;  %1795 = vmatprep.mubr.msk.bf16.mxu1 %vm579_vm0, %v2006_v41 }
  0x59   :  { %764 = vmatmul.mubr.bf16.gmra.mrb[24].mxu0 %v2008_v42  ;;  %892 = vmatmul.mubr.bf16.gmra.mrb[24].mxu1 %v2009_v43 }
  0x5a   :  { %1780 = vmatprep.mubr.msk.bf16.mxu0 %vm579_vm0, %v2010_v44  ;;  %1796 = vmatprep.mubr.msk.bf16.mxu1 %vm579_vm0, %v2012_v45  ;;  %v2492_v44 = vld [vmem:[%s2951_s3] ss:$0 sm:$0xff] }
  0x61   :  { %772 = vmatmul.mubr.bf16.gmra.mrb[28].mxu0 %v2014_v46  ;;  %900 = vmatmul.mubr.bf16.gmra.mrb[28].mxu1 %v2015_v47 }
  0x62   :  { %1781 = vmatprep.mubr.msk.bf16.mxu0 %vm579_vm0, %v2016_v48  ;;  %1797 = vmatprep.mubr.msk.bf16.mxu1 %vm579_vm0, %v2018_v49 }
  0x69   :  { %780 = vmatmul.mubr.bf16.gmra.mrb[32].mxu0 %v2020_v50  ;;  %908 = vmatmul.mubr.bf16.gmra.mrb[32].mxu1 %v2021_v51 }
  0x6a   :  { %1782 = vmatprep.mubr.msk.bf16.mxu0 %vm579_vm0, %v2022_v52  ;;  %1798 = vmatprep.mubr.msk.bf16.mxu1 %vm579_vm0, %v2024_v53 }
  0x71   :  { %788 = vmatmul.mubr.bf16.gmra.mrb[36].mxu0 %v2026_v54  ;;  %916 = vmatmul.mubr.bf16.gmra.mrb[36].mxu1 %v2027_v55 }
  0x72   :  { %1783 = vmatprep.mubr.msk.bf16.mxu0 %vm579_vm0, %v2028_v56  ;;  %1799 = vmatprep.mubr.msk.bf16.mxu1 %vm579_vm0, %v2030_v57 }
  0x79   :  { %796 = vmatmul.mubr.bf16.gmra.mrb[40].mxu0 %v2032_v58  ;;  %924 = vmatmul.mubr.bf16.gmra.mrb[40].mxu1 %v2033_v59 }
  0x7a   :  { %1784 = vmatprep.mubr.msk.bf16.mxu0 %vm579_vm0, %v2034_v60  ;;  %1800 = vmatprep.mubr.msk.bf16.mxu1 %vm579_vm0, %v2036_v61 }
  0x81   :  { %804 = vmatmul.mubr.bf16.gmra.mrb[44].mxu0 %v2038_v62  ;;  %932 = vmatmul.mubr.bf16.gmra.mrb[44].mxu1 %v2039_v63 }
  0x82   :  { %1785 = vmatprep.mubr.msk.bf16.mxu0 %vm579_vm0, %v2040_v0  ;;  %1801 = vmatprep.mubr.msk.bf16.mxu1 %vm579_vm0, %v2042_v1  ;;  %v155_v0 = vld [vmem:[#allocation2 + $0x20] sm:$0xff] }
  0x83   :  { %v187_v1 = vld [vmem:[#allocation2 + $0x120] sm:$0xff] }
  0x89   :  { %812 = vmatmul.mubr.bf16.gmra.mrb[48].mxu0 %v2044_v2  ;;  %940 = vmatmul.mubr.bf16.gmra.mrb[48].mxu1 %v2045_v3 }
  0x8a   :  { %1786 = vmatprep.mubr.msk.bf16.mxu0 %vm579_vm0, %v2046_v4  ;;  %1802 = vmatprep.mubr.msk.bf16.mxu1 %vm579_vm0, %v2048_v5 }
  0x91   :  { %820 = vmatmul.mubr.bf16.gmra.mrb[52].mxu0 %v2050_v6  ;;  %948 = vmatmul.mubr.bf16.gmra.mrb[52].mxu1 %v2051_v7 }
  0x92   :  { %1787 = vmatprep.mubr.msk.bf16.mxu0 %vm579_vm0, %v2052_v8  ;;  %1803 = vmatprep.mubr.msk.bf16.mxu1 %vm579_vm0, %v2054_v9 }
  0x99   :  { %828 = vmatmul.mubr.bf16.gmra.mrb[56].mxu0 %v2056_v10  ;;  %956 = vmatmul.mubr.bf16.gmra.mrb[56].mxu1 %v2057_v11  ;;  %v156_v10 = vld [vmem:[#allocation2 + $0x28] sm:$0xff] }
  0x9a   :  { %1788 = vmatprep.mubr.msk.bf16.mxu0 %vm579_vm0, %v2058_v12  ;;  %1804 = vmatprep.mubr.msk.bf16.mxu1 %vm579_vm0, %v2060_v13  ;;  %v188_v11 = vld [vmem:[#allocation2 + $0x128] sm:$0xff] }
  0xa1   :  { %836 = vmatmul.mubr.bf16.gmra.mrb[60].mxu0 %v2062_v14  ;;  %964 = vmatmul.mubr.bf16.gmra.mrb[60].mxu1 %v2063_v15 }
  0xfc   :  { %v717_v18 = vpop.f32.mrb[0].mxu0  ;;  %v845_v19 = vpop.f32.mrb[0].mxu1 }
  0xfd   :  { %v972_v22 = vadd.f32 %v717_v18, %v151_v16  ;;  %v1004_v23 = vadd.f32 %v845_v19, %v183_v17  ;;  %v719_v24 = vpop.f32.mrb[1].mxu0  ;;  %v847_v25 = vpop.f32.mrb[1].mxu1 }
  0xfe   :  { %v720_v26 = vpop.f32.mrb[2].mxu0  ;;  %v848_v27 = vpop.f32.mrb[2].mxu1 }
  0xff   :  { %1037 = vst.msk [vmem:[#allocation2] sm:$0xff] %vm22_vm3, %v972_v22  ;;  %1069 = vst.msk [vmem:[#allocation2 + $0x100] sm:$0xff] %vm22_vm3, %v1004_v23  ;;  %v973_v28 = vadd.f32 %v720_v26, %v152_v20  ;;  %v1005_v29 = vadd.f32 %v848_v27, %v184_v21  ;;  %v722_v30 = vpop.f32.mrb[3].mxu0  ;;  %v850_v31 = vpop.f32.mrb[3].mxu1 }
 0x101   :  { %1038 = vst.msk [vmem:[#allocation2 + $0x8] sm:$0xff] %vm22_vm3, %v973_v28  ;;  %1070 = vst.msk [vmem:[#allocation2 + $0x108] sm:$0xff] %vm22_vm3, %v1005_v29 }
 0x104   :  { %v725_v35 = vpop.f32.mrb[4].mxu0  ;;  %v853_v36 = vpop.f32.mrb[4].mxu1 }
 0x105   :  { %v974_v39 = vadd.f32 %v725_v35, %v153_v32  ;;  %v1006_v40 = vadd.f32 %v853_v36, %v185_v33  ;;  %v727_v41 = vpop.f32.mrb[5].mxu0  ;;  %v855_v42 = vpop.f32.mrb[5].mxu1 }
 0x106   :  { %v1104_v43 = vld [vmem:[#allocation2] sm:$0xff]  ;;  %v728_v46 = vpop.f32.mrb[6].mxu0  ;;  %v856_v47 = vpop.f32.mrb[6].mxu1  ;;  %v158_v41 = vld [vmem:[#allocation2 + $0x38] sm:$0xff] }
 0x107   :  { %v1136_v45 = vld [vmem:[#allocation2 + $0x100] sm:$0xff]  ;;  %v1175_v48 = vmul.f32 %v2487_v34, %v1104_v43  ;;  %1039 = vst.msk [vmem:[#allocation2 + $0x10] sm:$0xff] %vm22_vm3, %v974_v39  ;;  %1071 = vst.msk [vmem:[#allocation2 + $0x110] sm:$0xff] %vm22_vm3, %v1006_v40  ;;  %v975_v50 = vadd.f32 %v728_v46, %v154_v37  ;;  %v1007_v51 = vadd.f32 %v856_v47, %v186_v38  ;;  %v730_v52 = vpop.f32.mrb[7].mxu0  ;;  %v858_v53 = vpop.f32.mrb[7].mxu1  ;;  %v157_v37 = vld [vmem:[#allocation2 + $0x30] sm:$0xff] }
 0x108   :  { %v1207_v49 = vmul.f32 %v2487_v34, %v1136_v45  ;;  %v1105_v54 = vld [vmem:[#allocation2 + $0x8] sm:$0xff]  ;;  %v189_v38 = vld [vmem:[#allocation2 + $0x130] sm:$0xff]  ;;  %v190_v42 = vld [vmem:[#allocation2 + $0x138] sm:$0xff] }
 0x109   :  { %v1137_v55 = vld [vmem:[#allocation2 + $0x108] sm:$0xff]  ;;  %v1246_v56 = vadd.f32 %v2492_v44, %v1175_v48  ;;  %v1176_v58 = vmul.f32 %v2487_v34, %v1105_v54  ;;  %1040 = vst.msk [vmem:[#allocation2 + $0x18] sm:$0xff] %vm22_vm3, %v975_v50  ;;  %1072 = vst.msk [vmem:[#allocation2 + $0x118] sm:$0xff] %vm22_vm3, %v1007_v51 }
 0x10a   :  { %v1278_v57 = vadd.f32 %v2492_v44, %v1207_v49  ;;  %v1208_v59 = vmul.f32 %v2487_v34, %v1137_v55 }
 0x10b   :  { %v1310_v60 = vmax.f32 %v1246_v56, 0.0  ;;  %v1247_v62 = vadd.f32 %v2492_v44, %v1176_v58 }
 0x10c   :  { %v1342_v61 = vmax.f32 %v1278_v57, 0.0  ;;  %v1279_v63 = vadd.f32 %v2492_v44, %v1208_v59  ;;  %v733_v2 = vpop.f32.mrb[8].mxu0  ;;  %v861_v3 = vpop.f32.mrb[8].mxu1 }
 0x10d   :  { %v1871_v4 = vpack.c.bf16 %v1310_v60, %v1310_v60  ;;  %v1311_v6 = vmax.f32 %v1247_v62, 0.0  ;;  %v735_v8 = vpop.f32.mrb[9].mxu0  ;;  %v863_v9 = vpop.f32.mrb[9].mxu1  ;;  %v976_v14 = vadd.f32 %v733_v2, %v155_v0  ;;  %v1008_v15 = vadd.f32 %v861_v3, %v187_v1 }
 0x10e   :  { %v1903_v5 = vpack.c.bf16 %v1342_v61, %v1342_v61  ;;  %v1343_v7 = vmax.f32 %v1279_v63, 0.0  ;;  %v1106_v12 = vld [vmem:[#allocation2 + $0x10] sm:$0xff]  ;;  %v736_v16 = vpop.f32.mrb[10].mxu0  ;;  %v864_v17 = vpop.f32.mrb[10].mxu1 }
 0x10f   :  { %v1138_v13 = vld [vmem:[#allocation2 + $0x110] sm:$0xff]  ;;  %1631 = vst.msk [vmem:[%s2952_s4] sm:$0xf] %vm1630_vm4, %v1871_v4  ;;  %v1872_v18 = vpack.c.bf16 %v1311_v6, %v1311_v6  ;;  %v1177_v20 = vmul.f32 %v2487_v34, %v1106_v12  ;;  %v738_v22 = vpop.f32.mrb[11].mxu0  ;;  %v866_v23 = vpop.f32.mrb[11].mxu1  ;;  %v977_v26 = vadd.f32 %v736_v16, %v156_v10  ;;  %v1009_v27 = vadd.f32 %v864_v17, %v188_v11  ;;  %v159_v6 = vld [vmem:[#allocation2 + $0x40] sm:$0xff] }
 0x110   :  { %1663 = vst.msk [vmem:[%s2952_s4 + $0x80] sm:$0xf] %vm1630_vm4, %v1903_v5  ;;  %v1904_v19 = vpack.c.bf16 %v1343_v7, %v1343_v7  ;;  %v1209_v21 = vmul.f32 %v2487_v34, %v1138_v13  ;;  %v1107_v24 = vld [vmem:[#allocation2 + $0x18] sm:$0xff]  ;;  %v191_v7 = vld [vmem:[#allocation2 + $0x140] sm:$0xff] }
 0x111   :  { %v1139_v25 = vld [vmem:[#allocation2 + $0x118] sm:$0xff]  ;;  %1041 = vst.msk [vmem:[#allocation2 + $0x20] sm:$0xff] %vm22_vm3, %v976_v14  ;;  %1073 = vst.msk [vmem:[#allocation2 + $0x120] sm:$0xff] %vm22_vm3, %v1008_v15  ;;  %v1248_v28 = vadd.f32 %v2492_v44, %v1177_v20  ;;  %v1178_v30 = vmul.f32 %v2487_v34, %v1107_v24  ;;  %v160_v14 = vld [vmem:[#allocation2 + $0x48] sm:$0xff] }
 0x112   :  { %1632 = vst.msk [vmem:[%s2952_s4 + $0x4] sm:$0xf] %vm1630_vm4, %v1872_v18  ;;  %1664 = vst.msk [vmem:[%s2952_s4 + $0x84] sm:$0xf] %vm1630_vm4, %v1904_v19  ;;  %v1280_v29 = vadd.f32 %v2492_v44, %v1209_v21  ;;  %v1210_v31 = vmul.f32 %v2487_v34, %v1139_v25  ;;  %v192_v15 = vld [vmem:[#allocation2 + $0x148] sm:$0xff] }
 0x113   :  { %1042 = vst.msk [vmem:[#allocation2 + $0x28] sm:$0xff] %vm22_vm3, %v977_v26  ;;  %1074 = vst.msk [vmem:[#allocation2 + $0x128] sm:$0xff] %vm22_vm3, %v1009_v27  ;;  %v1312_v32 = vmax.f32 %v1248_v28, 0.0  ;;  %v1249_v35 = vadd.f32 %v2492_v44, %v1178_v30 }
 0x114   :  { %v1344_v33 = vmax.f32 %v1280_v29, 0.0  ;;  %v1281_v36 = vadd.f32 %v2492_v44, %v1210_v31  ;;  %v741_v39 = vpop.f32.mrb[12].mxu0  ;;  %v869_v40 = vpop.f32.mrb[12].mxu1 }
 0x115   :  { %v1873_v43 = vpack.c.bf16 %v1312_v32, %v1312_v32  ;;  %v1313_v46 = vmax.f32 %v1249_v35, 0.0  ;;  %v743_v48 = vpop.f32.mrb[13].mxu0  ;;  %v871_v49 = vpop.f32.mrb[13].mxu1  ;;  %v978_v50 = vadd.f32 %v741_v39, %v157_v37  ;;  %v1010_v51 = vadd.f32 %v869_v40, %v189_v38 }
 0x116   :  { %v1905_v45 = vpack.c.bf16 %v1344_v33, %v1344_v33  ;;  %v1345_v47 = vmax.f32 %v1281_v36, 0.0  ;;  %v744_v52 = vpop.f32.mrb[14].mxu0  ;;  %v872_v53 = vpop.f32.mrb[14].mxu1 }
 0x117   :  { %1633 = vst.msk [vmem:[%s2952_s4 + $0x8] sm:$0xf] %vm1630_vm4, %v1873_v43  ;;  %v1874_v54 = vpack.c.bf16 %v1313_v46, %v1313_v46  ;;  %v979_v58 = vadd.f32 %v744_v52, %v158_v41  ;;  %v1011_v59 = vadd.f32 %v872_v53, %v190_v42  ;;  %v746_v60 = vpop.f32.mrb[15].mxu0  ;;  %v874_v61 = vpop.f32.mrb[15].mxu1  ;;  %v161_v43 = vld [vmem:[#allocation2 + $0x50] sm:$0xff] }
 0x118   :  { %1665 = vst.msk [vmem:[%s2952_s4 + $0x88] sm:$0xf] %vm1630_vm4, %v1905_v45  ;;  %v1906_v55 = vpack.c.bf16 %v1345_v47, %v1345_v47  ;;  %v1108_v56 = vld [vmem:[#allocation2 + $0x20] sm:$0xff]  ;;  %v193_v45 = vld [vmem:[#allocation2 + $0x150] sm:$0xff] }
 0x119   :  { %v1140_v57 = vld [vmem:[#allocation2 + $0x120] sm:$0xff]  ;;  %v1179_v62 = vmul.f32 %v2487_v34, %v1108_v56  ;;  %1043 = vst.msk [vmem:[#allocation2 + $0x30] sm:$0xff] %vm22_vm3, %v978_v50  ;;  %1075 = vst.msk [vmem:[#allocation2 + $0x130] sm:$0xff] %vm22_vm3, %v1010_v51 }
 0x11a   :  { %v1211_v63 = vmul.f32 %v2487_v34, %v1140_v57  ;;  %1634 = vst.msk [vmem:[%s2952_s4 + $0xc] sm:$0xf] %vm1630_vm4, %v1874_v54  ;;  %1666 = vst.msk [vmem:[%s2952_s4 + $0x8c] sm:$0xf] %vm1630_vm4, %v1906_v55  ;;  %v1109_v0 = vld [vmem:[#allocation2 + $0x28] sm:$0xff] }
 0x11b   :  { %v1141_v1 = vld [vmem:[#allocation2 + $0x128] sm:$0xff]  ;;  %1044 = vst.msk [vmem:[#allocation2 + $0x38] sm:$0xff] %vm22_vm3, %v979_v58  ;;  %1076 = vst.msk [vmem:[#allocation2 + $0x138] sm:$0xff] %vm22_vm3, %v1011_v59  ;;  %v1250_v2 = vadd.f32 %v2492_v44, %v1179_v62  ;;  %v1180_v4 = vmul.f32 %v2487_v34, %v1109_v0  ;;  %v162_v58 = vld [vmem:[#allocation2 + $0x58] sm:$0xff] }
 0x11c   :  { %v1282_v3 = vadd.f32 %v2492_v44, %v1211_v63  ;;  %v1212_v5 = vmul.f32 %v2487_v34, %v1141_v1  ;;  %v749_v12 = vpop.f32.mrb[16].mxu0  ;;  %v877_v13 = vpop.f32.mrb[16].mxu1  ;;  %v194_v59 = vld [vmem:[#allocation2 + $0x158] sm:$0xff] }
 0x11d   :  { %v1314_v8 = vmax.f32 %v1250_v2, 0.0  ;;  %v1251_v10 = vadd.f32 %v2492_v44, %v1180_v4  ;;  %v980_v16 = vadd.f32 %v749_v12, %v159_v6  ;;  %v1012_v17 = vadd.f32 %v877_v13, %v191_v7  ;;  %v751_v18 = vpop.f32.mrb[17].mxu0  ;;  %v879_v19 = vpop.f32.mrb[17].mxu1 }
 0x11e   :  { %v1346_v9 = vmax.f32 %v1282_v3, 0.0  ;;  %v1283_v11 = vadd.f32 %v2492_v44, %v1212_v5  ;;  %v752_v24 = vpop.f32.mrb[18].mxu0  ;;  %v880_v25 = vpop.f32.mrb[18].mxu1 }
 0x11f   :  { %v1875_v20 = vpack.c.bf16 %v1314_v8, %v1314_v8  ;;  %v1315_v22 = vmax.f32 %v1251_v10, 0.0  ;;  %1045 = vst.msk [vmem:[#allocation2 + $0x40] sm:$0xff] %vm22_vm3, %v980_v16  ;;  %1077 = vst.msk [vmem:[#allocation2 + $0x140] sm:$0xff] %vm22_vm3, %v1012_v17  ;;  %v981_v28 = vadd.f32 %v752_v24, %v160_v14  ;;  %v1013_v29 = vadd.f32 %v880_v25, %v192_v15  ;;  %v754_v30 = vpop.f32.mrb[19].mxu0  ;;  %v882_v31 = vpop.f32.mrb[19].mxu1 }
 0x120   :  { %v1907_v21 = vpack.c.bf16 %v1346_v9, %v1346_v9  ;;  %v1347_v23 = vmax.f32 %v1283_v11, 0.0  ;;  %v1110_v26 = vld [vmem:[#allocation2 + $0x30] sm:$0xff]  ;;  %v164_v30 = vld [vmem:[#allocation2 + $0x68] sm:$0xff] }
 0x121   :  { %v1142_v27 = vld [vmem:[#allocation2 + $0x130] sm:$0xff]  ;;  %1635 = vst.msk [vmem:[%s2952_s4 + $0x10] sm:$0xf] %vm1630_vm4, %v1875_v20  ;;  %v1876_v32 = vpack.c.bf16 %v1315_v22, %v1315_v22  ;;  %v1181_v35 = vmul.f32 %v2487_v34, %v1110_v26  ;;  %v163_v20 = vld [vmem:[#allocation2 + $0x60] sm:$0xff]  ;;  %v196_v31 = vld [vmem:[#allocation2 + $0x168] sm:$0xff] }
 0x122   :  { %1667 = vst.msk [vmem:[%s2952_s4 + $0x90] sm:$0xf] %vm1630_vm4, %v1907_v21  ;;  %v1908_v33 = vpack.c.bf16 %v1347_v23, %v1347_v23  ;;  %v1213_v36 = vmul.f32 %v2487_v34, %v1142_v27  ;;  %v1111_v37 = vld [vmem:[#allocation2 + $0x38] sm:$0xff]  ;;  %v195_v21 = vld [vmem:[#allocation2 + $0x160] sm:$0xff] }
 0x123   :  { %v1143_v38 = vld [vmem:[#allocation2 + $0x138] sm:$0xff]  ;;  %v1182_v39 = vmul.f32 %v2487_v34, %v1111_v37  ;;  %1046 = vst.msk [vmem:[#allocation2 + $0x48] sm:$0xff] %vm22_vm3, %v981_v28  ;;  %1078 = vst.msk [vmem:[#allocation2 + $0x148] sm:$0xff] %vm22_vm3, %v1013_v29  ;;  %v1252_v41 = vadd.f32 %v2492_v44, %v1181_v35 }
 0x124   :  { %v1214_v40 = vmul.f32 %v2487_v34, %v1143_v38  ;;  %1636 = vst.msk [vmem:[%s2952_s4 + $0x14] sm:$0xf] %vm1630_vm4, %v1876_v32  ;;  %1668 = vst.msk [vmem:[%s2952_s4 + $0x94] sm:$0xf] %vm1630_vm4, %v1908_v33  ;;  %v1284_v42 = vadd.f32 %v2492_v44, %v1213_v36  ;;  %v757_v50 = vpop.f32.mrb[20].mxu0  ;;  %v885_v51 = vpop.f32.mrb[20].mxu1 }
 0x125   :  { %v1253_v46 = vadd.f32 %v2492_v44, %v1182_v39  ;;  %v1316_v48 = vmax.f32 %v1252_v41, 0.0  ;;  %v982_v54 = vadd.f32 %v757_v50, %v161_v43  ;;  %v1014_v55 = vadd.f32 %v885_v51, %v193_v45  ;;  %v759_v56 = vpop.f32.mrb[21].mxu0  ;;  %v887_v57 = vpop.f32.mrb[21].mxu1 }
 0x126   :  { %v1285_v47 = vadd.f32 %v2492_v44, %v1214_v40  ;;  %v1348_v49 = vmax.f32 %v1284_v42, 0.0  ;;  %v1112_v62 = vld [vmem:[#allocation2 + $0x40] sm:$0xff]  ;;  %v760_v0 = vpop.f32.mrb[22].mxu0  ;;  %v888_v1 = vpop.f32.mrb[22].mxu1 }
 0x127   :  { %v1317_v52 = vmax.f32 %v1253_v46, 0.0  ;;  %v1877_v60 = vpack.c.bf16 %v1316_v48, %v1316_v48  ;;  %v1144_v63 = vld [vmem:[#allocation2 + $0x140] sm:$0xff]  ;;  %v1183_v4 = vmul.f32 %v2487_v34, %v1112_v62  ;;  %1047 = vst.msk [vmem:[#allocation2 + $0x50] sm:$0xff] %vm22_vm3, %v982_v54  ;;  %1079 = vst.msk [vmem:[#allocation2 + $0x150] sm:$0xff] %vm22_vm3, %v1014_v55  ;;  %v762_v6 = vpop.f32.mrb[23].mxu0  ;;  %v890_v7 = vpop.f32.mrb[23].mxu1  ;;  %v983_v10 = vadd.f32 %v760_v0, %v162_v58 }
 0x128   :  { %v1349_v53 = vmax.f32 %v1285_v47, 0.0  ;;  %v1909_v61 = vpack.c.bf16 %v1348_v49, %v1348_v49  ;;  %v1215_v5 = vmul.f32 %v2487_v34, %v1144_v63  ;;  %v1015_v11 = vadd.f32 %v888_v1, %v194_v59  ;;  %v165_v54 = vld [vmem:[#allocation2 + $0x70] sm:$0xff]  ;;  %v166_v62 = vld [vmem:[#allocation2 + $0x78] sm:$0xff] }
 0x129   :  { %v1878_v2 = vpack.c.bf16 %v1317_v52, %v1317_v52  ;;  %1637 = vst.msk [vmem:[%s2952_s4 + $0x18] sm:$0xf] %vm1630_vm4, %v1877_v60  ;;  %v1254_v12 = vadd.f32 %v2492_v44, %v1183_v4  ;;  %v197_v55 = vld [vmem:[#allocation2 + $0x170] sm:$0xff]  ;;  %v198_v63 = vld [vmem:[#allocation2 + $0x178] sm:$0xff] }
 0x12a   :  { %v1910_v3 = vpack.c.bf16 %v1349_v53, %v1349_v53  ;;  %1669 = vst.msk [vmem:[%s2952_s4 + $0x98] sm:$0xf] %vm1630_vm4, %v1909_v61  ;;  %v1113_v8 = vld [vmem:[#allocation2 + $0x48] sm:$0xff]  ;;  %v1286_v13 = vadd.f32 %v2492_v44, %v1215_v5 }
 0x12b   :  { %v1145_v9 = vld [vmem:[#allocation2 + $0x148] sm:$0xff]  ;;  %1638 = vst.msk [vmem:[%s2952_s4 + $0x1c] sm:$0xf] %vm1630_vm4, %v1878_v2  ;;  %v1184_v14 = vmul.f32 %v2487_v34, %v1113_v8  ;;  %v1318_v16 = vmax.f32 %v1254_v12, 0.0 }
 0x12c   :  { %1670 = vst.msk [vmem:[%s2952_s4 + $0x9c] sm:$0xf] %vm1630_vm4, %v1910_v3  ;;  %v1216_v15 = vmul.f32 %v2487_v34, %v1145_v9  ;;  %v1350_v17 = vmax.f32 %v1286_v13, 0.0  ;;  %v765_v22 = vpop.f32.mrb[24].mxu0  ;;  %v893_v23 = vpop.f32.mrb[24].mxu1 }
 0x12d   :  { %1048 = vst.msk [vmem:[#allocation2 + $0x58] sm:$0xff] %vm22_vm3, %v983_v10  ;;  %1080 = vst.msk [vmem:[#allocation2 + $0x158] sm:$0xff] %vm22_vm3, %v1015_v11  ;;  %v1255_v18 = vadd.f32 %v2492_v44, %v1184_v14  ;;  %v1879_v24 = vpack.c.bf16 %v1318_v16, %v1318_v16  ;;  %v767_v28 = vpop.f32.mrb[25].mxu0  ;;  %v895_v29 = vpop.f32.mrb[25].mxu1  ;;  %v984_v35 = vadd.f32 %v765_v22, %v163_v20 }
 0x12e   :  { %v1287_v19 = vadd.f32 %v2492_v44, %v1216_v15  ;;  %v1911_v25 = vpack.c.bf16 %v1350_v17, %v1350_v17  ;;  %v1114_v32 = vld [vmem:[#allocation2 + $0x50] sm:$0xff]  ;;  %v1016_v36 = vadd.f32 %v893_v23, %v195_v21  ;;  %v768_v37 = vpop.f32.mrb[26].mxu0  ;;  %v896_v38 = vpop.f32.mrb[26].mxu1 }
 0x12f   :  { %v1319_v26 = vmax.f32 %v1255_v18, 0.0  ;;  %v1146_v33 = vld [vmem:[#allocation2 + $0x150] sm:$0xff]  ;;  %1639 = vst.msk [vmem:[%s2952_s4 + $0x20] sm:$0xf] %vm1630_vm4, %v1879_v24  ;;  %v1185_v41 = vmul.f32 %v2487_v34, %v1114_v32  ;;  %v770_v43 = vpop.f32.mrb[27].mxu0  ;;  %v898_v45 = vpop.f32.mrb[27].mxu1  ;;  %v985_v46 = vadd.f32 %v768_v37, %v164_v30  ;;  %v1017_v47 = vadd.f32 %v896_v38, %v196_v31 }
 0x130   :  { %v1351_v27 = vmax.f32 %v1287_v19, 0.0  ;;  %1671 = vst.msk [vmem:[%s2952_s4 + $0xa0] sm:$0xf] %vm1630_vm4, %v1911_v25  ;;  %v1217_v42 = vmul.f32 %v2487_v34, %v1146_v33 }
 0x131   :  { %v1880_v39 = vpack.c.bf16 %v1319_v26, %v1319_v26  ;;  %1049 = vst.msk [vmem:[#allocation2 + $0x60] sm:$0xff] %vm22_vm3, %v984_v35  ;;  %1081 = vst.msk [vmem:[#allocation2 + $0x160] sm:$0xff] %vm22_vm3, %v1016_v36  ;;  %v1256_v48 = vadd.f32 %v2492_v44, %v1185_v41  ;;  %v167_v26 = vld [vmem:[#allocation2 + $0x80] sm:$0xff]  ;;  %v168_v35 = vld [vmem:[#allocation2 + $0x88] sm:$0xff] }
 0x132   :  { %v1912_v40 = vpack.c.bf16 %v1351_v27, %v1351_v27  ;;  %v1288_v49 = vadd.f32 %v2492_v44, %v1217_v42  ;;  %1050 = vst.msk [vmem:[#allocation2 + $0x68] sm:$0xff] %vm22_vm3, %v985_v46  ;;  %1082 = vst.msk [vmem:[#allocation2 + $0x168] sm:$0xff] %vm22_vm3, %v1017_v47  ;;  %v199_v27 = vld [vmem:[#allocation2 + $0x180] sm:$0xff]  ;;  %v200_v36 = vld [vmem:[#allocation2 + $0x188] sm:$0xff] }
 0x133   :  { %1640 = vst.msk [vmem:[%s2952_s4 + $0x24] sm:$0xf] %vm1630_vm4, %v1880_v39  ;;  %v1320_v56 = vmax.f32 %v1256_v48, 0.0 }
 0x134   :  { %1672 = vst.msk [vmem:[%s2952_s4 + $0xa4] sm:$0xf] %vm1630_vm4, %v1912_v40  ;;  %v1115_v50 = vld [vmem:[#allocation2 + $0x58] sm:$0xff]  ;;  %v1352_v57 = vmax.f32 %v1288_v49, 0.0  ;;  %v773_v60 = vpop.f32.mrb[28].mxu0  ;;  %v901_v61 = vpop.f32.mrb[28].mxu1 }
 0x135   :  { %v1147_v51 = vld [vmem:[#allocation2 + $0x158] sm:$0xff]  ;;  %v1186_v52 = vmul.f32 %v2487_v34, %v1115_v50  ;;  %v1881_v0 = vpack.c.bf16 %v1320_v56, %v1320_v56  ;;  %v986_v2 = vadd.f32 %v773_v60, %v165_v54  ;;  %v1018_v3 = vadd.f32 %v901_v61, %v197_v55  ;;  %v775_v4 = vpop.f32.mrb[29].mxu0  ;;  %v903_v5 = vpop.f32.mrb[29].mxu1 }
 0x136   :  { %v1218_v53 = vmul.f32 %v2487_v34, %v1147_v51  ;;  %v1913_v1 = vpack.c.bf16 %v1352_v57, %v1352_v57  ;;  %v776_v8 = vpop.f32.mrb[30].mxu0  ;;  %v904_v9 = vpop.f32.mrb[30].mxu1  ;;  %v169_v4 = vld [vmem:[#allocation2 + $0x90] sm:$0xff] }
 0x137   :  { %v1257_v58 = vadd.f32 %v2492_v44, %v1186_v52  ;;  %1641 = vst.msk [vmem:[%s2952_s4 + $0x28] sm:$0xf] %vm1630_vm4, %v1881_v0  ;;  %v987_v12 = vadd.f32 %v776_v8, %v166_v62  ;;  %v1019_v13 = vadd.f32 %v904_v9, %v198_v63  ;;  %v778_v14 = vpop.f32.mrb[31].mxu0  ;;  %v906_v15 = vpop.f32.mrb[31].mxu1  ;;  %v201_v5 = vld [vmem:[#allocation2 + $0x190] sm:$0xff] }
 0x138   :  { %v1289_v59 = vadd.f32 %v2492_v44, %v1218_v53  ;;  %1673 = vst.msk [vmem:[%s2952_s4 + $0xa8] sm:$0xf] %vm1630_vm4, %v1913_v1  ;;  %v1116_v10 = vld [vmem:[#allocation2 + $0x60] sm:$0xff]  ;;  %v170_v14 = vld [vmem:[#allocation2 + $0x98] sm:$0xff] }
 0x139   :  { %v1321_v6 = vmax.f32 %v1257_v58, 0.0  ;;  %v1148_v11 = vld [vmem:[#allocation2 + $0x160] sm:$0xff]  ;;  %1051 = vst.msk [vmem:[#allocation2 + $0x70] sm:$0xff] %vm22_vm3, %v986_v2  ;;  %1083 = vst.msk [vmem:[#allocation2 + $0x170] sm:$0xff] %vm22_vm3, %v1018_v3  ;;  %v1187_v18 = vmul.f32 %v2487_v34, %v1116_v10  ;;  %v1117_v20 = vld [vmem:[#allocation2 + $0x68] sm:$0xff] }
 0x13a   :  { %v1353_v7 = vmax.f32 %v1289_v59, 0.0  ;;  %v1219_v19 = vmul.f32 %v2487_v34, %v1148_v11  ;;  %v1149_v21 = vld [vmem:[#allocation2 + $0x168] sm:$0xff]  ;;  %1052 = vst.msk [vmem:[#allocation2 + $0x78] sm:$0xff] %vm22_vm3, %v987_v12  ;;  %1084 = vst.msk [vmem:[#allocation2 + $0x178] sm:$0xff] %vm22_vm3, %v1019_v13  ;;  %v1188_v24 = vmul.f32 %v2487_v34, %v1117_v20  ;;  %v202_v15 = vld [vmem:[#allocation2 + $0x198] sm:$0xff] }
 0x13b   :  { %v1882_v16 = vpack.c.bf16 %v1321_v6, %v1321_v6  ;;  %v1258_v22 = vadd.f32 %v2492_v44, %v1187_v18  ;;  %v1220_v25 = vmul.f32 %v2487_v34, %v1149_v21 }
 0x13c   :  { %v1914_v17 = vpack.c.bf16 %v1353_v7, %v1353_v7  ;;  %v1290_v23 = vadd.f32 %v2492_v44, %v1219_v19  ;;  %v1259_v30 = vadd.f32 %v2492_v44, %v1188_v24  ;;  %v781_v32 = vpop.f32.mrb[32].mxu0  ;;  %v909_v33 = vpop.f32.mrb[32].mxu1 }
 0x13d   :  { %1642 = vst.msk [vmem:[%s2952_s4 + $0x2c] sm:$0xf] %vm1630_vm4, %v1882_v16  ;;  %v1322_v28 = vmax.f32 %v1258_v22, 0.0  ;;  %v1291_v31 = vadd.f32 %v2492_v44, %v1220_v25  ;;  %v988_v37 = vadd.f32 %v781_v32, %v167_v26  ;;  %v1020_v38 = vadd.f32 %v909_v33, %v199_v27  ;;  %v783_v39 = vpop.f32.mrb[33].mxu0  ;;  %v911_v40 = vpop.f32.mrb[33].mxu1 }
 0x13e   :  { %1674 = vst.msk [vmem:[%s2952_s4 + $0xac] sm:$0xf] %vm1630_vm4, %v1914_v17  ;;  %v1354_v29 = vmax.f32 %v1290_v23, 0.0  ;;  %v1323_v43 = vmax.f32 %v1259_v30, 0.0  ;;  %v784_v48 = vpop.f32.mrb[34].mxu0  ;;  %v912_v49 = vpop.f32.mrb[34].mxu1 }
 0x13f   :  { %v1883_v41 = vpack.c.bf16 %v1322_v28, %v1322_v28  ;;  %v1355_v45 = vmax.f32 %v1291_v31, 0.0  ;;  %1053 = vst.msk [vmem:[#allocation2 + $0x80] sm:$0xff] %vm22_vm3, %v988_v37  ;;  %1085 = vst.msk [vmem:[#allocation2 + $0x180] sm:$0xff] %vm22_vm3, %v1020_v38  ;;  %v989_v52 = vadd.f32 %v784_v48, %v168_v35  ;;  %v1021_v53 = vadd.f32 %v912_v49, %v200_v36  ;;  %v786_v54 = vpop.f32.mrb[35].mxu0  ;;  %v914_v55 = vpop.f32.mrb[35].mxu1 }
 0x140   :  { %v1915_v42 = vpack.c.bf16 %v1354_v29, %v1354_v29  ;;  %v1118_v46 = vld [vmem:[#allocation2 + $0x70] sm:$0xff]  ;;  %v1884_v56 = vpack.c.bf16 %v1323_v43, %v1323_v43 }
 0x141   :  { %v1150_v47 = vld [vmem:[#allocation2 + $0x170] sm:$0xff]  ;;  %v1189_v50 = vmul.f32 %v2487_v34, %v1118_v46  ;;  %1643 = vst.msk [vmem:[%s2952_s4 + $0x30] sm:$0xf] %vm1630_vm4, %v1883_v41  ;;  %v1916_v57 = vpack.c.bf16 %v1355_v45, %v1355_v45  ;;  %v1119_v58 = vld [vmem:[#allocation2 + $0x78] sm:$0xff]  ;;  %v171_v41 = vld [vmem:[#allocation2 + $0xa0] sm:$0xff] }
 0x142   :  { %v1221_v51 = vmul.f32 %v2487_v34, %v1150_v47  ;;  %1675 = vst.msk [vmem:[%s2952_s4 + $0xb0] sm:$0xf] %vm1630_vm4, %v1915_v42  ;;  %v1151_v59 = vld [vmem:[#allocation2 + $0x178] sm:$0xff]  ;;  %v1190_v62 = vmul.f32 %v2487_v34, %v1119_v58  ;;  %1644 = vst.msk [vmem:[%s2952_s4 + $0x34] sm:$0xf] %vm1630_vm4, %v1884_v56  ;;  %v203_v42 = vld [vmem:[#allocation2 + $0x1a0] sm:$0xff] }
 0x143   :  { %v1260_v60 = vadd.f32 %v2492_v44, %v1189_v50  ;;  %v1222_v63 = vmul.f32 %v2487_v34, %v1151_v59  ;;  %1054 = vst.msk [vmem:[#allocation2 + $0x88] sm:$0xff] %vm22_vm3, %v989_v52  ;;  %1086 = vst.msk [vmem:[#allocation2 + $0x188] sm:$0xff] %vm22_vm3, %v1021_v53  ;;  %v172_v46 = vld [vmem:[#allocation2 + $0xa8] sm:$0xff] }
 0x144   :  { %v1292_v61 = vadd.f32 %v2492_v44, %v1221_v51  ;;  %1676 = vst.msk [vmem:[%s2952_s4 + $0xb4] sm:$0xf] %vm1630_vm4, %v1916_v57  ;;  %v1261_v2 = vadd.f32 %v2492_v44, %v1190_v62  ;;  %v789_v6 = vpop.f32.mrb[36].mxu0  ;;  %v917_v7 = vpop.f32.mrb[36].mxu1  ;;  %v204_v47 = vld [vmem:[#allocation2 + $0x1a8] sm:$0xff] }
 0x145   :  { %v1324_v0 = vmax.f32 %v1260_v60, 0.0  ;;  %v1293_v3 = vadd.f32 %v2492_v44, %v1222_v63  ;;  %v791_v12 = vpop.f32.mrb[37].mxu0  ;;  %v919_v13 = vpop.f32.mrb[37].mxu1  ;;  %v990_v18 = vadd.f32 %v789_v6, %v169_v4  ;;  %v1022_v19 = vadd.f32 %v917_v7, %v201_v5 }
 0x146   :  { %v1356_v1 = vmax.f32 %v1292_v61, 0.0  ;;  %v1325_v10 = vmax.f32 %v1261_v2, 0.0  ;;  %v1120_v16 = vld [vmem:[#allocation2 + $0x80] sm:$0xff]  ;;  %v792_v20 = vpop.f32.mrb[38].mxu0  ;;  %v920_v21 = vpop.f32.mrb[38].mxu1 }
 0x147   :  { %v1885_v8 = vpack.c.bf16 %v1324_v0, %v1324_v0  ;;  %v1357_v11 = vmax.f32 %v1293_v3, 0.0  ;;  %v1152_v17 = vld [vmem:[#allocation2 + $0x180] sm:$0xff]  ;;  %v1191_v24 = vmul.f32 %v2487_v34, %v1120_v16  ;;  %v794_v26 = vpop.f32.mrb[39].mxu0  ;;  %v922_v27 = vpop.f32.mrb[39].mxu1  ;;  %1055 = vst.msk [vmem:[#allocation2 + $0x90] sm:$0xff] %vm22_vm3, %v990_v18  ;;  %1087 = vst.msk [vmem:[#allocation2 + $0x190] sm:$0xff] %vm22_vm3, %v1022_v19  ;;  %v991_v30 = vadd.f32 %v792_v20, %v170_v14 }
 0x148   :  { %v1917_v9 = vpack.c.bf16 %v1356_v1, %v1356_v1  ;;  %v1886_v22 = vpack.c.bf16 %v1325_v10, %v1325_v10  ;;  %v1223_v25 = vmul.f32 %v2487_v34, %v1152_v17  ;;  %v1023_v31 = vadd.f32 %v920_v21, %v202_v15  ;;  %v173_v10 = vld [vmem:[#allocation2 + $0xb0] sm:$0xff]  ;;  %v174_v18 = vld [vmem:[#allocation2 + $0xb8] sm:$0xff] }
 0x149   :  { %1645 = vst.msk [vmem:[%s2952_s4 + $0x38] sm:$0xf] %vm1630_vm4, %v1885_v8  ;;  %v1918_v23 = vpack.c.bf16 %v1357_v11, %v1357_v11  ;;  %v1262_v32 = vadd.f32 %v2492_v44, %v1191_v24  ;;  %v205_v11 = vld [vmem:[#allocation2 + $0x1b0] sm:$0xff]  ;;  %v206_v19 = vld [vmem:[#allocation2 + $0x1b8] sm:$0xff] }
 0x14a   :  { %1677 = vst.msk [vmem:[%s2952_s4 + $0xb8] sm:$0xf] %vm1630_vm4, %v1917_v9  ;;  %v1121_v28 = vld [vmem:[#allocation2 + $0x88] sm:$0xff]  ;;  %1646 = vst.msk [vmem:[%s2952_s4 + $0x3c] sm:$0xf] %vm1630_vm4, %v1886_v22  ;;  %v1294_v33 = vadd.f32 %v2492_v44, %v1223_v25 }
 0x14b   :  { %v1153_v29 = vld [vmem:[#allocation2 + $0x188] sm:$0xff]  ;;  %1678 = vst.msk [vmem:[%s2952_s4 + $0xbc] sm:$0xf] %vm1630_vm4, %v1918_v23  ;;  %v1192_v35 = vmul.f32 %v2487_v34, %v1121_v28  ;;  %v1326_v37 = vmax.f32 %v1262_v32, 0.0 }
 0x14c   :  { %v1224_v36 = vmul.f32 %v2487_v34, %v1153_v29  ;;  %1056 = vst.msk [vmem:[#allocation2 + $0x98] sm:$0xff] %vm22_vm3, %v991_v30  ;;  %1088 = vst.msk [vmem:[#allocation2 + $0x198] sm:$0xff] %vm22_vm3, %v1023_v31  ;;  %v1358_v38 = vmax.f32 %v1294_v33, 0.0  ;;  %v797_v43 = vpop.f32.mrb[40].mxu0  ;;  %v925_v45 = vpop.f32.mrb[40].mxu1 }
 0x14d   :  { %v1263_v39 = vadd.f32 %v2492_v44, %v1192_v35  ;;  %v1887_v48 = vpack.c.bf16 %v1326_v37, %v1326_v37  ;;  %v799_v52 = vpop.f32.mrb[41].mxu0  ;;  %v927_v53 = vpop.f32.mrb[41].mxu1  ;;  %v992_v54 = vadd.f32 %v797_v43, %v171_v41  ;;  %v1024_v55 = vadd.f32 %v925_v45, %v203_v42 }
 0x14e   :  { %v1295_v40 = vadd.f32 %v2492_v44, %v1224_v36  ;;  %v1919_v49 = vpack.c.bf16 %v1358_v38, %v1358_v38  ;;  %v800_v56 = vpop.f32.mrb[42].mxu0  ;;  %v928_v57 = vpop.f32.mrb[42].mxu1  ;;  %v1122_v60 = vld [vmem:[#allocation2 + $0x90] sm:$0xff] }
 0x14f   :  { %v1327_v50 = vmax.f32 %v1263_v39, 0.0  ;;  %1647 = vst.msk [vmem:[%s2952_s4 + $0x40] sm:$0xf] %vm1630_vm4, %v1887_v48  ;;  %v1154_v61 = vld [vmem:[#allocation2 + $0x190] sm:$0xff]  ;;  %v993_v62 = vadd.f32 %v800_v56, %v172_v46  ;;  %v1025_v63 = vadd.f32 %v928_v57, %v204_v47  ;;  %v802_v0 = vpop.f32.mrb[43].mxu0  ;;  %v930_v1 = vpop.f32.mrb[43].mxu1  ;;  %v1193_v2 = vmul.f32 %v2487_v34, %v1122_v60 }
 0x150   :  { %v1359_v51 = vmax.f32 %v1295_v40, 0.0  ;;  %1679 = vst.msk [vmem:[%s2952_s4 + $0xc0] sm:$0xf] %vm1630_vm4, %v1919_v49  ;;  %v1225_v3 = vmul.f32 %v2487_v34, %v1154_v61  ;;  %v175_v48 = vld [vmem:[#allocation2 + $0xc0] sm:$0xff] }
 0x151   :  { %v1888_v58 = vpack.c.bf16 %v1327_v50, %v1327_v50  ;;  %1057 = vst.msk [vmem:[#allocation2 + $0xa0] sm:$0xff] %vm22_vm3, %v992_v54  ;;  %1089 = vst.msk [vmem:[#allocation2 + $0x1a0] sm:$0xff] %vm22_vm3, %v1024_v55  ;;  %v1264_v6 = vadd.f32 %v2492_v44, %v1193_v2  ;;  %v207_v49 = vld [vmem:[#allocation2 + $0x1c0] sm:$0xff] }
 0x152   :  { %v1920_v59 = vpack.c.bf16 %v1359_v51, %v1359_v51  ;;  %1058 = vst.msk [vmem:[#allocation2 + $0xa8] sm:$0xff] %vm22_vm3, %v993_v62  ;;  %1090 = vst.msk [vmem:[#allocation2 + $0x1a8] sm:$0xff] %vm22_vm3, %v1025_v63  ;;  %v1296_v7 = vadd.f32 %v2492_v44, %v1225_v3  ;;  %v176_v62 = vld [vmem:[#allocation2 + $0xc8] sm:$0xff] }
 0x153   :  { %1648 = vst.msk [vmem:[%s2952_s4 + $0x44] sm:$0xf] %vm1630_vm4, %v1888_v58  ;;  %v1123_v4 = vld [vmem:[#allocation2 + $0x98] sm:$0xff]  ;;  %v1328_v12 = vmax.f32 %v1264_v6, 0.0  ;;  %v208_v63 = vld [vmem:[#allocation2 + $0x1c8] sm:$0xff] }
 0x154   :  { %1680 = vst.msk [vmem:[%s2952_s4 + $0xc4] sm:$0xf] %vm1630_vm4, %v1920_v59  ;;  %v1155_v5 = vld [vmem:[#allocation2 + $0x198] sm:$0xff]  ;;  %v1194_v8 = vmul.f32 %v2487_v34, %v1123_v4  ;;  %v1360_v13 = vmax.f32 %v1296_v7, 0.0  ;;  %v805_v16 = vpop.f32.mrb[44].mxu0  ;;  %v933_v17 = vpop.f32.mrb[44].mxu1 }
 0x155   :  { %v1226_v9 = vmul.f32 %v2487_v34, %v1155_v5  ;;  %v994_v20 = vadd.f32 %v805_v16, %v173_v10  ;;  %v1026_v21 = vadd.f32 %v933_v17, %v205_v11  ;;  %v807_v22 = vpop.f32.mrb[45].mxu0  ;;  %v935_v23 = vpop.f32.mrb[45].mxu1  ;;  %v1889_v24 = vpack.c.bf16 %v1328_v12, %v1328_v12  ;;  %v2811_v17 = vld [vmem:[%s2950_s2] ss:$0 sm:$0xff] }
 0x156   :  { %v1265_v14 = vadd.f32 %v2492_v44, %v1194_v8  ;;  %v1921_v25 = vpack.c.bf16 %v1360_v13, %v1360_v13  ;;  %v808_v28 = vpop.f32.mrb[46].mxu0  ;;  %v936_v29 = vpop.f32.mrb[46].mxu1 }
 0x157   :  { %v1297_v15 = vadd.f32 %v2492_v44, %v1226_v9  ;;  %1059 = vst.msk [vmem:[#allocation2 + $0xb0] sm:$0xff] %vm22_vm3, %v994_v20  ;;  %1091 = vst.msk [vmem:[#allocation2 + $0x1b0] sm:$0xff] %vm22_vm3, %v1026_v21  ;;  %v995_v32 = vadd.f32 %v808_v28, %v174_v18  ;;  %v1027_v33 = vadd.f32 %v936_v29, %v206_v19  ;;  %v810_v35 = vpop.f32.mrb[47].mxu0  ;;  %v938_v36 = vpop.f32.mrb[47].mxu1 }
 0x158   :  { %v1329_v26 = vmax.f32 %v1265_v14, 0.0  ;;  %v1124_v30 = vld [vmem:[#allocation2 + $0xa0] sm:$0xff]  ;;  %1649 = vst.msk [vmem:[%s2952_s4 + $0x48] sm:$0xf] %vm1630_vm4, %v1889_v24  ;;  %1681 = vst.msk [vmem:[%s2952_s4 + $0xc8] sm:$0xf] %vm1630_vm4, %v1921_v25 }
 0x159   :  { %v1361_v27 = vmax.f32 %v1297_v15, 0.0  ;;  %v1156_v31 = vld [vmem:[#allocation2 + $0x1a0] sm:$0xff]  ;;  %v1195_v39 = vmul.f32 %v2487_v34, %v1124_v30  ;;  %v1125_v41 = vld [vmem:[#allocation2 + $0xa8] sm:$0xff]  ;;  %1060 = vst.msk [vmem:[#allocation2 + $0xb8] sm:$0xff] %vm22_vm3, %v995_v32  ;;  %1092 = vst.msk [vmem:[#allocation2 + $0x1b8] sm:$0xff] %vm22_vm3, %v1027_v33 }
 0x15a   :  { %v1890_v37 = vpack.c.bf16 %v1329_v26, %v1329_v26  ;;  %v1227_v40 = vmul.f32 %v2487_v34, %v1156_v31  ;;  %v1157_v42 = vld [vmem:[#allocation2 + $0x1a8] sm:$0xff]  ;;  %v1196_v43 = vmul.f32 %v2487_v34, %v1125_v41  ;;  %v177_v24 = vld [vmem:[#allocation2 + $0xd0] sm:$0xff]  ;;  %v178_v35 = vld [vmem:[#allocation2 + $0xd8] sm:$0xff] }
 0x15b   :  { %v1922_v38 = vpack.c.bf16 %v1361_v27, %v1361_v27  ;;  %v1228_v45 = vmul.f32 %v2487_v34, %v1157_v42  ;;  %v1266_v46 = vadd.f32 %v2492_v44, %v1195_v39  ;;  %v209_v25 = vld [vmem:[#allocation2 + $0x1d0] sm:$0xff]  ;;  %v210_v36 = vld [vmem:[#allocation2 + $0x1d8] sm:$0xff] }
 0x15c   :  { %1650 = vst.msk [vmem:[%s2952_s4 + $0x4c] sm:$0xf] %vm1630_vm4, %v1890_v37  ;;  %v1298_v47 = vadd.f32 %v2492_v44, %v1227_v40  ;;  %v1267_v50 = vadd.f32 %v2492_v44, %v1196_v43  ;;  %v813_v54 = vpop.f32.mrb[48].mxu0  ;;  %v941_v55 = vpop.f32.mrb[48].mxu1 }
 0x15d   :  { %1682 = vst.msk [vmem:[%s2952_s4 + $0xcc] sm:$0xf] %vm1630_vm4, %v1922_v38  ;;  %v1299_v51 = vadd.f32 %v2492_v44, %v1228_v45  ;;  %v1330_v52 = vmax.f32 %v1266_v46, 0.0  ;;  %v996_v58 = vadd.f32 %v813_v54, %v175_v48  ;;  %v1028_v59 = vadd.f32 %v941_v55, %v207_v49  ;;  %v815_v60 = vpop.f32.mrb[49].mxu0  ;;  %v943_v61 = vpop.f32.mrb[49].mxu1 }
 0x15e   :  { %v1362_v53 = vmax.f32 %v1298_v47, 0.0  ;;  %v1331_v56 = vmax.f32 %v1267_v50, 0.0  ;;  %v1126_v2 = vld [vmem:[#allocation2 + $0xb0] sm:$0xff]  ;;  %v816_v4 = vpop.f32.mrb[50].mxu0  ;;  %v944_v5 = vpop.f32.mrb[50].mxu1 }
 0x15f   :  { %v1363_v57 = vmax.f32 %v1299_v51, 0.0  ;;  %v1891_v0 = vpack.c.bf16 %v1330_v52, %v1330_v52  ;;  %v1158_v3 = vld [vmem:[#allocation2 + $0x1b0] sm:$0xff]  ;;  %v1197_v8 = vmul.f32 %v2487_v34, %v1126_v2  ;;  %1061 = vst.msk [vmem:[#allocation2 + $0xc0] sm:$0xff] %vm22_vm3, %v996_v58  ;;  %1093 = vst.msk [vmem:[#allocation2 + $0x1c0] sm:$0xff] %vm22_vm3, %v1028_v59  ;;  %v818_v10 = vpop.f32.mrb[51].mxu0  ;;  %v946_v11 = vpop.f32.mrb[51].mxu1  ;;  %v997_v14 = vadd.f32 %v816_v4, %v176_v62 }
 0x160   :  { %v1923_v1 = vpack.c.bf16 %v1362_v53, %v1362_v53  ;;  %v1892_v6 = vpack.c.bf16 %v1331_v56, %v1331_v56  ;;  %v1229_v9 = vmul.f32 %v2487_v34, %v1158_v3  ;;  %v1127_v12 = vld [vmem:[#allocation2 + $0xb8] sm:$0xff]  ;;  %v1029_v34 = vadd.f32 %v944_v5, %v208_v63  ;;  %v2842_v51 = vld [vmem:[%s2951_s3] ss:$0 sm:$0xff]  ;;  %v180_v2 = vld [vmem:[#allocation2 + $0xe8] sm:$0xff] }
 0x161   :  { %v1924_v7 = vpack.c.bf16 %v1363_v57, %v1363_v57  ;;  %1651 = vst.msk [vmem:[%s2952_s4 + $0x50] sm:$0xf] %vm1630_vm4, %v1891_v0  ;;  %v1159_v13 = vld [vmem:[#allocation2 + $0x1b8] sm:$0xff]  ;;  %v1268_v15 = vadd.f32 %v2492_v44, %v1197_v8  ;;  %v1198_v18 = vmul.f32 %v2811_v17, %v1127_v12  ;;  %v179_v58 = vld [vmem:[#allocation2 + $0xe0] sm:$0xff]  ;;  %v212_v3 = vld [vmem:[#allocation2 + $0x1e8] sm:$0xff] }
 0x162   :  { %1683 = vst.msk [vmem:[%s2952_s4 + $0xd0] sm:$0xf] %vm1630_vm4, %v1923_v1  ;;  %1652 = vst.msk [vmem:[%s2952_s4 + $0x54] sm:$0xf] %vm1630_vm4, %v1892_v6  ;;  %v1300_v16 = vadd.f32 %v2492_v44, %v1229_v9  ;;  %v1230_v19 = vmul.f32 %v2811_v17, %v1159_v13  ;;  %v211_v59 = vld [vmem:[#allocation2 + $0x1e0] sm:$0xff] }
 0x163   :  { %1684 = vst.msk [vmem:[%s2952_s4 + $0xd4] sm:$0xf] %vm1630_vm4, %v1924_v7  ;;  %v1332_v20 = vmax.f32 %v1268_v15, 0.0  ;;  %v1269_v22 = vadd.f32 %v2492_v44, %v1198_v18 }
 0x164   :  { %1062 = vst.msk [vmem:[#allocation2 + $0xc8] sm:$0xff] %vm22_vm3, %v997_v14  ;;  %1094 = vst.msk [vmem:[#allocation2 + $0x1c8] sm:$0xff] %vm22_vm3, %v1029_v34  ;;  %v1364_v21 = vmax.f32 %v1300_v16, 0.0  ;;  %v1301_v23 = vadd.f32 %v2492_v44, %v1230_v19  ;;  %v821_v26 = vpop.f32.mrb[52].mxu0  ;;  %v949_v27 = vpop.f32.mrb[52].mxu1 }
 0x165   :  { %v1893_v28 = vpack.c.bf16 %v1332_v20, %v1332_v20  ;;  %v1333_v30 = vmax.f32 %v1269_v22, 0.0  ;;  %v823_v32 = vpop.f32.mrb[53].mxu0  ;;  %v951_v33 = vpop.f32.mrb[53].mxu1  ;;  %v998_v39 = vadd.f32 %v821_v26, %v177_v24  ;;  %v1030_v40 = vadd.f32 %v949_v27, %v209_v25 }
 0x166   :  { %v1925_v29 = vpack.c.bf16 %v1364_v21, %v1364_v21  ;;  %v1365_v31 = vmax.f32 %v1301_v23, 0.0  ;;  %v1128_v37 = vld [vmem:[#allocation2 + $0xc0] sm:$0xff]  ;;  %v824_v41 = vpop.f32.mrb[54].mxu0  ;;  %v952_v42 = vpop.f32.mrb[54].mxu1 }
 0x167   :  { %v1160_v38 = vld [vmem:[#allocation2 + $0x1c0] sm:$0xff]  ;;  %1653 = vst.msk [vmem:[%s2952_s4 + $0x58] sm:$0xf] %vm1630_vm4, %v1893_v28  ;;  %v1894_v44 = vpack.c.bf16 %v1333_v30, %v1333_v30  ;;  %v1199_v45 = vmul.f32 %v2811_v17, %v1128_v37  ;;  %v826_v47 = vpop.f32.mrb[55].mxu0  ;;  %v954_v48 = vpop.f32.mrb[55].mxu1  ;;  %v999_v49 = vadd.f32 %v824_v41, %v178_v35  ;;  %v1031_v50 = vadd.f32 %v952_v42, %v210_v36  ;;  %v181_v30 = vld [vmem:[#allocation2 + $0xf0] sm:$0xff] }
 0x168   :  { %1685 = vst.msk [vmem:[%s2952_s4 + $0xd8] sm:$0xf] %vm1630_vm4, %v1925_v29  ;;  %v1926_v43 = vpack.c.bf16 %v1365_v31, %v1365_v31  ;;  %v1231_v46 = vmul.f32 %v2811_v17, %v1160_v38  ;;  %v213_v31 = vld [vmem:[#allocation2 + $0x1f0] sm:$0xff] }
 0x169   :  { %1063 = vst.msk [vmem:[#allocation2 + $0xd0] sm:$0xff] %vm22_vm3, %v998_v39  ;;  %1095 = vst.msk [vmem:[#allocation2 + $0x1d0] sm:$0xff] %vm22_vm3, %v1030_v40  ;;  %v1270_v52 = vadd.f32 %v2842_v51, %v1199_v45  ;;  %v182_v39 = vld [vmem:[#allocation2 + $0xf8] sm:$0xff] }
 0x16a   :  { %1654 = vst.msk [vmem:[%s2952_s4 + $0x5c] sm:$0xf] %vm1630_vm4, %v1894_v44  ;;  %1686 = vst.msk [vmem:[%s2952_s4 + $0xdc] sm:$0xf] %vm1630_vm4, %v1926_v43  ;;  %v1302_v53 = vadd.f32 %v2842_v51, %v1231_v46  ;;  %v214_v40 = vld [vmem:[#allocation2 + $0x1f8] sm:$0xff] }
 0x16b   :  { %v1129_v54 = vld [vmem:[#allocation2 + $0xc8] sm:$0xff]  ;;  %1064 = vst.msk [vmem:[#allocation2 + $0xd8] sm:$0xff] %vm22_vm3, %v999_v49  ;;  %1096 = vst.msk [vmem:[#allocation2 + $0x1d8] sm:$0xff] %vm22_vm3, %v1031_v50  ;;  %v1334_v60 = vmax.f32 %v1270_v52, 0.0 }
 0x16c   :  { %v1161_v55 = vld [vmem:[#allocation2 + $0x1c8] sm:$0xff]  ;;  %v1200_v56 = vmul.f32 %v2811_v17, %v1129_v54  ;;  %v1366_v61 = vmax.f32 %v1302_v53, 0.0  ;;  %v829_v0 = vpop.f32.mrb[56].mxu0  ;;  %v957_v1 = vpop.f32.mrb[56].mxu1 }
 0x16d   :  { %v1232_v57 = vmul.f32 %v2811_v17, %v1161_v55  ;;  %v1895_v4 = vpack.c.bf16 %v1334_v60, %v1334_v60  ;;  %v1000_v6 = vadd.f32 %v829_v0, %v179_v58  ;;  %v1032_v7 = vadd.f32 %v957_v1, %v211_v59  ;;  %v831_v8 = vpop.f32.mrb[57].mxu0  ;;  %v959_v9 = vpop.f32.mrb[57].mxu1 }
 0x16e   :  { %v1271_v62 = vadd.f32 %v2842_v51, %v1200_v56  ;;  %v1927_v5 = vpack.c.bf16 %v1366_v61, %v1366_v61  ;;  %v832_v12 = vpop.f32.mrb[58].mxu0  ;;  %v960_v13 = vpop.f32.mrb[58].mxu1 }
 0x16f   :  { %v1303_v63 = vadd.f32 %v2842_v51, %v1232_v57  ;;  %1655 = vst.msk [vmem:[%s2952_s4 + $0x60] sm:$0xf] %vm1630_vm4, %v1895_v4  ;;  %v1001_v15 = vadd.f32 %v832_v12, %v180_v2  ;;  %v1033_v16 = vadd.f32 %v960_v13, %v212_v3  ;;  %v834_v18 = vpop.f32.mrb[59].mxu0  ;;  %v962_v19 = vpop.f32.mrb[59].mxu1 }
 0x170   :  { %v1335_v10 = vmax.f32 %v1271_v62, 0.0  ;;  %1687 = vst.msk [vmem:[%s2952_s4 + $0xe0] sm:$0xf] %vm1630_vm4, %v1927_v5  ;;  %v1130_v14 = vld [vmem:[#allocation2 + $0xd0] sm:$0xff] }
 0x171   :  { %v1367_v11 = vmax.f32 %v1303_v63, 0.0  ;;  %v1162_v34 = vld [vmem:[#allocation2 + $0x1d0] sm:$0xff]  ;;  %1065 = vst.msk [vmem:[#allocation2 + $0xe0] sm:$0xff] %vm22_vm3, %v1000_v6  ;;  %1097 = vst.msk [vmem:[#allocation2 + $0x1e0] sm:$0xff] %vm22_vm3, %v1032_v7  ;;  %v1201_v22 = vmul.f32 %v2811_v17, %v1130_v14 }
 0x172   :  { %v1896_v20 = vpack.c.bf16 %v1335_v10, %v1335_v10  ;;  %v1233_v23 = vmul.f32 %v2811_v17, %v1162_v34  ;;  %v1131_v24 = vld [vmem:[#allocation2 + $0xd8] sm:$0xff]  ;;  %1066 = vst.msk [vmem:[#allocation2 + $0xe8] sm:$0xff] %vm22_vm3, %v1001_v15  ;;  %1098 = vst.msk [vmem:[#allocation2 + $0x1e8] sm:$0xff] %vm22_vm3, %v1033_v16 }
 0x173   :  { %v1928_v21 = vpack.c.bf16 %v1367_v11, %v1367_v11  ;;  %v1163_v25 = vld [vmem:[#allocation2 + $0x1d8] sm:$0xff]  ;;  %v1272_v26 = vadd.f32 %v2842_v51, %v1201_v22  ;;  %v1202_v28 = vmul.f32 %v2811_v17, %v1131_v24 }
 0x174   :  { %1656 = vst.msk [vmem:[%s2952_s4 + $0x64] sm:$0xf] %vm1630_vm4, %v1896_v20  ;;  %v1304_v27 = vadd.f32 %v2842_v51, %v1233_v23  ;;  %v1234_v29 = vmul.f32 %v2811_v17, %v1163_v25  ;;  %v837_v37 = vpop.f32.mrb[60].mxu0  ;;  %v965_v38 = vpop.f32.mrb[60].mxu1 }
 0x175   :  { %1688 = vst.msk [vmem:[%s2952_s4 + $0xe4] sm:$0xf] %vm1630_vm4, %v1928_v21  ;;  %v1336_v32 = vmax.f32 %v1272_v26, 0.0  ;;  %v1273_v35 = vadd.f32 %v2842_v51, %v1202_v28  ;;  %v1002_v41 = vadd.f32 %v837_v37, %v181_v30  ;;  %v1034_v42 = vadd.f32 %v965_v38, %v213_v31  ;;  %v839_v44 = vpop.f32.mrb[61].mxu0  ;;  %v967_v43 = vpop.f32.mrb[61].mxu1 }
 0x176   :  { %v1368_v33 = vmax.f32 %v1304_v27, 0.0  ;;  %v1305_v36 = vadd.f32 %v2842_v51, %v1234_v29  ;;  %v840_v52 = vpop.f32.mrb[62].mxu0  ;;  %v968_v53 = vpop.f32.mrb[62].mxu1 }
 0x177   :  { %v1897_v45 = vpack.c.bf16 %v1336_v32, %v1336_v32  ;;  %v1337_v47 = vmax.f32 %v1273_v35, 0.0  ;;  %1067 = vst.msk [vmem:[#allocation2 + $0xf0] sm:$0xff] %vm22_vm3, %v1002_v41  ;;  %1099 = vst.msk [vmem:[#allocation2 + $0x1f0] sm:$0xff] %vm22_vm3, %v1034_v42  ;;  %v1003_v56 = vadd.f32 %v840_v52, %v182_v39  ;;  %v1035_v57 = vadd.f32 %v968_v53, %v214_v40  ;;  %v842_v58 = vpop.f32.mrb[63].mxu0  ;;  %v970_v59 = vpop.f32.mrb[63].mxu1 }
 0x178   :  { %v1929_v46 = vpack.c.bf16 %v1368_v33, %v1368_v33  ;;  %v1369_v48 = vmax.f32 %v1305_v36, 0.0  ;;  %v1132_v49 = vld [vmem:[#allocation2 + $0xe0] sm:$0xff] }
 0x179   :  { %v1164_v50 = vld [vmem:[#allocation2 + $0x1e0] sm:$0xff]  ;;  %v1203_v54 = vmul.f32 %v2811_v17, %v1132_v49  ;;  %1657 = vst.msk [vmem:[%s2952_s4 + $0x68] sm:$0xf] %vm1630_vm4, %v1897_v45  ;;  %v1898_v60 = vpack.c.bf16 %v1337_v47, %v1337_v47  ;;  %v1133_v62 = vld [vmem:[#allocation2 + $0xe8] sm:$0xff] }
 0x17a   :  { %v1235_v55 = vmul.f32 %v2811_v17, %v1164_v50  ;;  %1689 = vst.msk [vmem:[%s2952_s4 + $0xe8] sm:$0xf] %vm1630_vm4, %v1929_v46  ;;  %v1930_v61 = vpack.c.bf16 %v1369_v48, %v1369_v48  ;;  %v1165_v63 = vld [vmem:[#allocation2 + $0x1e8] sm:$0xff]  ;;  %v1204_v2 = vmul.f32 %v2811_v17, %v1133_v62 }
 0x17b   :  { %v1274_v0 = vadd.f32 %v2842_v51, %v1203_v54  ;;  %v1236_v3 = vmul.f32 %v2811_v17, %v1165_v63  ;;  %1068 = vst.msk [vmem:[#allocation2 + $0xf8] sm:$0xff] %vm22_vm3, %v1003_v56  ;;  %1100 = vst.msk [vmem:[#allocation2 + $0x1f8] sm:$0xff] %vm22_vm3, %v1035_v57 }
 0x17c   :  { %v1306_v1 = vadd.f32 %v2842_v51, %v1235_v55  ;;  %1658 = vst.msk [vmem:[%s2952_s4 + $0x6c] sm:$0xf] %vm1630_vm4, %v1898_v60  ;;  %1690 = vst.msk [vmem:[%s2952_s4 + $0xec] sm:$0xf] %vm1630_vm4, %v1930_v61  ;;  %v1275_v6 = vadd.f32 %v2842_v51, %v1204_v2 }
 0x17d   :  { %v1338_v4 = vmax.f32 %v1274_v0, 0.0  ;;  %v1307_v7 = vadd.f32 %v2842_v51, %v1236_v3 }
 0x17e   :  { %v1370_v5 = vmax.f32 %v1306_v1, 0.0  ;;  %v1339_v10 = vmax.f32 %v1275_v6, 0.0  ;;  %v1134_v12 = vld [vmem:[#allocation2 + $0xf0] sm:$0xff] }
 0x17f   :  { %v1899_v8 = vpack.c.bf16 %v1338_v4, %v1338_v4  ;;  %v1371_v11 = vmax.f32 %v1307_v7, 0.0  ;;  %v1166_v13 = vld [vmem:[#allocation2 + $0x1f0] sm:$0xff]  ;;  %v1205_v15 = vmul.f32 %v2811_v17, %v1134_v12 }
 0x180   :  { %v1931_v9 = vpack.c.bf16 %v1370_v5, %v1370_v5  ;;  %v1900_v14 = vpack.c.bf16 %v1339_v10, %v1339_v10  ;;  %v1237_v16 = vmul.f32 %v2811_v17, %v1166_v13 }
 0x181   :  { %1659 = vst.msk [vmem:[%s2952_s4 + $0x70] sm:$0xf] %vm1630_vm4, %v1899_v8  ;;  %v1932_v34 = vpack.c.bf16 %v1371_v11, %v1371_v11  ;;  %v1276_v20 = vadd.f32 %v2842_v51, %v1205_v15 }
 0x182   :  { %1691 = vst.msk [vmem:[%s2952_s4 + $0xf0] sm:$0xf] %vm1630_vm4, %v1931_v9  ;;  %v1135_v18 = vld [vmem:[#allocation2 + $0xf8] sm:$0xff]  ;;  %1660 = vst.msk [vmem:[%s2952_s4 + $0x74] sm:$0xf] %vm1630_vm4, %v1900_v14  ;;  %v1308_v21 = vadd.f32 %v2842_v51, %v1237_v16 }
 0x183   :  { %v1167_v19 = vld [vmem:[#allocation2 + $0x1f8] sm:$0xff]  ;;  %1692 = vst.msk [vmem:[%s2952_s4 + $0xf4] sm:$0xf] %vm1630_vm4, %v1932_v34  ;;  %v1206_v22 = vmul.f32 %v2811_v17, %v1135_v18  ;;  %v1340_v24 = vmax.f32 %v1276_v20, 0.0 }
 0x184   :  { %v1238_v23 = vmul.f32 %v2811_v17, %v1167_v19  ;;  %v1372_v25 = vmax.f32 %v1308_v21, 0.0 }
 0x185   :  { %v1277_v26 = vadd.f32 %v2842_v51, %v1206_v22  ;;  %v1901_v28 = vpack.c.bf16 %v1340_v24, %v1340_v24 }
 0x186   :  { %v1309_v27 = vadd.f32 %v2842_v51, %v1238_v23  ;;  %v1933_v29 = vpack.c.bf16 %v1372_v25, %v1372_v25 }
 0x187   :  { %v1341_v30 = vmax.f32 %v1277_v26, 0.0  ;;  %1661 = vst.msk [vmem:[%s2952_s4 + $0x78] sm:$0xf] %vm1630_vm4, %v1901_v28 }
 0x188   :  { %v1373_v31 = vmax.f32 %v1309_v27, 0.0  ;;  %1693 = vst.msk [vmem:[%s2952_s4 + $0xf8] sm:$0xf] %vm1630_vm4, %v1933_v29 }
 0x189   :  { %v1902_v17 = vpack.c.bf16 %v1341_v30, %v1341_v30 }
 0x18a   :  { %v1934_v32 = vpack.c.bf16 %v1373_v31, %v1373_v31 }
 0x18b   :  { %1662 = vst.msk [vmem:[%s2952_s4 + $0x7c] sm:$0xf] %vm1630_vm4, %v1902_v17 }
 0x18c   :  { %1694 = vst.msk [vmem:[%s2952_s4 + $0xfc] sm:$0xf] %vm1630_vm4, %v1934_v32 }

// kernel: densenet_forward.29
= control target key start
LH: loop header
LB: loop body
LE: loop exit
PB: predicated region body
PF: predicated region fallthrough
CT: control target
= control target key end

     0   :  { %s2146_s9 = smov 0   ;;  %s2634_s0 = inlined_call_operand.vmem [shape: bf16[2,110,32], index: 0, kind: input, shape index: {}]   ;;  %s2635_s1 = inlined_call_operand.vmem [shape: bf16[9,32,8], index: 1, kind: input, shape index: {}]   ;;  %s2636_s2 = inlined_call_operand.vmem [shape: bf16[2,80,8], index: 2, kind: output, shape index: {}]  }
   0x1 LB: > { %s1506_s10 = sadd.s32 4294967295, %s2127_s9   ;;  %p1510_p0 = scmp.ge.s32.totalorder %s2127_s9, 1  ;;  %s2127_s9 = sphi %s2146_s9, %s12_s9  }
   0x2   : > { %p112_p1 = scmp.lt.s32.totalorder %s2127_s9, 3 }
   0x4   : > { %p113_p2 = pnand %p1510_p0, %p112_p1 }
   0x5   : > { %v2157_v0 = vld [vmem:[%s2635_s1 + $0x40] sm:$0xff] (!%p113_p2)   ;;  %v2129_v1 = vmov (!%p113_p2), 0.0   ;;  %v2090_v2 = vld [vmem:[%s2635_s1 + $0x10] sm:$0xff] (!%p113_p2)   ;;  %v2168_v3 = vld [vmem:[%s2635_s1 + $0x48] sm:$0xff] (!%p113_p2)   ;;  %vm2130_vm0 = vmmov (!%p113_p2), 0   ;;  %p134_p3 = scmp.lt.s32.totalorder (!%p113_p2), %s1506_s10, 1 }
   0x6   : > { %116 = sbr.rel (%p113_p2) target bundleno = 423 (0x1a7), region = 28  ;;  %1803 = vmatprep.subr.bf16.mxu0 (!%p113_p2), %v2129_v1  ;;  %1707 = vmatprep.subr.bf16.mxu1 (!%p113_p2), %v2129_v1  ;;  %v2092_v4 = vld [vmem:[%s2635_s1 + $0x18] sm:$0xff] (!%p113_p2)   ;;  %vm186_vm1 = vsmask.f32 (!%p113_p2), 7424  ;;  %vm703_vm2 = vsmask.f32 (!%p113_p2), 6400 }
   0x7   : > { %1804 = vmatpush3.bf16.msra.mxu0 (!%p113_p2), %v2157_v0  ;;  %1711 = vmatprep.mubr.msk.bf16.mxu1 (!%p113_p2), %vm2130_vm0, %v2129_v1  ;;  %vm243_vm3 = vcmask (!%p113_p2), 261120   ;;  %v2098_v37 = vld [vmem:[%s2635_s1 + $0x50] sm:$0xff] (!%p113_p2)   ;;  %v2099_v39 = vld [vmem:[%s2635_s1] sm:$0xff] (!%p113_p2)   ;;  %v2102_v48 = vld [vmem:[%s2635_s1 + $0x58] sm:$0xff] (!%p113_p2)   ;;  %vm872_vm4 = vcmask (!%p113_p2), 1045504   ;;  %vm438_vm5 = vcmask (!%p113_p2), 1046528  }
   0x8   : > { %1708 = vmatpush3.bf16.msra.mxu1 (!%p113_p2), %v2090_v2  ;;  %1805 = vmatprep.subr.bf16.mxu0 (!%p113_p2), %v2129_v1  ;;  %v2106_v54 = vld [vmem:[%s2635_s1 + $0x8] sm:$0xff] (!%p113_p2)   ;;  %vm1129_vm6 = vsmask.f32 (!%p113_p2), 5376  ;;  %vm1278_vm7 = vcmask (!%p113_p2), 1044480   ;;  %vm1440_vm8 = vcmask (!%p113_p2), 60416  }
   0x9   : > { %1709 = vmatprep.subr.bf16.mxu1 (!%p113_p2), %v2129_v1  ;;  %1807 = vmatprep.mubr.msk.bf16.mxu0 (!%p113_p2), %vm2130_vm0, %v2129_v1 }
   0xb   : > { %1806 = vmatpush3.bf16.msra.mxu0 (!%p113_p2), %v2168_v3 }
   0xc   : > { %1710 = vmatpush3.bf16.msra.mxu1 (!%p113_p2), %v2092_v4  ;;  %1827 = vmatprep.subr.bf16.mxu0 (!%p113_p2), %v2129_v1 }
   0xd   : > { %s2638_s10 = smov (!%p134_p3, %s1506_s10), 1  ;;  %1731 = vmatprep.subr.bf16.mxu1 %v2129_v1 }
   0xe   : > { %s2077_s19 = smul.u32 56, %s2638_s10 }
   0xf   : > { %s2078_s25 = smul.u32 40, %s2638_s10 }
  0x10   : > { %s2187_s22 = scalar_lea.vmem %s2634_s0, %s2077_s19 }
  0x11   : > { %v145_v5 = vld [vmem:[%s2187_s22] sm:$0xf]  ;;  %v146_v6 = vld [vmem:[%s2187_s22 + $0x4] sm:$0xf]  ;;  %v147_v7 = vld [vmem:[%s2187_s22 + $0x8] sm:$0xf]  ;;  %s2609_s28 = scalar_lea.vmem %s2636_s2, %s2078_s25 }
  0x12   : > { %v148_v8 = vld [vmem:[%s2187_s22 + $0xc] sm:$0xf]  ;;  %v2194_v9 = vcombine.low %v145_v5, %v146_v6  ;;  %v149_v10 = vld [vmem:[%s2187_s22 + $0x10] sm:$0xf]  ;;  %v150_v11 = vld [vmem:[%s2187_s22 + $0x14] sm:$0xf]  ;;  %v2198_v12 = vcombine.low %v146_v6, %v147_v7 }
  0x13   : > { %v2200_v13 = vcombine.low %v147_v7, %v148_v8  ;;  %v2202_v14 = vcombine.low %v149_v10, %v150_v11  ;;  %v2204_v15 = vcombine.low %v148_v8, %v149_v10  ;;  %v151_v26 = vld [vmem:[%s2187_s22 + $0x18] sm:$0xf]  ;;  %v152_v30 = vld [vmem:[%s2187_s22 + $0x1c] sm:$0xf]  ;;  %v153_v35 = vld [vmem:[%s2187_s22 + $0x20] sm:$0xf] }
  0x14   : > { %v188_v16 = vshrl.u32 %v2194_v9, 16  ;;  %v190_v17 = vshll.u32 %v2194_v9, 16  ;;  %v705_v18 = vshrl.u32 %v2198_v12, 16  ;;  %v708_v19 = vshll.u32 %v2198_v12, 16  ;;  %v2246_v49 = vld [vmem:[%s2187_s22 + $0x24] sm:$0xf] }
  0x15   : > { %v195_v20 = vshll.u32 %v2200_v13, 16  ;;  %v713_v21 = vshrl.u32 %v2204_v15, 16  ;;  %v716_v22 = vshll.u32 %v2204_v15, 16  ;;  %v199_v33 = vshrl.u32 %v2200_v13, 16  ;;  %v155_v63 = vld [vmem:[%s2187_s22 + $0x28] sm:$0xf] }
  0x16   : > { %v192_v23 = vrot.slane %v190_v17, 1  ;;  %v707_v24 = vrot.slane %v705_v18, 1  ;;  %v710_v25 = vrot.slane %v708_v19, 2  ;;  %v203_v34 = vshll.u32 %v2202_v14, 16  ;;  %v156_v7 = vld [vmem:[%s2187_s22 + $0x2c] sm:$0xf] }
  0x17   : > { %v197_v27 = vrot.slane %v195_v20, 1  ;;  %v715_v28 = vrot.slane %v713_v21, 1  ;;  %v718_v29 = vrot.slane %v716_v22, 2  ;;  %v2227_v40 = vcombine.low %v150_v11, %v151_v26  ;;  %v2279_v11 = vld [vmem:[%s2187_s22 + $0x30] ss:$0 sps:$4 sm:$0xff]  }
  0x18   : > { %v193_v31 = vor.u32 %v192_v23, %v188_v16  ;;  %v711_v32 = vor.u32 %v710_v25, %v707_v24  ;;  %v2231_v42 = vcombine.low %v151_v26, %v152_v30  ;;  %v2233_v43 = vcombine.low %v152_v30, %v153_v35 }
  0x19   : > { %v719_v36 = vor.u32 %v718_v29, %v715_v28  ;;  %v201_v44 = vor.u32 %v199_v33, %v197_v27  ;;  %v205_v45 = vrot.slane %v203_v34, 1  ;;  %v722_v46 = vshrl.u32 %v2227_v40, 16 }
  0x1a   : > { %v198_v38 = vsel %vm186_vm1, %v193_v31, %v197_v27  ;;  %v725_v47 = vshll.u32 %v2227_v40, 16  ;;  %v731_v50 = vshrl.u32 %v2233_v43, 16  ;;  %v734_v51 = vshll.u32 %v2233_v43, 16 }
  0x1b   : > { %1712 = vmatmul.mubr.msk.bf16.vlgmr.msra.gmra.mrb[0].mxu1 %vm243_vm3, %v198_v38  ;;  %v720_v41 = vsel %vm703_vm2, %v711_v32, %v719_v36  ;;  %v724_v52 = vrot.slane %v722_v46, 1  ;;  %v207_v55 = vshrl.u32 %v2202_v14, 16  ;;  %v211_v56 = vshll.u32 %v2231_v42, 16 }
  0x1c   : > { %1808 = vmatmul.mubr.msk.bf16.vlgmr.msra.gmra.mrb[0].mxu0 %vm243_vm3, %v720_v41  ;;  %1715 = vmatprep.mubr.msk.bf16.mxu1 %vm2130_vm0, %v2129_v1  ;;  %v727_v53 = vrot.slane %v725_v47, 2  ;;  %v206_v57 = vsel %vm186_vm1, %v201_v44, %v205_v45  ;;  %v2259_v59 = vcombine.low %v153_v35, %v2246_v49  ;;  %v733_v60 = vrot.slane %v731_v50, 1 }
  0x1d   : > { %1828 = vmatpush3.bf16.msra.mxu0 %v2098_v37  ;;  %1811 = vmatprep.mubr.msk.bf16.mxu0 %vm2130_vm0, %v2129_v1  ;;  %v736_v61 = vrot.slane %v734_v51, 2  ;;  %v209_v2 = vor.u32 %v207_v55, %v205_v45  ;;  %v213_v4 = vrot.slane %v211_v56, 1  ;;  %v215_v5 = vshrl.u32 %v2231_v42, 16 }
  0x1e   : > { %1732 = vmatpush3.bf16.msra.mxu1 %v2099_v39  ;;  %1829 = vmatprep.subr.bf16.mxu0 %v2129_v1  ;;  %v728_v58 = vor.u32 %v727_v53, %v724_v52  ;;  %v219_v6 = vshll.u32 %v2259_v59, 16  ;;  %v2276_v10 = vcombine.low %v155_v63, %v156_v7  ;;  %v1131_v16 = vrot.slane %v195_v20, 3 }
  0x1f   : > { %1733 = vmatprep.subr.bf16.mxu1 %v2129_v1  ;;  %v2274_v8 = vor.u32 %v736_v61, %v733_v60  ;;  %v1130_v17 = vrot.slane %v199_v33, 2  ;;  %v1134_v18 = vrot.slane %v203_v34, 3  ;;  %v439_v19 = vrot.slane %v2194_v9, 1  ;;  %v2105_v60 = vld [vmem:[%s2635_s1 + $0x60] sm:$0xff]  }
  0x20   : > { %v729_v62 = vsel %vm703_vm2, %v719_v36, %v728_v58  ;;  %v214_v21 = vsel %vm186_vm1, %v209_v2, %v213_v4  ;;  %v1133_v22 = vrot.slane %v207_v55, 2  ;;  %v873_v23 = vrot.slane %v2198_v12, 2 }
  0x21   : > { %1830 = vmatpush3.bf16.msra.mxu0 %v2102_v48  ;;  %v440_v24 = vrot.slane %v2200_v13, 1  ;;  %v217_v25 = vor.u32 %v215_v5, %v213_v4  ;;  %v221_v26 = vrot.slane %v219_v6, 1  ;;  %v442_v27 = vrot.slane %v2202_v14, 1 }
  0x22   : > { %1851 = vmatprep.subr.bf16.mxu0 %v2129_v1  ;;  %1734 = vmatpush3.bf16.msra.mxu1 %v2106_v54  ;;  %v444_v28 = vrot.slane %v2231_v42, 1  ;;  %v738_v20 = vsel %vm703_vm2, %v728_v58, %v2274_v8  ;;  %v1010_v30 = vrot.slane %v2276_v10, 2  ;;  %v1012_v31 = vrot.slane %v2279_v11, 2 }
  0x23   : > { %1716 = vmatmul.mubr.msk.bf16.gmra.mrb[4].mxu1 %vm243_vm3, %v206_v57  ;;  %1755 = vmatprep.subr.bf16.mxu1 %v2129_v1  ;;  %v2292_v29 = vsel %vm438_vm5, %v439_v19, %v440_v24  ;;  %v874_v32 = vrot.slane %v2204_v15, 2  ;;  %v2298_v33 = vsel %vm438_vm5, %v440_v24, %v442_v27  ;;  %v223_v35 = vshrl.u32 %v2259_v59, 16 }
  0x24   : > { %1812 = vmatmul.mubr.msk.bf16.gmra.mrb[4].mxu0 %vm243_vm3, %v729_v62  ;;  %1719 = vmatprep.mubr.msk.bf16.mxu1 %vm2130_vm0, %v2129_v1  ;;  %v2303_v34 = vsel %vm438_vm5, %v442_v27, %v444_v28  ;;  %v2310_v36 = vsel %vm872_vm4, %v1010_v30, %v1012_v31  ;;  %v1132_v37 = vor.u32 %v1131_v16, %v1130_v17  ;;  %v1137_v41 = vrot.slane %v215_v5, 2 }
  0x25   : > { %1815 = vmatprep.mubr.msk.bf16.mxu0 %vm2130_vm0, %v2129_v1  ;;  %v1135_v38 = vor.u32 %v1134_v18, %v1133_v22  ;;  %v2315_v39 = vcombine.low %v155_v63, %v155_v63  ;;  %v1138_v44 = vrot.slane %v211_v56, 3  ;;  %v577_v45 = vrot.slane %v2198_v12, 1 }
  0x26   : > { %v578_v47 = vrot.slane %v2204_v15, 1  ;;  %v1141_v48 = vrot.slane %v223_v35, 2  ;;  %v1142_v50 = vrot.slane %v219_v6, 3  ;;  %v580_v52 = vrot.slane %v2227_v40, 1 }
  0x27   : > { %v2321_v46 = vsel %vm1129_vm6, %v1132_v37, %v1135_v38  ;;  %v1139_v51 = vor.u32 %v1138_v44, %v1137_v41  ;;  %v2326_v53 = vcombine.low %v2246_v49, %v155_v63  ;;  %v582_v55 = vrot.slane %v2233_v43, 1 }
  0x28   : > { %v2329_v54 = vsel %vm438_vm5, %v577_v45, %v578_v47  ;;  %v2331_v12 = vor.u32 %v1142_v50, %v1141_v48  ;;  %v222_v56 = vsel %vm186_vm1, %v217_v25, %v221_v26  ;;  %v227_v57 = vshll.u32 %v2315_v39, 16  ;;  %v2111_v48 = vld [vmem:[%s2635_s1 + $0x20] sm:$0xff]  }
  0x29   : > { %v2337_v15 = vsel %vm1129_vm6, %v1135_v38, %v1139_v51  ;;  %v2340_v58 = vsel %vm438_vm5, %v578_v47, %v580_v52  ;;  %v875_v49 = vsel %vm872_vm4, %v873_v23, %v874_v32  ;;  %v2346_v61 = vcombine.low %v156_v7, %v156_v7 }
  0x2a   : > { %v2350_v62 = vsel %vm1129_vm6, %v1139_v51, %v2331_v12  ;;  %v2353_v63 = vsel %vm438_vm5, %v580_v52, %v582_v55  ;;  %v584_v2 = vrot.slane %v2326_v53, 1  ;;  %v1279_v4 = vrot.slane %v2200_v13, 3  ;;  %v2114_v51 = vld [vmem:[%s2635_s1 + $0x28] sm:$0xff]  }
  0x2b   : > { %1720 = vmatmul.mubr.msk.bf16.gmra.mrb[8].mxu1 %vm243_vm3, %v214_v21  ;;  %v1280_v5 = vrot.slane %v2202_v14, 3  ;;  %v586_v6 = vrot.slane %v2346_v61, 1  ;;  %v225_v7 = vor.u32 %v223_v35, %v221_v26  ;;  %v229_v16 = vrot.slane %v227_v57, 1  ;;  %v2110_v21 = vld [vmem:[%s2635_s1 + $0x68] sm:$0xff]  }
  0x2c   : > { %1816 = vmatmul.mubr.msk.bf16.gmra.mrb[8].mxu0 %vm243_vm3, %v738_v20  ;;  %1723 = vmatprep.mubr.msk.bf16.mxu1 %vm2130_vm0, %v2129_v1  ;;  %v2364_v17 = vsel %vm438_vm5, %v582_v55, %v584_v2  ;;  %v1282_v18 = vrot.slane %v2231_v42, 3  ;;  %v876_v19 = vrot.slane %v2227_v40, 2  ;;  %v740_v23 = vshrl.u32 %v2326_v53, 16 }
  0x2d   : > { %1831 = vmatprep.mubr.msk.bf16.mxu0 %vm2130_vm0, %v2129_v1  ;;  %v2374_v22 = vsel %vm1278_vm7, %v1279_v4, %v1280_v5  ;;  %v2379_v24 = vsel %vm438_vm5, %v584_v2, %v586_v6  ;;  %v743_v40 = vshll.u32 %v2326_v53, 16  ;;  %v230_v27 = vsel %vm186_vm1, %v225_v7, %v229_v16  ;;  %v2116_v7 = vld [vmem:[%s2635_s1 + $0x30] sm:$0xff]   ;;  %v2119_v16 = vld [vmem:[%s2635_s1 + $0x38] sm:$0xff]  }
  0x2e   : > { %v2384_v25 = vsel %vm1278_vm7, %v1280_v5, %v1282_v18  ;;  %v742_v26 = vrot.slane %v740_v23, 1  ;;  %v877_v31 = vsel %vm872_vm4, %v874_v32, %v876_v19  ;;  %v878_v32 = vrot.slane %v2233_v43, 2 }
  0x2f   : > { %v745_v20 = vrot.slane %v743_v40, 2  ;;  %v749_v38 = vshrl.u32 %v2346_v61, 16  ;;  %v752_v41 = vshll.u32 %v2346_v61, 16  ;;  %v880_v43 = vrot.slane %v2326_v53, 2 }
  0x30   : > { %v879_v47 = vsel %vm872_vm4, %v876_v19, %v878_v32  ;;  %v1288_v52 = vrot.slane %v2279_v11, 3  ;;  %v882_v53 = vrot.slane %v2346_v61, 2  ;;  %v2113_v61 = vld [vmem:[%s2635_s1 + $0x70] sm:$0xff]   ;;  %v1008_v5 = vrot.slane %v2259_v59, 2 }
  0x31   : > { %v746_v35 = vor.u32 %v745_v20, %v742_v26  ;;  %v751_v44 = vrot.slane %v749_v38, 1  ;;  %v754_v45 = vrot.slane %v752_v41, 2  ;;  %v1155_v40 = vshrl.u32 %v2279_v11, 16 }
  0x32   : > { %v883_v57 = vsel %vm872_vm4, %v880_v43, %v882_v53  ;;  %v1011_v19 = vsel %vm872_vm4, %v1008_v5, %v1010_v30  ;;  %v1158_v26 = vshll.u32 %v2279_v11, 16 }
  0x33   : > { %1724 = vmatmul.mubr.msk.bf16.gmra.mrb[12].mxu1 %vm243_vm3, %v222_v56  ;;  %v2396_v37 = vsel %vm703_vm2, %v2274_v8, %v746_v35  ;;  %v755_v50 = vor.u32 %v754_v45, %v751_v44  ;;  %v881_v56 = vsel %vm872_vm4, %v878_v32, %v880_v43 }
  0x34   : > { %1832 = vmatmul.mubr.msk.bf16.vlgmr.msra.gmra.mrb[0].mxu0 %vm243_vm3, %v875_v49  ;;  %1727 = vmatprep.mubr.msk.bf16.mxu1 %vm2130_vm0, %v2129_v1  ;;  %v1003_v49 = vrot.slane %v2200_v13, 2 }
  0x35   : > { %1852 = vmatpush3.bf16.msra.mxu0 %v2105_v60  ;;  %1835 = vmatprep.mubr.msk.bf16.mxu0 %vm2130_vm0, %v2129_v1  ;;  %v2410_v8 = vsel %vm703_vm2, %v746_v35, %v755_v50  ;;  %v1004_v60 = vrot.slane %v2202_v14, 2 }
  0x36   : > { %1853 = vmatprep.subr.bf16.mxu0 %v2129_v1 }
  0x37   : > { %v1005_v2 = vsel %vm872_vm4, %v1003_v49, %v1004_v60 }
  0x39   : > { %1854 = vmatpush3.bf16.msra.mxu0 %v2110_v21 }
  0x3a   : > { %1875 = vmatprep.subr.bf16.mxu0 %v2129_v1 }
  0x3b   : > { %1728 = vmatmul.mubr.msk.bf16.gmra.mrb[16].mxu1 %vm243_vm3, %v230_v27  ;;  %v1157_v27 = vrot.slane %v1155_v40, 2 }
  0x3c   : > { %1836 = vmatmul.mubr.msk.bf16.gmra.mrb[4].mxu0 %vm243_vm3, %v877_v31  ;;  %1735 = vmatprep.mubr.msk.bf16.mxu1 %vm2130_vm0, %v2129_v1 }
  0x3d   : > { %1839 = vmatprep.mubr.msk.bf16.mxu0 %vm2130_vm0, %v2129_v1 }
  0x43   : > { %1736 = vmatmul.mubr.msk.bf16.vlgmr.msra.gmra.mrb[0].mxu1 %vm243_vm3, %v2194_v9  ;;  %v1286_v9 = vrot.slane %v2276_v10, 3 }
  0x44   : > { %1840 = vmatmul.mubr.msk.bf16.gmra.mrb[8].mxu0 %vm243_vm3, %v879_v47  ;;  %1739 = vmatprep.mubr.msk.bf16.mxu1 %vm2130_vm0, %v2129_v1 }
  0x45   : > { %1843 = vmatprep.mubr.msk.bf16.mxu0 %vm2130_vm0, %v2129_v1  ;;  %1756 = vmatpush3.bf16.msra.mxu1 %v2111_v48  ;;  %v2427_v55 = vsel %vm1278_vm7, %v1286_v9, %v1288_v52 }
  0x46   : > { %1757 = vmatprep.subr.bf16.mxu1 %v2129_v1 }
  0x49   : > { %1758 = vmatpush3.bf16.msra.mxu1 %v2114_v51 }
  0x4a   : > { %1779 = vmatprep.subr.bf16.mxu1 %v2129_v1 }
  0x4b   : > { %1740 = vmatmul.mubr.msk.bf16.gmra.mrb[4].mxu1 %vm243_vm3, %v2200_v13  ;;  %v1006_v13 = vrot.slane %v2231_v42, 2 }
  0x4c   : > { %1844 = vmatmul.mubr.msk.bf16.gmra.mrb[12].mxu0 %vm243_vm3, %v881_v56  ;;  %1743 = vmatprep.mubr.msk.bf16.mxu1 %vm2130_vm0, %v2129_v1 }
  0x4d   : > { %1847 = vmatprep.mubr.msk.bf16.mxu0 %vm2130_vm0, %v2129_v1  ;;  %v1007_v4 = vsel %vm872_vm4, %v1004_v60, %v1006_v13  ;;  %v1009_v6 = vsel %vm872_vm4, %v1006_v13, %v1008_v5 }
  0x53   : > { %1744 = vmatmul.mubr.msk.bf16.gmra.mrb[8].mxu1 %vm243_vm3, %v2202_v14  ;;  %v2115_v14 = vld [vmem:[%s2635_s1 + $0x78] sm:$0xff]  }
  0x54   : > { %1848 = vmatmul.mubr.msk.bf16.gmra.mrb[16].mxu0 %vm243_vm3, %v883_v57  ;;  %1747 = vmatprep.mubr.msk.bf16.mxu1 %vm2130_vm0, %v2129_v1 }
  0x55   : > { %1855 = vmatprep.mubr.msk.bf16.mxu0 %vm2130_vm0, %v2129_v1 }
  0x5b   : > { %1748 = vmatmul.mubr.msk.bf16.gmra.mrb[12].mxu1 %vm243_vm3, %v2231_v42 }
  0x5c   : > { %1856 = vmatmul.mubr.msk.bf16.vlgmr.msra.gmra.mrb[0].mxu0 %vm243_vm3, %v1005_v2  ;;  %1751 = vmatprep.mubr.msk.bf16.mxu1 %vm2130_vm0, %v2129_v1 }
  0x5d   : > { %1876 = vmatpush3.bf16.msra.mxu0 %v2113_v61  ;;  %1859 = vmatprep.mubr.msk.bf16.mxu0 %vm2130_vm0, %v2129_v1 }
  0x5e   : > { %1877 = vmatprep.subr.bf16.mxu0 %v2129_v1 }
  0x61   : > { %1878 = vmatpush3.bf16.msra.mxu0 %v2115_v14 }
  0x62   : > { %1899 = vmatprep.subr.bf16.mxu0 %v2129_v1 }
  0x63   : > { %1752 = vmatmul.mubr.msk.bf16.gmra.mrb[16].mxu1 %vm243_vm3, %v2259_v59 }
  0x64   : > { %1860 = vmatmul.mubr.msk.bf16.gmra.mrb[4].mxu0 %vm243_vm3, %v1007_v4  ;;  %1759 = vmatprep.mubr.msk.bf16.mxu1 %vm2130_vm0, %v2129_v1 }
  0x65   : > { %1863 = vmatprep.mubr.msk.bf16.mxu0 %vm2130_vm0, %v2129_v1 }
  0x6b   : > { %1760 = vmatmul.mubr.msk.bf16.vlgmr.msra.gmra.mrb[0].mxu1 %vm243_vm3, %v2292_v29  ;;  %v446_v29 = vrot.slane %v2259_v59, 1 }
  0x6c   : > { %1864 = vmatmul.mubr.msk.bf16.gmra.mrb[8].mxu0 %vm243_vm3, %v1009_v6  ;;  %1763 = vmatprep.mubr.msk.bf16.mxu1 %vm2130_vm0, %v2129_v1 }
  0x6d   : > { %1867 = vmatprep.mubr.msk.bf16.mxu0 %vm2130_vm0, %v2129_v1  ;;  %1780 = vmatpush3.bf16.msra.mxu1 %v2116_v7  ;;  %v447_v30 = vsel %vm438_vm5, %v444_v28, %v446_v29  ;;  %v2120_v28 = vld [vmem:[%s2635_s1 + $0x88] sm:$0xff]  }
  0x6e   : > { %1781 = vmatprep.subr.bf16.mxu1 %v2129_v1 }
  0x71   : > { %1782 = vmatpush3.bf16.msra.mxu1 %v2119_v16 }
  0x72   : > { %1923 = vmatprep.subr.bf16.mxu1 %v2129_v1 }
  0x73   : > { %1764 = vmatmul.mubr.msk.bf16.gmra.mrb[4].mxu1 %vm243_vm3, %v2298_v33  ;;  %v2118_v33 = vld [vmem:[%s2635_s1 + $0x80] sm:$0xff]  }
  0x74   : > { %1868 = vmatmul.mubr.msk.bf16.gmra.mrb[12].mxu0 %vm243_vm3, %v1011_v19  ;;  %1767 = vmatprep.mubr.msk.bf16.mxu1 %vm2130_vm0, %v2129_v1 }
  0x75   : > { %1871 = vmatprep.mubr.msk.bf16.mxu0 %vm2130_vm0, %v2129_v1 }
  0x7b   : > { %1768 = vmatmul.mubr.msk.bf16.gmra.mrb[8].mxu1 %vm243_vm3, %v2303_v34  ;;  %v448_v34 = vrot.slane %v2315_v39, 1  ;;  %v1146_v39 = vshrl.u32 %v2276_v10, 16 }
  0x7c   : > { %1872 = vmatmul.mubr.msk.bf16.gmra.mrb[16].mxu0 %vm243_vm3, %v2310_v36  ;;  %1771 = vmatprep.mubr.msk.bf16.mxu1 %vm2130_vm0, %v2129_v1 }
  0x7d   : > { %1879 = vmatprep.mubr.msk.bf16.mxu0 %vm2130_vm0, %v2129_v1  ;;  %v449_v36 = vsel %vm438_vm5, %v446_v29, %v448_v34  ;;  %v1148_v21 = vrot.slane %v1146_v39, 2 }
  0x83   : > { %1772 = vmatmul.mubr.msk.bf16.gmra.mrb[12].mxu1 %vm243_vm3, %v447_v30 }
  0x84   : > { %1880 = vmatmul.mubr.msk.bf16.vlgmr.msra.gmra.mrb[0].mxu0 %vm243_vm3, %v2321_v46  ;;  %1775 = vmatprep.mubr.msk.bf16.mxu1 %vm2130_vm0, %v2129_v1  ;;  %v1149_v46 = vshll.u32 %v2276_v10, 16 }
  0x85   : > { %1900 = vmatpush3.bf16.msra.mxu0 %v2118_v33  ;;  %1883 = vmatprep.mubr.msk.bf16.mxu0 %vm2130_vm0, %v2129_v1 }
  0x86   : > { %1901 = vmatprep.subr.bf16.mxu0 %v2129_v1  ;;  %v1151_v23 = vrot.slane %v1149_v46, 3 }
  0x89   : > { %1902 = vmatpush3.bf16.msra.mxu0 %v2120_v28 }
  0x8b   : > { %1776 = vmatmul.mubr.msk.bf16.gmra.mrb[16].mxu1 %vm243_vm3, %v449_v36 }
  0x8c   : > { %1884 = vmatmul.mubr.msk.bf16.gmra.mrb[4].mxu0 %vm243_vm3, %v2337_v15  ;;  %1783 = vmatprep.mubr.msk.bf16.mxu1 %vm2130_vm0, %v2129_v1  ;;  %v1152_v15 = vor.u32 %v1151_v23, %v1148_v21 }
  0x8d   : > { %1887 = vmatprep.mubr.msk.bf16.mxu0 %vm2130_vm0, %v2129_v1 }
  0x93   : > { %1784 = vmatmul.mubr.msk.bf16.vlgmr.msra.gmra.mrb[0].mxu1 %vm243_vm3, %v2329_v54  ;;  %v1153_v54 = vsel %vm1129_vm6, %v2331_v12, %v1152_v15 }
  0x94   : > { %1888 = vmatmul.mubr.msk.bf16.gmra.mrb[8].mxu0 %vm243_vm3, %v2350_v62  ;;  %1787 = vmatprep.mubr.msk.bf16.mxu1 %vm2130_vm0, %v2129_v1  ;;  %v1160_v62 = vrot.slane %v1158_v26, 3 }
  0x95   : > { %1891 = vmatprep.mubr.msk.bf16.mxu0 %vm2130_vm0, %v2129_v1  ;;  %1925 = vmatpush3.bf16.msra.mxu1 %v2157_v0 }
  0x96   : > { %1924 = vmatprep.subr.bf16.mxu1 %v2129_v1  ;;  %v1161_v0 = vor.u32 %v1160_v62, %v1157_v27 }
  0x98   : > { %v1162_v11 = vsel %vm1129_vm6, %v1152_v15, %v1161_v0 }
  0x99   : > { %1926 = vmatpush3.bf16.msra.mxu1 %v2168_v3  ;;  %v1284_v3 = vrot.slane %v2259_v59, 3 }
  0x9b   : > { %1788 = vmatmul.mubr.msk.bf16.gmra.mrb[4].mxu1 %vm243_vm3, %v2340_v58  ;;  %v1285_v12 = vsel %vm1278_vm7, %v1282_v18, %v1284_v3  ;;  %v1287_v58 = vsel %vm1278_vm7, %v1284_v3, %v1286_v9 }
  0x9c   : > { %1892 = vmatmul.mubr.msk.bf16.gmra.mrb[12].mxu0 %vm243_vm3, %v1153_v54  ;;  %1791 = vmatprep.mubr.msk.bf16.mxu1 %vm2130_vm0, %v2129_v1 }
  0x9d   : > { %1895 = vmatprep.mubr.msk.bf16.mxu0 %vm2130_vm0, %v2129_v1 }
  0xa3   : > { %1792 = vmatmul.mubr.msk.bf16.gmra.mrb[8].mxu1 %vm243_vm3, %v2353_v63 }
  0xa4   : > { %1896 = vmatmul.mubr.msk.bf16.gmra.mrb[16].mxu0 %vm243_vm3, %v1162_v11  ;;  %1795 = vmatprep.mubr.msk.bf16.mxu1 %vm2130_vm0, %v2129_v1 }
  0xa5   : > { %1903 = vmatprep.mubr.msk.bf16.mxu0 %vm2130_vm0, %v2129_v1 }
  0xab   : > { %1796 = vmatmul.mubr.msk.bf16.gmra.mrb[12].mxu1 %vm243_vm3, %v2364_v17 }
  0xac   : > { %1904 = vmatmul.mubr.msk.bf16.vlgmr.msra.gmra.mrb[0].mxu0 %vm243_vm3, %v2374_v22  ;;  %1799 = vmatprep.mubr.msk.bf16.mxu1 %vm2130_vm0, %v2129_v1 }
  0xad   : > { %1907 = vmatprep.mubr.msk.bf16.mxu0 %vm2130_vm0, %v2129_v1 }
  0xb3   : > { %1800 = vmatmul.mubr.msk.bf16.gmra.mrb[16].mxu1 %vm243_vm3, %v2379_v24 }
  0xb4   : > { %1908 = vmatmul.mubr.msk.bf16.gmra.mrb[4].mxu0 %vm243_vm3, %v2384_v25  ;;  %1819 = vmatprep.mubr.msk.bf16.mxu1 %vm2130_vm0, %v2129_v1 }
  0xb5   : > { %1911 = vmatprep.mubr.msk.bf16.mxu0 %vm2130_vm0, %v2129_v1 }
  0xbb   : > { %1820 = vmatmul.mubr.msk.bf16.vlgmr.msra.gmra.mrb[12].mxu1 %vm243_vm3, %v2396_v37 }
  0xbc   : > { %1912 = vmatmul.mubr.msk.bf16.gmra.mrb[8].mxu0 %vm243_vm3, %v1285_v12  ;;  %1823 = vmatprep.mubr.msk.bf16.mxu1 %vm2130_vm0, %v2129_v1 }
  0xbd   : > { %1915 = vmatprep.mubr.msk.bf16.mxu0 %vm2130_vm0, %v2129_v1 }
  0xc3   : > { %1824 = vmatmul.mubr.msk.bf16.gmra.mrb[16].mxu1 %vm243_vm3, %v2410_v8 }
  0xc4   : > { %1916 = vmatmul.mubr.msk.bf16.gmra.mrb[12].mxu0 %vm243_vm3, %v1287_v58 }
  0xc5   : > { %1919 = vmatprep.mubr.msk.bf16.mxu0 %vm2130_vm0, %v2129_v1 }
  0xcc   : > { %1920 = vmatmul.mubr.msk.bf16.gmra.mrb[16].mxu0 %vm243_vm3, %v2427_v55 }
 0x166   : > { %v649_v42 = vpop.f32.mrb[0].mxu1 }
 0x167   : > { %v1785_v59 = vpop.f32.mrb[1].mxu1 }
 0x168   : > { %v652_v63 = vpop.f32.mrb[2].mxu1 }
 0x169   : > { %v1786_v17 = vpop.f32.mrb[3].mxu1 }
 0x16e   : > { %v657_v18 = vpop.f32.mrb[4].mxu1 }
 0x16f   : > { %v1789_v10 = vpop.f32.mrb[5].mxu1 }
 0x170   : > { %v660_v22 = vpop.f32.mrb[6].mxu1 }
 0x171   : > { %v1790_v24 = vpop.f32.mrb[7].mxu1 }
 0x176   : > { %v665_v25 = vpop.f32.mrb[8].mxu1 }
 0x177   : > { %v1793_v20 = vpop.f32.mrb[9].mxu1 }
 0x178   : > { %v668_v31 = vpop.f32.mrb[10].mxu1 }
 0x179   : > { %v1794_v35 = vpop.f32.mrb[11].mxu1 }
 0x17f   : > { %v1351_v37 = vpop.f32.mrb[0].mxu0 }
 0x180   : > { %v1927_v32 = vadd.f32 %v1351_v37, %v649_v42  ;;  %v1905_v38 = vpop.f32.mrb[1].mxu0 }
 0x181   : > { %v1354_v1 = vpop.f32.mrb[2].mxu0 }
 0x182   : > { %v1634_v41 = vpack.c.bf16 %v1927_v32, %v1927_v32  ;;  %v1928_v44 = vadd.f32 %v1354_v1, %v652_v63  ;;  %v1906_v45 = vpop.f32.mrb[3].mxu0 }
 0x184   : > { %1441 = vst.msk [vmem:[%s2609_s28] sm:$0xf] %vm1440_vm8, %v1634_v41  ;;  %v1635_v47 = vpack.c.bf16 %v1928_v44, %v1928_v44 }
 0x186   : > { %1442 = vst.msk [vmem:[%s2609_s28 + $0x4] sm:$0xf] %vm1440_vm8, %v1635_v47 }
 0x187   : > { %v1359_v48 = vpop.f32.mrb[4].mxu0 }
 0x188   : > { %v1929_v50 = vadd.f32 %v1359_v48, %v657_v18  ;;  %v1909_v8 = vpop.f32.mrb[5].mxu0 }
 0x189   : > { %v1362_v43 = vpop.f32.mrb[6].mxu0 }
 0x18a   : > { %v1636_v51 = vpack.c.bf16 %v1929_v50, %v1929_v50  ;;  %v1930_v9 = vadd.f32 %v1362_v43, %v660_v22  ;;  %v1910_v52 = vpop.f32.mrb[7].mxu0 }
 0x18c   : > { %1443 = vst.msk [vmem:[%s2609_s28 + $0x8] sm:$0xf] %vm1440_vm8, %v1636_v51  ;;  %v1637_v55 = vpack.c.bf16 %v1930_v9, %v1930_v9 }
 0x18e   : > { %1444 = vst.msk [vmem:[%s2609_s28 + $0xc] sm:$0xf] %vm1440_vm8, %v1637_v55  ;;  %v842_v56 = vpop.f32.mrb[12].mxu1 }
 0x18f   : > { %v1367_v53 = vpop.f32.mrb[8].mxu0  ;;  %v1821_v57 = vpop.f32.mrb[13].mxu1 }
 0x190   : > { %v1931_v49 = vadd.f32 %v1367_v53, %v665_v25  ;;  %v1913_v60 = vpop.f32.mrb[9].mxu0  ;;  %v845_v2 = vpop.f32.mrb[14].mxu1 }
 0x191   : > { %v1370_v61 = vpop.f32.mrb[10].mxu0  ;;  %v1822_v13 = vpop.f32.mrb[15].mxu1 }
 0x192   : > { %v1638_v14 = vpack.c.bf16 %v1931_v49, %v1931_v49  ;;  %v1932_v4 = vadd.f32 %v1370_v61, %v668_v31  ;;  %v1914_v5 = vpop.f32.mrb[11].mxu0 }
 0x194   : > { %1445 = vst.msk [vmem:[%s2609_s28 + $0x10] sm:$0xf] %vm1440_vm8, %v1638_v14  ;;  %v1639_v6 = vpack.c.bf16 %v1932_v4, %v1932_v4 }
 0x196   : > { %1446 = vst.msk [vmem:[%s2609_s28 + $0x14] sm:$0xf] %vm1440_vm8, %v1639_v6  ;;  %v850_v7 = vpop.f32.mrb[16].mxu1 }
 0x197   : > { %v1375_v16 = vpop.f32.mrb[12].mxu0  ;;  %v1825_v19 = vpop.f32.mrb[17].mxu1 }
 0x198   : > { %v1933_v29 = vadd.f32 %v1375_v16, %v842_v56  ;;  %v1917_v30 = vpop.f32.mrb[13].mxu0  ;;  %v853_v33 = vpop.f32.mrb[18].mxu1 }
 0x199   : > { %v1378_v34 = vpop.f32.mrb[14].mxu0  ;;  %v1826_v28 = vpop.f32.mrb[19].mxu1 }
 0x19a   : > { %v1640_v36 = vpack.c.bf16 %v1933_v29, %v1933_v29  ;;  %v1934_v39 = vadd.f32 %v1378_v34, %v845_v2  ;;  %v1918_v46 = vpop.f32.mrb[15].mxu0 }
 0x19c   : > { %1447 = vst.msk [vmem:[%s2609_s28 + $0x18] sm:$0xf] %vm1440_vm8, %v1640_v36  ;;  %v1641_v21 = vpack.c.bf16 %v1934_v39, %v1934_v39 }
 0x19e   : > { %1448 = vst.msk [vmem:[%s2609_s28 + $0x1c] sm:$0xf] %vm1440_vm8, %v1641_v21 }
 0x19f   : > { %v1383_v23 = vpop.f32.mrb[16].mxu0 }
 0x1a0   : > { %v1935_v15 = vadd.f32 %v1383_v23, %v850_v7  ;;  %v1921_v40 = vpop.f32.mrb[17].mxu0 }
 0x1a1   : > { %v1386_v26 = vpop.f32.mrb[18].mxu0 }
 0x1a2   : > { %v1642_v54 = vpack.c.bf16 %v1935_v15, %v1935_v15  ;;  %v1936_v27 = vadd.f32 %v1386_v26, %v853_v33  ;;  %v1922_v62 = vpop.f32.mrb[19].mxu0 }
 0x1a4   : > { %1449 = vst.msk [vmem:[%s2609_s28 + $0x20] sm:$0xf] %vm1440_vm8, %v1642_v54  ;;  %v1643_v0 = vpack.c.bf16 %v1936_v27, %v1936_v27 }
 0x1a6   : > { %1450 = vst.msk [vmem:[%s2609_s28 + $0x24] sm:$0xf] %vm1440_vm8, %v1643_v0 }
 0x1a7 PF: > { %s12_s9 = sadd.s32 1, %s2127_s9  }
 0x1a8   : > { %p9_p4 = scmp.ge.s32.totalorder %s12_s9, 4  }
 0x1aa   :  { %11 = sbr.rel (!%p9_p4) target bundleno = 1 (0x1), region = 66 }

// kernel: densenet_forward.30
= control target key start
LH: loop header
LB: loop body
LE: loop exit
PB: predicated region body
PF: predicated region fallthrough
CT: control target
= control target key end

     0   :  { %vm28_vm0 = vcmask 261120   ;;  %vm200_vm1 = vcmask 1043456   ;;  %v624_v1 = vmov 0.0   ;;  %vm175_vm2 = vcmask 195584   ;;  %s881_s1 = inlined_call_operand.vmem [shape: bf16[24,32], index: 1, kind: input, shape index: {}]   ;;  %s882_s0 = inlined_call_operand.vmem [shape: bf16[128,24], index: 0, kind: input, shape index: {}]   ;;  %s883_s2 = inlined_call_operand.vmem [shape: f32[1,24], index: 2, kind: input, shape index: {}]   ;;  %s884_s3 = inlined_call_operand.vmem [shape: f32[1,24], index: 3, kind: input, shape index: {}]   ;;  %s885_s4 = inlined_call_operand.vmem [shape: f32[1,32], index: 4, kind: input, shape index: {}]   ;;  %s886_s5 = inlined_call_operand.vmem [shape: f32[1,32], index: 5, kind: input, shape index: {}]   ;;  %s887_s6 = inlined_call_operand.vmem [shape: bf16[128,32], index: 6, kind: output, shape index: {}]  }
   0x1   :  { %v622_v0 = vld [vmem:[%s881_s1] sm:$0xff]   ;;  %31 = vst.msk [vmem:[#allocation2 + $0x10] sm:$0xff] %vm28_vm0, %v624_v1  ;;  %29 = vst.msk [vmem:[#allocation2] sm:$0xff] %vm28_vm0, %v624_v1  ;;  %v623_v2 = vld [vmem:[%s881_s1 + $0x8] ss:$0 sps:$4 sm:$0xff]   ;;  %vm479_vm3 = vcmask 257024  }
   0x2   :  { %30 = vst.msk [vmem:[#allocation2 + $0x8] sm:$0xff] %vm28_vm0, %v624_v1  ;;  %32 = vst.msk [vmem:[#allocation2 + $0x18] sm:$0xff] %vm28_vm0, %v624_v1  ;;  %v547_v3 = vld [vmem:[%s882_s0] sm:$0xff]   ;;  %595 = vmatprep.subr.bf16.mxu0 %v622_v0  ;;  %615 = vmatprep.subr.bf16.mxu1 %v622_v0  ;;  %v202_v8 = vsel %vm200_vm1, %v623_v2, 0  ;;  %v578_v12 = vld [vmem:[%s882_s0 + $0x8] sm:$0xff]  }
   0x3   :  { %33 = vst.msk [vmem:[#allocation2 + $0x20] sm:$0xff] %vm28_vm0, %v624_v1  ;;  %34 = vst.msk [vmem:[#allocation2 + $0x28] sm:$0xff] %vm28_vm0, %v624_v1  ;;  %v548_v4 = vunpack.c.l.bf16 %v547_v3  ;;  %v549_v5 = vunpack.c.h.bf16 %v547_v3  ;;  %v688_v6 = vld [vmem:[%s883_s2] ss:$0 sm:$0xff]  ;;  %596 = vmatpush3.bf16.msra.mxu0 %v622_v0  ;;  %617 = vmatpush3.bf16.msra.mxu1 %v622_v0  ;;  %v582_v13 = vld [vmem:[%s882_s0 + $0x28] sm:$0xff]   ;;  %v552_v16 = vunpack.c.l.bf16 %v578_v12  ;;  %v553_v17 = vunpack.c.h.bf16 %v578_v12 }
   0x4   :  { %35 = vst.msk [vmem:[#allocation2 + $0x30] sm:$0xff] %vm28_vm0, %v624_v1  ;;  %36 = vst.msk [vmem:[#allocation2 + $0x38] sm:$0xff] %vm28_vm0, %v624_v1  ;;  %v581_v7 = vld [vmem:[%s882_s0 + $0x20] sm:$0xff]   ;;  %619 = vmatprep.subr.msk.bf16.mxu0 %vm200_vm1, %v623_v2  ;;  %620 = vmatprep.subr.msk.bf16.mxu1 %vm200_vm1, %v623_v2  ;;  %v579_v18 = vld [vmem:[%s882_s0 + $0x10] sm:$0xff]   ;;  %v568_v21 = vunpack.c.l.bf16 %v582_v13  ;;  %v569_v22 = vunpack.c.h.bf16 %v582_v13 }
   0x5   :  { %37 = vst.msk [vmem:[#allocation2 + $0x40] sm:$0xff] %vm28_vm0, %v624_v1  ;;  %38 = vst.msk [vmem:[#allocation2 + $0x48] sm:$0xff] %vm28_vm0, %v624_v1  ;;  %v697_v9 = vld [vmem:[%s884_s3] ss:$0 sm:$0xff]  ;;  %v564_v10 = vunpack.c.l.bf16 %v581_v7  ;;  %v565_v11 = vunpack.c.h.bf16 %v581_v7  ;;  %v84_v14 = vmul.f32 %v548_v4, %v688_v6  ;;  %v85_v15 = vmul.f32 %v549_v5, %v688_v6  ;;  %v583_v39 = vld [vmem:[%s882_s0 + $0x30] sm:$0xff]  }
   0x6   :  { %39 = vst.msk [vmem:[#allocation2 + $0x50] sm:$0xff] %vm28_vm0, %v624_v1  ;;  %40 = vst.msk [vmem:[#allocation2 + $0x58] sm:$0xff] %vm28_vm0, %v624_v1  ;;  %v86_v25 = vmul.f32 %v552_v16, %v688_v6  ;;  %v87_v26 = vmul.f32 %v553_v17, %v688_v6  ;;  %v94_v29 = vmul.f32 %v568_v21, %v688_v6  ;;  %v556_v30 = vunpack.c.l.bf16 %v579_v18  ;;  %v580_v44 = vld [vmem:[%s882_s0 + $0x18] sm:$0xff]  }
   0x7   :  { %41 = vst.msk [vmem:[#allocation2 + $0x60] sm:$0xff] %vm28_vm0, %v624_v1  ;;  %42 = vst.msk [vmem:[#allocation2 + $0x68] sm:$0xff] %vm28_vm0, %v624_v1  ;;  %v92_v19 = vmul.f32 %v564_v10, %v688_v6  ;;  %v93_v20 = vmul.f32 %v565_v11, %v688_v6  ;;  %v107_v23 = vadd.f32 %v697_v9, %v84_v14  ;;  %598 = vmatpush3.bf16.msra.mxu0 %v202_v8  ;;  %v584_v49 = vld [vmem:[%s882_s0 + $0x38] sm:$0xff]  }
   0x8   :  { %43 = vst.msk [vmem:[#allocation2 + $0x70] sm:$0xff] %vm28_vm0, %v624_v1  ;;  %44 = vst.msk [vmem:[#allocation2 + $0x78] sm:$0xff] %vm28_vm0, %v624_v1  ;;  %v108_v24 = vadd.f32 %v697_v9, %v85_v15  ;;  %618 = vmatpush3.bf16.msra.mxu1 %v202_v8  ;;  %v109_v33 = vadd.f32 %v697_v9, %v86_v25  ;;  %v110_v34 = vadd.f32 %v697_v9, %v87_v26 }
   0x9   :  { %v115_v27 = vadd.f32 %v697_v9, %v92_v19  ;;  %v116_v28 = vadd.f32 %v697_v9, %v93_v20  ;;  %v123_v31 = vmax.f32 %v107_v23, 0.0  ;;  %v95_v37 = vmul.f32 %v569_v22, %v688_v6  ;;  %v142_v26 = vld [vmem:[#allocation2 + $0x18] sm:$0xff] }
   0xa   :  { %v124_v32 = vmax.f32 %v108_v24, 0.0  ;;  %v117_v38 = vadd.f32 %v697_v9, %v94_v29  ;;  %v125_v41 = vmax.f32 %v109_v33, 0.0  ;;  %v126_v42 = vmax.f32 %v110_v34, 0.0  ;;  %v139_v24 = vld [vmem:[#allocation2] sm:$0xff] }
   0xb   :  { %v131_v35 = vmax.f32 %v115_v27, 0.0  ;;  %v132_v36 = vmax.f32 %v116_v28, 0.0  ;;  %v557_v43 = vunpack.c.h.bf16 %v579_v18  ;;  %v118_v46 = vadd.f32 %v697_v9, %v95_v37 }
   0xc   :  { %v155_v40 = vpack.c.bf16 %v124_v32, %v123_v31  ;;  %v133_v47 = vmax.f32 %v117_v38, 0.0  ;;  %v88_v48 = vmul.f32 %v556_v30, %v688_v6  ;;  %v156_v50 = vpack.c.bf16 %v126_v42, %v125_v41  ;;  %v140_v30 = vld [vmem:[#allocation2 + $0x8] sm:$0xff] }
   0xd   :  { %v159_v45 = vpack.c.bf16 %v132_v36, %v131_v35  ;;  %v89_v51 = vmul.f32 %v557_v43, %v688_v6  ;;  %v572_v52 = vunpack.c.l.bf16 %v583_v39  ;;  %v573_v53 = vunpack.c.h.bf16 %v583_v39  ;;  %v149_v28 = vld [vmem:[#allocation2 + $0x50] sm:$0xff]  ;;  %v150_v35 = vld [vmem:[#allocation2 + $0x58] sm:$0xff] }
   0xe   :  { %599 = vmatprep.mubr.msk.bf16.mxu0 %vm175_vm2, %v155_v40  ;;  %v134_v54 = vmax.f32 %v118_v46, 0.0  ;;  %v111_v55 = vadd.f32 %v697_v9, %v88_v48  ;;  %v560_v56 = vunpack.c.l.bf16 %v580_v44  ;;  %v561_v57 = vunpack.c.h.bf16 %v580_v44  ;;  %v148_v40 = vld [vmem:[#allocation2 + $0x48] sm:$0xff]  ;;  %v145_v46 = vld [vmem:[#allocation2 + $0x30] sm:$0xff]  ;;  %v143_v48 = vld [vmem:[#allocation2 + $0x20] sm:$0xff] }
   0xf   :  { %607 = vmatprep.mubr.msk.bf16.mxu1 %vm175_vm2, %v159_v45  ;;  %600 = vmatmul.mubr.msk.bf16.vlgmr.msra.gmra.mrb[0].mxu0 %vm175_vm2, %v156_v50  ;;  %v112_v58 = vadd.f32 %v697_v9, %v89_v51  ;;  %v96_v59 = vmul.f32 %v572_v52, %v688_v6  ;;  %v97_v60 = vmul.f32 %v573_v53, %v688_v6  ;;  %v576_v61 = vunpack.c.l.bf16 %v584_v49  ;;  %v146_v51 = vld [vmem:[#allocation2 + $0x38] sm:$0xff] }
  0x10   :  { %v160_v62 = vpack.c.bf16 %v134_v54, %v133_v47  ;;  %v127_v63 = vmax.f32 %v111_v55, 0.0  ;;  %v90_v0 = vmul.f32 %v560_v56, %v688_v6  ;;  %v91_v1 = vmul.f32 %v561_v57, %v688_v6  ;;  %v768_v47 = vld [vmem:[%s885_s4] ss:$0 sm:$0xff]  ;;  %v153_v54 = vld [vmem:[#allocation2 + $0x70] sm:$0xff]  ;;  %v144_v56 = vld [vmem:[#allocation2 + $0x28] sm:$0xff] }
  0x11   :  { %v128_v2 = vmax.f32 %v112_v58, 0.0  ;;  %v119_v3 = vadd.f32 %v697_v9, %v96_v59  ;;  %v120_v4 = vadd.f32 %v697_v9, %v97_v60  ;;  %v577_v5 = vunpack.c.h.bf16 %v584_v49  ;;  %v774_v49 = vld [vmem:[%s886_s5] ss:$0 sm:$0xff] }
  0x12   :  { %608 = vmatmul.mubr.msk.bf16.vlgmr.msra.gmra.mrb[0].mxu1 %vm175_vm2, %v160_v62  ;;  %v113_v7 = vadd.f32 %v697_v9, %v90_v0  ;;  %v114_v8 = vadd.f32 %v697_v9, %v91_v1  ;;  %v98_v10 = vmul.f32 %v576_v61, %v688_v6  ;;  %v151_v60 = vld [vmem:[#allocation2 + $0x60] sm:$0xff] }
  0x13   :  { %v157_v11 = vpack.c.bf16 %v128_v2, %v127_v63  ;;  %v135_v12 = vmax.f32 %v119_v3, 0.0  ;;  %v136_v13 = vmax.f32 %v120_v4, 0.0  ;;  %v99_v14 = vmul.f32 %v577_v5, %v688_v6  ;;  %v141_v6 = vld [vmem:[#allocation2 + $0x10] sm:$0xff]  ;;  %v154_v2 = vld [vmem:[#allocation2 + $0x78] sm:$0xff] }
  0x14   :  { %v129_v15 = vmax.f32 %v113_v7, 0.0  ;;  %v130_v16 = vmax.f32 %v114_v8, 0.0  ;;  %v121_v17 = vadd.f32 %v697_v9, %v98_v10 }
  0x15   :  { %603 = vmatprep.mubr.msk.bf16.mxu0 %vm175_vm2, %v157_v11  ;;  %v161_v18 = vpack.c.bf16 %v136_v13, %v135_v12  ;;  %v122_v19 = vadd.f32 %v697_v9, %v99_v14  ;;  %v147_v9 = vld [vmem:[#allocation2 + $0x40] sm:$0xff] }
  0x16   :  { %v158_v20 = vpack.c.bf16 %v130_v16, %v129_v15  ;;  %v137_v21 = vmax.f32 %v121_v17, 0.0 }
  0x17   :  { %611 = vmatprep.mubr.msk.bf16.mxu1 %vm175_vm2, %v161_v18  ;;  %v138_v22 = vmax.f32 %v122_v19, 0.0 }
  0x18   :  { %604 = vmatmul.mubr.msk.bf16.gmra.mrb[4].mxu0 %vm175_vm2, %v158_v20 }
  0x19   :  { %v162_v23 = vpack.c.bf16 %v138_v22, %v137_v21 }
  0x1b   :  { %612 = vmatmul.mubr.msk.bf16.gmra.mrb[4].mxu1 %vm175_vm2, %v162_v23 }
  0xe2   :  { %v601_v25 = vpop.f32.mrb[0].mxu0 }
  0xe3   :  { %v303_v27 = vadd.f32 %v601_v25, %v141_v6  ;;  %v238_v29 = vpop.f32.mrb[1].mxu0 }
  0xe4   :  { %v301_v31 = vadd.f32 %v238_v29, %v139_v24  ;;  %v602_v32 = vpop.f32.mrb[2].mxu0  ;;  %v152_v29 = vld [vmem:[#allocation2 + $0x68] sm:$0xff] }
  0xe5   :  { %320 = vst.msk [vmem:[#allocation2 + $0x10] sm:$0xff] %vm28_vm0, %v303_v27  ;;  %v609_v33 = vpop.f32.mrb[0].mxu1  ;;  %v304_v34 = vadd.f32 %v602_v32, %v142_v26  ;;  %v241_v36 = vpop.f32.mrb[3].mxu0 }
  0xe6   :  { %v311_v37 = vadd.f32 %v609_v33, %v149_v28  ;;  %318 = vst.msk [vmem:[#allocation2] sm:$0xff] %vm28_vm0, %v301_v31  ;;  %v270_v38 = vpop.f32.mrb[1].mxu1  ;;  %v302_v39 = vadd.f32 %v241_v36, %v140_v30 }
  0xe7   :  { %v309_v41 = vadd.f32 %v270_v38, %v147_v9  ;;  %321 = vst.msk [vmem:[#allocation2 + $0x18] sm:$0xff] %vm28_vm0, %v304_v34  ;;  %v610_v42 = vpop.f32.mrb[2].mxu1 }
  0xe8   :  { %328 = vst.msk [vmem:[#allocation2 + $0x50] sm:$0xff] %vm28_vm0, %v311_v37  ;;  %v312_v43 = vadd.f32 %v610_v42, %v150_v35  ;;  %319 = vst.msk [vmem:[#allocation2 + $0x8] sm:$0xff] %vm28_vm0, %v302_v39  ;;  %v273_v44 = vpop.f32.mrb[3].mxu1 }
  0xe9   :  { %326 = vst.msk [vmem:[#allocation2 + $0x40] sm:$0xff] %vm28_vm0, %v309_v41  ;;  %v310_v45 = vadd.f32 %v273_v44, %v148_v40 }
  0xea   :  { %329 = vst.msk [vmem:[#allocation2 + $0x58] sm:$0xff] %vm28_vm0, %v312_v43 }
  0xeb   :  { %327 = vst.msk [vmem:[#allocation2 + $0x48] sm:$0xff] %vm28_vm0, %v310_v45  ;;  %v605_v50 = vpop.f32.mrb[4].mxu0 }
  0xec   :  { %v339_v52 = vld [vmem:[#allocation2 + $0x10] sm:$0xff]  ;;  %v307_v53 = vadd.f32 %v605_v50, %v145_v46  ;;  %v254_v55 = vpop.f32.mrb[5].mxu0 }
  0xed   :  { %v362_v57 = vmul.f32 %v768_v47, %v339_v52  ;;  %v337_v58 = vld [vmem:[#allocation2] sm:$0xff]  ;;  %v305_v59 = vadd.f32 %v254_v55, %v143_v48  ;;  %v606_v61 = vpop.f32.mrb[6].mxu0 }
  0xee   :  { %v360_v62 = vmul.f32 %v768_v47, %v337_v58  ;;  %v340_v63 = vld [vmem:[#allocation2 + $0x18] sm:$0xff]  ;;  %324 = vst.msk [vmem:[#allocation2 + $0x30] sm:$0xff] %vm28_vm0, %v307_v53  ;;  %v613_v0 = vpop.f32.mrb[4].mxu1  ;;  %v308_v1 = vadd.f32 %v606_v61, %v146_v51  ;;  %v257_v3 = vpop.f32.mrb[7].mxu0 }
  0xef   :  { %v385_v4 = vadd.f32 %v774_v49, %v362_v57  ;;  %v347_v5 = vld [vmem:[#allocation2 + $0x50] sm:$0xff]  ;;  %v363_v7 = vmul.f32 %v768_v47, %v340_v63  ;;  %v338_v8 = vld [vmem:[#allocation2 + $0x8] sm:$0xff]  ;;  %v315_v10 = vadd.f32 %v613_v0, %v153_v54  ;;  %322 = vst.msk [vmem:[#allocation2 + $0x20] sm:$0xff] %vm28_vm0, %v305_v59  ;;  %v286_v11 = vpop.f32.mrb[5].mxu1  ;;  %v306_v12 = vadd.f32 %v257_v3, %v144_v56 }
  0xf0   :  { %v370_v13 = vmul.f32 %v768_v47, %v347_v5  ;;  %v383_v14 = vadd.f32 %v774_v49, %v360_v62  ;;  %v345_v15 = vld [vmem:[#allocation2 + $0x40] sm:$0xff]  ;;  %v361_v16 = vmul.f32 %v768_v47, %v338_v8  ;;  %v313_v17 = vadd.f32 %v286_v11, %v151_v60  ;;  %325 = vst.msk [vmem:[#allocation2 + $0x38] sm:$0xff] %vm28_vm0, %v308_v1  ;;  %v614_v18 = vpop.f32.mrb[6].mxu1 }
  0xf1   :  { %v401_v19 = vmax.f32 %v385_v4, 0.0  ;;  %v368_v20 = vmul.f32 %v768_v47, %v345_v15  ;;  %v386_v21 = vadd.f32 %v774_v49, %v363_v7  ;;  %v348_v22 = vld [vmem:[#allocation2 + $0x58] sm:$0xff]  ;;  %332 = vst.msk [vmem:[#allocation2 + $0x70] sm:$0xff] %vm28_vm0, %v315_v10  ;;  %v316_v23 = vadd.f32 %v614_v18, %v154_v2  ;;  %323 = vst.msk [vmem:[#allocation2 + $0x28] sm:$0xff] %vm28_vm0, %v306_v12  ;;  %v289_v6 = vpop.f32.mrb[7].mxu1 }
  0xf2   :  { %v393_v24 = vadd.f32 %v774_v49, %v370_v13  ;;  %v399_v25 = vmax.f32 %v383_v14, 0.0  ;;  %v371_v26 = vmul.f32 %v768_v47, %v348_v22  ;;  %v384_v27 = vadd.f32 %v774_v49, %v361_v16  ;;  %v346_v28 = vld [vmem:[#allocation2 + $0x48] sm:$0xff]  ;;  %330 = vst.msk [vmem:[#allocation2 + $0x60] sm:$0xff] %vm28_vm0, %v313_v17 }
  0xf3   :  { %v532_v30 = vpack.c.bf16 %v401_v19, %v401_v19  ;;  %v391_v31 = vadd.f32 %v774_v49, %v368_v20  ;;  %v402_v9 = vmax.f32 %v386_v21, 0.0  ;;  %v369_v32 = vmul.f32 %v768_v47, %v346_v28  ;;  %333 = vst.msk [vmem:[#allocation2 + $0x78] sm:$0xff] %vm28_vm0, %v316_v23 }
  0xf4   :  { %v409_v33 = vmax.f32 %v393_v24, 0.0  ;;  %v530_v34 = vpack.c.bf16 %v399_v25, %v399_v25  ;;  %v394_v35 = vadd.f32 %v774_v49, %v371_v26  ;;  %v400_v36 = vmax.f32 %v384_v27, 0.0 }
  0xf5   :  { %482 = vst.msk [vmem:[%s887_s6 + $0x8] sm:$0xf] %vm479_vm3, %v532_v30  ;;  %v407_v37 = vmax.f32 %v391_v31, 0.0  ;;  %v533_v38 = vpack.c.bf16 %v402_v9, %v402_v9  ;;  %v392_v39 = vadd.f32 %v774_v49, %v369_v32  ;;  %v343_v40 = vld [vmem:[#allocation2 + $0x30] sm:$0xff]  ;;  %v314_v41 = vadd.f32 %v289_v6, %v152_v29 }
  0xf6   :  { %v540_v42 = vpack.c.bf16 %v409_v33, %v409_v33  ;;  %480 = vst.msk [vmem:[%s887_s6] sm:$0xf] %vm479_vm3, %v530_v34  ;;  %v410_v43 = vmax.f32 %v394_v35, 0.0  ;;  %v531_v44 = vpack.c.bf16 %v400_v36, %v400_v36  ;;  %v366_v45 = vmul.f32 %v768_v47, %v343_v40  ;;  %v341_v46 = vld [vmem:[#allocation2 + $0x20] sm:$0xff] }
  0xf7   :  { %v538_v48 = vpack.c.bf16 %v407_v37, %v407_v37  ;;  %483 = vst.msk [vmem:[%s887_s6 + $0xc] sm:$0xf] %vm479_vm3, %v533_v38  ;;  %v408_v50 = vmax.f32 %v392_v39, 0.0  ;;  %v364_v51 = vmul.f32 %v768_v47, %v341_v46  ;;  %v344_v52 = vld [vmem:[#allocation2 + $0x38] sm:$0xff] }
  0xf8   :  { %331 = vst.msk [vmem:[#allocation2 + $0x68] sm:$0xff] %vm28_vm0, %v314_v41  ;;  %v541_v53 = vpack.c.bf16 %v410_v43, %v410_v43  ;;  %v389_v54 = vadd.f32 %v774_v49, %v366_v45  ;;  %v351_v55 = vld [vmem:[#allocation2 + $0x70] sm:$0xff]  ;;  %v367_v56 = vmul.f32 %v768_v47, %v344_v52  ;;  %v342_v57 = vld [vmem:[#allocation2 + $0x28] sm:$0xff] }
  0xf9   :  { %490 = vst.msk [vmem:[%s887_s6 + $0x28] sm:$0xf] %vm479_vm3, %v540_v42  ;;  %481 = vst.msk [vmem:[%s887_s6 + $0x4] sm:$0xf] %vm479_vm3, %v531_v44  ;;  %v539_v58 = vpack.c.bf16 %v408_v50, %v408_v50  ;;  %v374_v59 = vmul.f32 %v768_v47, %v351_v55  ;;  %v387_v60 = vadd.f32 %v774_v49, %v364_v51  ;;  %v349_v61 = vld [vmem:[#allocation2 + $0x60] sm:$0xff] }
  0xfa   :  { %488 = vst.msk [vmem:[%s887_s6 + $0x20] sm:$0xf] %vm479_vm3, %v538_v48  ;;  %v365_v62 = vmul.f32 %v768_v47, %v342_v57  ;;  %491 = vst.msk [vmem:[%s887_s6 + $0x2c] sm:$0xf] %vm479_vm3, %v541_v53  ;;  %v405_v63 = vmax.f32 %v389_v54, 0.0  ;;  %v372_v0 = vmul.f32 %v768_v47, %v349_v61  ;;  %v390_v1 = vadd.f32 %v774_v49, %v367_v56  ;;  %v352_v2 = vld [vmem:[#allocation2 + $0x78] sm:$0xff] }
  0xfb   :  { %489 = vst.msk [vmem:[%s887_s6 + $0x24] sm:$0xf] %vm479_vm3, %v539_v58  ;;  %v397_v3 = vadd.f32 %v774_v49, %v374_v59  ;;  %v403_v4 = vmax.f32 %v387_v60, 0.0  ;;  %v375_v5 = vmul.f32 %v768_v47, %v352_v2 }
  0xfc   :  { %v388_v7 = vadd.f32 %v774_v49, %v365_v62  ;;  %v536_v8 = vpack.c.bf16 %v405_v63, %v405_v63  ;;  %v395_v10 = vadd.f32 %v774_v49, %v372_v0  ;;  %v406_v11 = vmax.f32 %v390_v1, 0.0 }
  0xfd   :  { %v413_v12 = vmax.f32 %v397_v3, 0.0  ;;  %v534_v13 = vpack.c.bf16 %v403_v4, %v403_v4  ;;  %v398_v14 = vadd.f32 %v774_v49, %v375_v5 }
  0xfe   :  { %v404_v15 = vmax.f32 %v388_v7, 0.0  ;;  %486 = vst.msk [vmem:[%s887_s6 + $0x18] sm:$0xf] %vm479_vm3, %v536_v8  ;;  %v411_v16 = vmax.f32 %v395_v10, 0.0  ;;  %v537_v17 = vpack.c.bf16 %v406_v11, %v406_v11 }
  0xff   :  { %v350_v18 = vld [vmem:[#allocation2 + $0x68] sm:$0xff]  ;;  %v544_v19 = vpack.c.bf16 %v413_v12, %v413_v12  ;;  %484 = vst.msk [vmem:[%s887_s6 + $0x10] sm:$0xf] %vm479_vm3, %v534_v13  ;;  %v414_v20 = vmax.f32 %v398_v14, 0.0 }
 0x100   :  { %v535_v21 = vpack.c.bf16 %v404_v15, %v404_v15  ;;  %v373_v22 = vmul.f32 %v768_v47, %v350_v18  ;;  %v542_v23 = vpack.c.bf16 %v411_v16, %v411_v16  ;;  %487 = vst.msk [vmem:[%s887_s6 + $0x1c] sm:$0xf] %vm479_vm3, %v537_v17 }
 0x101   :  { %494 = vst.msk [vmem:[%s887_s6 + $0x38] sm:$0xf] %vm479_vm3, %v544_v19  ;;  %v545_v6 = vpack.c.bf16 %v414_v20, %v414_v20 }
 0x102   :  { %485 = vst.msk [vmem:[%s887_s6 + $0x14] sm:$0xf] %vm479_vm3, %v535_v21  ;;  %v396_v24 = vadd.f32 %v774_v49, %v373_v22  ;;  %492 = vst.msk [vmem:[%s887_s6 + $0x30] sm:$0xf] %vm479_vm3, %v542_v23 }
 0x103   :  { %495 = vst.msk [vmem:[%s887_s6 + $0x3c] sm:$0xf] %vm479_vm3, %v545_v6 }
 0x104   :  { %v412_v47 = vmax.f32 %v396_v24, 0.0 }
 0x106   :  { %v543_v25 = vpack.c.bf16 %v412_v47, %v412_v47 }
 0x108   :  { %493 = vst.msk [vmem:[%s887_s6 + $0x34] sm:$0xf] %vm479_vm3, %v543_v25 }

// kernel: densenet_forward.32
= control target key start
LH: loop header
LB: loop body
LE: loop exit
PB: predicated region body
PF: predicated region fallthrough
CT: control target
= control target key end

     0   :  { %vm22_vm0 = vcmask 130048   ;;  %v552_v1 = vmov 0.0   ;;  %vm173_vm1 = vcmask 261120   ;;  %vm411_vm2 = vcmask 125952   ;;  %s754_s1 = inlined_call_operand.vmem [shape: bf16[32,16], index: 1, kind: input, shape index: {}]   ;;  %s755_s0 = inlined_call_operand.vmem [shape: bf16[128,32], index: 0, kind: input, shape index: {}]   ;;  %s756_s2 = inlined_call_operand.vmem [shape: f32[1,32], index: 2, kind: input, shape index: {}]   ;;  %s757_s3 = inlined_call_operand.vmem [shape: f32[1,32], index: 3, kind: input, shape index: {}]   ;;  %s758_s4 = inlined_call_operand.vmem [shape: bf16[128,16], index: 4, kind: output, shape index: {}]  }
   0x1   :  { %v550_v0 = vld [vmem:[%s754_s1] sm:$0xff]   ;;  %25 = vst.msk [vmem:[#allocation2 + $0x10] sm:$0xff] %vm22_vm0, %v552_v1  ;;  %23 = vst.msk [vmem:[#allocation2] sm:$0xff] %vm22_vm0, %v552_v1  ;;  %v551_v2 = vld [vmem:[%s754_s1 + $0x8] sm:$0xff]  }
   0x2   :  { %24 = vst.msk [vmem:[#allocation2 + $0x8] sm:$0xff] %vm22_vm0, %v552_v1  ;;  %26 = vst.msk [vmem:[#allocation2 + $0x18] sm:$0xff] %vm22_vm0, %v552_v1  ;;  %525 = vmatprep.subr.bf16.mxu0 %v550_v0  ;;  %545 = vmatprep.subr.bf16.mxu1 %v550_v0  ;;  %v477_v3 = vld [vmem:[%s755_s0] sm:$0xff]   ;;  %v508_v8 = vld [vmem:[%s755_s0 + $0x8] sm:$0xff]  }
   0x3   :  { %27 = vst.msk [vmem:[#allocation2 + $0x20] sm:$0xff] %vm22_vm0, %v552_v1  ;;  %28 = vst.msk [vmem:[#allocation2 + $0x28] sm:$0xff] %vm22_vm0, %v552_v1  ;;  %v606_v4 = vld [vmem:[%s756_s2] ss:$0 sm:$0xff]  ;;  %526 = vmatpush3.bf16.msra.mxu0 %v550_v0  ;;  %547 = vmatpush3.bf16.msra.mxu1 %v550_v0  ;;  %v478_v5 = vunpack.c.l.bf16 %v477_v3  ;;  %v479_v6 = vunpack.c.h.bf16 %v477_v3  ;;  %v512_v9 = vld [vmem:[%s755_s0 + $0x28] sm:$0xff]   ;;  %v482_v13 = vunpack.c.l.bf16 %v508_v8  ;;  %v483_v14 = vunpack.c.h.bf16 %v508_v8 }
   0x4   :  { %29 = vst.msk [vmem:[#allocation2 + $0x30] sm:$0xff] %vm22_vm0, %v552_v1  ;;  %30 = vst.msk [vmem:[#allocation2 + $0x38] sm:$0xff] %vm22_vm0, %v552_v1  ;;  %v511_v7 = vld [vmem:[%s755_s0 + $0x20] sm:$0xff]   ;;  %527 = vmatprep.subr.bf16.mxu0 %v551_v2  ;;  %546 = vmatprep.subr.bf16.mxu1 %v551_v2  ;;  %v509_v15 = vld [vmem:[%s755_s0 + $0x10] sm:$0xff]   ;;  %v498_v18 = vunpack.c.l.bf16 %v512_v9  ;;  %v499_v19 = vunpack.c.h.bf16 %v512_v9 }
   0x5   :  { %31 = vst.msk [vmem:[#allocation2 + $0x40] sm:$0xff] %vm22_vm0, %v552_v1  ;;  %32 = vst.msk [vmem:[#allocation2 + $0x48] sm:$0xff] %vm22_vm0, %v552_v1  ;;  %v620_v10 = vld [vmem:[%s757_s3] ss:$0 sm:$0xff]  ;;  %v494_v11 = vunpack.c.l.bf16 %v511_v7  ;;  %v495_v12 = vunpack.c.h.bf16 %v511_v7  ;;  %v78_v16 = vmul.f32 %v478_v5, %v606_v4  ;;  %v79_v17 = vmul.f32 %v479_v6, %v606_v4  ;;  %v513_v36 = vld [vmem:[%s755_s0 + $0x30] sm:$0xff]  }
   0x6   :  { %33 = vst.msk [vmem:[#allocation2 + $0x50] sm:$0xff] %vm22_vm0, %v552_v1  ;;  %34 = vst.msk [vmem:[#allocation2 + $0x58] sm:$0xff] %vm22_vm0, %v552_v1  ;;  %v80_v22 = vmul.f32 %v482_v13, %v606_v4  ;;  %v81_v23 = vmul.f32 %v483_v14, %v606_v4  ;;  %v88_v26 = vmul.f32 %v498_v18, %v606_v4  ;;  %v486_v27 = vunpack.c.l.bf16 %v509_v15  ;;  %v510_v41 = vld [vmem:[%s755_s0 + $0x18] sm:$0xff]  }
   0x7   :  { %35 = vst.msk [vmem:[#allocation2 + $0x60] sm:$0xff] %vm22_vm0, %v552_v1  ;;  %36 = vst.msk [vmem:[#allocation2 + $0x68] sm:$0xff] %vm22_vm0, %v552_v1  ;;  %v86_v20 = vmul.f32 %v494_v11, %v606_v4  ;;  %v87_v21 = vmul.f32 %v495_v12, %v606_v4  ;;  %528 = vmatpush3.bf16.msra.mxu0 %v551_v2  ;;  %548 = vmatpush3.bf16.msra.mxu1 %v551_v2  ;;  %v487_v45 = vunpack.c.h.bf16 %v509_v15  ;;  %v514_v46 = vld [vmem:[%s755_s0 + $0x38] sm:$0xff]  }
   0x8   :  { %37 = vst.msk [vmem:[#allocation2 + $0x70] sm:$0xff] %vm22_vm0, %v552_v1  ;;  %38 = vst.msk [vmem:[#allocation2 + $0x78] sm:$0xff] %vm22_vm0, %v552_v1  ;;  %v101_v24 = vadd.f32 %v620_v10, %v78_v16  ;;  %v102_v25 = vadd.f32 %v620_v10, %v79_v17  ;;  %v103_v30 = vadd.f32 %v620_v10, %v80_v22  ;;  %v502_v50 = vunpack.c.l.bf16 %v513_v36 }
   0x9   :  { %v109_v28 = vadd.f32 %v620_v10, %v86_v20  ;;  %v110_v29 = vadd.f32 %v620_v10, %v87_v21  ;;  %v104_v31 = vadd.f32 %v620_v10, %v81_v23  ;;  %v89_v34 = vmul.f32 %v499_v19, %v606_v4  ;;  %v133_v23 = vld [vmem:[#allocation2] sm:$0xff] }
   0xa   :  { %v117_v32 = vmax.f32 %v101_v24, 0.0  ;;  %v118_v33 = vmax.f32 %v102_v25, 0.0  ;;  %v111_v35 = vadd.f32 %v620_v10, %v88_v26  ;;  %v119_v39 = vmax.f32 %v103_v30, 0.0  ;;  %v136_v25 = vld [vmem:[#allocation2 + $0x18] sm:$0xff] }
   0xb   :  { %v125_v37 = vmax.f32 %v109_v28, 0.0  ;;  %v126_v38 = vmax.f32 %v110_v29, 0.0  ;;  %v120_v40 = vmax.f32 %v104_v31, 0.0  ;;  %v112_v43 = vadd.f32 %v620_v10, %v89_v34  ;;  %v134_v28 = vld [vmem:[#allocation2 + $0x8] sm:$0xff] }
   0xc   :  { %v149_v42 = vpack.c.bf16 %v118_v33, %v117_v32  ;;  %v127_v44 = vmax.f32 %v111_v35, 0.0  ;;  %v82_v49 = vmul.f32 %v486_v27, %v606_v4  ;;  %v83_v52 = vmul.f32 %v487_v45, %v606_v4  ;;  %v141_v30 = vld [vmem:[#allocation2 + $0x40] sm:$0xff]  ;;  %v139_v45 = vld [vmem:[#allocation2 + $0x30] sm:$0xff] }
   0xd   :  { %v153_v47 = vpack.c.bf16 %v126_v38, %v125_v37  ;;  %v150_v48 = vpack.c.bf16 %v120_v40, %v119_v39  ;;  %v128_v51 = vmax.f32 %v112_v43, 0.0  ;;  %v503_v53 = vunpack.c.h.bf16 %v513_v36  ;;  %v143_v27 = vld [vmem:[#allocation2 + $0x50] sm:$0xff]  ;;  %v144_v34 = vld [vmem:[#allocation2 + $0x58] sm:$0xff]  ;;  %v142_v39 = vld [vmem:[#allocation2 + $0x48] sm:$0xff] }
   0xe   :  { %529 = vmatprep.mubr.msk.bf16.mxu0 %vm173_vm1, %v149_v42  ;;  %v490_v54 = vunpack.c.l.bf16 %v510_v41  ;;  %v105_v55 = vadd.f32 %v620_v10, %v82_v49  ;;  %v90_v56 = vmul.f32 %v502_v50, %v606_v4  ;;  %v491_v57 = vunpack.c.h.bf16 %v510_v41  ;;  %v140_v50 = vld [vmem:[#allocation2 + $0x38] sm:$0xff] }
   0xf   :  { %537 = vmatprep.mubr.msk.bf16.mxu1 %vm173_vm1, %v153_v47  ;;  %530 = vmatmul.mubr.msk.bf16.vlgmr.msra.gmra.mrb[0].mxu0 %vm173_vm1, %v150_v48  ;;  %v506_v58 = vunpack.c.l.bf16 %v514_v46  ;;  %v154_v59 = vpack.c.bf16 %v128_v51, %v127_v44  ;;  %v106_v60 = vadd.f32 %v620_v10, %v83_v52  ;;  %v91_v61 = vmul.f32 %v503_v53, %v606_v4  ;;  %v147_v49 = vld [vmem:[#allocation2 + $0x70] sm:$0xff] }
  0x10   :  { %v84_v62 = vmul.f32 %v490_v54, %v606_v4  ;;  %v121_v63 = vmax.f32 %v105_v55, 0.0  ;;  %v113_v0 = vadd.f32 %v620_v10, %v90_v56  ;;  %v85_v1 = vmul.f32 %v491_v57, %v606_v4  ;;  %v145_v55 = vld [vmem:[#allocation2 + $0x60] sm:$0xff]  ;;  %v138_v56 = vld [vmem:[#allocation2 + $0x28] sm:$0xff] }
  0x11   :  { %v507_v2 = vunpack.c.h.bf16 %v514_v46  ;;  %538 = vmatmul.mubr.msk.bf16.vlgmr.msra.gmra.mrb[0].mxu1 %vm173_vm1, %v154_v59  ;;  %v122_v3 = vmax.f32 %v106_v60, 0.0  ;;  %v114_v5 = vadd.f32 %v620_v10, %v91_v61  ;;  %v92_v7 = vmul.f32 %v506_v58, %v606_v4  ;;  %v137_v46 = vld [vmem:[#allocation2 + $0x20] sm:$0xff] }
  0x12   :  { %v107_v6 = vadd.f32 %v620_v10, %v84_v62  ;;  %v129_v8 = vmax.f32 %v113_v0, 0.0  ;;  %v108_v9 = vadd.f32 %v620_v10, %v85_v1  ;;  %v148_v62 = vld [vmem:[#allocation2 + $0x78] sm:$0xff] }
  0x13   :  { %v93_v11 = vmul.f32 %v507_v2, %v606_v4  ;;  %v151_v12 = vpack.c.bf16 %v122_v3, %v121_v63  ;;  %v130_v13 = vmax.f32 %v114_v5, 0.0  ;;  %v115_v15 = vadd.f32 %v620_v10, %v92_v7  ;;  %v135_v4 = vld [vmem:[#allocation2 + $0x10] sm:$0xff]  ;;  %v146_v7 = vld [vmem:[#allocation2 + $0x68] sm:$0xff] }
  0x14   :  { %v123_v14 = vmax.f32 %v107_v6, 0.0  ;;  %v124_v16 = vmax.f32 %v108_v9, 0.0 }
  0x15   :  { %v116_v17 = vadd.f32 %v620_v10, %v93_v11  ;;  %533 = vmatprep.mubr.msk.bf16.mxu0 %vm173_vm1, %v151_v12  ;;  %v155_v18 = vpack.c.bf16 %v130_v13, %v129_v8  ;;  %v131_v19 = vmax.f32 %v115_v15, 0.0 }
  0x16   :  { %v152_v20 = vpack.c.bf16 %v124_v16, %v123_v14 }
  0x17   :  { %v132_v21 = vmax.f32 %v116_v17, 0.0  ;;  %541 = vmatprep.mubr.msk.bf16.mxu1 %vm173_vm1, %v155_v18 }
  0x18   :  { %534 = vmatmul.mubr.msk.bf16.gmra.mrb[4].mxu0 %vm173_vm1, %v152_v20 }
  0x19   :  { %v156_v22 = vpack.c.bf16 %v132_v21, %v131_v19 }
  0x1b   :  { %542 = vmatmul.mubr.msk.bf16.gmra.mrb[4].mxu1 %vm173_vm1, %v156_v22 }
  0xe2   :  { %v531_v24 = vpop.f32.mrb[0].mxu0 }
  0xe3   :  { %v297_v26 = vadd.f32 %v531_v24, %v135_v4  ;;  %v232_v10 = vpop.f32.mrb[1].mxu0 }
  0xe4   :  { %v295_v29 = vadd.f32 %v232_v10, %v133_v23  ;;  %v532_v31 = vpop.f32.mrb[2].mxu0  ;;  %v539_v32 = vpop.f32.mrb[0].mxu1 }
  0xe5   :  { %314 = vst.msk [vmem:[#allocation2 + $0x10] sm:$0xff] %vm22_vm0, %v297_v26  ;;  %v298_v33 = vadd.f32 %v532_v31, %v136_v25  ;;  %v235_v35 = vpop.f32.mrb[3].mxu0  ;;  %v305_v36 = vadd.f32 %v539_v32, %v143_v27  ;;  %v264_v37 = vpop.f32.mrb[1].mxu1 }
  0xe6   :  { %312 = vst.msk [vmem:[#allocation2] sm:$0xff] %vm22_vm0, %v295_v29  ;;  %v296_v38 = vadd.f32 %v235_v35, %v134_v28  ;;  %v303_v40 = vadd.f32 %v264_v37, %v141_v30  ;;  %v540_v41 = vpop.f32.mrb[2].mxu1 }
  0xe7   :  { %315 = vst.msk [vmem:[#allocation2 + $0x18] sm:$0xff] %vm22_vm0, %v298_v33  ;;  %322 = vst.msk [vmem:[#allocation2 + $0x50] sm:$0xff] %vm22_vm0, %v305_v36  ;;  %v306_v42 = vadd.f32 %v540_v41, %v144_v34  ;;  %v267_v43 = vpop.f32.mrb[3].mxu1 }
  0xe8   :  { %313 = vst.msk [vmem:[#allocation2 + $0x8] sm:$0xff] %vm22_vm0, %v296_v38  ;;  %320 = vst.msk [vmem:[#allocation2 + $0x40] sm:$0xff] %vm22_vm0, %v303_v40  ;;  %v304_v44 = vadd.f32 %v267_v43, %v142_v39 }
  0xe9   :  { %323 = vst.msk [vmem:[#allocation2 + $0x58] sm:$0xff] %vm22_vm0, %v306_v42 }
  0xea   :  { %321 = vst.msk [vmem:[#allocation2 + $0x48] sm:$0xff] %vm22_vm0, %v304_v44 }
  0xeb   :  { %v535_v48 = vpop.f32.mrb[4].mxu0 }
  0xec   :  { %v333_v47 = vld [vmem:[#allocation2 + $0x10] sm:$0xff]  ;;  %v301_v53 = vadd.f32 %v535_v48, %v139_v45  ;;  %v248_v54 = vpop.f32.mrb[5].mxu0 }
  0xed   :  { %v462_v51 = vpack.c.bf16 %v333_v47, %v333_v47  ;;  %v331_v52 = vld [vmem:[#allocation2] sm:$0xff]  ;;  %v299_v60 = vadd.f32 %v248_v54, %v137_v46  ;;  %v536_v61 = vpop.f32.mrb[6].mxu0 }
  0xee   :  { %v460_v57 = vpack.c.bf16 %v331_v52, %v331_v52  ;;  %v334_v58 = vld [vmem:[#allocation2 + $0x18] sm:$0xff]  ;;  %v543_v59 = vpop.f32.mrb[4].mxu1  ;;  %v341_v63 = vld [vmem:[#allocation2 + $0x50] sm:$0xff]  ;;  %318 = vst.msk [vmem:[#allocation2 + $0x30] sm:$0xff] %vm22_vm0, %v301_v53  ;;  %v302_v5 = vadd.f32 %v536_v61, %v140_v50  ;;  %v251_v6 = vpop.f32.mrb[7].mxu0 }
  0xef   :  { %414 = vst.msk [vmem:[%s758_s4 + $0x8] sm:$0xf] %vm411_vm2, %v462_v51  ;;  %v463_v0 = vpack.c.bf16 %v334_v58, %v334_v58  ;;  %v332_v1 = vld [vmem:[#allocation2 + $0x8] sm:$0xff]  ;;  %v309_v2 = vadd.f32 %v543_v59, %v147_v49  ;;  %v280_v3 = vpop.f32.mrb[5].mxu1  ;;  %v470_v8 = vpack.c.bf16 %v341_v63, %v341_v63  ;;  %v339_v9 = vld [vmem:[#allocation2 + $0x40] sm:$0xff]  ;;  %v300_v14 = vadd.f32 %v251_v6, %v138_v56 }
  0xf0   :  { %412 = vst.msk [vmem:[%s758_s4] sm:$0xf] %vm411_vm2, %v460_v57  ;;  %v461_v11 = vpack.c.bf16 %v332_v1, %v332_v1  ;;  %v307_v12 = vadd.f32 %v280_v3, %v145_v55  ;;  %v544_v13 = vpop.f32.mrb[6].mxu1  ;;  %v468_v15 = vpack.c.bf16 %v339_v9, %v339_v9  ;;  %v342_v16 = vld [vmem:[#allocation2 + $0x58] sm:$0xff] }
  0xf1   :  { %316 = vst.msk [vmem:[#allocation2 + $0x20] sm:$0xff] %vm22_vm0, %v299_v60  ;;  %326 = vst.msk [vmem:[#allocation2 + $0x70] sm:$0xff] %vm22_vm0, %v309_v2  ;;  %v310_v17 = vadd.f32 %v544_v13, %v148_v62  ;;  %v283_v18 = vpop.f32.mrb[7].mxu1  ;;  %v471_v19 = vpack.c.bf16 %v342_v16, %v342_v16  ;;  %v340_v20 = vld [vmem:[#allocation2 + $0x48] sm:$0xff] }
  0xf2   :  { %415 = vst.msk [vmem:[%s758_s4 + $0xc] sm:$0xf] %vm411_vm2, %v463_v0  ;;  %422 = vst.msk [vmem:[%s758_s4 + $0x28] sm:$0xf] %vm411_vm2, %v470_v8  ;;  %v308_v21 = vadd.f32 %v283_v18, %v146_v7  ;;  %v469_v22 = vpack.c.bf16 %v340_v20, %v340_v20 }
  0xf3   :  { %319 = vst.msk [vmem:[#allocation2 + $0x38] sm:$0xff] %vm22_vm0, %v302_v5  ;;  %324 = vst.msk [vmem:[#allocation2 + $0x60] sm:$0xff] %vm22_vm0, %v307_v12 }
  0xf4   :  { %413 = vst.msk [vmem:[%s758_s4 + $0x4] sm:$0xf] %vm411_vm2, %v461_v11  ;;  %420 = vst.msk [vmem:[%s758_s4 + $0x20] sm:$0xf] %vm411_vm2, %v468_v15 }
  0xf5   :  { %317 = vst.msk [vmem:[#allocation2 + $0x28] sm:$0xff] %vm22_vm0, %v300_v14  ;;  %327 = vst.msk [vmem:[#allocation2 + $0x78] sm:$0xff] %vm22_vm0, %v310_v17  ;;  %v337_v4 = vld [vmem:[#allocation2 + $0x30] sm:$0xff] }
  0xf6   :  { %423 = vst.msk [vmem:[%s758_s4 + $0x2c] sm:$0xf] %vm411_vm2, %v471_v19  ;;  %421 = vst.msk [vmem:[%s758_s4 + $0x24] sm:$0xf] %vm411_vm2, %v469_v22  ;;  %v466_v23 = vpack.c.bf16 %v337_v4, %v337_v4 }
  0xf7   :  { %325 = vst.msk [vmem:[#allocation2 + $0x68] sm:$0xff] %vm22_vm0, %v308_v21 }
  0xf8   :  { %v335_v24 = vld [vmem:[#allocation2 + $0x20] sm:$0xff]  ;;  %v345_v25 = vld [vmem:[#allocation2 + $0x70] sm:$0xff]  ;;  %418 = vst.msk [vmem:[%s758_s4 + $0x18] sm:$0xf] %vm411_vm2, %v466_v23 }
  0xf9   :  { %v464_v26 = vpack.c.bf16 %v335_v24, %v335_v24  ;;  %v474_v10 = vpack.c.bf16 %v345_v25, %v345_v25 }
  0xfa   :  { %v338_v27 = vld [vmem:[#allocation2 + $0x38] sm:$0xff]  ;;  %v343_v28 = vld [vmem:[#allocation2 + $0x60] sm:$0xff] }
  0xfb   :  { %v467_v29 = vpack.c.bf16 %v338_v27, %v338_v27  ;;  %416 = vst.msk [vmem:[%s758_s4 + $0x10] sm:$0xf] %vm411_vm2, %v464_v26  ;;  %v472_v31 = vpack.c.bf16 %v343_v28, %v343_v28  ;;  %426 = vst.msk [vmem:[%s758_s4 + $0x38] sm:$0xf] %vm411_vm2, %v474_v10 }
  0xfc   :  { %v336_v30 = vld [vmem:[#allocation2 + $0x28] sm:$0xff]  ;;  %v346_v32 = vld [vmem:[#allocation2 + $0x78] sm:$0xff] }
  0xfd   :  { %v465_v33 = vpack.c.bf16 %v336_v30, %v336_v30  ;;  %419 = vst.msk [vmem:[%s758_s4 + $0x1c] sm:$0xf] %vm411_vm2, %v467_v29  ;;  %v475_v34 = vpack.c.bf16 %v346_v32, %v346_v32  ;;  %424 = vst.msk [vmem:[%s758_s4 + $0x30] sm:$0xf] %vm411_vm2, %v472_v31 }
  0xfe   :  { %v344_v35 = vld [vmem:[#allocation2 + $0x68] sm:$0xff] }
  0xff   :  { %417 = vst.msk [vmem:[%s758_s4 + $0x14] sm:$0xf] %vm411_vm2, %v465_v33  ;;  %v473_v36 = vpack.c.bf16 %v344_v35, %v344_v35  ;;  %427 = vst.msk [vmem:[%s758_s4 + $0x3c] sm:$0xf] %vm411_vm2, %v475_v34 }
 0x101   :  { %425 = vst.msk [vmem:[%s758_s4 + $0x34] sm:$0xf] %vm411_vm2, %v473_v36 }

// kernel: densenet_forward.33
= control target key start
LH: loop header
LB: loop body
LE: loop exit
PB: predicated region body
PF: predicated region fallthrough
CT: control target
= control target key end

     0   :  { %s328_s6 = smov 0   ;;  %s385_s0 = inlined_call_operand.vmem [shape: bf16[2,8,8,16], index: 0, kind: input, shape index: {}]   ;;  %s386_s1 = inlined_call_operand.vmem [shape: bf16[2,7,7,16], index: 1, kind: output, shape index: {}]  }
   0x1 LB: > { %s271_s7 = sadd.s32 4294967295, %s316_s6   ;;  %p275_p0 = scmp.ge.s32.totalorder %s316_s6, 1  ;;  %s316_s6 = sphi %s328_s6, %s11_s6  }
   0x2   : > { %p87_p1 = scmp.lt.s32.totalorder %s316_s6, 3 }
   0x4   : > { %p88_p2 = pnand %p275_p0, %p87_p1 }
   0x5   : > { %p107_p3 = scmp.lt.s32.totalorder (!%p88_p2), %s271_s7, 1  ;;  %vm192_vm0 = vcmask (!%p88_p2), 125952   ;;  %vm193_vm1 = vsmask.f32 (!%p88_p2), 3328 }
   0x6   : > { %91 = sbr.rel (%p88_p2) target bundleno = 36 (0x24), region = 24  ;;  %vm352_vm2 = vmand (!%p88_p2), %vm192_vm0, %vm193_vm1 }
   0xd   : > { %s390_s7 = smov (!%p107_p3, %s271_s7), 1 }
   0xe   : > { %s281_s8 = sshll.u32 %s390_s7, 5  ;;  %s301_s12 = smul.u32 28, %s390_s7 }
   0xf   : > { %s111_s11 = scalar_lea.vmem %s385_s0, %s281_s8 }
  0x10   : > { %v283_v0 = vld [vmem:[%s111_s11] sm:$0xff]   ;;  %v298_v1 = vld [vmem:[%s111_s11 + $0x8] sm:$0xff]   ;;  %v299_v2 = vld [vmem:[%s111_s11 + $0x10] sm:$0xff]   ;;  %s346_s15 = scalar_lea.vmem %s386_s1, %s301_s12 }
  0x11   : > { %v284_v3 = vunpack.c.l.bf16 %v283_v0  ;;  %v285_v4 = vunpack.c.h.bf16 %v283_v0  ;;  %v288_v5 = vunpack.c.l.bf16 %v298_v1  ;;  %v289_v6 = vunpack.c.h.bf16 %v298_v1  ;;  %v300_v9 = vld [vmem:[%s111_s11 + $0x18] sm:$0xff]   ;;  %v195_v37 = vld [vmem:[%s346_s15] sm:$0xf]  ;;  %v198_v43 = vld [vmem:[%s346_s15 + $0x4] sm:$0xf] }
  0x12   : > { %v292_v7 = vunpack.c.l.bf16 %v299_v2  ;;  %v293_v8 = vunpack.c.h.bf16 %v299_v2  ;;  %v296_v16 = vunpack.c.l.bf16 %v300_v9  ;;  %v297_v17 = vunpack.c.h.bf16 %v300_v9  ;;  %v201_v47 = vld [vmem:[%s346_s15 + $0x8] sm:$0xf]  ;;  %v204_v48 = vld [vmem:[%s346_s15 + $0xc] sm:$0xf]  ;;  %v207_v56 = vld [vmem:[%s346_s15 + $0x10] sm:$0xf] }
  0x13   : > { %v140_v10 = vrot.slane %v284_v3, 1  ;;  %v141_v11 = vrot.slane %v285_v4, 1  ;;  %v142_v12 = vrot.slane %v288_v5, 1  ;;  %v143_v13 = vrot.slane %v289_v6, 1  ;;  %v210_v57 = vld [vmem:[%s346_s15 + $0x14] sm:$0xf] }
  0x14   : > { %v144_v14 = vrot.slane %v292_v7, 1  ;;  %v145_v15 = vrot.slane %v293_v8, 1  ;;  %v146_v23 = vrot.slane %v296_v16, 1  ;;  %v169_v32 = vrot.slane %v297_v17, 1  ;;  %v213_v1 = vld [vmem:[%s346_s15 + $0x18] sm:$0xf] }
  0x15   : > { %v154_v18 = vadd.f32 %v284_v3, %v140_v10  ;;  %v155_v19 = vadd.f32 %v285_v4, %v141_v11  ;;  %v156_v20 = vadd.f32 %v288_v5, %v142_v12  ;;  %v157_v21 = vadd.f32 %v289_v6, %v143_v13 }
  0x16   : > { %v158_v22 = vadd.f32 %v292_v7, %v144_v14  ;;  %v159_v24 = vadd.f32 %v293_v8, %v145_v15  ;;  %v160_v31 = vadd.f32 %v296_v16, %v146_v23 }
  0x17   : > { %v161_v25 = vadd.f32 %v285_v4, %v154_v18  ;;  %v162_v26 = vadd.f32 %v288_v5, %v155_v19  ;;  %v163_v27 = vadd.f32 %v289_v6, %v156_v20  ;;  %v164_v28 = vadd.f32 %v292_v7, %v157_v21 }
  0x18   : > { %v165_v29 = vadd.f32 %v293_v8, %v158_v22  ;;  %v166_v30 = vadd.f32 %v296_v16, %v159_v24  ;;  %v167_v40 = vadd.f32 %v297_v17, %v160_v31 }
  0x19   : > { %v171_v33 = vadd.f32 %v161_v25, %v141_v11  ;;  %v172_v34 = vadd.f32 %v162_v26, %v142_v12  ;;  %v173_v35 = vadd.f32 %v163_v27, %v143_v13  ;;  %v174_v36 = vadd.f32 %v164_v28, %v144_v14 }
  0x1a   : > { %v175_v38 = vadd.f32 %v165_v29, %v145_v15  ;;  %v176_v39 = vadd.f32 %v166_v30, %v146_v23  ;;  %v177_v51 = vadd.f32 %v169_v32, %v167_v40 }
  0x1b   : > { %v178_v41 = vmul.f32 0.25, %v171_v33  ;;  %v179_v42 = vmul.f32 0.25, %v172_v34  ;;  %v180_v44 = vmul.f32 0.25, %v173_v35  ;;  %v181_v45 = vmul.f32 0.25, %v174_v36 }
  0x1c   : > { %v182_v49 = vmul.f32 0.25, %v175_v38  ;;  %v183_v50 = vmul.f32 0.25, %v176_v39  ;;  %v184_v60 = vmul.f32 0.25, %v177_v51 }
  0x1d   : > { %v185_v52 = vpack.c.bf16 %v178_v41, %v178_v41  ;;  %v186_v53 = vpack.c.bf16 %v179_v42, %v179_v42  ;;  %v187_v54 = vpack.c.bf16 %v180_v44, %v180_v44  ;;  %v188_v55 = vpack.c.bf16 %v181_v45, %v181_v45 }
  0x1e   : > { %v189_v58 = vpack.c.bf16 %v182_v49, %v182_v49  ;;  %v190_v59 = vpack.c.bf16 %v183_v50, %v183_v50  ;;  %v191_v4 = vpack.c.bf16 %v184_v60, %v184_v60 }
  0x1f   : > { %v196_v61 = vsel %vm352_vm2, %v185_v52, %v195_v37  ;;  %v199_v62 = vsel %vm352_vm2, %v186_v53, %v198_v43  ;;  %v202_v63 = vsel %vm352_vm2, %v187_v54, %v201_v47  ;;  %v205_v0 = vsel %vm352_vm2, %v188_v55, %v204_v48 }
  0x20   : > { %197 = vst [vmem:[%s346_s15] sm:$0xf] %v196_v61  ;;  %200 = vst [vmem:[%s346_s15 + $0x4] sm:$0xf] %v199_v62  ;;  %v208_v2 = vsel %vm352_vm2, %v189_v58, %v207_v56  ;;  %v211_v3 = vsel %vm352_vm2, %v190_v59, %v210_v57  ;;  %v214_v5 = vsel %vm352_vm2, %v191_v4, %v213_v1 }
  0x21   : > { %203 = vst [vmem:[%s346_s15 + $0x8] sm:$0xf] %v202_v63  ;;  %206 = vst [vmem:[%s346_s15 + $0xc] sm:$0xf] %v205_v0 }
  0x22   : > { %209 = vst [vmem:[%s346_s15 + $0x10] sm:$0xf] %v208_v2  ;;  %212 = vst [vmem:[%s346_s15 + $0x14] sm:$0xf] %v211_v3 }
  0x23   : > { %215 = vst [vmem:[%s346_s15 + $0x18] sm:$0xf] %v214_v5 }
  0x24 PF: > { %s11_s6 = sadd.s32 1, %s316_s6  }
  0x25   : > { %p8_p4 = scmp.ge.s32.totalorder %s11_s6, 4  }
  0x27   :  { %10 = sbr.rel (!%p8_p4) target bundleno = 1 (0x1), region = 54 }

// kernel: densenet_forward.34
= control target key start
LH: loop header
LB: loop body
LE: loop exit
PB: predicated region body
PF: predicated region fallthrough
CT: control target
= control target key end

     0   :  { %vm28_vm0 = vcmask 261120   ;;  %v239_v1 = vmov 0.0   ;;  %vm81_vm1 = vcmask 130048   ;;  %vm195_vm2 = vcmask 257024   ;;  %s316_s1 = inlined_call_operand.vmem [shape: bf16[16,32], index: 1, kind: input, shape index: {}]   ;;  %s317_s0 = inlined_call_operand.vmem [shape: bf16[32,16], index: 0, kind: input, shape index: {}]   ;;  %s318_s2 = inlined_call_operand.vmem [shape: f32[1,16], index: 2, kind: input, shape index: {}]   ;;  %s319_s3 = inlined_call_operand.vmem [shape: f32[1,16], index: 3, kind: input, shape index: {}]   ;;  %s320_s4 = inlined_call_operand.vmem [shape: f32[1,32], index: 4, kind: input, shape index: {}]   ;;  %s321_s5 = inlined_call_operand.vmem [shape: f32[1,32], index: 5, kind: input, shape index: {}]   ;;  %s322_s6 = inlined_call_operand.vmem [shape: bf16[32,32], index: 6, kind: output, shape index: {}]  }
   0x1   :  { %v238_v0 = vld [vmem:[%s316_s1] sm:$0xff]   ;;  %31 = vst.msk [vmem:[#allocation2 + $0x10] sm:$0xff] %vm28_vm0, %v239_v1  ;;  %29 = vst.msk [vmem:[#allocation2] sm:$0xff] %vm28_vm0, %v239_v1  ;;  %v227_v3 = vld [vmem:[%s317_s0 + $0x8] sm:$0xff]  }
   0x2   :  { %30 = vst.msk [vmem:[#allocation2 + $0x8] sm:$0xff] %vm28_vm0, %v239_v1  ;;  %32 = vst.msk [vmem:[#allocation2 + $0x18] sm:$0xff] %vm28_vm0, %v239_v1  ;;  %v220_v2 = vld [vmem:[%s317_s0] sm:$0xff]   ;;  %231 = vmatprep.subr.bf16.mxu0 %v238_v0  ;;  %v225_v7 = vunpack.c.l.bf16 %v227_v3  ;;  %v226_v8 = vunpack.c.h.bf16 %v227_v3 }
   0x3   :  { %v204_v4 = vld [vmem:[%s318_s2] ss:$0 sm:$0xff]  ;;  %v221_v5 = vunpack.c.l.bf16 %v220_v2  ;;  %v222_v6 = vunpack.c.h.bf16 %v220_v2  ;;  %232 = vmatpush3.bf16.msra.mxu0 %v238_v0 }
   0x4   :  { %v205_v9 = vld [vmem:[%s319_s3] ss:$0 sm:$0xff]  ;;  %v50_v12 = vmul.f32 %v225_v7, %v204_v4  ;;  %v51_v13 = vmul.f32 %v226_v8, %v204_v4 }
   0x5   :  { %v48_v10 = vmul.f32 %v221_v5, %v204_v4  ;;  %v49_v11 = vmul.f32 %v222_v6, %v204_v4  ;;  %v209_v36 = vld [vmem:[%s320_s4] ss:$0 sm:$0xff] }
   0x6   :  { %v61_v16 = vadd.f32 %v205_v9, %v50_v12  ;;  %v62_v17 = vadd.f32 %v205_v9, %v51_v13  ;;  %v210_v38 = vld [vmem:[%s321_s5] ss:$0 sm:$0xff] }
   0x7   :  { %v59_v14 = vadd.f32 %v205_v9, %v48_v10  ;;  %v60_v15 = vadd.f32 %v205_v9, %v49_v11 }
   0x8   :  { %v65_v20 = vmax.f32 %v61_v16, 0.0  ;;  %v66_v21 = vmax.f32 %v62_v17, 0.0  ;;  %v69_v24 = vld [vmem:[#allocation2 + $0x10] sm:$0xff]  ;;  %v67_v25 = vld [vmem:[#allocation2] sm:$0xff] }
   0x9   :  { %v63_v18 = vmax.f32 %v59_v14, 0.0  ;;  %v64_v19 = vmax.f32 %v60_v15, 0.0  ;;  %v70_v27 = vld [vmem:[#allocation2 + $0x18] sm:$0xff]  ;;  %v68_v30 = vld [vmem:[#allocation2 + $0x8] sm:$0xff] }
   0xa   :  { %v72_v23 = vpack.c.bf16 %v66_v21, %v65_v20 }
   0xb   :  { %v71_v22 = vpack.c.bf16 %v64_v19, %v63_v18 }
   0xd   :  { %233 = vmatprep.mubr.msk.bf16.mxu0 %vm81_vm1, %v71_v22 }
   0xe   :  { %234 = vmatmul.mubr.msk.bf16.vlgmr.msra.gmra.mrb[0].mxu0 %vm81_vm1, %v72_v23 }
  0xe1   :  { %v235_v26 = vpop.f32.mrb[0].mxu0 }
  0xe2   :  { %v139_v28 = vadd.f32 %v235_v26, %v69_v24  ;;  %v122_v29 = vpop.f32.mrb[1].mxu0 }
  0xe3   :  { %v137_v31 = vadd.f32 %v122_v29, %v67_v25  ;;  %v236_v32 = vpop.f32.mrb[2].mxu0 }
  0xe4   :  { %144 = vst.msk [vmem:[#allocation2 + $0x10] sm:$0xff] %vm28_vm0, %v139_v28  ;;  %v140_v33 = vadd.f32 %v236_v32, %v70_v27  ;;  %v125_v34 = vpop.f32.mrb[3].mxu0 }
  0xe5   :  { %142 = vst.msk [vmem:[#allocation2] sm:$0xff] %vm28_vm0, %v137_v31  ;;  %v138_v35 = vadd.f32 %v125_v34, %v68_v30 }
  0xe6   :  { %145 = vst.msk [vmem:[#allocation2 + $0x18] sm:$0xff] %vm28_vm0, %v140_v33 }
  0xe7   :  { %143 = vst.msk [vmem:[#allocation2 + $0x8] sm:$0xff] %vm28_vm0, %v138_v35 }
  0xeb   :  { %v151_v37 = vld [vmem:[#allocation2 + $0x10] sm:$0xff] }
  0xec   :  { %v162_v39 = vmul.f32 %v209_v36, %v151_v37  ;;  %v149_v40 = vld [vmem:[#allocation2] sm:$0xff] }
  0xed   :  { %v160_v41 = vmul.f32 %v209_v36, %v149_v40  ;;  %v152_v42 = vld [vmem:[#allocation2 + $0x18] sm:$0xff] }
  0xee   :  { %v173_v43 = vadd.f32 %v210_v38, %v162_v39  ;;  %v163_v44 = vmul.f32 %v209_v36, %v152_v42  ;;  %v150_v45 = vld [vmem:[#allocation2 + $0x8] sm:$0xff] }
  0xef   :  { %v171_v46 = vadd.f32 %v210_v38, %v160_v41  ;;  %v161_v47 = vmul.f32 %v209_v36, %v150_v45 }
  0xf0   :  { %v177_v48 = vmax.f32 %v173_v43, 0.0  ;;  %v174_v49 = vadd.f32 %v210_v38, %v163_v44 }
  0xf1   :  { %v175_v50 = vmax.f32 %v171_v46, 0.0  ;;  %v172_v51 = vadd.f32 %v210_v38, %v161_v47 }
  0xf2   :  { %v217_v52 = vpack.c.bf16 %v177_v48, %v177_v48  ;;  %v178_v53 = vmax.f32 %v174_v49, 0.0 }
  0xf3   :  { %v215_v54 = vpack.c.bf16 %v175_v50, %v175_v50  ;;  %v176_v55 = vmax.f32 %v172_v51, 0.0 }
  0xf4   :  { %198 = vst.msk [vmem:[%s322_s6 + $0x8] sm:$0xf] %vm195_vm2, %v217_v52  ;;  %v218_v56 = vpack.c.bf16 %v178_v53, %v178_v53 }
  0xf5   :  { %196 = vst.msk [vmem:[%s322_s6] sm:$0xf] %vm195_vm2, %v215_v54  ;;  %v216_v57 = vpack.c.bf16 %v176_v55, %v176_v55 }
  0xf6   :  { %199 = vst.msk [vmem:[%s322_s6 + $0xc] sm:$0xf] %vm195_vm2, %v218_v56 }
  0xf7   :  { %197 = vst.msk [vmem:[%s322_s6 + $0x4] sm:$0xf] %vm195_vm2, %v216_v57 }

// kernel: densenet_forward.35
= control target key start
LH: loop header
LB: loop body
LE: loop exit
PB: predicated region body
PF: predicated region fallthrough
CT: control target
= control target key end

     0   :  { %s1237_s9 = smov 0   ;;  %s1366_s0 = inlined_call_operand.vmem [shape: bf16[2,42,32], index: 0, kind: input, shape index: {}]   ;;  %s1367_s1 = inlined_call_operand.vmem [shape: bf16[9,32,8], index: 1, kind: input, shape index: {}]   ;;  %s1368_s2 = inlined_call_operand.vmem [shape: bf16[2,24,8], index: 2, kind: output, shape index: {}]  }
   0x1 LB: > { %s952_s10 = sadd.s32 4294967295, %s1220_s9   ;;  %p956_p0 = scmp.ge.s32.totalorder %s1220_s9, 1  ;;  %s1220_s9 = sphi %s1237_s9, %s12_s9  }
   0x2   : > { %p112_p1 = scmp.lt.s32.totalorder %s1220_s9, 3 }
   0x4   : > { %p113_p2 = pnand %p956_p0, %p112_p1 }
   0x5   : > { %v1190_v0 = vld [vmem:[%s1367_s1 + $0x40] sm:$0xff] (!%p113_p2)   ;;  %p134_p3 = scmp.lt.s32.totalorder (!%p113_p2), %s952_s10, 1  ;;  %v1191_v1 = vld [vmem:[%s1367_s1 + $0x10] sm:$0xff] (!%p113_p2)   ;;  %v1192_v2 = vld [vmem:[%s1367_s1 + $0x48] sm:$0xff] (!%p113_p2)   ;;  %vm167_vm0 = vsmask.f32 (!%p113_p2), 7424 }
   0x6   : > { %116 = sbr.rel (%p113_p2) target bundleno = 297 (0x129), region = 28  ;;  %1109 = vmatprep.subr.bf16.mxu0 (!%p113_p2), %v1190_v0  ;;  %1077 = vmatprep.subr.bf16.mxu1 (!%p113_p2), %v1191_v1  ;;  %v1193_v3 = vld [vmem:[%s1367_s1 + $0x18] sm:$0xff] (!%p113_p2)   ;;  %v1196_v4 = vld [vmem:[%s1367_s1 + $0x50] sm:$0xff] (!%p113_p2)   ;;  %v1197_v5 = vld [vmem:[%s1367_s1] sm:$0xff] (!%p113_p2)   ;;  %vm478_vm1 = vsmask.f32 (!%p113_p2), 4352 }
   0x7   : > { %1110 = vmatpush3.bf16.msra.mxu0 (!%p113_p2), %v1190_v0  ;;  %1078 = vmatpush3.bf16.msra.mxu1 (!%p113_p2), %v1191_v1  ;;  %vm195_vm2 = vcmask (!%p113_p2), 261120   ;;  %v1199_v27 = vld [vmem:[%s1367_s1 + $0x8] sm:$0xff] (!%p113_p2)   ;;  %v1198_v29 = vld [vmem:[%s1367_s1 + $0x58] sm:$0xff] (!%p113_p2)   ;;  %v1204_v32 = vld [vmem:[%s1367_s1 + $0x20] sm:$0xff] (!%p113_p2)   ;;  %vm322_vm3 = vcmask (!%p113_p2), 1046528   ;;  %vm639_vm4 = vcmask (!%p113_p2), 1045504  }
   0x8   : > { %1111 = vmatprep.subr.bf16.mxu0 (!%p113_p2), %v1192_v2  ;;  %1079 = vmatprep.subr.bf16.mxu1 (!%p113_p2), %v1193_v3  ;;  %v1201_v33 = vld [vmem:[%s1367_s1 + $0x60] sm:$0xff] (!%p113_p2)   ;;  %v1206_v41 = vld [vmem:[%s1367_s1 + $0x28] sm:$0xff] (!%p113_p2)   ;;  %v1209_v49 = vld [vmem:[%s1367_s1 + $0x30] sm:$0xff] (!%p113_p2)   ;;  %vm400_vm5 = vcmask (!%p113_p2), 1044480   ;;  %vm717_vm6 = vsmask.f32 (!%p113_p2), 5376 }
   0x9   : > { %v1205_v42 = vld [vmem:[%s1367_s1 + $0x68] sm:$0xff] (!%p113_p2)   ;;  %v1208_v50 = vld [vmem:[%s1367_s1 + $0x70] sm:$0xff] (!%p113_p2)   ;;  %v1211_v59 = vld [vmem:[%s1367_s1 + $0x38] sm:$0xff] (!%p113_p2)   ;;  %vm893_vm7 = vcmask (!%p113_p2), 60416  }
   0xa   : > { %v1210_v60 = vld [vmem:[%s1367_s1 + $0x78] sm:$0xff] (!%p113_p2)   ;;  %v1212_v63 = vld [vmem:[%s1367_s1 + $0x80] sm:$0xff] (!%p113_p2)  }
   0xb   : > { %1112 = vmatpush3.bf16.msra.mxu0 (!%p113_p2), %v1192_v2  ;;  %1080 = vmatpush3.bf16.msra.mxu1 (!%p113_p2), %v1193_v3  ;;  %v1213_v2 = vld [vmem:[%s1367_s1 + $0x88] sm:$0xff] (!%p113_p2)  }
   0xc   : > { %1117 = vmatprep.subr.bf16.mxu0 (!%p113_p2), %v1196_v4  ;;  %1085 = vmatprep.subr.bf16.mxu1 (!%p113_p2), %v1197_v5 }
   0xd   : > { %s1370_s10 = smov (!%p134_p3, %s952_s10), 1 }
   0xe   : > { %s1180_s19 = smul.u32 24, %s1370_s10 }
   0xf   : > { %s1181_s25 = smul.u32 12, %s1370_s10 }
  0x10   : > { %s1266_s24 = scalar_lea.vmem %s1366_s0, %s1180_s19 }
  0x11   : > { %v145_v6 = vld [vmem:[%s1266_s24] sm:$0xf]  ;;  %v146_v7 = vld [vmem:[%s1266_s24 + $0x4] sm:$0xf]  ;;  %v147_v8 = vld [vmem:[%s1266_s24 + $0x8] sm:$0xf]  ;;  %s143_s28 = scalar_lea.vmem %s1368_s2, %s1181_s25 }
  0x12   : > { %v148_v9 = vld [vmem:[%s1266_s24 + $0xc] sm:$0xf]  ;;  %v1275_v10 = vcombine.low %v145_v6, %v146_v7  ;;  %v1293_v30 = vcombine.low %v146_v7, %v147_v8  ;;  %v149_v31 = vld [vmem:[%s1266_s24 + $0x10] sm:$0xf]  ;;  %v960_v35 = vcombine.low %v147_v8, %v147_v8 }
  0x13   : > { %v1277_v11 = vcombine.low %v147_v8, %v148_v9  ;;  %v1307_v34 = vcombine.low %v148_v9, %v149_v31  ;;  %v999_v40 = vcombine.low %v148_v9, %v148_v9 }
  0x14   : > { %v169_v12 = vshrl.u32 %v1275_v10, 16  ;;  %v171_v13 = vshll.u32 %v1275_v10, 16  ;;  %v323_v36 = vrot.slane %v1275_v10, 1  ;;  %v640_v38 = vrot.slane %v1293_v30, 2 }
  0x15   : > { %v176_v14 = vshll.u32 %v1277_v11, 16  ;;  %v180_v15 = vshrl.u32 %v1277_v11, 16  ;;  %v324_v37 = vrot.slane %v1277_v11, 1  ;;  %v641_v39 = vrot.slane %v1307_v34, 2 }
  0x16   : > { %v173_v16 = vrot.slane %v171_v13, 1  ;;  %v479_v17 = vrot.slane %v169_v12, 3  ;;  %v480_v18 = vrot.slane %v171_v13, 4  ;;  %v718_v45 = vshrl.u32 %v1293_v30, 16 }
  0x17   : > { %v178_v19 = vrot.slane %v176_v14, 1  ;;  %v482_v20 = vrot.slane %v180_v15, 3  ;;  %v483_v21 = vrot.slane %v176_v14, 4  ;;  %v325_v43 = vsel %vm322_vm3, %v323_v36, %v324_v37 }
  0x18   : > { %v174_v22 = vor.u32 %v173_v16, %v169_v12  ;;  %v481_v23 = vor.u32 %v480_v18, %v479_v17  ;;  %v642_v44 = vsel %vm639_vm4, %v640_v38, %v641_v39  ;;  %v721_v46 = vshll.u32 %v1293_v30, 16 }
  0x19   : > { %v182_v24 = vor.u32 %v180_v15, %v178_v19  ;;  %v484_v25 = vor.u32 %v483_v21, %v482_v20  ;;  %v726_v47 = vshrl.u32 %v1307_v34, 16  ;;  %v729_v48 = vshll.u32 %v1307_v34, 16 }
  0x1a   : > { %v179_v26 = vsel %vm167_vm0, %v174_v22, %v178_v19  ;;  %v720_v51 = vrot.slane %v718_v45, 2  ;;  %v723_v52 = vrot.slane %v721_v46, 3  ;;  %v401_v55 = vrot.slane %v1275_v10, 3 }
  0x1b   : > { %1081 = vmatprep.mubr.msk.bf16.mxu1 %vm195_vm2, %v179_v26  ;;  %v485_v28 = vsel %vm478_vm1, %v481_v23, %v484_v25  ;;  %v728_v53 = vrot.slane %v726_v47, 2  ;;  %v731_v54 = vrot.slane %v729_v48, 3  ;;  %v402_v56 = vrot.slane %v1277_v11, 3 }
  0x1c   : > { %1113 = vmatprep.mubr.msk.bf16.mxu0 %vm195_vm2, %v485_v28  ;;  %1082 = vmatmul.mubr.msk.bf16.vlgmr.msra.gmra.mrb[0].mxu1 %vm195_vm2, %v182_v24  ;;  %v724_v57 = vor.u32 %v723_v52, %v720_v51  ;;  %v808_v0 = vrot.slane %v1293_v30, 3  ;;  %v809_v1 = vrot.slane %v1307_v34, 3 }
  0x1d   : > { %1114 = vmatmul.mubr.msk.bf16.vlgmr.msra.gmra.mrb[0].mxu0 %vm195_vm2, %v484_v25  ;;  %1086 = vmatpush3.bf16.msra.mxu1 %v1197_v5  ;;  %v732_v58 = vor.u32 %v731_v54, %v728_v53  ;;  %v403_v61 = vsel %vm400_vm5, %v401_v55, %v402_v56 }
  0x1e   : > { %1118 = vmatpush3.bf16.msra.mxu0 %v1196_v4  ;;  %1087 = vmatprep.subr.bf16.mxu1 %v1199_v27  ;;  %v810_v3 = vsel %vm400_vm5, %v808_v0, %v809_v1 }
  0x1f   : > { %1119 = vmatprep.subr.bf16.mxu0 %v1198_v29  ;;  %1089 = vmatprep.mubr.msk.bf16.mxu1 %vm195_vm2, %v1275_v10  ;;  %v733_v62 = vsel %vm717_vm6, %v724_v57, %v732_v58 }
  0x20   : > { %1121 = vmatprep.mubr.msk.bf16.mxu0 %vm195_vm2, %v1293_v30 }
  0x21   : > { %1088 = vmatpush3.bf16.msra.mxu1 %v1199_v27 }
  0x22   : > { %1120 = vmatpush3.bf16.msra.mxu0 %v1198_v29  ;;  %1093 = vmatprep.subr.bf16.mxu1 %v1204_v32 }
  0x23   : > { %1125 = vmatprep.subr.bf16.mxu0 %v1201_v33 }
  0x28   : > { %1090 = vmatmul.mubr.msk.bf16.vlgmr.msra.gmra.mrb[0].mxu1 %vm195_vm2, %v960_v35 }
  0x29   : > { %1122 = vmatmul.mubr.msk.bf16.vlgmr.msra.gmra.mrb[0].mxu0 %vm195_vm2, %v999_v40  ;;  %1094 = vmatpush3.bf16.msra.mxu1 %v1204_v32 }
  0x2a   : > { %1126 = vmatpush3.bf16.msra.mxu0 %v1201_v33  ;;  %1095 = vmatprep.subr.bf16.mxu1 %v1206_v41 }
  0x2b   : > { %1127 = vmatprep.subr.bf16.mxu0 %v1205_v42  ;;  %1097 = vmatprep.mubr.msk.bf16.mxu1 %vm195_vm2, %v325_v43 }
  0x2c   : > { %1129 = vmatprep.mubr.msk.bf16.mxu0 %vm195_vm2, %v642_v44 }
  0x2d   : > { %1096 = vmatpush3.bf16.msra.mxu1 %v1206_v41 }
  0x2e   : > { %1128 = vmatpush3.bf16.msra.mxu0 %v1205_v42  ;;  %1101 = vmatprep.subr.bf16.mxu1 %v1209_v49 }
  0x2f   : > { %1133 = vmatprep.subr.bf16.mxu0 %v1208_v50 }
  0x34   : > { %1098 = vmatmul.mubr.msk.bf16.vlgmr.msra.gmra.mrb[0].mxu1 %vm195_vm2, %v324_v37 }
  0x35   : > { %1130 = vmatmul.mubr.msk.bf16.vlgmr.msra.gmra.mrb[0].mxu0 %vm195_vm2, %v641_v39  ;;  %1102 = vmatpush3.bf16.msra.mxu1 %v1209_v49 }
  0x36   : > { %1134 = vmatpush3.bf16.msra.mxu0 %v1208_v50  ;;  %1103 = vmatprep.subr.bf16.mxu1 %v1211_v59 }
  0x37   : > { %1135 = vmatprep.subr.bf16.mxu0 %v1210_v60  ;;  %1105 = vmatprep.mubr.msk.bf16.mxu1 %vm195_vm2, %v403_v61 }
  0x38   : > { %1137 = vmatprep.mubr.msk.bf16.mxu0 %vm195_vm2, %v733_v62 }
  0x39   : > { %1104 = vmatpush3.bf16.msra.mxu1 %v1211_v59 }
  0x3a   : > { %1136 = vmatpush3.bf16.msra.mxu0 %v1210_v60 }
  0x3b   : > { %1141 = vmatprep.subr.bf16.mxu0 %v1212_v63 }
  0x40   : > { %1106 = vmatmul.mubr.msk.bf16.vlgmr.msra.gmra.mrb[0].mxu1 %vm195_vm2, %v402_v56 }
  0x41   : > { %1138 = vmatmul.mubr.msk.bf16.vlgmr.msra.gmra.mrb[0].mxu0 %vm195_vm2, %v732_v58 }
  0x42   : > { %1142 = vmatpush3.bf16.msra.mxu0 %v1212_v63  ;;  %1145 = vmatprep.mubr.msk.bf16.mxu0 %vm195_vm2, %v810_v3 }
  0x43   : > { %1143 = vmatprep.subr.bf16.mxu0 %v1213_v2 }
  0x46   : > { %1144 = vmatpush3.bf16.msra.mxu0 %v1213_v2 }
  0x4d   : > { %1146 = vmatmul.mubr.msk.bf16.vlgmr.msra.gmra.mrb[0].mxu0 %vm195_vm2, %v809_v1 }
 0x113   : > { %v1107_v4 = vpop.f32.mrb[0].mxu1 }
 0x114   : > { %v456_v5 = vpop.f32.mrb[1].mxu1 }
 0x115   : > { %v1108_v6 = vpop.f32.mrb[2].mxu1 }
 0x116   : > { %v459_v7 = vpop.f32.mrb[3].mxu1 }
 0x120   : > { %v1147_v8 = vpop.f32.mrb[0].mxu0 }
 0x121   : > { %v1149_v9 = vadd.f32 %v1147_v8, %v1107_v4  ;;  %v863_v10 = vpop.f32.mrb[1].mxu0 }
 0x122   : > { %v1150_v11 = vadd.f32 %v863_v10, %v456_v5  ;;  %v1148_v12 = vpop.f32.mrb[2].mxu0 }
 0x123   : > { %v1040_v13 = vpack.c.bf16 %v1149_v9, %v1149_v9  ;;  %v866_v14 = vpop.f32.mrb[3].mxu0 }
 0x124   : > { %v1038_v15 = vpack.c.bf16 %v1150_v11, %v1150_v11  ;;  %v1151_v16 = vadd.f32 %v866_v14, %v459_v7 }
 0x125   : > { %896 = vst.msk [vmem:[%s143_s28 + $0x8] sm:$0xf] %vm893_vm7, %v1040_v13 }
 0x126   : > { %894 = vst.msk [vmem:[%s143_s28] sm:$0xf] %vm893_vm7, %v1038_v15  ;;  %v1039_v17 = vpack.c.bf16 %v1151_v16, %v1151_v16 }
 0x128   : > { %895 = vst.msk [vmem:[%s143_s28 + $0x4] sm:$0xf] %vm893_vm7, %v1039_v17 }
 0x129 PF: > { %s12_s9 = sadd.s32 1, %s1220_s9  }
 0x12a   : > { %p9_p4 = scmp.ge.s32.totalorder %s12_s9, 4  }
 0x12c   :  { %11 = sbr.rel (!%p9_p4) target bundleno = 1 (0x1), region = 66 }

// kernel: densenet_forward.36
= control target key start
LH: loop header
LB: loop body
LE: loop exit
PB: predicated region body
PF: predicated region fallthrough
CT: control target
= control target key end

     0   :  { %vm28_vm0 = vcmask 261120   ;;  %v253_v0 = vmov 0.0   ;;  %vm92_vm1 = vcmask 1043456   ;;  %vm85_vm2 = vcmask 195584   ;;  %s333_s1 = inlined_call_operand.vmem [shape: bf16[24,32], index: 1, kind: input, shape index: {}]   ;;  %s334_s0 = inlined_call_operand.vmem [shape: bf16[32,24], index: 0, kind: input, shape index: {}]   ;;  %s335_s2 = inlined_call_operand.vmem [shape: f32[1,24], index: 2, kind: input, shape index: {}]   ;;  %s336_s3 = inlined_call_operand.vmem [shape: f32[1,24], index: 3, kind: input, shape index: {}]   ;;  %s337_s4 = inlined_call_operand.vmem [shape: f32[1,32], index: 4, kind: input, shape index: {}]   ;;  %s338_s5 = inlined_call_operand.vmem [shape: f32[1,32], index: 5, kind: input, shape index: {}]   ;;  %s339_s6 = inlined_call_operand.vmem [shape: bf16[32,32], index: 6, kind: output, shape index: {}]  }
   0x1   :  { %31 = vst.msk [vmem:[#allocation2 + $0x10] sm:$0xff] %vm28_vm0, %v253_v0  ;;  %29 = vst.msk [vmem:[#allocation2] sm:$0xff] %vm28_vm0, %v253_v0  ;;  %v251_v1 = vld [vmem:[%s333_s1] sm:$0xff]   ;;  %v252_v2 = vld [vmem:[%s333_s1 + $0x8] ss:$0 sps:$4 sm:$0xff]   ;;  %vm203_vm3 = vcmask 257024  }
   0x2   :  { %30 = vst.msk [vmem:[#allocation2 + $0x8] sm:$0xff] %vm28_vm0, %v253_v0  ;;  %32 = vst.msk [vmem:[#allocation2 + $0x18] sm:$0xff] %vm28_vm0, %v253_v0  ;;  %v229_v3 = vld [vmem:[%s334_s0] sm:$0xff]   ;;  %v236_v6 = vld [vmem:[%s334_s0 + $0x8] sm:$0xff]   ;;  %241 = vmatprep.subr.bf16.mxu0 %v251_v1  ;;  %v94_v13 = vsel %vm92_vm1, %v252_v2, 0 }
   0x3   :  { %v230_v4 = vunpack.c.l.bf16 %v229_v3  ;;  %v231_v5 = vunpack.c.h.bf16 %v229_v3  ;;  %v212_v7 = vld [vmem:[%s335_s2] ss:$0 sm:$0xff]  ;;  %v234_v8 = vunpack.c.l.bf16 %v236_v6  ;;  %v235_v9 = vunpack.c.h.bf16 %v236_v6  ;;  %242 = vmatpush3.bf16.msra.mxu0 %v251_v1 }
   0x4   :  { %v213_v10 = vld [vmem:[%s336_s3] ss:$0 sm:$0xff]  ;;  %249 = vmatprep.subr.msk.bf16.mxu0 %vm92_vm1, %v252_v2 }
   0x5   :  { %v48_v11 = vmul.f32 %v230_v4, %v212_v7  ;;  %v49_v12 = vmul.f32 %v231_v5, %v212_v7  ;;  %v50_v14 = vmul.f32 %v234_v8, %v212_v7  ;;  %v51_v15 = vmul.f32 %v235_v9, %v212_v7  ;;  %v218_v38 = vld [vmem:[%s337_s4] ss:$0 sm:$0xff] }
   0x6   :  { %v219_v40 = vld [vmem:[%s338_s5] ss:$0 sm:$0xff] }
   0x7   :  { %v59_v16 = vadd.f32 %v213_v10, %v48_v11  ;;  %v60_v17 = vadd.f32 %v213_v10, %v49_v12  ;;  %v61_v18 = vadd.f32 %v213_v10, %v50_v14  ;;  %v62_v19 = vadd.f32 %v213_v10, %v51_v15  ;;  %244 = vmatpush3.bf16.msra.mxu0 %v94_v13 }
   0x8   :  { %v69_v26 = vld [vmem:[#allocation2 + $0x10] sm:$0xff]  ;;  %v67_v27 = vld [vmem:[#allocation2] sm:$0xff] }
   0x9   :  { %v63_v20 = vmax.f32 %v59_v16, 0.0  ;;  %v64_v21 = vmax.f32 %v60_v17, 0.0  ;;  %v65_v22 = vmax.f32 %v61_v18, 0.0  ;;  %v66_v23 = vmax.f32 %v62_v19, 0.0  ;;  %v70_v29 = vld [vmem:[#allocation2 + $0x18] sm:$0xff]  ;;  %v68_v32 = vld [vmem:[#allocation2 + $0x8] sm:$0xff] }
   0xb   :  { %v71_v24 = vpack.c.bf16 %v64_v21, %v63_v20  ;;  %v72_v25 = vpack.c.bf16 %v66_v23, %v65_v22 }
   0xd   :  { %245 = vmatprep.mubr.msk.bf16.mxu0 %vm85_vm2, %v71_v24 }
   0xe   :  { %246 = vmatmul.mubr.msk.bf16.vlgmr.msra.gmra.mrb[0].mxu0 %vm85_vm2, %v72_v25 }
  0xe1   :  { %v247_v28 = vpop.f32.mrb[0].mxu0 }
  0xe2   :  { %v147_v30 = vadd.f32 %v247_v28, %v69_v26  ;;  %v130_v31 = vpop.f32.mrb[1].mxu0 }
  0xe3   :  { %v145_v33 = vadd.f32 %v130_v31, %v67_v27  ;;  %v248_v34 = vpop.f32.mrb[2].mxu0 }
  0xe4   :  { %152 = vst.msk [vmem:[#allocation2 + $0x10] sm:$0xff] %vm28_vm0, %v147_v30  ;;  %v148_v35 = vadd.f32 %v248_v34, %v70_v29  ;;  %v133_v36 = vpop.f32.mrb[3].mxu0 }
  0xe5   :  { %150 = vst.msk [vmem:[#allocation2] sm:$0xff] %vm28_vm0, %v145_v33  ;;  %v146_v37 = vadd.f32 %v133_v36, %v68_v32 }
  0xe6   :  { %153 = vst.msk [vmem:[#allocation2 + $0x18] sm:$0xff] %vm28_vm0, %v148_v35 }
  0xe7   :  { %151 = vst.msk [vmem:[#allocation2 + $0x8] sm:$0xff] %vm28_vm0, %v146_v37 }
  0xeb   :  { %v159_v39 = vld [vmem:[#allocation2 + $0x10] sm:$0xff] }
  0xec   :  { %v170_v41 = vmul.f32 %v218_v38, %v159_v39  ;;  %v157_v42 = vld [vmem:[#allocation2] sm:$0xff] }
  0xed   :  { %v168_v43 = vmul.f32 %v218_v38, %v157_v42  ;;  %v160_v44 = vld [vmem:[#allocation2 + $0x18] sm:$0xff] }
  0xee   :  { %v181_v45 = vadd.f32 %v219_v40, %v170_v41  ;;  %v171_v46 = vmul.f32 %v218_v38, %v160_v44  ;;  %v158_v47 = vld [vmem:[#allocation2 + $0x8] sm:$0xff] }
  0xef   :  { %v179_v48 = vadd.f32 %v219_v40, %v168_v43  ;;  %v169_v49 = vmul.f32 %v218_v38, %v158_v47 }
  0xf0   :  { %v185_v50 = vmax.f32 %v181_v45, 0.0  ;;  %v182_v51 = vadd.f32 %v219_v40, %v171_v46 }
  0xf1   :  { %v183_v52 = vmax.f32 %v179_v48, 0.0  ;;  %v180_v53 = vadd.f32 %v219_v40, %v169_v49 }
  0xf2   :  { %v226_v54 = vpack.c.bf16 %v185_v50, %v185_v50  ;;  %v186_v55 = vmax.f32 %v182_v51, 0.0 }
  0xf3   :  { %v224_v56 = vpack.c.bf16 %v183_v52, %v183_v52  ;;  %v184_v57 = vmax.f32 %v180_v53, 0.0 }
  0xf4   :  { %206 = vst.msk [vmem:[%s339_s6 + $0x8] sm:$0xf] %vm203_vm3, %v226_v54  ;;  %v227_v58 = vpack.c.bf16 %v186_v55, %v186_v55 }
  0xf5   :  { %204 = vst.msk [vmem:[%s339_s6] sm:$0xf] %vm203_vm3, %v224_v56  ;;  %v225_v59 = vpack.c.bf16 %v184_v57, %v184_v57 }
  0xf6   :  { %207 = vst.msk [vmem:[%s339_s6 + $0xc] sm:$0xf] %vm203_vm3, %v227_v58 }
  0xf7   :  { %205 = vst.msk [vmem:[%s339_s6 + $0x4] sm:$0xf] %vm203_vm3, %v225_v59 }

// kernel: densenet_forward.38
= control target key start
LH: loop header
LB: loop body
LE: loop exit
PB: predicated region body
PF: predicated region fallthrough
CT: control target
= control target key end

     0   :  { %vm22_vm0 = vcmask 130048   ;;  %v218_v1 = vmov 0.0   ;;  %vm83_vm1 = vcmask 261120   ;;  %vm171_vm2 = vcmask 125952   ;;  %s282_s1 = inlined_call_operand.vmem [shape: bf16[32,16], index: 1, kind: input, shape index: {}]   ;;  %s283_s0 = inlined_call_operand.vmem [shape: bf16[32,32], index: 0, kind: input, shape index: {}]   ;;  %s284_s2 = inlined_call_operand.vmem [shape: f32[1,32], index: 2, kind: input, shape index: {}]   ;;  %s285_s3 = inlined_call_operand.vmem [shape: f32[1,32], index: 3, kind: input, shape index: {}]   ;;  %s286_s4 = inlined_call_operand.vmem [shape: bf16[32,16], index: 4, kind: output, shape index: {}]  }
   0x1   :  { %v216_v0 = vld [vmem:[%s282_s1] sm:$0xff]   ;;  %25 = vst.msk [vmem:[#allocation2 + $0x10] sm:$0xff] %vm22_vm0, %v218_v1  ;;  %23 = vst.msk [vmem:[#allocation2] sm:$0xff] %vm22_vm0, %v218_v1  ;;  %v217_v2 = vld [vmem:[%s282_s1 + $0x8] sm:$0xff]  }
   0x2   :  { %24 = vst.msk [vmem:[#allocation2 + $0x8] sm:$0xff] %vm22_vm0, %v218_v1  ;;  %26 = vst.msk [vmem:[#allocation2 + $0x18] sm:$0xff] %vm22_vm0, %v218_v1  ;;  %207 = vmatprep.subr.bf16.mxu0 %v216_v0  ;;  %v195_v3 = vld [vmem:[%s283_s0] sm:$0xff]   ;;  %v202_v4 = vld [vmem:[%s283_s0 + $0x8] sm:$0xff]  }
   0x3   :  { %v180_v5 = vld [vmem:[%s284_s2] ss:$0 sm:$0xff]  ;;  %208 = vmatpush3.bf16.msra.mxu0 %v216_v0  ;;  %v196_v6 = vunpack.c.l.bf16 %v195_v3  ;;  %v197_v7 = vunpack.c.h.bf16 %v195_v3  ;;  %v200_v8 = vunpack.c.l.bf16 %v202_v4  ;;  %v201_v9 = vunpack.c.h.bf16 %v202_v4 }
   0x4   :  { %209 = vmatprep.subr.bf16.mxu0 %v217_v2  ;;  %v181_v10 = vld [vmem:[%s285_s3] ss:$0 sm:$0xff] }
   0x5   :  { %v42_v11 = vmul.f32 %v196_v6, %v180_v5  ;;  %v43_v12 = vmul.f32 %v197_v7, %v180_v5  ;;  %v44_v13 = vmul.f32 %v200_v8, %v180_v5  ;;  %v45_v14 = vmul.f32 %v201_v9, %v180_v5 }
   0x7   :  { %210 = vmatpush3.bf16.msra.mxu0 %v217_v2  ;;  %v53_v15 = vadd.f32 %v181_v10, %v42_v11  ;;  %v54_v16 = vadd.f32 %v181_v10, %v43_v12  ;;  %v55_v17 = vadd.f32 %v181_v10, %v44_v13  ;;  %v56_v18 = vadd.f32 %v181_v10, %v45_v14 }
   0x8   :  { %v63_v25 = vld [vmem:[#allocation2 + $0x10] sm:$0xff]  ;;  %v61_v26 = vld [vmem:[#allocation2] sm:$0xff] }
   0x9   :  { %v57_v19 = vmax.f32 %v53_v15, 0.0  ;;  %v58_v20 = vmax.f32 %v54_v16, 0.0  ;;  %v59_v21 = vmax.f32 %v55_v17, 0.0  ;;  %v60_v22 = vmax.f32 %v56_v18, 0.0  ;;  %v64_v28 = vld [vmem:[#allocation2 + $0x18] sm:$0xff]  ;;  %v62_v31 = vld [vmem:[#allocation2 + $0x8] sm:$0xff] }
   0xb   :  { %v65_v23 = vpack.c.bf16 %v58_v20, %v57_v19  ;;  %v66_v24 = vpack.c.bf16 %v60_v22, %v59_v21 }
   0xd   :  { %211 = vmatprep.mubr.msk.bf16.mxu0 %vm83_vm1, %v65_v23 }
   0xe   :  { %212 = vmatmul.mubr.msk.bf16.vlgmr.msra.gmra.mrb[0].mxu0 %vm83_vm1, %v66_v24 }
  0xe1   :  { %v213_v27 = vpop.f32.mrb[0].mxu0 }
  0xe2   :  { %v141_v29 = vadd.f32 %v213_v27, %v63_v25  ;;  %v124_v30 = vpop.f32.mrb[1].mxu0 }
  0xe3   :  { %v139_v32 = vadd.f32 %v124_v30, %v61_v26  ;;  %v214_v33 = vpop.f32.mrb[2].mxu0 }
  0xe4   :  { %146 = vst.msk [vmem:[#allocation2 + $0x10] sm:$0xff] %vm22_vm0, %v141_v29  ;;  %v142_v34 = vadd.f32 %v214_v33, %v64_v28  ;;  %v127_v35 = vpop.f32.mrb[3].mxu0 }
  0xe5   :  { %144 = vst.msk [vmem:[#allocation2] sm:$0xff] %vm22_vm0, %v139_v32  ;;  %v140_v36 = vadd.f32 %v127_v35, %v62_v31 }
  0xe6   :  { %147 = vst.msk [vmem:[#allocation2 + $0x18] sm:$0xff] %vm22_vm0, %v142_v34 }
  0xe7   :  { %145 = vst.msk [vmem:[#allocation2 + $0x8] sm:$0xff] %vm22_vm0, %v140_v36 }
  0xeb   :  { %v153_v37 = vld [vmem:[#allocation2 + $0x10] sm:$0xff] }
  0xec   :  { %v192_v38 = vpack.c.bf16 %v153_v37, %v153_v37  ;;  %v151_v39 = vld [vmem:[#allocation2] sm:$0xff] }
  0xed   :  { %v190_v40 = vpack.c.bf16 %v151_v39, %v151_v39  ;;  %v154_v41 = vld [vmem:[#allocation2 + $0x18] sm:$0xff] }
  0xee   :  { %174 = vst.msk [vmem:[%s286_s4 + $0x8] sm:$0xf] %vm171_vm2, %v192_v38  ;;  %v193_v42 = vpack.c.bf16 %v154_v41, %v154_v41  ;;  %v152_v43 = vld [vmem:[#allocation2 + $0x8] sm:$0xff] }
  0xef   :  { %172 = vst.msk [vmem:[%s286_s4] sm:$0xf] %vm171_vm2, %v190_v40  ;;  %v191_v44 = vpack.c.bf16 %v152_v43, %v152_v43 }
  0xf0   :  { %175 = vst.msk [vmem:[%s286_s4 + $0xc] sm:$0xf] %vm171_vm2, %v193_v42 }
  0xf1   :  { %173 = vst.msk [vmem:[%s286_s4 + $0x4] sm:$0xf] %vm171_vm2, %v191_v44 }

// kernel: densenet_forward.39
= control target key start
LH: loop header
LB: loop body
LE: loop exit
PB: predicated region body
PF: predicated region fallthrough
CT: control target
= control target key end

     0   :  { %s263_s6 = smov 0   ;;  %s280_s0 = inlined_call_operand.vmem [shape: bf16[2,4,4,16], index: 0, kind: input, shape index: {}]   ;;  %s281_s1 = inlined_call_operand.vmem [shape: bf16[2,3,3,16], index: 1, kind: output, shape index: {}]  }
   0x1 LB: > { %s223_s7 = sadd.s32 4294967295, %s251_s6   ;;  %p227_p0 = scmp.ge.s32.totalorder %s251_s6, 1  ;;  %s251_s6 = sphi %s263_s6, %s11_s6  }
   0x2   : > { %p87_p1 = scmp.lt.s32.totalorder %s251_s6, 3 }
   0x4   : > { %p88_p2 = pnand %p227_p0, %p87_p1 }
   0x5   : > { %p107_p3 = scmp.lt.s32.totalorder (!%p88_p2), %s223_s7, 1  ;;  %vm156_vm0 = vcmask (!%p88_p2), 123904   ;;  %vm157_vm1 = vsmask.f32 (!%p88_p2), 1280 }
   0x6   : > { %91 = sbr.rel (%p88_p2) target bundleno = 35 (0x23), region = 24  ;;  %vm158_vm2 = vmand (!%p88_p2), %vm156_vm0, %vm157_vm1 }
   0xd   : > { %s283_s7 = smov (!%p107_p3, %s223_s7), 1 }
   0xe   : > { %s235_s8 = sshll.u32 %s283_s7, 3  ;;  %s236_s12 = smul.u32 6, %s283_s7 }
   0xf   : > { %s111_s11 = scalar_lea.vmem %s280_s0, %s235_s8 }
  0x10   : > { %v117_v0 = vld [vmem:[%s111_s11] sm:$0x3]  ;;  %v118_v1 = vld [vmem:[%s111_s11 + $0x2] sm:$0x3]  ;;  %v119_v2 = vld [vmem:[%s111_s11 + $0x4] sm:$0x3]  ;;  %s116_s15 = scalar_lea.vmem %s281_s1, %s236_s12 }
  0x11   : > { %v121_v3 = vunpack.c.l.bf16 %v117_v0  ;;  %v122_v4 = vunpack.c.l.bf16 %v118_v1  ;;  %v123_v5 = vunpack.c.l.bf16 %v119_v2  ;;  %v120_v6 = vld [vmem:[%s111_s11 + $0x6] sm:$0x3]  ;;  %v159_v24 = vld [vmem:[%s116_s15] sm:$0x3]  ;;  %v162_v28 = vld [vmem:[%s116_s15 + $0x2] sm:$0x3] }
  0x12   : > { %v124_v10 = vunpack.c.l.bf16 %v120_v6  ;;  %v165_v29 = vld [vmem:[%s116_s15 + $0x4] sm:$0x3] }
  0x13   : > { %v231_v7 = vrot.slane %v121_v3, 9  ;;  %v130_v8 = vrot.slane %v122_v4, 5  ;;  %v132_v9 = vrot.slane %v123_v5, 5 }
  0x14   : > { %v232_v17 = vrot.slane %v124_v10, 9 }
  0x15   : > { %v131_v11 = vrot.slane %v130_v8, 4  ;;  %v137_v12 = vadd.f32 %v231_v7, %v121_v3  ;;  %v133_v13 = vrot.slane %v132_v9, 4 }
  0x17   : > { %v140_v14 = vadd.f32 %v137_v12, %v122_v4  ;;  %v138_v15 = vadd.f32 %v131_v11, %v122_v4  ;;  %v139_v16 = vadd.f32 %v133_v13, %v123_v5 }
  0x19   : > { %v147_v18 = vadd.f32 %v140_v14, %v131_v11  ;;  %v141_v19 = vadd.f32 %v138_v15, %v123_v5  ;;  %v142_v20 = vadd.f32 %v139_v16, %v124_v10 }
  0x1b   : > { %v150_v21 = vmul.f32 0.25, %v147_v18  ;;  %v148_v22 = vadd.f32 %v141_v19, %v133_v13  ;;  %v149_v23 = vadd.f32 %v232_v17, %v142_v20 }
  0x1d   : > { %v153_v25 = vpack.c.bf16 %v150_v21, %v150_v21  ;;  %v151_v26 = vmul.f32 0.25, %v148_v22  ;;  %v152_v27 = vmul.f32 0.25, %v149_v23 }
  0x1f   : > { %v160_v30 = vsel %vm158_vm2, %v153_v25, %v159_v24  ;;  %v154_v31 = vpack.c.bf16 %v151_v26, %v151_v26  ;;  %v155_v32 = vpack.c.bf16 %v152_v27, %v152_v27 }
  0x20   : > { %161 = vst [vmem:[%s116_s15] sm:$0x3] %v160_v30 }
  0x21   : > { %v163_v33 = vsel %vm158_vm2, %v154_v31, %v162_v28  ;;  %v166_v34 = vsel %vm158_vm2, %v155_v32, %v165_v29 }
  0x22   : > { %164 = vst [vmem:[%s116_s15 + $0x2] sm:$0x3] %v163_v33  ;;  %167 = vst [vmem:[%s116_s15 + $0x4] sm:$0x3] %v166_v34 }
  0x23 PF: > { %s11_s6 = sadd.s32 1, %s251_s6  }
  0x24   : > { %p8_p4 = scmp.ge.s32.totalorder %s11_s6, 4  }
  0x26   :  { %10 = sbr.rel (!%p8_p4) target bundleno = 1 (0x1), region = 54 }

// kernel: densenet_forward.40
= control target key start
LH: loop header
LB: loop body
LE: loop exit
PB: predicated region body
PF: predicated region fallthrough
CT: control target
= control target key end

     0   :  { %vm28_vm0 = vcmask 261120   ;;  %v181_v0 = vmov 0.0   ;;  %vm182_vm1 = vmmov 0   ;;  %vm66_vm2 = vcmask 130048   ;;  %s246_s1 = inlined_call_operand.vmem [shape: bf16[16,32], index: 1, kind: input, shape index: {}]   ;;  %s247_s0 = inlined_call_operand.vmem [shape: bf16[16,16], index: 0, kind: input, shape index: {}]   ;;  %s248_s2 = inlined_call_operand.vmem [shape: f32[1,16], index: 2, kind: input, shape index: {}]   ;;  %s249_s3 = inlined_call_operand.vmem [shape: f32[1,16], index: 3, kind: input, shape index: {}]   ;;  %s250_s4 = inlined_call_operand.vmem [shape: f32[1,32], index: 4, kind: input, shape index: {}]   ;;  %s251_s5 = inlined_call_operand.vmem [shape: f32[1,32], index: 5, kind: input, shape index: {}]   ;;  %s252_s6 = inlined_call_operand.vmem [shape: bf16[16,32], index: 6, kind: output, shape index: {}]  }
   0x1   :  { %29 = vst.msk [vmem:[#allocation2] sm:$0xff] %vm28_vm0, %v181_v0  ;;  %30 = vst.msk [vmem:[#allocation2 + $0x8] sm:$0xff] %vm28_vm0, %v181_v0  ;;  %172 = vmatprep.subr.bf16.mxu0 %v181_v0  ;;  %v180_v1 = vld [vmem:[%s246_s1] sm:$0xff]   ;;  %174 = vmatprep.mubr.msk.bf16.mxu0 %vm182_vm1, %v181_v0  ;;  %vm149_vm3 = vcmask 257024  }
   0x2   :  { %v167_v2 = vld [vmem:[%s247_s0] sm:$0xff]   ;;  %173 = vmatpush3.bf16.msra.mxu0 %v180_v1 }
   0x3   :  { %v156_v3 = vld [vmem:[%s248_s2] ss:$0 sm:$0xff]  ;;  %v168_v4 = vunpack.c.l.bf16 %v167_v2  ;;  %v169_v5 = vunpack.c.h.bf16 %v167_v2 }
   0x4   :  { %v157_v6 = vld [vmem:[%s249_s3] ss:$0 sm:$0xff] }
   0x5   :  { %v42_v7 = vmul.f32 %v168_v4, %v156_v3  ;;  %v43_v8 = vmul.f32 %v169_v5, %v156_v3  ;;  %v160_v22 = vld [vmem:[%s250_s4] ss:$0 sm:$0xff] }
   0x6   :  { %v161_v24 = vld [vmem:[%s251_s5] ss:$0 sm:$0xff] }
   0x7   :  { %v51_v9 = vadd.f32 %v157_v6, %v42_v7  ;;  %v52_v10 = vadd.f32 %v157_v6, %v43_v8 }
   0x8   :  { %v55_v14 = vld [vmem:[#allocation2] sm:$0xff]  ;;  %v56_v16 = vld [vmem:[#allocation2 + $0x8] sm:$0xff] }
   0x9   :  { %v53_v11 = vmax.f32 %v51_v9, 0.0  ;;  %v54_v12 = vmax.f32 %v52_v10, 0.0 }
   0xb   :  { %v57_v13 = vpack.c.bf16 %v54_v12, %v53_v11 }
   0xd   :  { %175 = vmatmul.mubr.msk.bf16.vlgmr.msra.gmra.mrb[0].mxu0 %vm66_vm2, %v57_v13 }
  0xe0   :  { %v104_v15 = vpop.f32.mrb[0].mxu0 }
  0xe1   :  { %v111_v17 = vadd.f32 %v104_v15, %v55_v14  ;;  %v176_v18 = vpop.f32.mrb[1].mxu0 }
  0xe2   :  { %v107_v19 = vpop.f32.mrb[2].mxu0 }
  0xe3   :  { %114 = vst.msk [vmem:[#allocation2] sm:$0xff] %vm28_vm0, %v111_v17  ;;  %v112_v20 = vadd.f32 %v107_v19, %v56_v16  ;;  %v177_v21 = vpop.f32.mrb[3].mxu0 }
  0xe5   :  { %115 = vst.msk [vmem:[#allocation2 + $0x8] sm:$0xff] %vm28_vm0, %v112_v20 }
  0xea   :  { %v119_v23 = vld [vmem:[#allocation2] sm:$0xff] }
  0xeb   :  { %v128_v25 = vmul.f32 %v160_v22, %v119_v23 }
  0xec   :  { %v120_v26 = vld [vmem:[#allocation2 + $0x8] sm:$0xff] }
  0xed   :  { %v137_v27 = vadd.f32 %v161_v24, %v128_v25  ;;  %v129_v28 = vmul.f32 %v160_v22, %v120_v26 }
  0xef   :  { %v139_v29 = vmax.f32 %v137_v27, 0.0  ;;  %v138_v30 = vadd.f32 %v161_v24, %v129_v28 }
  0xf1   :  { %v164_v31 = vpack.c.bf16 %v139_v29, %v139_v29  ;;  %v140_v32 = vmax.f32 %v138_v30, 0.0 }
  0xf3   :  { %150 = vst.msk [vmem:[%s252_s6] sm:$0xf] %vm149_vm3, %v164_v31  ;;  %v165_v33 = vpack.c.bf16 %v140_v32, %v140_v32 }
  0xf5   :  { %151 = vst.msk [vmem:[%s252_s6 + $0x4] sm:$0xf] %vm149_vm3, %v165_v33 }

// kernel: densenet_forward.42
= control target key start
LH: loop header
LB: loop body
LE: loop exit
PB: predicated region body
PF: predicated region fallthrough
CT: control target
= control target key end

     0   :  { %vm74_vm0 = vcmask 1043456   ;;  %v194_v0 = vmov 0.0   ;;  %vm195_vm1 = vmmov 0   ;;  %vm28_vm2 = vcmask 261120   ;;  %s263_s1 = inlined_call_operand.vmem [shape: bf16[24,32], index: 1, kind: input, shape index: {}]   ;;  %s264_s0 = inlined_call_operand.vmem [shape: bf16[16,24], index: 0, kind: input, shape index: {}]   ;;  %s265_s2 = inlined_call_operand.vmem [shape: f32[1,24], index: 2, kind: input, shape index: {}]   ;;  %s266_s3 = inlined_call_operand.vmem [shape: f32[1,24], index: 3, kind: input, shape index: {}]   ;;  %s267_s4 = inlined_call_operand.vmem [shape: f32[1,32], index: 4, kind: input, shape index: {}]   ;;  %s268_s5 = inlined_call_operand.vmem [shape: f32[1,32], index: 5, kind: input, shape index: {}]   ;;  %s269_s6 = inlined_call_operand.vmem [shape: bf16[16,32], index: 6, kind: output, shape index: {}]  }
   0x1   :  { %182 = vmatprep.subr.bf16.mxu0 %v194_v0  ;;  %v192_v1 = vld [vmem:[%s263_s1] sm:$0xff]   ;;  %186 = vmatprep.mubr.msk.bf16.mxu0 %vm195_vm1, %v194_v0  ;;  %v193_v2 = vld [vmem:[%s263_s1 + $0x8] ss:$0 sps:$4 sm:$0xff]   ;;  %29 = vst.msk [vmem:[#allocation2] sm:$0xff] %vm28_vm2, %v194_v0  ;;  %30 = vst.msk [vmem:[#allocation2 + $0x8] sm:$0xff] %vm28_vm2, %v194_v0  ;;  %vm70_vm3 = vcmask 195584  }
   0x2   :  { %v176_v3 = vld [vmem:[%s264_s0] sm:$0xff]   ;;  %183 = vmatpush3.bf16.msra.mxu0 %v192_v1  ;;  %v76_v7 = vsel %vm74_vm0, %v193_v2, 0  ;;  %vm157_vm4 = vcmask 257024  }
   0x3   :  { %v177_v4 = vunpack.c.l.bf16 %v176_v3  ;;  %v178_v5 = vunpack.c.h.bf16 %v176_v3  ;;  %v164_v6 = vld [vmem:[%s265_s2] ss:$0 sm:$0xff]  ;;  %184 = vmatprep.subr.bf16.mxu0 %v194_v0 }
   0x4   :  { %v165_v8 = vld [vmem:[%s266_s3] ss:$0 sm:$0xff] }
   0x5   :  { %v42_v9 = vmul.f32 %v177_v4, %v164_v6  ;;  %v43_v10 = vmul.f32 %v178_v5, %v164_v6  ;;  %v169_v24 = vld [vmem:[%s267_s4] ss:$0 sm:$0xff] }
   0x6   :  { %185 = vmatpush3.bf16.msra.mxu0 %v76_v7  ;;  %v170_v26 = vld [vmem:[%s268_s5] ss:$0 sm:$0xff] }
   0x7   :  { %v51_v11 = vadd.f32 %v165_v8, %v42_v9  ;;  %v52_v12 = vadd.f32 %v165_v8, %v43_v10 }
   0x8   :  { %v55_v16 = vld [vmem:[#allocation2] sm:$0xff]  ;;  %v56_v18 = vld [vmem:[#allocation2 + $0x8] sm:$0xff] }
   0x9   :  { %v53_v13 = vmax.f32 %v51_v11, 0.0  ;;  %v54_v14 = vmax.f32 %v52_v12, 0.0 }
   0xb   :  { %v57_v15 = vpack.c.bf16 %v54_v14, %v53_v13 }
   0xd   :  { %187 = vmatmul.mubr.msk.bf16.vlgmr.msra.gmra.mrb[0].mxu0 %vm70_vm3, %v57_v15 }
  0xe0   :  { %v112_v17 = vpop.f32.mrb[0].mxu0 }
  0xe1   :  { %v119_v19 = vadd.f32 %v112_v17, %v55_v16  ;;  %v188_v20 = vpop.f32.mrb[1].mxu0 }
  0xe2   :  { %v115_v21 = vpop.f32.mrb[2].mxu0 }
  0xe3   :  { %122 = vst.msk [vmem:[#allocation2] sm:$0xff] %vm28_vm2, %v119_v19  ;;  %v120_v22 = vadd.f32 %v115_v21, %v56_v18  ;;  %v189_v23 = vpop.f32.mrb[3].mxu0 }
  0xe5   :  { %123 = vst.msk [vmem:[#allocation2 + $0x8] sm:$0xff] %vm28_vm2, %v120_v22 }
  0xea   :  { %v127_v25 = vld [vmem:[#allocation2] sm:$0xff] }
  0xeb   :  { %v136_v27 = vmul.f32 %v169_v24, %v127_v25 }
  0xec   :  { %v128_v28 = vld [vmem:[#allocation2 + $0x8] sm:$0xff] }
  0xed   :  { %v145_v29 = vadd.f32 %v170_v26, %v136_v27  ;;  %v137_v30 = vmul.f32 %v169_v24, %v128_v28 }
  0xef   :  { %v147_v31 = vmax.f32 %v145_v29, 0.0  ;;  %v146_v32 = vadd.f32 %v170_v26, %v137_v30 }
  0xf1   :  { %v173_v33 = vpack.c.bf16 %v147_v31, %v147_v31  ;;  %v148_v34 = vmax.f32 %v146_v32, 0.0 }
  0xf3   :  { %158 = vst.msk [vmem:[%s269_s6] sm:$0xf] %vm157_vm4, %v173_v33  ;;  %v174_v35 = vpack.c.bf16 %v148_v34, %v148_v34 }
  0xf5   :  { %159 = vst.msk [vmem:[%s269_s6 + $0x4] sm:$0xf] %vm157_vm4, %v174_v35 }

// kernel: densenet_forward.41
= control target key start
LH: loop header
LB: loop body
LE: loop exit
PB: predicated region body
PF: predicated region fallthrough
CT: control target
= control target key end

     0   :  { %s1037_s9 = smov 0   ;;  %s1169_s0 = inlined_call_operand.vmem [shape: bf16[2,20,32], index: 0, kind: input, shape index: {}]   ;;  %s1170_s1 = inlined_call_operand.vmem [shape: bf16[9,32,8], index: 1, kind: input, shape index: {}]   ;;  %s1171_s2 = inlined_call_operand.vmem [shape: bf16[2,8,8], index: 2, kind: output, shape index: {}]  }
   0x1 LB: > { %s779_s10 = sadd.s32 4294967295, %s1018_s9   ;;  %p783_p0 = scmp.ge.s32.totalorder %s1018_s9, 1  ;;  %s1018_s9 = sphi %s1037_s9, %s12_s9  }
   0x2   : > { %p112_p1 = scmp.lt.s32.totalorder %s1018_s9, 3 }
   0x4   : > { %p113_p2 = pnand %p783_p0, %p112_p1 }
   0x5   : > { %v990_v0 = vld [vmem:[%s1170_s1 + $0x40] sm:$0xff] (!%p113_p2)   ;;  %v1020_v1 = vmov (!%p113_p2), 0.0   ;;  %v991_v2 = vld [vmem:[%s1170_s1 + $0x10] sm:$0xff] (!%p113_p2)   ;;  %v992_v3 = vld [vmem:[%s1170_s1 + $0x48] sm:$0xff] (!%p113_p2)   ;;  %vm1021_vm0 = vmmov (!%p113_p2), 0   ;;  %p133_p3 = scmp.lt.s32.totalorder (!%p113_p2), %s779_s10, 1 }
   0x6   : > { %116 = sbr.rel (%p113_p2) target bundleno = 291 (0x123), region = 28  ;;  %910 = vmatprep.subr.bf16.mxu0 (!%p113_p2), %v1020_v1  ;;  %878 = vmatprep.subr.bf16.mxu1 (!%p113_p2), %v1020_v1  ;;  %v993_v4 = vld [vmem:[%s1170_s1 + $0x18] sm:$0xff] (!%p113_p2)   ;;  %vm179_vm1 = vcmask (!%p113_p2), 261120   ;;  %v995_v10 = vld [vmem:[%s1170_s1 + $0x50] sm:$0xff] (!%p113_p2)   ;;  %v996_v14 = vld [vmem:[%s1170_s1] sm:$0xff] (!%p113_p2)   ;;  %vm724_vm2 = vcmask (!%p113_p2), 60416  }
   0x7   : > { %911 = vmatpush3.bf16.msra.mxu0 (!%p113_p2), %v990_v0  ;;  %882 = vmatprep.mubr.msk.bf16.mxu1 (!%p113_p2), %vm1021_vm0, %v1020_v1  ;;  %v997_v17 = vld [vmem:[%s1170_s1 + $0x58] sm:$0xff] (!%p113_p2)   ;;  %v998_v18 = vld [vmem:[%s1170_s1 + $0x8] sm:$0xff] (!%p113_p2)   ;;  %v1000_v21 = vld [vmem:[%s1170_s1 + $0x60] sm:$0xff] (!%p113_p2)  }
   0x8   : > { %879 = vmatpush3.bf16.msra.mxu1 (!%p113_p2), %v991_v2  ;;  %912 = vmatprep.subr.bf16.mxu0 (!%p113_p2), %v1020_v1  ;;  %v1001_v22 = vld [vmem:[%s1170_s1 + $0x20] sm:$0xff] (!%p113_p2)   ;;  %v1002_v23 = vld [vmem:[%s1170_s1 + $0x68] sm:$0xff] (!%p113_p2)   ;;  %v1005_v29 = vld [vmem:[%s1170_s1 + $0x70] sm:$0xff] (!%p113_p2)  }
   0x9   : > { %880 = vmatprep.subr.bf16.mxu1 (!%p113_p2), %v1020_v1  ;;  %914 = vmatprep.mubr.msk.bf16.mxu0 (!%p113_p2), %vm1021_vm0, %v1020_v1  ;;  %v1003_v24 = vld [vmem:[%s1170_s1 + $0x28] sm:$0xff] (!%p113_p2)   ;;  %v1006_v30 = vld [vmem:[%s1170_s1 + $0x30] sm:$0xff] (!%p113_p2)   ;;  %v1007_v32 = vld [vmem:[%s1170_s1 + $0x78] sm:$0xff] (!%p113_p2)  }
   0xa   : > { %v1008_v33 = vld [vmem:[%s1170_s1 + $0x38] sm:$0xff] (!%p113_p2)   ;;  %v1010_v38 = vld [vmem:[%s1170_s1 + $0x80] sm:$0xff] (!%p113_p2)   ;;  %v1011_v39 = vld [vmem:[%s1170_s1 + $0x88] sm:$0xff] (!%p113_p2)  }
   0xb   : > { %913 = vmatpush3.bf16.msra.mxu0 (!%p113_p2), %v992_v3 }
   0xc   : > { %881 = vmatpush3.bf16.msra.mxu1 (!%p113_p2), %v993_v4  ;;  %918 = vmatprep.subr.bf16.mxu0 (!%p113_p2), %v1020_v1 }
   0xd   : > { %s1173_s10 = smov (!%p133_p3, %s779_s10), 1  ;;  %886 = vmatprep.subr.bf16.mxu1 %v1020_v1 }
   0xe   : > { %s979_s19 = smul.u32 12, %s1173_s10  ;;  %s785_s25 = sshll.u32 %s1173_s10, 2 }
   0xf   : > { %s141_s28 = scalar_lea.vmem %s1171_s2, %s785_s25 }
  0x10   : > { %s1072_s22 = scalar_lea.vmem %s1169_s0, %s979_s19 }
  0x11   : > { %v143_v5 = vld [vmem:[%s1072_s22] sm:$0xf]  ;;  %v144_v6 = vld [vmem:[%s1072_s22 + $0x4] sm:$0xf]  ;;  %v145_v25 = vld [vmem:[%s1072_s22 + $0x8] sm:$0x3] }
  0x12   : > { %v1077_v7 = vcombine.low %v143_v5, %v144_v6  ;;  %v786_v19 = vcombine.low %v143_v5, %v143_v5  ;;  %v826_v27 = vcombine.low %v144_v6, %v144_v6  ;;  %v834_v28 = vcombine.low %v144_v6, %v145_v25 }
  0x14   : > { %v161_v8 = vshrl.u32 %v1077_v7, 16  ;;  %v163_v9 = vshll.u32 %v1077_v7, 16  ;;  %v472_v20 = vrot.slane %v1077_v7, 3  ;;  %v284_v26 = vrot.slane %v1077_v7, 1 }
  0x15   : > { %v600_v31 = vshll.u32 %v834_v28, 16  ;;  %v598_v34 = vshrl.u32 %v834_v28, 16  ;;  %v346_v36 = vrot.slane %v1077_v7, 2  ;;  %v666_v40 = vrot.slane %v834_v28, 1 }
  0x16   : > { %v165_v11 = vrot.slane %v163_v9, 1  ;;  %v408_v12 = vrot.slane %v161_v8, 2  ;;  %v409_v13 = vrot.slane %v163_v9, 3 }
  0x17   : > { %v602_v35 = vrot.slane %v600_v31, 1 }
  0x18   : > { %v166_v15 = vor.u32 %v165_v11, %v161_v8  ;;  %v410_v16 = vor.u32 %v409_v13, %v408_v12 }
  0x19   : > { %v603_v37 = vor.u32 %v602_v35, %v598_v34 }
  0x1a   : > { %883 = vmatmul.mubr.msk.bf16.vlgmr.msra.gmra.mrb[0].mxu1 %vm179_vm1, %v166_v15  ;;  %915 = vmatmul.mubr.msk.bf16.vlgmr.msra.gmra.mrb[0].mxu0 %vm179_vm1, %v410_v16 }
  0x1b   : > { %919 = vmatpush3.bf16.msra.mxu0 %v995_v10  ;;  %887 = vmatpush3.bf16.msra.mxu1 %v996_v14 }
  0x1c   : > { %920 = vmatprep.subr.bf16.mxu0 %v1020_v1  ;;  %888 = vmatprep.subr.bf16.mxu1 %v1020_v1 }
  0x1d   : > { %890 = vmatprep.mubr.msk.bf16.mxu1 %vm1021_vm0, %v1020_v1  ;;  %922 = vmatprep.mubr.msk.bf16.mxu0 %vm1021_vm0, %v1020_v1 }
  0x1f   : > { %921 = vmatpush3.bf16.msra.mxu0 %v997_v17  ;;  %889 = vmatpush3.bf16.msra.mxu1 %v998_v18 }
  0x20   : > { %926 = vmatprep.subr.bf16.mxu0 %v1020_v1  ;;  %894 = vmatprep.subr.bf16.mxu1 %v1020_v1 }
  0x26   : > { %891 = vmatmul.mubr.msk.bf16.vlgmr.msra.gmra.mrb[0].mxu1 %vm179_vm1, %v786_v19  ;;  %923 = vmatmul.mubr.msk.bf16.vlgmr.msra.gmra.mrb[0].mxu0 %vm179_vm1, %v472_v20 }
  0x27   : > { %927 = vmatpush3.bf16.msra.mxu0 %v1000_v21  ;;  %895 = vmatpush3.bf16.msra.mxu1 %v1001_v22 }
  0x28   : > { %928 = vmatprep.subr.bf16.mxu0 %v1020_v1  ;;  %896 = vmatprep.subr.bf16.mxu1 %v1020_v1 }
  0x29   : > { %898 = vmatprep.mubr.msk.bf16.mxu1 %vm1021_vm0, %v1020_v1  ;;  %930 = vmatprep.mubr.msk.bf16.mxu0 %vm1021_vm0, %v1020_v1 }
  0x2b   : > { %929 = vmatpush3.bf16.msra.mxu0 %v1002_v23  ;;  %897 = vmatpush3.bf16.msra.mxu1 %v1003_v24 }
  0x2c   : > { %934 = vmatprep.subr.bf16.mxu0 %v1020_v1  ;;  %902 = vmatprep.subr.bf16.mxu1 %v1020_v1 }
  0x32   : > { %899 = vmatmul.mubr.msk.bf16.vlgmr.msra.gmra.mrb[0].mxu1 %vm179_vm1, %v284_v26  ;;  %931 = vmatmul.mubr.msk.bf16.vlgmr.msra.gmra.mrb[0].mxu0 %vm179_vm1, %v826_v27 }
  0x33   : > { %935 = vmatpush3.bf16.msra.mxu0 %v1005_v29  ;;  %903 = vmatpush3.bf16.msra.mxu1 %v1006_v30 }
  0x34   : > { %936 = vmatprep.subr.bf16.mxu0 %v1020_v1  ;;  %904 = vmatprep.subr.bf16.mxu1 %v1020_v1 }
  0x35   : > { %906 = vmatprep.mubr.msk.bf16.mxu1 %vm1021_vm0, %v1020_v1  ;;  %938 = vmatprep.mubr.msk.bf16.mxu0 %vm1021_vm0, %v1020_v1 }
  0x37   : > { %937 = vmatpush3.bf16.msra.mxu0 %v1007_v32  ;;  %905 = vmatpush3.bf16.msra.mxu1 %v1008_v33 }
  0x38   : > { %942 = vmatprep.subr.bf16.mxu0 %v1020_v1 }
  0x3e   : > { %907 = vmatmul.mubr.msk.bf16.vlgmr.msra.gmra.mrb[0].mxu1 %vm179_vm1, %v346_v36  ;;  %939 = vmatmul.mubr.msk.bf16.vlgmr.msra.gmra.mrb[0].mxu0 %vm179_vm1, %v603_v37 }
  0x3f   : > { %943 = vmatpush3.bf16.msra.mxu0 %v1010_v38  ;;  %946 = vmatprep.mubr.msk.bf16.mxu0 %vm1021_vm0, %v1020_v1 }
  0x40   : > { %944 = vmatprep.subr.bf16.mxu0 %v1020_v1 }
  0x43   : > { %945 = vmatpush3.bf16.msra.mxu0 %v1011_v39 }
  0x4a   : > { %947 = vmatmul.mubr.msk.bf16.vlgmr.msra.gmra.mrb[0].mxu0 %vm179_vm1, %v666_v40 }
 0x111   : > { %v396_v41 = vpop.f32.mrb[0].mxu1 }
 0x112   : > { %v908_v42 = vpop.f32.mrb[1].mxu1 }
 0x113   : > { %v399_v43 = vpop.f32.mrb[2].mxu1 }
 0x114   : > { %v909_v44 = vpop.f32.mrb[3].mxu1 }
 0x11d   : > { %v716_v45 = vpop.f32.mrb[0].mxu0 }
 0x11e   : > { %v950_v46 = vadd.f32 %v716_v45, %v396_v41  ;;  %v948_v47 = vpop.f32.mrb[1].mxu0 }
 0x11f   : > { %v719_v48 = vpop.f32.mrb[2].mxu0 }
 0x120   : > { %v723_v49 = vpack.c.bf16 %v950_v46, %v950_v46  ;;  %v949_v50 = vpop.f32.mrb[3].mxu0 }
 0x122   : > { %725 = vst.msk [vmem:[%s141_s28] sm:$0xf] %vm724_vm2, %v723_v49 }
 0x123 PF: > { %s12_s9 = sadd.s32 1, %s1018_s9  }
 0x124   : > { %p9_p4 = scmp.ge.s32.totalorder %s12_s9, 4  }
 0x126   :  { %11 = sbr.rel (!%p9_p4) target bundleno = 1 (0x1), region = 66 }

// kernel: densenet_forward.44
= control target key start
LH: loop header
LB: loop body
LE: loop exit
PB: predicated region body
PF: predicated region fallthrough
CT: control target
= control target key end

     0   :  { %vm22_vm0 = vcmask 130048   ;;  %v166_v0 = vmov 0.0   ;;  %vm167_vm1 = vmmov 0   ;;  %vm68_vm2 = vcmask 261120   ;;  %s218_s1 = inlined_call_operand.vmem [shape: bf16[32,16], index: 1, kind: input, shape index: {}]   ;;  %s219_s0 = inlined_call_operand.vmem [shape: bf16[16,32], index: 0, kind: input, shape index: {}]   ;;  %s220_s2 = inlined_call_operand.vmem [shape: f32[1,32], index: 2, kind: input, shape index: {}]   ;;  %s221_s3 = inlined_call_operand.vmem [shape: f32[1,32], index: 3, kind: input, shape index: {}]   ;;  %s222_s4 = inlined_call_operand.vmem [shape: bf16[16,16], index: 4, kind: output, shape index: {}]  }
   0x1   :  { %154 = vmatprep.subr.bf16.mxu0 %v166_v0  ;;  %v164_v1 = vld [vmem:[%s218_s1] sm:$0xff]   ;;  %158 = vmatprep.mubr.msk.bf16.mxu0 %vm167_vm1, %v166_v0  ;;  %23 = vst.msk [vmem:[#allocation2] sm:$0xff] %vm22_vm0, %v166_v0  ;;  %24 = vst.msk [vmem:[#allocation2 + $0x8] sm:$0xff] %vm22_vm0, %v166_v0  ;;  %v165_v2 = vld [vmem:[%s218_s1 + $0x8] sm:$0xff]   ;;  %vm131_vm3 = vcmask 125952  }
   0x2   :  { %155 = vmatpush3.bf16.msra.mxu0 %v164_v1  ;;  %v148_v3 = vld [vmem:[%s219_s0] sm:$0xff]  }
   0x3   :  { %v138_v4 = vld [vmem:[%s220_s2] ss:$0 sm:$0xff]  ;;  %156 = vmatprep.subr.bf16.mxu0 %v166_v0  ;;  %v149_v5 = vunpack.c.l.bf16 %v148_v3  ;;  %v150_v6 = vunpack.c.h.bf16 %v148_v3 }
   0x4   :  { %v139_v7 = vld [vmem:[%s221_s3] ss:$0 sm:$0xff] }
   0x5   :  { %v36_v8 = vmul.f32 %v149_v5, %v138_v4  ;;  %v37_v9 = vmul.f32 %v150_v6, %v138_v4 }
   0x6   :  { %157 = vmatpush3.bf16.msra.mxu0 %v165_v2 }
   0x7   :  { %v45_v10 = vadd.f32 %v139_v7, %v36_v8  ;;  %v46_v11 = vadd.f32 %v139_v7, %v37_v9 }
   0x8   :  { %v49_v15 = vld [vmem:[#allocation2] sm:$0xff]  ;;  %v50_v17 = vld [vmem:[#allocation2 + $0x8] sm:$0xff] }
   0x9   :  { %v47_v12 = vmax.f32 %v45_v10, 0.0  ;;  %v48_v13 = vmax.f32 %v46_v11, 0.0 }
   0xb   :  { %v51_v14 = vpack.c.bf16 %v48_v13, %v47_v12 }
   0xd   :  { %159 = vmatmul.mubr.msk.bf16.vlgmr.msra.gmra.mrb[0].mxu0 %vm68_vm2, %v51_v14 }
  0xe0   :  { %v106_v16 = vpop.f32.mrb[0].mxu0 }
  0xe1   :  { %v113_v18 = vadd.f32 %v106_v16, %v49_v15  ;;  %v160_v19 = vpop.f32.mrb[1].mxu0 }
  0xe2   :  { %v109_v20 = vpop.f32.mrb[2].mxu0 }
  0xe3   :  { %116 = vst.msk [vmem:[#allocation2] sm:$0xff] %vm22_vm0, %v113_v18  ;;  %v114_v21 = vadd.f32 %v109_v20, %v50_v17  ;;  %v161_v22 = vpop.f32.mrb[3].mxu0 }
  0xe5   :  { %117 = vst.msk [vmem:[#allocation2 + $0x8] sm:$0xff] %vm22_vm0, %v114_v21 }
  0xea   :  { %v121_v23 = vld [vmem:[#allocation2] sm:$0xff] }
  0xeb   :  { %v145_v24 = vpack.c.bf16 %v121_v23, %v121_v23 }
  0xec   :  { %v122_v25 = vld [vmem:[#allocation2 + $0x8] sm:$0xff] }
  0xed   :  { %132 = vst.msk [vmem:[%s222_s4] sm:$0xf] %vm131_vm3, %v145_v24  ;;  %v146_v26 = vpack.c.bf16 %v122_v25, %v122_v25 }
  0xef   :  { %133 = vst.msk [vmem:[%s222_s4 + $0x4] sm:$0xf] %vm131_vm3, %v146_v26 }

// kernel: densenet_forward.45
= control target key start
LH: loop header
LB: loop body
LE: loop exit
PB: predicated region body
PF: predicated region fallthrough
CT: control target
= control target key end

     0   :  { %s216_s6 = smov 0   ;;  %s233_s0 = inlined_call_operand.vmem [shape: bf16[2,2,2,16], index: 0, kind: input, shape index: {}]   ;;  %s234_s1 = inlined_call_operand.vmem [shape: bf16[2,1,1,16], index: 1, kind: output, shape index: {}]  }
   0x1 LB: > { %s180_s7 = sadd.s32 4294967295, %s204_s6   ;;  %p184_p0 = scmp.ge.s32.totalorder %s204_s6, 1  ;;  %s204_s6 = sphi %s216_s6, %s11_s6  }
   0x2   : > { %p86_p1 = scmp.lt.s32.totalorder %s204_s6, 3 }
   0x4   : > { %p87_p2 = pnand %p184_p0, %p86_p1 }
   0x5   : > { %p103_p3 = scmp.lt.s32.totalorder (!%p87_p2), %s180_s7, 1  ;;  %vm127_vm0 = vcmask (!%p87_p2), 122880   ;;  %vm128_vm1 = vsmask.f32 (!%p87_p2), 256 }
   0x6   : > { %90 = sbr.rel (%p87_p2) target bundleno = 33 (0x21), region = 24  ;;  %vm129_vm2 = vmand (!%p87_p2), %vm127_vm0, %vm128_vm1 }
   0xd   : > { %s236_s7 = smov (!%p103_p3, %s180_s7), 1 }
   0xe   : > { %s185_s8 = sshll.u32 %s236_s7, 1  ;;  %s109_s14 = scalar_lea.vmem %s234_s1, %s236_s7 }
   0xf   : > { %s106_s11 = scalar_lea.vmem %s233_s0, %s185_s8  ;;  %v130_v10 = vld [vmem:[%s109_s14] sm:$0x1] }
  0x10   : > { %v110_v0 = vld [vmem:[%s106_s11] sm:$0x1]  ;;  %v111_v1 = vld [vmem:[%s106_s11 + $0x1] sm:$0x1] }
  0x11   : > { %v112_v2 = vunpack.c.l.bf16 %v110_v0  ;;  %v113_v3 = vunpack.c.l.bf16 %v111_v1 }
  0x13   : > { %v186_v4 = vrot.slane %v112_v2, 9  ;;  %v187_v6 = vrot.slane %v113_v3, 9 }
  0x15   : > { %v118_v5 = vadd.f32 %v186_v4, %v112_v2 }
  0x17   : > { %v119_v7 = vadd.f32 %v118_v5, %v113_v3 }
  0x19   : > { %v124_v8 = vadd.f32 %v187_v6, %v119_v7 }
  0x1b   : > { %v125_v9 = vmul.f32 0.25, %v124_v8 }
  0x1d   : > { %v126_v11 = vpack.c.bf16 %v125_v9, %v125_v9 }
  0x1f   : > { %v131_v12 = vsel %vm129_vm2, %v126_v11, %v130_v10 }
  0x20   : > { %132 = vst [vmem:[%s109_s14] sm:$0x1] %v131_v12 }
  0x21 PF: > { %s11_s6 = sadd.s32 1, %s204_s6  }
  0x22   : > { %p8_p4 = scmp.ge.s32.totalorder %s11_s6, 4  }
  0x24   :  { %10 = sbr.rel (!%p8_p4) target bundleno = 1 (0x1), region = 54 }

// kernel: densenet_forward.47
= control target key start
LH: loop header
LB: loop body
LE: loop exit
PB: predicated region body
PF: predicated region fallthrough
CT: control target
= control target key end

     0   :  { %s1039_s9 = smov 0   ;;  %s1173_s0 = inlined_call_operand.vmem [shape: bf16[2,12,32], index: 0, kind: input, shape index: {}]   ;;  %s1174_s1 = inlined_call_operand.vmem [shape: bf16[9,32,8], index: 1, kind: input, shape index: {}]   ;;  %s1175_s2 = inlined_call_operand.vmem [shape: bf16[2,3,8], index: 2, kind: output, shape index: {}]  }
   0x1 LB: > { %s782_s10 = sadd.s32 4294967295, %s1020_s9   ;;  %p786_p0 = scmp.ge.s32.totalorder %s1020_s9, 1  ;;  %s1020_s9 = sphi %s1039_s9, %s12_s9  }
   0x2   : > { %p112_p1 = scmp.lt.s32.totalorder %s1020_s9, 3 }
   0x4   : > { %p113_p2 = pnand %p786_p0, %p112_p1 }
   0x5   : > { %v993_v0 = vld [vmem:[%s1174_s1 + $0x40] sm:$0xff] (!%p113_p2)   ;;  %v1022_v1 = vmov (!%p113_p2), 0.0   ;;  %v994_v2 = vld [vmem:[%s1174_s1 + $0x48] sm:$0xff] (!%p113_p2)   ;;  %v995_v3 = vld [vmem:[%s1174_s1 + $0x10] sm:$0xff] (!%p113_p2)   ;;  %vm1023_vm0 = vmmov (!%p113_p2), 0   ;;  %p133_p3 = scmp.lt.s32.totalorder (!%p113_p2), %s782_s10, 1 }
   0x6   : > { %116 = sbr.rel (%p113_p2) target bundleno = 287 (0x11f), region = 28  ;;  %914 = vmatprep.subr.bf16.mxu0 (!%p113_p2), %v1022_v1  ;;  %882 = vmatprep.subr.bf16.mxu1 (!%p113_p2), %v1022_v1  ;;  %v998_v4 = vld [vmem:[%s1174_s1 + $0x18] sm:$0xff] (!%p113_p2)   ;;  %vm176_vm1 = vcmask (!%p113_p2), 261120   ;;  %v997_v7 = vld [vmem:[%s1174_s1 + $0x50] sm:$0xff] (!%p113_p2)   ;;  %v1000_v13 = vld [vmem:[%s1174_s1] sm:$0xff] (!%p113_p2)   ;;  %vm723_vm2 = vcmask (!%p113_p2), 58368  }
   0x7   : > { %915 = vmatpush3.bf16.msra.mxu0 (!%p113_p2), %v993_v0  ;;  %918 = vmatprep.mubr.msk.bf16.mxu0 (!%p113_p2), %vm1023_vm0, %v1022_v1  ;;  %v999_v12 = vld [vmem:[%s1174_s1 + $0x58] sm:$0xff] (!%p113_p2)   ;;  %v1002_v17 = vld [vmem:[%s1174_s1 + $0x8] sm:$0xff] (!%p113_p2)   ;;  %v1001_v19 = vld [vmem:[%s1174_s1 + $0x60] sm:$0xff] (!%p113_p2)   ;;  %vm724_vm3 = vsmask.f32 (!%p113_p2), 1280 }
   0x8   : > { %916 = vmatprep.subr.bf16.mxu0 (!%p113_p2), %v1022_v1  ;;  %886 = vmatprep.mubr.msk.bf16.mxu1 (!%p113_p2), %vm1023_vm0, %v1022_v1  ;;  %v1003_v20 = vld [vmem:[%s1174_s1 + $0x68] sm:$0xff] (!%p113_p2)   ;;  %v1004_v21 = vld [vmem:[%s1174_s1 + $0x20] sm:$0xff] (!%p113_p2)   ;;  %v1006_v26 = vld [vmem:[%s1174_s1 + $0x70] sm:$0xff] (!%p113_p2)  }
   0x9   : > { %883 = vmatpush3.bf16.msra.mxu1 (!%p113_p2), %v995_v3  ;;  %v1007_v24 = vld [vmem:[%s1174_s1 + $0x28] sm:$0xff] (!%p113_p2)   ;;  %v1008_v30 = vld [vmem:[%s1174_s1 + $0x78] sm:$0xff] (!%p113_p2)   ;;  %v1009_v31 = vld [vmem:[%s1174_s1 + $0x30] sm:$0xff] (!%p113_p2)  }
   0xa   : > { %884 = vmatprep.subr.bf16.mxu1 (!%p113_p2), %v1022_v1  ;;  %v1011_v34 = vld [vmem:[%s1174_s1 + $0x38] sm:$0xff] (!%p113_p2)   ;;  %v1010_v38 = vld [vmem:[%s1174_s1 + $0x80] sm:$0xff] (!%p113_p2)   ;;  %v1012_v40 = vld [vmem:[%s1174_s1 + $0x88] sm:$0xff] (!%p113_p2)  }
   0xb   : > { %917 = vmatpush3.bf16.msra.mxu0 (!%p113_p2), %v994_v2  ;;  %vm725_vm4 = vmand (!%p113_p2), %vm723_vm2, %vm724_vm3 }
   0xc   : > { %922 = vmatprep.subr.bf16.mxu0 (!%p113_p2), %v1022_v1 }
   0xd   : > { %s1177_s10 = smov (!%p133_p3, %s782_s10), 1  ;;  %885 = vmatpush3.bf16.msra.mxu1 %v998_v4 }
   0xe   : > { %s854_s19 = sshll.u32 %s1177_s10, 3  ;;  %890 = vmatprep.subr.bf16.mxu1 %v1022_v1  ;;  %s789_s25 = sshll.u32 %s1177_s10, 1 }
   0xf   : > { %s1074_s22 = scalar_lea.vmem %s1173_s0, %s854_s19  ;;  %s141_s28 = scalar_lea.vmem %s1175_s2, %s789_s25 }
  0x10   : > { %v143_v5 = vld [vmem:[%s1074_s22] sm:$0xf]  ;;  %v144_v22 = vld [vmem:[%s1074_s22 + $0x4] sm:$0x3] }
  0x11   : > { %v790_v6 = vcombine.low %v143_v5, %v143_v5  ;;  %v829_v23 = vcombine.low %v143_v5, %v144_v22  ;;  %v844_v41 = vcombine.low %v144_v22, %v144_v22  ;;  %v726_v49 = vld [vmem:[%s141_s28] sm:$0x3] }
  0x13   : > { %v406_v8 = vrot.slane %v790_v6, 2  ;;  %v1081_v9 = vshrl.u32 %v790_v6, 16  ;;  %v1083_v10 = vshll.u32 %v790_v6, 16  ;;  %v534_v25 = vrot.slane %v829_v23, 3 }
  0x14   : > { %v280_v27 = vrot.slane %v790_v6, 1  ;;  %v597_v28 = vshrl.u32 %v829_v23, 16  ;;  %v600_v29 = vshll.u32 %v829_v23, 16 }
  0x15   : > { %919 = vmatmul.mubr.msk.bf16.vlgmr.msra.gmra.mrb[0].mxu0 %vm176_vm1, %v406_v8  ;;  %v162_v11 = vrot.slane %v1083_v10, 1  ;;  %v468_v15 = vrot.slane %v1081_v9, 2  ;;  %v469_v16 = vrot.slane %v1083_v10, 3  ;;  %v342_v36 = vrot.slane %v1081_v9, 1 }
  0x16   : > { %923 = vmatpush3.bf16.msra.mxu0 %v997_v7  ;;  %926 = vmatprep.mubr.msk.bf16.mxu0 %vm1023_vm0, %v1022_v1  ;;  %v599_v32 = vrot.slane %v597_v28, 3  ;;  %v602_v33 = vrot.slane %v600_v29, 4  ;;  %v343_v37 = vrot.slane %v1083_v10, 2 }
  0x17   : > { %v163_v14 = vor.u32 %v162_v11, %v1081_v9  ;;  %924 = vmatprep.subr.bf16.mxu0 %v1022_v1  ;;  %v470_v18 = vor.u32 %v469_v16, %v468_v15 }
  0x18   : > { %v603_v35 = vor.u32 %v602_v33, %v599_v32  ;;  %v344_v39 = vor.u32 %v343_v37, %v342_v36 }
  0x19   : > { %887 = vmatmul.mubr.msk.bf16.vlgmr.msra.gmra.mrb[0].mxu1 %vm176_vm1, %v163_v14 }
  0x1a   : > { %925 = vmatpush3.bf16.msra.mxu0 %v999_v12  ;;  %891 = vmatpush3.bf16.msra.mxu1 %v1000_v13 }
  0x1b   : > { %930 = vmatprep.subr.bf16.mxu0 %v1022_v1  ;;  %892 = vmatprep.subr.bf16.mxu1 %v1022_v1 }
  0x1c   : > { %894 = vmatprep.mubr.msk.bf16.mxu1 %vm1023_vm0, %v1022_v1 }
  0x1e   : > { %893 = vmatpush3.bf16.msra.mxu1 %v1002_v17 }
  0x1f   : > { %898 = vmatprep.subr.bf16.mxu1 %v1022_v1 }
  0x21   : > { %927 = vmatmul.mubr.msk.bf16.vlgmr.msra.gmra.mrb[0].mxu0 %vm176_vm1, %v470_v18 }
  0x22   : > { %931 = vmatpush3.bf16.msra.mxu0 %v1001_v19  ;;  %934 = vmatprep.mubr.msk.bf16.mxu0 %vm1023_vm0, %v1022_v1 }
  0x23   : > { %932 = vmatprep.subr.bf16.mxu0 %v1022_v1 }
  0x25   : > { %895 = vmatmul.mubr.msk.bf16.vlgmr.msra.gmra.mrb[0].mxu1 %vm176_vm1, %v790_v6 }
  0x26   : > { %933 = vmatpush3.bf16.msra.mxu0 %v1003_v20  ;;  %899 = vmatpush3.bf16.msra.mxu1 %v1004_v21 }
  0x27   : > { %938 = vmatprep.subr.bf16.mxu0 %v1022_v1  ;;  %900 = vmatprep.subr.bf16.mxu1 %v1022_v1 }
  0x28   : > { %902 = vmatprep.mubr.msk.bf16.mxu1 %vm1023_vm0, %v1022_v1 }
  0x2a   : > { %901 = vmatpush3.bf16.msra.mxu1 %v1007_v24 }
  0x2b   : > { %906 = vmatprep.subr.bf16.mxu1 %v1022_v1 }
  0x2d   : > { %935 = vmatmul.mubr.msk.bf16.vlgmr.msra.gmra.mrb[0].mxu0 %vm176_vm1, %v534_v25 }
  0x2e   : > { %939 = vmatpush3.bf16.msra.mxu0 %v1006_v26  ;;  %942 = vmatprep.mubr.msk.bf16.mxu0 %vm1023_vm0, %v1022_v1 }
  0x2f   : > { %940 = vmatprep.subr.bf16.mxu0 %v1022_v1 }
  0x31   : > { %903 = vmatmul.mubr.msk.bf16.vlgmr.msra.gmra.mrb[0].mxu1 %vm176_vm1, %v280_v27 }
  0x32   : > { %941 = vmatpush3.bf16.msra.mxu0 %v1008_v30  ;;  %907 = vmatpush3.bf16.msra.mxu1 %v1009_v31 }
  0x33   : > { %946 = vmatprep.subr.bf16.mxu0 %v1022_v1  ;;  %908 = vmatprep.subr.bf16.mxu1 %v1022_v1 }
  0x34   : > { %910 = vmatprep.mubr.msk.bf16.mxu1 %vm1023_vm0, %v1022_v1 }
  0x36   : > { %909 = vmatpush3.bf16.msra.mxu1 %v1011_v34 }
  0x39   : > { %943 = vmatmul.mubr.msk.bf16.vlgmr.msra.gmra.mrb[0].mxu0 %vm176_vm1, %v603_v35 }
  0x3a   : > { %947 = vmatpush3.bf16.msra.mxu0 %v1010_v38  ;;  %950 = vmatprep.mubr.msk.bf16.mxu0 %vm1023_vm0, %v1022_v1 }
  0x3b   : > { %948 = vmatprep.subr.bf16.mxu0 %v1022_v1 }
  0x3d   : > { %911 = vmatmul.mubr.msk.bf16.vlgmr.msra.gmra.mrb[0].mxu1 %vm176_vm1, %v344_v39 }
  0x3e   : > { %949 = vmatpush3.bf16.msra.mxu0 %v1012_v40 }
  0x45   : > { %951 = vmatmul.mubr.msk.bf16.vlgmr.msra.gmra.mrb[0].mxu0 %vm176_vm1, %v844_v41 }
 0x110   : > { %v394_v42 = vpop.f32.mrb[0].mxu1 }
 0x111   : > { %v912_v43 = vpop.f32.mrb[1].mxu1 }
 0x112   : > { %v397_v44 = vpop.f32.mrb[2].mxu1 }
 0x113   : > { %v913_v45 = vpop.f32.mrb[3].mxu1 }
 0x118   : > { %v715_v46 = vpop.f32.mrb[0].mxu0 }
 0x119   : > { %v954_v47 = vadd.f32 %v715_v46, %v394_v42  ;;  %v952_v48 = vpop.f32.mrb[1].mxu0 }
 0x11a   : > { %v718_v50 = vpop.f32.mrb[2].mxu0 }
 0x11b   : > { %v722_v51 = vpack.c.bf16 %v954_v47, %v954_v47  ;;  %v953_v52 = vpop.f32.mrb[3].mxu0 }
 0x11d   : > { %v727_v53 = vsel %vm725_vm4, %v722_v51, %v726_v49 }
 0x11e   : > { %728 = vst [vmem:[%s141_s28] sm:$0x3] %v727_v53 }
 0x11f PF: > { %s12_s9 = sadd.s32 1, %s1020_s9  }
 0x120   : > { %p9_p4 = scmp.ge.s32.totalorder %s12_s9, 4  }
 0x122   :  { %11 = sbr.rel (!%p9_p4) target bundleno = 1 (0x1), region = 66 }

// kernel: densenet_forward.51
= control target key start
LH: loop header
LB: loop body
LE: loop exit
PB: predicated region body
PF: predicated region fallthrough
CT: control target
= control target key end

     0   :  { %v169_v3 = vmov 0.0|0.0   ;;  %vm170_vm0 = vmmov 0   ;;  %v171_v6 = vmov 0.0   ;;  %s223_s0 = inlined_call_operand.vmem [shape: f32[2,32], index: 0, kind: input, shape index: {}]   ;;  %s224_s1 = inlined_call_operand.vmem [shape: f32[32,2], index: 1, kind: input, shape index: {}]   ;;  %s225_s2 = inlined_call_operand.vmem [shape: f32[1,2], index: 2, kind: input, shape index: {}]   ;;  %s226_s3 = inlined_call_operand.hbm [shape: f32[2,2], index: 3, kind: output, shape index: {}]  }
   0x1   :  { %v16_v0 = vld [vmem:[%s224_s1] sm:$0xff]  ;;  %v17_v1 = vld [vmem:[%s224_s1 + $0x8] sm:$0xff]  ;;  %v18_v2 = vld [vmem:[%s224_s1 + $0x10] sm:$0xff]  ;;  %135 = vmatprep.subr.bf16.mxu0 %v169_v3  ;;  %132 = vmatprep.mubr.msk.f32.mxu0 %vm170_vm0, %v171_v6 }
   0x2   :  { %v136_v4 = vpack.c.bf16 %v17_v1, %v16_v0  ;;  %v19_v5 = vld [vmem:[%s224_s1 + $0x18] sm:$0xff] }
   0x3   :  { %8 = vsyncpa [#allocation3], 0  ;;  %v139_v7 = vpack.c.bf16 %v19_v5, %v18_v2  ;;  %v15_v8 = vld [vmem:[%s223_s0] sm:$0x3]  ;;  %vm27_vm1 = vcmask 261120   ;;  %s172_s24 = smov [#allocation2]  }
   0x4   :  { %137 = vmatpush3.bf16.msra.mxu0 %v136_v4  ;;  %v117_v9 = vld [vmem:[%s225_s2] ss:$0 sm:$0xff]  ;;  %s109_s1 = sshll.u32 %s172_s24, 4  ;;  %vm101_vm2 = vcmask 9216   ;;  %s110_s1 = int_to_ptr.vmem [resolvable:$true] %s109_s1 }
   0x5   :  { %138 = vmatprep.subr.bf16.mxu0 %v169_v3  ;;  %s145_s25 = scalar_lea.vmem %s110_s1, 32  ;;  %p150_p1 = scmp.lt.s32.totalorder %s110_s1, %s110_s1 }
   0x6   :  { %p146_p0 = scmp.ne.s32.totalorder %s110_s1, %s145_s25  ;;  %p151_p2 = scmp.lt.s32.totalorder %s145_s25, %s145_s25 }
   0x8   :  { %140 = vmatpush3.bf16.msra.mxu0 %v139_v7  ;;  %p152_p3 = por %p151_p2, %p150_p1 }
   0xa   :  { %p153_p4 = pnand %p152_p3, %p146_p0 }
   0xb   :  { %133 = vmatmul.mubr.msk.f32.vlgmr.msra.gmra.mrb[0].mxu0 %vm27_vm1, %v15_v8 }
  0xde   :  { %v97_v10 = vpop.f32.mrb[0].mxu0 }
  0xdf   :  { %v98_v11 = vadd.f32 %v117_v9, %v97_v10  ;;  %v134_v12 = vpop.f32.mrb[1].mxu0 }
  0xe1   :  { %102 = vst.msk [vmem:[#allocation2] sm:$0x3] %vm101_vm2, %v98_v11 }
  0xe2   :  { %156 = shalt.err (!%p153_p4)
}
  0xe3   :  { %s157_s27 = scalar_lea.hbm %s226_s3, 32 }
  0xe4   :  { %p158_p5 = scmp.ne.s32.totalorder %s226_s3, %s157_s27  ;;  %p161_p6 = scmp.lt.u32.totalorder %s157_s27, %s226_s3 }
  0xe6   :  { %p163_p7 = pnand %p161_p6, %p158_p5 }
  0xe8   :  { %166 = shalt.err (!%p163_p7)
}
  0xe9   :  { %112 = dma.vmem_to_hbm [thread:$0]  %s110_s1, 32, %s226_s3, [#allocation3]  }
  0xea   :  { %167 = dma.done.wait [#allocation3], 32  }
  0xeb   :  { %168 = vsyncadd [#allocation3], 4294967264 }
  0xec   :  { %116 = vsyncpa [#allocation3], 1 }

// kernel: densenet_forward.50
= control target key start
LH: loop header
LB: loop body
LE: loop exit
PB: predicated region body
PF: predicated region fallthrough
CT: control target
= control target key end

     0   :  { %s234_s12 = smov 0   ;;  %s270_s0 = inlined_call_operand.vmem [shape: bf16[2,1,32], index: 0, kind: input, shape index: {}]   ;;  %s271_s1 = inlined_call_operand.vmem [shape: f32[1,32], index: 1, kind: input, shape index: {}]   ;;  %s272_s2 = inlined_call_operand.vmem [shape: f32[1,32], index: 2, kind: input, shape index: {}]   ;;  %s273_s3 = inlined_call_operand.vmem [shape: f32[2,1,32], index: 3, kind: output, shape index: {}]  }
   0x1 LB: > { %s215_s13 = sadd.s32 4294967295, %s236_s12   ;;  %p219_p0 = scmp.ge.s32.totalorder %s236_s12, 1  ;;  %s236_s12 = sphi %s234_s12, %s13_s12  }
   0x2   : > { %p135_p1 = scmp.lt.s32.totalorder %s236_s12, 3 }
   0x4   : > { %p136_p2 = pnand %p219_p0, %p135_p1 }
   0x5   : > { %p155_p3 = scmp.lt.s32.totalorder (!%p136_p2), %s215_s13, 1  ;;  %v163_v1 = vld [vmem:[%s271_s1] sm:$0x1] (!%p136_p2)  ;;  %vm169_vm0 = vcmask (!%p136_p2), 253952  }
   0x6   : > { %139 = sbr.rel (%p136_p2) target bundleno = 25 (0x19), region = 32  ;;  %v165_v3 = vld [vmem:[%s272_s2] sm:$0x1] (!%p136_p2) }
   0xd   : > { %s275_s13 = smov (!%p155_p3, %s215_s13), 1 }
   0xe   : > { %s157_s16 = scalar_lea.vmem %s270_s0, %s275_s13  ;;  %s160_s23 = scalar_lea.vmem %s273_s3, %s275_s13 }
   0xf   : > { %v161_v0 = vld [vmem:[%s157_s16] sm:$0x1] }
  0x10   : > { %v162_v2 = vunpack.c.l.bf16 %v161_v0 }
  0x12   : > { %v164_v4 = vmul.f32 %v163_v1, %v162_v2 }
  0x14   : > { %v166_v5 = vadd.f32 %v165_v3, %v164_v4 }
  0x16   : > { %v167_v6 = vmax.f32 %v166_v5, 0.0 }
  0x18   : > { %170 = vst.msk [vmem:[%s160_s23] sm:$0x1] %vm169_vm0, %v167_v6 }
  0x19 PF: > { %s13_s12 = sadd.s32 1, %s236_s12  }
  0x1a   : > { %p10_p4 = scmp.ge.s32.totalorder %s13_s12, 4  }
  0x1c   :  { %12 = sbr.rel (!%p10_p4) target bundleno = 1 (0x1), region = 62 }

</bundles_post_ra>
